<compile_context>
chip_gen: v7x
topology: tpu7x:2x2x1
jax: 0.10.0
libtpu: 0.0.40
codegen_flags: <defaults>
</compile_context>

<pallas_src>
import functools

import jax
import jax.numpy as jnp
import numpy as np
from jax.experimental import pallas as pl
from jax.experimental.pallas import tpu as pltpu


# ---------------------------------------------------------------------------
# Pallas kernels
# ---------------------------------------------------------------------------
def _conv_gates(x_ref, w_ref, b_ref, cx_ref, *, k, dil, W, n, cout):
    """Implicit-GEMM conv + convLSTM gating for one batch image (VMEM resident)."""
    # Bias folded into the accumulator init (no separate broadcast-add pass).
    acc = jnp.broadcast_to(b_ref[...], (n, 4 * cout))
    for kh in range(k):
        # All k width taps are packed into the channel (lane) dim, so each row
        # tap is a single [n, k*Cin] x [k*Cin, 4*Cout] MXU matmul.
        lhs = x_ref[pl.ds(kh * dil * W, n), :]          # [n, k*Cin]  bf16
        acc = acc + jnp.dot(lhs, w_ref[kh],
                            preferred_element_type=jnp.float32)
    # One full-width (128-lane) tanh EUP pass: sigmoid(x) = 0.5*(1+tanh(x/2)),
    # selected per lane, instead of separate sigmoid + tanh passes.
    lane = jax.lax.broadcasted_iota(jnp.int32, acc.shape, 1)
    sig = lane < 3 * cout
    t = jnp.tanh(jnp.where(sig, 0.5 * acc, acc))
    act = jnp.where(sig, 0.5 * t + 0.5, t)
    i_g = act[:, 0 * cout:1 * cout]
    f_g = act[:, 1 * cout:2 * cout]
    o_g = act[:, 2 * cout:3 * cout]
    g_g = act[:, 3 * cout:4 * cout]
    next_c = f_g * cx_ref[...] + i_g * g_g
    next_h = o_g * jnp.tanh(next_c)
    return next_h, next_c


def _cell_kernel(x_ref, w_ref, b_ref, cx_ref, h_ref, c_ref,
                 *, k, dil, W, n, cout):
    next_h, next_c = _conv_gates(x_ref, w_ref, b_ref, cx_ref,
                                 k=k, dil=dil, W=W, n=n, cout=cout)
    h_ref[...] = next_h.astype(h_ref.dtype)      # bf16 (next cell reads bf16)
    c_ref[...] = next_c


def _cell_softmax_kernel(x_ref, w_ref, b_ref, cx_ref, sm_ref, c_ref, lsm_ref,
                         *, k, dil, W, n, cout):
    """Last cell: gating fused with channel softmax / log-softmax."""
    next_h, next_c = _conv_gates(x_ref, w_ref, b_ref, cx_ref,
                                 k=k, dil=dil, W=W, n=n, cout=cout)
    c_ref[...] = next_c
    m = jnp.max(next_h, axis=-1, keepdims=True)
    z = next_h - m
    e = jnp.exp(z)
    s = jnp.sum(e, axis=-1, keepdims=True)
    sm_ref[...] = e * pl.reciprocal(s, approx=True)
    lsm_ref[...] = z - jnp.log(s)


# ---------------------------------------------------------------------------
# pallas_call wrapper
# ---------------------------------------------------------------------------
def _run_cell(x_cat, w_taps, bias, cx_flat, *, k, dil, W, n, cout, last):
    B, m, kcin = x_cat.shape
    common = dict(k=k, dil=dil, W=W, n=n, cout=cout)
    if last:
        kernel = functools.partial(_cell_softmax_kernel, **common)
        out_shape = (jax.ShapeDtypeStruct((B, n, cout), jnp.float32),   # softmax
                     jax.ShapeDtypeStruct((B, n, cout), jnp.float32),   # c
                     jax.ShapeDtypeStruct((B, n, cout), jnp.float32))   # log_softmax
    else:
        kernel = functools.partial(_cell_kernel, **common)
        out_shape = (jax.ShapeDtypeStruct((B, n, cout), jnp.bfloat16),  # h
                     jax.ShapeDtypeStruct((B, n, cout), jnp.float32))   # c
    out_specs = tuple(pl.BlockSpec((None, n, cout), lambda b: (b, 0, 0))
                      for _ in out_shape)
    return pl.pallas_call(
        kernel,
        out_shape=out_shape,
        grid_spec=pltpu.PrefetchScalarGridSpec(
            num_scalar_prefetch=0,
            grid=(B,),                                   # 2 parallel steps (v7x: 2 TCs)
            in_specs=[
                pl.BlockSpec((None, m, kcin), lambda b: (b, 0, 0)),       # shifted inputs
                pl.BlockSpec((k, kcin, 4 * cout), lambda b: (0, 0, 0)),   # per-row-tap weights
                pl.BlockSpec((1, 4 * cout), lambda b: (0, 0)),            # bias
                pl.BlockSpec((None, n, cout), lambda b: (b, 0, 0)),       # cx
            ],
            out_specs=out_specs,
        ),
        compiler_params=pltpu.CompilerParams(
            dimension_semantics=("parallel",)),
    )(x_cat, w_taps, bias, cx_flat)


# ---------------------------------------------------------------------------
# Glue (plain JAX): layout transposes, width-shift packing, weight reshuffle
# ---------------------------------------------------------------------------
def _shifted_inputs(x_nhwc, hx_nhwc, k, pad, dil):
    """k width-shifted, spatially padded bf16 copies of cat([x, hx], channels),
    packed along the channel axis.

    Returns [B, (H + 2*pad) * W, k*Cin]. Conv row-tap kh is the contiguous row
    slice [kh*dil*W : kh*dil*W + H*W] (sliced inside the kernel); the kw taps
    live in channel block [kw*Cin : (kw+1)*Cin]. Only a k-fold activation
    expansion reaches HBM (vs k*k for im2col), and the lane dim is k*Cin
    (108/180) instead of Cin (36), so far less tile padding is DMA'd.
    """
    combined = jnp.concatenate(
        [x_nhwc.astype(jnp.bfloat16), hx_nhwc.astype(jnp.bfloat16)], axis=-1)
    B, H, W, cin = combined.shape
    xp = jnp.pad(combined, ((0, 0), (pad, pad), (pad, pad), (0, 0)))
    Hp = H + 2 * pad
    shifts = [xp[:, :, kw * dil:kw * dil + W, :] for kw in range(k)]
    return jnp.concatenate(shifts, axis=-1).reshape(B, Hp * W, k * cin)


def conv_lstm_cell(x_nhwc, hx_nhwc, cx_nhwc, w_oihw, bias, *, k, pad, dil,
                   last=False):
    B, H, W, _ = x_nhwc.shape
    cout = cx_nhwc.shape[-1]
    cin = x_nhwc.shape[-1] + hx_nhwc.shape[-1]
    x_cat = _shifted_inputs(x_nhwc, hx_nhwc, k, pad, dil)
    # OIHW -> [row tap kh, (kw, in_channel), out_channel] to match per-row-tap matmuls.
    w_taps = (jnp.transpose(w_oihw, (2, 3, 1, 0))
              .reshape(k, k * cin, 4 * cout).astype(jnp.bfloat16))
    b2 = bias.reshape(1, 4 * cout).astype(jnp.float32)
    cx_flat = cx_nhwc.reshape(B, H * W, cout)
    outs = _run_cell(x_cat, w_taps, b2, cx_flat,
                     k=k, dil=dil, W=W, n=H * W, cout=cout, last=last)
    return tuple(o.reshape(B, H, W, cout) for o in outs)


CELL_CFG = (
    dict(k=3, pad=2, dil=2),   # cell_1
    dict(k=5, pad=2, dil=1),   # cell_2
    dict(k=3, pad=1, dil=1),   # cell_3
)


def conv_lstm_forward(x_nchw, hx_nchw, cx_nchw, params):
    to_nhwc = lambda a: jnp.transpose(a, (0, 2, 3, 1))
    to_nchw = lambda a: jnp.transpose(a, (0, 3, 1, 2))
    x = to_nhwc(x_nchw)
    hx = to_nhwc(hx_nchw)
    cx = to_nhwc(cx_nchw)
    hx, cx = conv_lstm_cell(x, hx, cx, params["w1"], params["b1"], **CELL_CFG[0])
    hx, cx = conv_lstm_cell(x, hx, cx, params["w2"], params["b2"], **CELL_CFG[1])
    sm, cx, lsm = conv_lstm_cell(x, hx, cx, params["w3"], params["b3"],
                                 **CELL_CFG[2], last=True)
    return to_nchw(sm), to_nchw(cx), to_nchw(lsm)


# ---------------------------------------------------------------------------
# Deterministic synthetic parameters (weights_init replaced by fixed PRNG init)
# ---------------------------------------------------------------------------
def init_params(key, in_channels, in_feature_channels, out_feature_channels):
    ks = jax.random.split(key, 6)

    def conv_params(kw, kb, cin, k):
        w = 0.05 * jax.random.normal(kw, (4 * out_feature_channels, cin, k, k), jnp.float32)
        b = 0.05 * jax.random.normal(kb, (4 * out_feature_channels,), jnp.float32)
        return w, b

    w1, b1 = conv_params(ks[0], ks[1], in_channels + in_feature_channels, 3)
    w2, b2 = conv_params(ks[2], ks[3], in_channels + out_feature_channels, 5)
    w3, b3 = conv_params(ks[4], ks[5], in_channels + out_feature_channels, 3)
    return dict(w1=w1, b1=b1, w2=w2, b2=b2, w3=w3, b3=b3)


# ---------------------------------------------------------------------------
# Pure-JAX reference (semantics check against the Pallas path)
# ---------------------------------------------------------------------------
def _ref_conv(x, w, b, pad, dil):
    y = jax.lax.conv_general_dilated(
        x, w, window_strides=(1, 1), padding=((pad, pad), (pad, pad)),
        rhs_dilation=(dil, dil), dimension_numbers=("NCHW", "OIHW", "NCHW"),
        precision=jax.lax.Precision.HIGHEST)
    return y + b.reshape(1, -1, 1, 1)


def _ref_cell(x, hx, cx, w, b, pad, dil):
    a = _ref_conv(jnp.concatenate([x, hx], axis=1), w, b, pad, dil)
    ai, af, ao, ag = jnp.split(a, 4, axis=1)
    i = jax.nn.sigmoid(ai)
    f = jax.nn.sigmoid(af)
    o = jax.nn.sigmoid(ao)
    g = jnp.tanh(ag)
    nc = f * cx + i * g
    return o * jnp.tanh(nc), nc


def _ref_forward(x, hx, cx, params):
    for idx, cfg in enumerate(CELL_CFG, start=1):
        hx, cx = _ref_cell(x, hx, cx, params[f"w{idx}"], params[f"b{idx}"],
                           cfg["pad"], cfg["dil"])
    return jax.nn.softmax(hx, axis=1), cx, jax.nn.log_softmax(hx, axis=1)


# ---------------------------------------------------------------------------
if __name__ == "__main__":
    B, IN_C, FEAT_C, OUT_C, H, W = 2, 4, 32, 32, 16, 16
    key = jax.random.PRNGKey(0)
    k_x, k_h, k_c, k_p = jax.random.split(key, 4)
    x = jax.random.normal(k_x, (B, IN_C, H, W), jnp.float32)
    hx0 = jax.random.normal(k_h, (B, FEAT_C, H, W), jnp.float32)
    cx0 = jax.random.normal(k_c, (B, OUT_C, H, W), jnp.float32)
    params = init_params(k_p, IN_C, FEAT_C, OUT_C)

    fwd = jax.jit(conv_lstm_forward)
    sm, cx_out, lsm = fwd(x, hx0, cx0, params)
    jax.block_until_ready((sm, cx_out, lsm))

    assert sm.shape == (B, OUT_C, H, W)
    assert cx_out.shape == (B, OUT_C, H, W)
    assert lsm.shape == (B, OUT_C, H, W)

    sm_r, cx_r, lsm_r = _ref_forward(x, hx0, cx0, params)
    # Tolerance covers bf16 MXU inputs (f32 accumulation) vs the f32 HIGHEST reference.
    np.testing.assert_allclose(np.asarray(sm), np.asarray(sm_r), atol=2e-2, rtol=2e-2)
    np.testing.assert_allclose(np.asarray(cx_out), np.asarray(cx_r), atol=2e-2, rtol=2e-2)
    np.testing.assert_allclose(np.asarray(lsm), np.asarray(lsm_r), atol=2e-2, rtol=2e-2)

    print("KERNEL_OK")
</pallas_src>

<mosaic_0001>
module attributes {stable_mosaic.version = 11 : i64} {
  func.func @_cell_kernel(%arg0: i32, %arg1: memref<1x320x108xbf16, #tpu.memory_space<vmem>>, %arg2: memref<3x108x128xbf16, #tpu.memory_space<vmem>>, %arg3: memref<1x128xf32, #tpu.memory_space<vmem>>, %arg4: memref<1x256x32xf32, #tpu.memory_space<vmem>>, %arg5: memref<1x256x32xbf16, #tpu.memory_space<vmem>>, %arg6: memref<1x256x32xf32, #tpu.memory_space<vmem>>) attributes {dimension_semantics = [#tpu.dimension_semantics<parallel>], iteration_bounds = array<i64: 2>, scalar_prefetch = 0 : i64, scratch_operands = 0 : i64, tpu.core_type = #tpu.core_type<tc>, window_params = [{transform_indices = @transform_0, window_bounds = array<i64: 1, 320, 108>}, {pipeline_mode = #tpu.pipeline_mode<synchronous>, transform_indices = @transform_1, window_bounds = array<i64: 3, 108, 128>}, {pipeline_mode = #tpu.pipeline_mode<synchronous>, transform_indices = @transform_2, window_bounds = array<i64: 1, 128>}, {transform_indices = @transform_3, window_bounds = array<i64: 1, 256, 32>}, {transform_indices = @transform_4, window_bounds = array<i64: 1, 256, 32>}, {transform_indices = @transform_5, window_bounds = array<i64: 1, 256, 32>}]} {
    %c0 = arith.constant 0 : index
    %c0_0 = arith.constant 0 : index
    %0 = vector.load %arg3[%c0, %c0_0] : memref<1x128xf32, #tpu.memory_space<vmem>>, vector<1x128xf32>
    %1 = vector.shape_cast %0 : vector<1x128xf32> to vector<1x128xf32>
    %2 = vector.broadcast %1 : vector<1x128xf32> to vector<256x128xf32>
    %c0_1 = arith.constant 0 : index
    %c0_2 = arith.constant 0 : index
    %c0_3 = arith.constant 0 : index
    %3 = vector.load %arg1[%c0_1, %c0_2, %c0_3] : memref<1x320x108xbf16, #tpu.memory_space<vmem>>, vector<1x256x108xbf16>
    %4 = vector.shape_cast %3 : vector<1x256x108xbf16> to vector<256x108xbf16>
    %c0_4 = arith.constant 0 : index
    %c0_5 = arith.constant 0 : index
    %c0_6 = arith.constant 0 : index
    %5 = vector.load %arg2[%c0_4, %c0_5, %c0_6] : memref<3x108x128xbf16, #tpu.memory_space<vmem>>, vector<1x108x128xbf16>
    %6 = vector.shape_cast %5 : vector<1x108x128xbf16> to vector<108x128xbf16>
    %cst = arith.constant dense<0.000000e+00> : vector<256x128xf32>
    %7 = tpu.matmul %4, %6, %cst {dimension_numbers = #tpu.dot_dimension_numbers<[1], [0], [0], [1], [0, 0, 1, 1], [], []>} : vector<256x108xbf16>, vector<108x128xbf16>, vector<256x128xf32> -> vector<256x128xf32>
    %8 = arith.addf %2, %7 : vector<256x128xf32>
    %c0_7 = arith.constant 0 : index
    %c32 = arith.constant 32 : index
    %c0_8 = arith.constant 0 : index
    %9 = vector.load %arg1[%c0_7, %c32, %c0_8] : memref<1x320x108xbf16, #tpu.memory_space<vmem>>, vector<1x256x108xbf16>
    %10 = vector.shape_cast %9 : vector<1x256x108xbf16> to vector<256x108xbf16>
    %c1 = arith.constant 1 : index
    %c0_9 = arith.constant 0 : index
    %c0_10 = arith.constant 0 : index
    %11 = vector.load %arg2[%c1, %c0_9, %c0_10] : memref<3x108x128xbf16, #tpu.memory_space<vmem>>, vector<1x108x128xbf16>
    %12 = vector.shape_cast %11 : vector<1x108x128xbf16> to vector<108x128xbf16>
    %cst_11 = arith.constant dense<0.000000e+00> : vector<256x128xf32>
    %13 = tpu.matmul %10, %12, %cst_11 {dimension_numbers = #tpu.dot_dimension_numbers<[1], [0], [0], [1], [0, 0, 1, 1], [], []>} : vector<256x108xbf16>, vector<108x128xbf16>, vector<256x128xf32> -> vector<256x128xf32>
    %14 = arith.addf %8, %13 : vector<256x128xf32>
    %c0_12 = arith.constant 0 : index
    %c64 = arith.constant 64 : index
    %c0_13 = arith.constant 0 : index
    %15 = vector.load %arg1[%c0_12, %c64, %c0_13] : memref<1x320x108xbf16, #tpu.memory_space<vmem>>, vector<1x256x108xbf16>
    %16 = vector.shape_cast %15 : vector<1x256x108xbf16> to vector<256x108xbf16>
    %c2 = arith.constant 2 : index
    %c0_14 = arith.constant 0 : index
    %c0_15 = arith.constant 0 : index
    %17 = vector.load %arg2[%c2, %c0_14, %c0_15] : memref<3x108x128xbf16, #tpu.memory_space<vmem>>, vector<1x108x128xbf16>
    %18 = vector.shape_cast %17 : vector<1x108x128xbf16> to vector<108x128xbf16>
    %cst_16 = arith.constant dense<0.000000e+00> : vector<256x128xf32>
    %19 = tpu.matmul %16, %18, %cst_16 {dimension_numbers = #tpu.dot_dimension_numbers<[1], [0], [0], [1], [0, 0, 1, 1], [], []>} : vector<256x108xbf16>, vector<108x128xbf16>, vector<256x128xf32> -> vector<256x128xf32>
    %20 = arith.addf %14, %19 : vector<256x128xf32>
    %21 = tpu.iota {dimensions = array<i32: 1>} : vector<256x128xi32>
    %c96_i32 = arith.constant 96 : i32
    %22 = vector.broadcast %c96_i32 : i32 to vector<256x128xi32>
    %23 = arith.cmpi slt, %21, %22 : vector<256x128xi32>
    %cst_17 = arith.constant 5.000000e-01 : f32
    %24 = vector.broadcast %cst_17 : f32 to vector<256x128xf32>
    %25 = arith.mulf %24, %20 : vector<256x128xf32>
    %26 = arith.select %23, %25, %20 : vector<256x128xi1>, vector<256x128xf32>
    %27 = math.tanh %26 : vector<256x128xf32>
    %cst_18 = arith.constant 5.000000e-01 : f32
    %28 = vector.broadcast %cst_18 : f32 to vector<256x128xf32>
    %29 = arith.mulf %28, %27 : vector<256x128xf32>
    %cst_19 = arith.constant 5.000000e-01 : f32
    %30 = vector.broadcast %cst_19 : f32 to vector<256x128xf32>
    %31 = arith.addf %29, %30 : vector<256x128xf32>
    %32 = arith.select %23, %31, %27 : vector<256x128xi1>, vector<256x128xf32>
    %33 = vector.extract_strided_slice %32 {offsets = [0, 0], sizes = [256, 32], strides = [1, 1]} : vector<256x128xf32> to vector<256x32xf32>
    %34 = vector.extract_strided_slice %32 {offsets = [0, 32], sizes = [256, 32], strides = [1, 1]} : vector<256x128xf32> to vector<256x32xf32>
    %35 = vector.extract_strided_slice %32 {offsets = [0, 64], sizes = [256, 32], strides = [1, 1]} : vector<256x128xf32> to vector<256x32xf32>
    %36 = vector.extract_strided_slice %32 {offsets = [0, 96], sizes = [256, 32], strides = [1, 1]} : vector<256x128xf32> to vector<256x32xf32>
    %c0_20 = arith.constant 0 : index
    %c0_21 = arith.constant 0 : index
    %c0_22 = arith.constant 0 : index
    %37 = vector.load %arg4[%c0_20, %c0_21, %c0_22] : memref<1x256x32xf32, #tpu.memory_space<vmem>>, vector<1x256x32xf32>
    %38 = vector.shape_cast %37 : vector<1x256x32xf32> to vector<256x32xf32>
    %39 = arith.mulf %34, %38 : vector<256x32xf32>
    %40 = arith.mulf %33, %36 : vector<256x32xf32>
    %41 = arith.addf %39, %40 : vector<256x32xf32>
    %42 = math.tanh %41 : vector<256x32xf32>
    %43 = arith.mulf %35, %42 : vector<256x32xf32>
    %44 = arith.truncf %43 : vector<256x32xf32> to vector<256x32xbf16>
    %c0_23 = arith.constant 0 : index
    %c0_24 = arith.constant 0 : index
    %c0_25 = arith.constant 0 : index
    %45 = vector.load %arg5[%c0_23, %c0_24, %c0_25] : memref<1x256x32xbf16, #tpu.memory_space<vmem>>, vector<1x256x32xbf16>
    %46 = vector.shape_cast %45 : vector<1x256x32xbf16> to vector<256x32xbf16>
    %47 = vector.shape_cast %44 : vector<256x32xbf16> to vector<1x256x32xbf16>
    tpu.vector_store %arg5[%c0_23, %c0_24, %c0_25], %47 {strides = array<i32>} : memref<1x256x32xbf16, #tpu.memory_space<vmem>>, vector<1x256x32xbf16>,
    %c0_26 = arith.constant 0 : index
    %c0_27 = arith.constant 0 : index
    %c0_28 = arith.constant 0 : index
    %48 = vector.load %arg6[%c0_26, %c0_27, %c0_28] : memref<1x256x32xf32, #tpu.memory_space<vmem>>, vector<1x256x32xf32>
    %49 = vector.shape_cast %48 : vector<1x256x32xf32> to vector<256x32xf32>
    %50 = vector.shape_cast %41 : vector<256x32xf32> to vector<1x256x32xf32>
    tpu.vector_store %arg6[%c0_26, %c0_27, %c0_28], %50 {strides = array<i32>} : memref<1x256x32xf32, #tpu.memory_space<vmem>>, vector<1x256x32xf32>,
    return
  }
  func.func @transform_0(%arg0: i32) -> (i32, i32, i32) {
    %c0_i32 = arith.constant 0 : i32
    %c0_i32_0 = arith.constant 0 : i32
    %c0_i32_1 = arith.constant 0 : i32
    return %arg0, %c0_i32, %c0_i32_0 : i32, i32, i32
  }
  func.func @transform_1(%arg0: i32) -> (i32, i32, i32) {
    %c0_i32 = arith.constant 0 : i32
    %c0_i32_0 = arith.constant 0 : i32
    %c0_i32_1 = arith.constant 0 : i32
    %c0_i32_2 = arith.constant 0 : i32
    return %c0_i32, %c0_i32_0, %c0_i32_1 : i32, i32, i32
  }
  func.func @transform_2(%arg0: i32) -> (i32, i32) {
    %c0_i32 = arith.constant 0 : i32
    %c0_i32_0 = arith.constant 0 : i32
    %c0_i32_1 = arith.constant 0 : i32
    return %c0_i32, %c0_i32_0 : i32, i32
  }
  func.func @transform_3(%arg0: i32) -> (i32, i32, i32) {
    %c0_i32 = arith.constant 0 : i32
    %c0_i32_0 = arith.constant 0 : i32
    %c0_i32_1 = arith.constant 0 : i32
    return %arg0, %c0_i32, %c0_i32_0 : i32, i32, i32
  }
  func.func @transform_4(%arg0: i32) -> (i32, i32, i32) {
    %c0_i32 = arith.constant 0 : i32
    %c0_i32_0 = arith.constant 0 : i32
    %c0_i32_1 = arith.constant 0 : i32
    return %arg0, %c0_i32, %c0_i32_0 : i32, i32, i32
  }
  func.func @transform_5(%arg0: i32) -> (i32, i32, i32) {
    %c0_i32 = arith.constant 0 : i32
    %c0_i32_0 = arith.constant 0 : i32
    %c0_i32_1 = arith.constant 0 : i32
    return %arg0, %c0_i32, %c0_i32_0 : i32, i32, i32
  }
}

module attributes {stable_mosaic.version = 11 : i64} {
  func.func @_cell_kernel(%arg0: i32, %arg1: memref<1x320x180xbf16, #tpu.memory_space<vmem>>, %arg2: memref<5x180x128xbf16, #tpu.memory_space<vmem>>, %arg3: memref<1x128xf32, #tpu.memory_space<vmem>>, %arg4: memref<1x256x32xf32, #tpu.memory_space<vmem>>, %arg5: memref<1x256x32xbf16, #tpu.memory_space<vmem>>, %arg6: memref<1x256x32xf32, #tpu.memory_space<vmem>>) attributes {dimension_semantics = [#tpu.dimension_semantics<parallel>], iteration_bounds = array<i64: 2>, scalar_prefetch = 0 : i64, scratch_operands = 0 : i64, tpu.core_type = #tpu.core_type<tc>, window_params = [{transform_indices = @transform_0, window_bounds = array<i64: 1, 320, 180>}, {pipeline_mode = #tpu.pipeline_mode<synchronous>, transform_indices = @transform_1, window_bounds = array<i64: 5, 180, 128>}, {pipeline_mode = #tpu.pipeline_mode<synchronous>, transform_indices = @transform_2, window_bounds = array<i64: 1, 128>}, {transform_indices = @transform_3, window_bounds = array<i64: 1, 256, 32>}, {transform_indices = @transform_4, window_bounds = array<i64: 1, 256, 32>}, {transform_indices = @transform_5, window_bounds = array<i64: 1, 256, 32>}]} {
    %c0 = arith.constant 0 : index
    %c0_0 = arith.constant 0 : index
    %0 = vector.load %arg3[%c0, %c0_0] : memref<1x128xf32, #tpu.memory_space<vmem>>, vector<1x128xf32>
    %1 = vector.shape_cast %0 : vector<1x128xf32> to vector<1x128xf32>
    %2 = vector.broadcast %1 : vector<1x128xf32> to vector<256x128xf32>
    %c0_1 = arith.constant 0 : index
    %c0_2 = arith.constant 0 : index
    %c0_3 = arith.constant 0 : index
    %3 = vector.load %arg1[%c0_1, %c0_2, %c0_3] : memref<1x320x180xbf16, #tpu.memory_space<vmem>>, vector<1x256x180xbf16>
    %4 = vector.shape_cast %3 : vector<1x256x180xbf16> to vector<256x180xbf16>
    %c0_4 = arith.constant 0 : index
    %c0_5 = arith.constant 0 : index
    %c0_6 = arith.constant 0 : index
    %5 = vector.load %arg2[%c0_4, %c0_5, %c0_6] : memref<5x180x128xbf16, #tpu.memory_space<vmem>>, vector<1x180x128xbf16>
    %6 = vector.shape_cast %5 : vector<1x180x128xbf16> to vector<180x128xbf16>
    %cst = arith.constant dense<0.000000e+00> : vector<256x128xf32>
    %7 = tpu.matmul %4, %6, %cst {dimension_numbers = #tpu.dot_dimension_numbers<[1], [0], [0], [1], [0, 0, 1, 1], [], []>} : vector<256x180xbf16>, vector<180x128xbf16>, vector<256x128xf32> -> vector<256x128xf32>
    %8 = arith.addf %2, %7 : vector<256x128xf32>
    %c0_7 = arith.constant 0 : index
    %c16 = arith.constant 16 : index
    %c0_8 = arith.constant 0 : index
    %9 = vector.load %arg1[%c0_7, %c16, %c0_8] : memref<1x320x180xbf16, #tpu.memory_space<vmem>>, vector<1x256x180xbf16>
    %10 = vector.shape_cast %9 : vector<1x256x180xbf16> to vector<256x180xbf16>
    %c1 = arith.constant 1 : index
    %c0_9 = arith.constant 0 : index
    %c0_10 = arith.constant 0 : index
    %11 = vector.load %arg2[%c1, %c0_9, %c0_10] : memref<5x180x128xbf16, #tpu.memory_space<vmem>>, vector<1x180x128xbf16>
    %12 = vector.shape_cast %11 : vector<1x180x128xbf16> to vector<180x128xbf16>
    %cst_11 = arith.constant dense<0.000000e+00> : vector<256x128xf32>
    %13 = tpu.matmul %10, %12, %cst_11 {dimension_numbers = #tpu.dot_dimension_numbers<[1], [0], [0], [1], [0, 0, 1, 1], [], []>} : vector<256x180xbf16>, vector<180x128xbf16>, vector<256x128xf32> -> vector<256x128xf32>
    %14 = arith.addf %8, %13 : vector<256x128xf32>
    %c0_12 = arith.constant 0 : index
    %c32 = arith.constant 32 : index
    %c0_13 = arith.constant 0 : index
    %15 = vector.load %arg1[%c0_12, %c32, %c0_13] : memref<1x320x180xbf16, #tpu.memory_space<vmem>>, vector<1x256x180xbf16>
    %16 = vector.shape_cast %15 : vector<1x256x180xbf16> to vector<256x180xbf16>
    %c2 = arith.constant 2 : index
    %c0_14 = arith.constant 0 : index
    %c0_15 = arith.constant 0 : index
    %17 = vector.load %arg2[%c2, %c0_14, %c0_15] : memref<5x180x128xbf16, #tpu.memory_space<vmem>>, vector<1x180x128xbf16>
    %18 = vector.shape_cast %17 : vector<1x180x128xbf16> to vector<180x128xbf16>
    %cst_16 = arith.constant dense<0.000000e+00> : vector<256x128xf32>
    %19 = tpu.matmul %16, %18, %cst_16 {dimension_numbers = #tpu.dot_dimension_numbers<[1], [0], [0], [1], [0, 0, 1, 1], [], []>} : vector<256x180xbf16>, vector<180x128xbf16>, vector<256x128xf32> -> vector<256x128xf32>
    %20 = arith.addf %14, %19 : vector<256x128xf32>
    %c0_17 = arith.constant 0 : index
    %c48 = arith.constant 48 : index
    %c0_18 = arith.constant 0 : index
    %21 = vector.load %arg1[%c0_17, %c48, %c0_18] : memref<1x320x180xbf16, #tpu.memory_space<vmem>>, vector<1x256x180xbf16>
    %22 = vector.shape_cast %21 : vector<1x256x180xbf16> to vector<256x180xbf16>
    %c3 = arith.constant 3 : index
    %c0_19 = arith.constant 0 : index
    %c0_20 = arith.constant 0 : index
    %23 = vector.load %arg2[%c3, %c0_19, %c0_20] : memref<5x180x128xbf16, #tpu.memory_space<vmem>>, vector<1x180x128xbf16>
    %24 = vector.shape_cast %23 : vector<1x180x128xbf16> to vector<180x128xbf16>
    %cst_21 = arith.constant dense<0.000000e+00> : vector<256x128xf32>
    %25 = tpu.matmul %22, %24, %cst_21 {dimension_numbers = #tpu.dot_dimension_numbers<[1], [0], [0], [1], [0, 0, 1, 1], [], []>} : vector<256x180xbf16>, vector<180x128xbf16>, vector<256x128xf32> -> vector<256x128xf32>
    %26 = arith.addf %20, %25 : vector<256x128xf32>
    %c0_22 = arith.constant 0 : index
    %c64 = arith.constant 64 : index
    %c0_23 = arith.constant 0 : index
    %27 = vector.load %arg1[%c0_22, %c64, %c0_23] : memref<1x320x180xbf16, #tpu.memory_space<vmem>>, vector<1x256x180xbf16>
    %28 = vector.shape_cast %27 : vector<1x256x180xbf16> to vector<256x180xbf16>
    %c4 = arith.constant 4 : index
    %c0_24 = arith.constant 0 : index
    %c0_25 = arith.constant 0 : index
    %29 = vector.load %arg2[%c4, %c0_24, %c0_25] : memref<5x180x128xbf16, #tpu.memory_space<vmem>>, vector<1x180x128xbf16>
    %30 = vector.shape_cast %29 : vector<1x180x128xbf16> to vector<180x128xbf16>
    %cst_26 = arith.constant dense<0.000000e+00> : vector<256x128xf32>
    %31 = tpu.matmul %28, %30, %cst_26 {dimension_numbers = #tpu.dot_dimension_numbers<[1], [0], [0], [1], [0, 0, 1, 1], [], []>} : vector<256x180xbf16>, vector<180x128xbf16>, vector<256x128xf32> -> vector<256x128xf32>
    %32 = arith.addf %26, %31 : vector<256x128xf32>
    %33 = tpu.iota {dimensions = array<i32: 1>} : vector<256x128xi32>
    %c96_i32 = arith.constant 96 : i32
    %34 = vector.broadcast %c96_i32 : i32 to vector<256x128xi32>
    %35 = arith.cmpi slt, %33, %34 : vector<256x128xi32>
    %cst_27 = arith.constant 5.000000e-01 : f32
    %36 = vector.broadcast %cst_27 : f32 to vector<256x128xf32>
    %37 = arith.mulf %36, %32 : vector<256x128xf32>
    %38 = arith.select %35, %37, %32 : vector<256x128xi1>, vector<256x128xf32>
    %39 = math.tanh %38 : vector<256x128xf32>
    %cst_28 = arith.constant 5.000000e-01 : f32
    %40 = vector.broadcast %cst_28 : f32 to vector<256x128xf32>
    %41 = arith.mulf %40, %39 : vector<256x128xf32>
    %cst_29 = arith.constant 5.000000e-01 : f32
    %42 = vector.broadcast %cst_29 : f32 to vector<256x128xf32>
    %43 = arith.addf %41, %42 : vector<256x128xf32>
    %44 = arith.select %35, %43, %39 : vector<256x128xi1>, vector<256x128xf32>
    %45 = vector.extract_strided_slice %44 {offsets = [0, 0], sizes = [256, 32], strides = [1, 1]} : vector<256x128xf32> to vector<256x32xf32>
    %46 = vector.extract_strided_slice %44 {offsets = [0, 32], sizes = [256, 32], strides = [1, 1]} : vector<256x128xf32> to vector<256x32xf32>
    %47 = vector.extract_strided_slice %44 {offsets = [0, 64], sizes = [256, 32], strides = [1, 1]} : vector<256x128xf32> to vector<256x32xf32>
    %48 = vector.extract_strided_slice %44 {offsets = [0, 96], sizes = [256, 32], strides = [1, 1]} : vector<256x128xf32> to vector<256x32xf32>
    %c0_30 = arith.constant 0 : index
    %c0_31 = arith.constant 0 : index
    %c0_32 = arith.constant 0 : index
    %49 = vector.load %arg4[%c0_30, %c0_31, %c0_32] : memref<1x256x32xf32, #tpu.memory_space<vmem>>, vector<1x256x32xf32>
    %50 = vector.shape_cast %49 : vector<1x256x32xf32> to vector<256x32xf32>
    %51 = arith.mulf %46, %50 : vector<256x32xf32>
    %52 = arith.mulf %45, %48 : vector<256x32xf32>
    %53 = arith.addf %51, %52 : vector<256x32xf32>
    %54 = math.tanh %53 : vector<256x32xf32>
    %55 = arith.mulf %47, %54 : vector<256x32xf32>
    %56 = arith.truncf %55 : vector<256x32xf32> to vector<256x32xbf16>
    %c0_33 = arith.constant 0 : index
    %c0_34 = arith.constant 0 : index
    %c0_35 = arith.constant 0 : index
    %57 = vector.load %arg5[%c0_33, %c0_34, %c0_35] : memref<1x256x32xbf16, #tpu.memory_space<vmem>>, vector<1x256x32xbf16>
    %58 = vector.shape_cast %57 : vector<1x256x32xbf16> to vector<256x32xbf16>
    %59 = vector.shape_cast %56 : vector<256x32xbf16> to vector<1x256x32xbf16>
    tpu.vector_store %arg5[%c0_33, %c0_34, %c0_35], %59 {strides = array<i32>} : memref<1x256x32xbf16, #tpu.memory_space<vmem>>, vector<1x256x32xbf16>,
    %c0_36 = arith.constant 0 : index
    %c0_37 = arith.constant 0 : index
    %c0_38 = arith.constant 0 : index
    %60 = vector.load %arg6[%c0_36, %c0_37, %c0_38] : memref<1x256x32xf32, #tpu.memory_space<vmem>>, vector<1x256x32xf32>
    %61 = vector.shape_cast %60 : vector<1x256x32xf32> to vector<256x32xf32>
    %62 = vector.shape_cast %53 : vector<256x32xf32> to vector<1x256x32xf32>
    tpu.vector_store %arg6[%c0_36, %c0_37, %c0_38], %62 {strides = array<i32>} : memref<1x256x32xf32, #tpu.memory_space<vmem>>, vector<1x256x32xf32>,
    return
  }
  func.func @transform_0(%arg0: i32) -> (i32, i32, i32) {
    %c0_i32 = arith.constant 0 : i32
    %c0_i32_0 = arith.constant 0 : i32
    %c0_i32_1 = arith.constant 0 : i32
    return %arg0, %c0_i32, %c0_i32_0 : i32, i32, i32
  }
  func.func @transform_1(%arg0: i32) -> (i32, i32, i32) {
    %c0_i32 = arith.constant 0 : i32
    %c0_i32_0 = arith.constant 0 : i32
    %c0_i32_1 = arith.constant 0 : i32
    %c0_i32_2 = arith.constant 0 : i32
    return %c0_i32, %c0_i32_0, %c0_i32_1 : i32, i32, i32
  }
  func.func @transform_2(%arg0: i32) -> (i32, i32) {
    %c0_i32 = arith.constant 0 : i32
    %c0_i32_0 = arith.constant 0 : i32
    %c0_i32_1 = arith.constant 0 : i32
    return %c0_i32, %c0_i32_0 : i32, i32
  }
  func.func @transform_3(%arg0: i32) -> (i32, i32, i32) {
    %c0_i32 = arith.constant 0 : i32
    %c0_i32_0 = arith.constant 0 : i32
    %c0_i32_1 = arith.constant 0 : i32
    return %arg0, %c0_i32, %c0_i32_0 : i32, i32, i32
  }
  func.func @transform_4(%arg0: i32) -> (i32, i32, i32) {
    %c0_i32 = arith.constant 0 : i32
    %c0_i32_0 = arith.constant 0 : i32
    %c0_i32_1 = arith.constant 0 : i32
    return %arg0, %c0_i32, %c0_i32_0 : i32, i32, i32
  }
  func.func @transform_5(%arg0: i32) -> (i32, i32, i32) {
    %c0_i32 = arith.constant 0 : i32
    %c0_i32_0 = arith.constant 0 : i32
    %c0_i32_1 = arith.constant 0 : i32
    return %arg0, %c0_i32, %c0_i32_0 : i32, i32, i32
  }
}

module attributes {stable_mosaic.version = 11 : i64} {
  func.func @_cell_softmax_kernel(%arg0: i32, %arg1: memref<1x288x108xbf16, #tpu.memory_space<vmem>>, %arg2: memref<3x108x128xbf16, #tpu.memory_space<vmem>>, %arg3: memref<1x128xf32, #tpu.memory_space<vmem>>, %arg4: memref<1x256x32xf32, #tpu.memory_space<vmem>>, %arg5: memref<1x256x32xf32, #tpu.memory_space<vmem>>, %arg6: memref<1x256x32xf32, #tpu.memory_space<vmem>>, %arg7: memref<1x256x32xf32, #tpu.memory_space<vmem>>) attributes {dimension_semantics = [#tpu.dimension_semantics<parallel>], iteration_bounds = array<i64: 2>, scalar_prefetch = 0 : i64, scratch_operands = 0 : i64, tpu.core_type = #tpu.core_type<tc>, window_params = [{transform_indices = @transform_0, window_bounds = array<i64: 1, 288, 108>}, {pipeline_mode = #tpu.pipeline_mode<synchronous>, transform_indices = @transform_1, window_bounds = array<i64: 3, 108, 128>}, {pipeline_mode = #tpu.pipeline_mode<synchronous>, transform_indices = @transform_2, window_bounds = array<i64: 1, 128>}, {transform_indices = @transform_3, window_bounds = array<i64: 1, 256, 32>}, {transform_indices = @transform_4, window_bounds = array<i64: 1, 256, 32>}, {transform_indices = @transform_5, window_bounds = array<i64: 1, 256, 32>}, {transform_indices = @transform_6, window_bounds = array<i64: 1, 256, 32>}]} {
    %c0 = arith.constant 0 : index
    %c0_0 = arith.constant 0 : index
    %0 = vector.load %arg3[%c0, %c0_0] : memref<1x128xf32, #tpu.memory_space<vmem>>, vector<1x128xf32>
    %1 = vector.shape_cast %0 : vector<1x128xf32> to vector<1x128xf32>
    %2 = vector.broadcast %1 : vector<1x128xf32> to vector<256x128xf32>
    %c0_1 = arith.constant 0 : index
    %c0_2 = arith.constant 0 : index
    %c0_3 = arith.constant 0 : index
    %3 = vector.load %arg1[%c0_1, %c0_2, %c0_3] : memref<1x288x108xbf16, #tpu.memory_space<vmem>>, vector<1x256x108xbf16>
    %4 = vector.shape_cast %3 : vector<1x256x108xbf16> to vector<256x108xbf16>
    %c0_4 = arith.constant 0 : index
    %c0_5 = arith.constant 0 : index
    %c0_6 = arith.constant 0 : index
    %5 = vector.load %arg2[%c0_4, %c0_5, %c0_6] : memref<3x108x128xbf16, #tpu.memory_space<vmem>>, vector<1x108x128xbf16>
    %6 = vector.shape_cast %5 : vector<1x108x128xbf16> to vector<108x128xbf16>
    %cst = arith.constant dense<0.000000e+00> : vector<256x128xf32>
    %7 = tpu.matmul %4, %6, %cst {dimension_numbers = #tpu.dot_dimension_numbers<[1], [0], [0], [1], [0, 0, 1, 1], [], []>} : vector<256x108xbf16>, vector<108x128xbf16>, vector<256x128xf32> -> vector<256x128xf32>
    %8 = arith.addf %2, %7 : vector<256x128xf32>
    %c0_7 = arith.constant 0 : index
    %c16 = arith.constant 16 : index
    %c0_8 = arith.constant 0 : index
    %9 = vector.load %arg1[%c0_7, %c16, %c0_8] : memref<1x288x108xbf16, #tpu.memory_space<vmem>>, vector<1x256x108xbf16>
    %10 = vector.shape_cast %9 : vector<1x256x108xbf16> to vector<256x108xbf16>
    %c1 = arith.constant 1 : index
    %c0_9 = arith.constant 0 : index
    %c0_10 = arith.constant 0 : index
    %11 = vector.load %arg2[%c1, %c0_9, %c0_10] : memref<3x108x128xbf16, #tpu.memory_space<vmem>>, vector<1x108x128xbf16>
    %12 = vector.shape_cast %11 : vector<1x108x128xbf16> to vector<108x128xbf16>
    %cst_11 = arith.constant dense<0.000000e+00> : vector<256x128xf32>
    %13 = tpu.matmul %10, %12, %cst_11 {dimension_numbers = #tpu.dot_dimension_numbers<[1], [0], [0], [1], [0, 0, 1, 1], [], []>} : vector<256x108xbf16>, vector<108x128xbf16>, vector<256x128xf32> -> vector<256x128xf32>
    %14 = arith.addf %8, %13 : vector<256x128xf32>
    %c0_12 = arith.constant 0 : index
    %c32 = arith.constant 32 : index
    %c0_13 = arith.constant 0 : index
    %15 = vector.load %arg1[%c0_12, %c32, %c0_13] : memref<1x288x108xbf16, #tpu.memory_space<vmem>>, vector<1x256x108xbf16>
    %16 = vector.shape_cast %15 : vector<1x256x108xbf16> to vector<256x108xbf16>
    %c2 = arith.constant 2 : index
    %c0_14 = arith.constant 0 : index
    %c0_15 = arith.constant 0 : index
    %17 = vector.load %arg2[%c2, %c0_14, %c0_15] : memref<3x108x128xbf16, #tpu.memory_space<vmem>>, vector<1x108x128xbf16>
    %18 = vector.shape_cast %17 : vector<1x108x128xbf16> to vector<108x128xbf16>
    %cst_16 = arith.constant dense<0.000000e+00> : vector<256x128xf32>
    %19 = tpu.matmul %16, %18, %cst_16 {dimension_numbers = #tpu.dot_dimension_numbers<[1], [0], [0], [1], [0, 0, 1, 1], [], []>} : vector<256x108xbf16>, vector<108x128xbf16>, vector<256x128xf32> -> vector<256x128xf32>
    %20 = arith.addf %14, %19 : vector<256x128xf32>
    %21 = tpu.iota {dimensions = array<i32: 1>} : vector<256x128xi32>
    %c96_i32 = arith.constant 96 : i32
    %22 = vector.broadcast %c96_i32 : i32 to vector<256x128xi32>
    %23 = arith.cmpi slt, %21, %22 : vector<256x128xi32>
    %cst_17 = arith.constant 5.000000e-01 : f32
    %24 = vector.broadcast %cst_17 : f32 to vector<256x128xf32>
    %25 = arith.mulf %24, %20 : vector<256x128xf32>
    %26 = arith.select %23, %25, %20 : vector<256x128xi1>, vector<256x128xf32>
    %27 = math.tanh %26 : vector<256x128xf32>
    %cst_18 = arith.constant 5.000000e-01 : f32
    %28 = vector.broadcast %cst_18 : f32 to vector<256x128xf32>
    %29 = arith.mulf %28, %27 : vector<256x128xf32>
    %cst_19 = arith.constant 5.000000e-01 : f32
    %30 = vector.broadcast %cst_19 : f32 to vector<256x128xf32>
    %31 = arith.addf %29, %30 : vector<256x128xf32>
    %32 = arith.select %23, %31, %27 : vector<256x128xi1>, vector<256x128xf32>
    %33 = vector.extract_strided_slice %32 {offsets = [0, 0], sizes = [256, 32], strides = [1, 1]} : vector<256x128xf32> to vector<256x32xf32>
    %34 = vector.extract_strided_slice %32 {offsets = [0, 32], sizes = [256, 32], strides = [1, 1]} : vector<256x128xf32> to vector<256x32xf32>
    %35 = vector.extract_strided_slice %32 {offsets = [0, 64], sizes = [256, 32], strides = [1, 1]} : vector<256x128xf32> to vector<256x32xf32>
    %36 = vector.extract_strided_slice %32 {offsets = [0, 96], sizes = [256, 32], strides = [1, 1]} : vector<256x128xf32> to vector<256x32xf32>
    %c0_20 = arith.constant 0 : index
    %c0_21 = arith.constant 0 : index
    %c0_22 = arith.constant 0 : index
    %37 = vector.load %arg4[%c0_20, %c0_21, %c0_22] : memref<1x256x32xf32, #tpu.memory_space<vmem>>, vector<1x256x32xf32>
    %38 = vector.shape_cast %37 : vector<1x256x32xf32> to vector<256x32xf32>
    %39 = arith.mulf %34, %38 : vector<256x32xf32>
    %40 = arith.mulf %33, %36 : vector<256x32xf32>
    %41 = arith.addf %39, %40 : vector<256x32xf32>
    %42 = math.tanh %41 : vector<256x32xf32>
    %43 = arith.mulf %35, %42 : vector<256x32xf32>
    %c0_23 = arith.constant 0 : index
    %c0_24 = arith.constant 0 : index
    %c0_25 = arith.constant 0 : index
    %44 = vector.load %arg6[%c0_23, %c0_24, %c0_25] : memref<1x256x32xf32, #tpu.memory_space<vmem>>, vector<1x256x32xf32>
    %45 = vector.shape_cast %44 : vector<1x256x32xf32> to vector<256x32xf32>
    %46 = vector.shape_cast %41 : vector<256x32xf32> to vector<1x256x32xf32>
    tpu.vector_store %arg6[%c0_23, %c0_24, %c0_25], %46 {strides = array<i32>} : memref<1x256x32xf32, #tpu.memory_space<vmem>>, vector<1x256x32xf32>,
    %cst_26 = arith.constant dense<0xFF800000> : vector<256xf32>
    %47 = vector.multi_reduction <maximumf>, %43, %cst_26 [1] : vector<256x32xf32> to vector<256xf32>
    %48 = vector.shape_cast %47 : vector<256xf32> to vector<256x1xf32>
    %49 = vector.broadcast %48 : vector<256x1xf32> to vector<256x32xf32>
    %50 = arith.subf %43, %49 : vector<256x32xf32>
    %51 = math.exp %50 : vector<256x32xf32>
    %cst_27 = arith.constant dense<0.000000e+00> : vector<256xf32>
    %52 = vector.multi_reduction <add>, %51, %cst_27 [1] : vector<256x32xf32> to vector<256xf32>
    %53 = vector.shape_cast %52 : vector<256xf32> to vector<256x1xf32>
    %54 = tpu.reciprocal %53 {approx = true} : vector<256x1xf32> -> vector<256x1xf32>
    %55 = vector.broadcast %54 : vector<256x1xf32> to vector<256x32xf32>
    %56 = arith.mulf %51, %55 : vector<256x32xf32>
    %c0_28 = arith.constant 0 : index
    %c0_29 = arith.constant 0 : index
    %c0_30 = arith.constant 0 : index
    %57 = vector.load %arg5[%c0_28, %c0_29, %c0_30] : memref<1x256x32xf32, #tpu.memory_space<vmem>>, vector<1x256x32xf32>
    %58 = vector.shape_cast %57 : vector<1x256x32xf32> to vector<256x32xf32>
    %59 = vector.shape_cast %56 : vector<256x32xf32> to vector<1x256x32xf32>
    tpu.vector_store %arg5[%c0_28, %c0_29, %c0_30], %59 {strides = array<i32>} : memref<1x256x32xf32, #tpu.memory_space<vmem>>, vector<1x256x32xf32>,
    %60 = math.log %53 : vector<256x1xf32>
    %61 = vector.broadcast %60 : vector<256x1xf32> to vector<256x32xf32>
    %62 = arith.subf %50, %61 : vector<256x32xf32>
    %c0_31 = arith.constant 0 : index
    %c0_32 = arith.constant 0 : index
    %c0_33 = arith.constant 0 : index
    %63 = vector.load %arg7[%c0_31, %c0_32, %c0_33] : memref<1x256x32xf32, #tpu.memory_space<vmem>>, vector<1x256x32xf32>
    %64 = vector.shape_cast %63 : vector<1x256x32xf32> to vector<256x32xf32>
    %65 = vector.shape_cast %62 : vector<256x32xf32> to vector<1x256x32xf32>
    tpu.vector_store %arg7[%c0_31, %c0_32, %c0_33], %65 {strides = array<i32>} : memref<1x256x32xf32, #tpu.memory_space<vmem>>, vector<1x256x32xf32>,
    return
  }
  func.func @transform_0(%arg0: i32) -> (i32, i32, i32) {
    %c0_i32 = arith.constant 0 : i32
    %c0_i32_0 = arith.constant 0 : i32
    %c0_i32_1 = arith.constant 0 : i32
    return %arg0, %c0_i32, %c0_i32_0 : i32, i32, i32
  }
  func.func @transform_1(%arg0: i32) -> (i32, i32, i32) {
    %c0_i32 = arith.constant 0 : i32
    %c0_i32_0 = arith.constant 0 : i32
    %c0_i32_1 = arith.constant 0 : i32
    %c0_i32_2 = arith.constant 0 : i32
    return %c0_i32, %c0_i32_0, %c0_i32_1 : i32, i32, i32
  }
  func.func @transform_2(%arg0: i32) -> (i32, i32) {
    %c0_i32 = arith.constant 0 : i32
    %c0_i32_0 = arith.constant 0 : i32
    %c0_i32_1 = arith.constant 0 : i32
    return %c0_i32, %c0_i32_0 : i32, i32
  }
  func.func @transform_3(%arg0: i32) -> (i32, i32, i32) {
    %c0_i32 = arith.constant 0 : i32
    %c0_i32_0 = arith.constant 0 : i32
    %c0_i32_1 = arith.constant 0 : i32
    return %arg0, %c0_i32, %c0_i32_0 : i32, i32, i32
  }
  func.func @transform_4(%arg0: i32) -> (i32, i32, i32) {
    %c0_i32 = arith.constant 0 : i32
    %c0_i32_0 = arith.constant 0 : i32
    %c0_i32_1 = arith.constant 0 : i32
    return %arg0, %c0_i32, %c0_i32_0 : i32, i32, i32
  }
  func.func @transform_5(%arg0: i32) -> (i32, i32, i32) {
    %c0_i32 = arith.constant 0 : i32
    %c0_i32_0 = arith.constant 0 : i32
    %c0_i32_1 = arith.constant 0 : i32
    return %arg0, %c0_i32, %c0_i32_0 : i32, i32, i32
  }
  func.func @transform_6(%arg0: i32) -> (i32, i32, i32) {
    %c0_i32 = arith.constant 0 : i32
    %c0_i32_0 = arith.constant 0 : i32
    %c0_i32_1 = arith.constant 0 : i32
    return %arg0, %c0_i32, %c0_i32_0 : i32, i32, i32
  }
}

</mosaic_0001>

<bundles_post_ra>
// kernel: conv_lstm_forward.3
= control target key start
LH: loop header
LB: loop body
LE: loop exit
PB: predicated region body
PF: predicated region fallthrough
CT: control target
= control target key end

     0   :  { %s3686_s18 = smov 0   ;;  %s4776_s0 = inlined_call_operand.vmem [shape: bf16[2,320,108], index: 0, kind: input, shape index: {}]   ;;  %s4777_s1 = inlined_call_operand.vmem [shape: bf16[3,108,128], index: 1, kind: input, shape index: {}]   ;;  %s4778_s2 = inlined_call_operand.vmem [shape: f32[1,128], index: 2, kind: input, shape index: {}]   ;;  %s4779_s3 = inlined_call_operand.vmem [shape: f32[2,256,32], index: 3, kind: input, shape index: {}]   ;;  %s4780_s4 = inlined_call_operand.vmem [shape: bf16[2,256,32], index: 4, kind: output, shape index: {0}]   ;;  %s4781_s5 = inlined_call_operand.vmem [shape: f32[2,256,32], index: 5, kind: output, shape index: {1}]  }
   0x1 LB: > { %s2888_s19 = sadd.s32 4294967295, %s3651_s18   ;;  %p2892_p0 = scmp.ge.s32.totalorder %s3651_s18, 1  ;;  %s3651_s18 = sphi %s3686_s18, %s16_s18  }
   0x2   : > { %p200_p1 = scmp.lt.s32.totalorder %s3651_s18, 3 }
   0x4   : > { %p201_p2 = pnand %p2892_p0, %p200_p1 }
   0x6   : > { %204 = sbr.rel (%p201_p2) target bundleno = 903 (0x387), region = 36 }
   0xd   : > { %v3448_v0 = vld [vmem:[%s4777_s1] sm:$0xff]   ;;  %v3700_v1 = vld [vmem:[%s4777_s1 + $0x38] sm:$0xff]   ;;  %p238_p3 = scmp.lt.s32.totalorder %s2888_s19, 1  ;;  %v3450_v2 = vld [vmem:[%s4777_s1 + $0x8] sm:$0xff]   ;;  %vm433_vm0 = vcmask 883712   ;;  %vm482_vm1 = vcmask 1045504  }
   0xe   : > { %3184 = vmatprep.subr.bf16.mxu1 %v3448_v0  ;;  %3230 = vmatprep.subr.bf16.mxu0 %v3700_v1  ;;  %v3709_v3 = vld [vmem:[%s4777_s1 + $0x40] sm:$0xff]   ;;  %v3452_v4 = vld [vmem:[%s4777_s1 + $0x10] sm:$0xff]   ;;  %v3721_v5 = vld [vmem:[%s4777_s1 + $0x48] sm:$0xff]   ;;  %s3653_s25 = smov 32   ;;  %s3654_s27 = smov 96   ;;  %vm2755_vm3 = vcmask 261120  }
   0xf   : > { %3185 = vmatpush3.bf16.msra.mxu1 %v3448_v0  ;;  %s4803_s19 = smov (!%p238_p3, %s2888_s19), 1  ;;  %3231 = vmatpush3.bf16.msra.mxu0 %v3700_v1  ;;  %v3454_v6 = vld [vmem:[%s4777_s1 + $0x18] sm:$0xff]   ;;  %v3732_v7 = vld [vmem:[%s4777_s1 + $0x50] sm:$0xff]   ;;  %v3456_v8 = vld [vmem:[%s4777_s1 + $0x20] sm:$0xff]   ;;  %s3655_s6 = smov 64   ;;  %vm2594_vm4 = vcmask 257024  }
  0x10   : > { %3186 = vmatprep.subr.bf16.mxu1 %v3450_v2  ;;  %3232 = vmatprep.subr.bf16.mxu0 %v3709_v3  ;;  %s3436_s7 = smul.u32 160, %s4803_s19  ;;  %v3747_v9 = vld [vmem:[%s4777_s1 + $0x58] sm:$0xff]   ;;  %v3458_v12 = vld [vmem:[%s4777_s1 + $0x28] sm:$0xff]   ;;  %v3759_v13 = vld [vmem:[%s4777_s1 + $0x60] sm:$0xff]   ;;  %s3080_s21 = sshll.u32 %s4803_s19, 8 }
  0x11   : > { %v3460_v14 = vld [vmem:[%s4777_s1 + $0x30] sm:$0x3f]   ;;  %v3771_v15 = vld [vmem:[%s4777_s1 + $0x68] sm:$0x3f]   ;;  %v3467_v23 = vld [vmem:[%s4777_s1 + $0x78] sm:$0xff]   ;;  %s3869_s24 = scalar_lea.vmem %s4779_s3, %s3080_s21  ;;  %s4563_s30 = scalar_lea.vmem %s4781_s5, %s3080_s21 }
  0x12   : > { %s3737_s14 = scalar_lea.vmem %s4776_s0, %s3436_s7  ;;  %v484_v16 = vsel %vm482_vm1, %v3460_v14, 0  ;;  %v3781_v18 = vsel %vm482_vm1, %v3771_v15, 0  ;;  %v3466_v19 = vld [vmem:[%s4777_s1 + $0x70] sm:$0xff]   ;;  %v3472_v25 = vld [vmem:[%s4777_s1 + $0x80] sm:$0xff]   ;;  %v3473_v29 = vld [vmem:[%s4777_s1 + $0x88] sm:$0xff]   ;;  %s3081_s7 = sshll.u32 %s4803_s19, 7 }
  0x13   : > { %3187 = vmatpush3.bf16.msra.mxu1 %v3450_v2  ;;  %3233 = vmatpush3.bf16.msra.mxu0 %v3709_v3  ;;  %v3462_v10 = vld [vmem:[%s3737_s14] sm:$0xff]   ;;  %v3463_v11 = vld [vmem:[%s3737_s14 + $0x10] sm:$0xff]   ;;  %v3464_v17 = vld [vmem:[%s3737_s14 + $0x8] sm:$0xff]   ;;  %s4701_s10 = scalar_lea.vmem %s4780_s4, %s3081_s7 }
  0x14   : > { %3188 = vmatprep.subr.bf16.mxu1 %v3452_v4  ;;  %3234 = vmatprep.subr.bf16.mxu0 %v3721_v5  ;;  %v3465_v20 = vld [vmem:[%s3737_s14 + $0x18] sm:$0xff]   ;;  %v3468_v21 = vld [vmem:[%s3737_s14 + $0x10] sm:$0xff]   ;;  %v3469_v22 = vld [vmem:[%s3737_s14 + $0x20] sm:$0xff]  }
  0x15   : > { %3198 = vmatprep.mubr.msk.bf16.mxu1 %vm433_vm0, %v3462_v10  ;;  %3244 = vmatprep.mubr.msk.bf16.mxu0 %vm433_vm0, %v3463_v11  ;;  %v3470_v24 = vld [vmem:[%s3737_s14 + $0x18] sm:$0xff]   ;;  %v3471_v26 = vld [vmem:[%s3737_s14 + $0x28] sm:$0xff]   ;;  %v3474_v27 = vld [vmem:[%s3737_s14 + $0x20] sm:$0xff]  }
  0x16   : > { %v3475_v28 = vld [vmem:[%s3737_s14 + $0x30] sm:$0xff]   ;;  %v3476_v30 = vld [vmem:[%s3737_s14 + $0x28] sm:$0xff]   ;;  %v3477_v32 = vld [vmem:[%s3737_s14 + $0x38] sm:$0xff]  }
  0x17   : > { %3189 = vmatpush3.bf16.msra.mxu1 %v3452_v4  ;;  %3235 = vmatpush3.bf16.msra.mxu0 %v3721_v5  ;;  %v3478_v31 = vld [vmem:[%s4777_s1 + $0x90] sm:$0xff]   ;;  %v3480_v34 = vld [vmem:[%s3737_s14 + $0x40] sm:$0xff]   ;;  %v3481_v35 = vld [vmem:[%s4777_s1 + $0x98] sm:$0xff]  }
  0x18   : > { %3190 = vmatprep.subr.bf16.mxu1 %v3454_v6  ;;  %3236 = vmatprep.subr.bf16.mxu0 %v3732_v7  ;;  %v3479_v33 = vld [vmem:[%s3737_s14 + $0x30] sm:$0xff]   ;;  %v3482_v36 = vld [vmem:[%s3737_s14 + $0x38] sm:$0xff]   ;;  %v3484_v37 = vld [vmem:[%s4777_s1 + $0xa0] sm:$0x3f]  }
  0x19   : > { %v3483_v38 = vld [vmem:[%s3737_s14 + $0x48] sm:$0xff]   ;;  %v3485_v39 = vld [vmem:[%s3737_s14 + $0x40] sm:$0xff]   ;;  %v1308_v41 = vsel %vm482_vm1, %v3484_v37, 0  ;;  %v3489_v44 = vld [vmem:[%s3737_s14 + $0x50] sm:$0xff]  }
  0x1a   : > { %v3486_v40 = vld [vmem:[%s3737_s14 + $0x20] sm:$0xff]   ;;  %v3487_v42 = vld [vmem:[%s3737_s14 + $0x48] sm:$0xff]   ;;  %v3490_v45 = vld [vmem:[%s3737_s14 + $0x30] sm:$0xff]  }
  0x1b   : > { %3191 = vmatpush3.bf16.msra.mxu1 %v3454_v6  ;;  %3237 = vmatpush3.bf16.msra.mxu0 %v3732_v7  ;;  %v3488_v43 = vld [vmem:[%s3737_s14 + $0x28] sm:$0xff]   ;;  %v3491_v46 = vld [vmem:[%s3737_s14 + $0x58] sm:$0xff]   ;;  %v3493_v48 = vld [vmem:[%s3737_s14 + $0x60] sm:$0xff]  }
  0x1c   : > { %3192 = vmatprep.subr.bf16.mxu1 %v3456_v8  ;;  %3238 = vmatprep.subr.bf16.mxu0 %v3747_v9  ;;  %v3492_v47 = vld [vmem:[%s3737_s14 + $0x38] sm:$0xff]   ;;  %v3494_v49 = vld [vmem:[%s3737_s14 + $0x40] sm:$0xff]   ;;  %v1700_v51 = vld [vmem:[%s3869_s24 + $0x10] sm:$0xff] }
  0x1d   : > { %v1698_v50 = vld [vmem:[%s3869_s24] sm:$0xff]  ;;  %v1699_v52 = vld [vmem:[%s3869_s24 + $0x8] sm:$0xff]  ;;  %1766 = vrot.lane.b32.xlu1 %v1700_v51, %s3653_s25  ;;  %v1701_v53 = vld [vmem:[%s3869_s24 + $0x18] sm:$0xff] }
  0x1e   : > { %1762 = vrot.lane.b32.xlu0 %v1698_v50, %s3653_s25  ;;  %v3495_v54 = vld [vmem:[%s3737_s14 + $0x68] sm:$0xff]   ;;  %v3497_v56 = vld [vmem:[%s3737_s14 + $0x70] sm:$0xff]   ;;  %v1702_v57 = vld [vmem:[%s3869_s24 + $0x20] sm:$0xff] }
  0x1f   : > { %3193 = vmatpush3.bf16.msra.mxu1 %v3456_v8  ;;  %3239 = vmatpush3.bf16.msra.mxu0 %v3747_v9  ;;  %v3496_v55 = vld [vmem:[%s3737_s14 + $0x48] sm:$0xff]   ;;  %v3498_v58 = vld [vmem:[%s3737_s14 + $0x50] sm:$0xff]   ;;  %v1705_v61 = vld [vmem:[%s3869_s24 + $0x38] sm:$0xff] }
  0x20   : > { %3194 = vmatprep.subr.bf16.mxu1 %v3458_v12  ;;  %3240 = vmatprep.subr.bf16.mxu0 %v3759_v13  ;;  %v1703_v59 = vld [vmem:[%s3869_s24 + $0x28] sm:$0xff]  ;;  %v1704_v60 = vld [vmem:[%s3869_s24 + $0x30] sm:$0xff]  ;;  %v3499_v62 = vld [vmem:[%s3737_s14 + $0x78] sm:$0xff]  }
  0x21   : > { %1768 = vrot.lane.b32.xlu1 %v1701_v53, %s3653_s25  ;;  %v3500_v63 = vld [vmem:[%s3737_s14 + $0x58] sm:$0xff]   ;;  %v3501_v0 = vld [vmem:[%s3737_s14 + $0x50] sm:$0xff]   ;;  %v3503_v2 = vld [vmem:[%s3737_s14 + $0x60] sm:$0xff]  }
  0x22   : > { %1764 = vrot.lane.b32.xlu0 %v1699_v52, %s3653_s25  ;;  %v1708_v4 = vld [vmem:[%s3869_s24 + $0x50] sm:$0xff]  ;;  %v3502_v6 = vld [vmem:[%s3737_s14 + $0x58] sm:$0xff]   ;;  %v3505_v8 = vld [vmem:[%s3737_s14 + $0x60] sm:$0xff]  }
  0x23   : > { %3195 = vmatpush3.bf16.msra.mxu1 %v3458_v12  ;;  %3241 = vmatpush3.bf16.msra.mxu0 %v3759_v13  ;;  %v3507_v10 = vld [vmem:[%s3737_s14 + $0x70] sm:$0xff]   ;;  %v1711_v11 = vld [vmem:[%s3869_s24 + $0x68] sm:$0xff] }
  0x24   : > { %3432 = vmatprep.subr.msk.bf16.mxu1 %vm482_vm1, %v3460_v14  ;;  %3433 = vmatprep.subr.msk.bf16.mxu0 %vm482_vm1, %v3771_v15  ;;  %v1712_v12 = vld [vmem:[%s3869_s24 + $0x70] sm:$0xff]  ;;  %v3506_v14 = vld [vmem:[%s3737_s14 + $0x68] sm:$0xff]  }
  0x25   : > { %1772 = vrot.lane.b32.xlu1 %v1703_v59, %s3653_s25 }
  0x26   : > { %1770 = vrot.lane.b32.xlu0 %v1702_v57, %s3653_s25  ;;  %v3998_v57 = vld [vmem:[%s4778_s2] ss:$0 sm:$0xff] }
  0x27   : > { %3197 = vmatpush3.bf16.msra.mxu1 %v484_v16  ;;  %3243 = vmatpush3.bf16.msra.mxu0 %v3781_v18  ;;  %v3509_v16 = vld [vmem:[%s3737_s14 + $0x70] sm:$0xff]  }
  0x28   : > { %3322 = vmatprep.subr.bf16.mxu1 %v3700_v1  ;;  %3276 = vmatprep.subr.bf16.mxu0 %v3466_v19 }
  0x29   : > { %1776 = vrot.lane.b32.xlu1 %v1705_v61, %s3653_s25 }
  0x2a   : > { %3199 = vmatmul.mubr.msk.bf16.vlgmr.msra.gmra.mrb[0].mxu1 %vm433_vm0, %v3464_v17  ;;  %3245 = vmatmul.mubr.msk.bf16.vlgmr.msra.gmra.mrb[0].mxu0 %vm433_vm0, %v3465_v20  ;;  %v1714_v17 = vld [vmem:[%s3869_s24 + $0x80] sm:$0xff]  ;;  %v1716_v20 = vld [vmem:[%s3869_s24 + $0x90] sm:$0xff] }
  0x2b   : > { %3202 = vmatprep.mubr.msk.bf16.mxu1 %vm433_vm0, %v3468_v21  ;;  %3277 = vmatpush3.bf16.msra.mxu0 %v3466_v19  ;;  %v1715_v19 = vld [vmem:[%s3869_s24 + $0x88] sm:$0xff]  ;;  %v1717_v21 = vld [vmem:[%s3869_s24 + $0x98] sm:$0xff] }
  0x2c   : > { %3248 = vmatprep.mubr.msk.bf16.mxu0 %vm433_vm0, %v3469_v22  ;;  %3278 = vmatprep.subr.bf16.mxu0 %v3467_v23  ;;  %v3510_v22 = vld [vmem:[%s3737_s14 + $0x78] sm:$0xff]  }
  0x2d   : > { %3329 = vmatpush3.bf16.msra.mxu1 %v3700_v1  ;;  %1774 = vrot.lane.b32.xlu0 %v1704_v60, %s3653_s25  ;;  %v1706_v1 = vld [vmem:[%s3869_s24 + $0x40] sm:$0xff] }
  0x2e   : > { %3323 = vmatprep.subr.bf16.mxu1 %v3709_v3 }
  0x2f   : > { %3279 = vmatpush3.bf16.msra.mxu0 %v3467_v23  ;;  %v3512_v23 = vld [vmem:[%s3737_s14 + $0x88] sm:$0xff]  }
  0x30   : > { %3280 = vmatprep.subr.bf16.mxu0 %v3472_v25 }
  0x31   : > { %3330 = vmatpush3.bf16.msra.mxu1 %v3709_v3  ;;  %v1707_v3 = vld [vmem:[%s3869_s24 + $0x48] sm:$0xff]  ;;  %1778 = vrot.lane.b32.xlu0 %v1706_v1, %s3653_s25 }
  0x32   : > { %3203 = vmatmul.mubr.msk.bf16.gmra.mrb[4].mxu1 %vm433_vm0, %v3470_v24  ;;  %3324 = vmatprep.subr.bf16.mxu1 %v3721_v5  ;;  %v3513_v24 = vld [vmem:[%s3737_s14 + $0x80] sm:$0xff]  }
  0x33   : > { %3249 = vmatmul.mubr.msk.bf16.gmra.mrb[4].mxu0 %vm433_vm0, %v3471_v26  ;;  %3206 = vmatprep.mubr.msk.bf16.mxu1 %vm433_vm0, %v3474_v27  ;;  %v3515_v26 = vld [vmem:[%s3737_s14 + $0x90] sm:$0xff]   ;;  %v1719_v27 = vld [vmem:[%s3869_s24 + $0xa8] sm:$0xff] }
  0x34   : > { %3281 = vmatpush3.bf16.msra.mxu0 %v3472_v25  ;;  %3252 = vmatprep.mubr.msk.bf16.mxu0 %vm433_vm0, %v3475_v28  ;;  %v1718_v25 = vld [vmem:[%s3869_s24 + $0xa0] sm:$0xff]  ;;  %v1720_v28 = vld [vmem:[%s3869_s24 + $0xb0] sm:$0xff] }
  0x35   : > { %3282 = vmatprep.subr.bf16.mxu0 %v3473_v29  ;;  %3331 = vmatpush3.bf16.msra.mxu1 %v3721_v5  ;;  %v1709_v5 = vld [vmem:[%s3869_s24 + $0x58] sm:$0xff] }
  0x36   : > { %3325 = vmatprep.subr.bf16.mxu1 %v3732_v7  ;;  %1780 = vrot.lane.b32.xlu1 %v1707_v3, %s3653_s25 }
  0x37   : > { %1782 = vrot.lane.b32.xlu0 %v1708_v4, %s3653_s25 }
  0x38   : > { %3283 = vmatpush3.bf16.msra.mxu0 %v3473_v29  ;;  %v1721_v29 = vld [vmem:[%s3869_s24 + $0xb8] sm:$0xff] }
  0x39   : > { %3284 = vmatprep.subr.bf16.mxu0 %v3478_v31  ;;  %3332 = vmatpush3.bf16.msra.mxu1 %v3732_v7  ;;  %v3504_v7 = vld [vmem:[%s3737_s14 + $0x68] sm:$0xff]  }
  0x3a   : > { %3207 = vmatmul.mubr.msk.bf16.gmra.mrb[8].mxu1 %vm433_vm0, %v3476_v30  ;;  %3326 = vmatprep.subr.bf16.mxu1 %v3747_v9  ;;  %v3514_v30 = vld [vmem:[%s3737_s14 + $0x88] sm:$0xff]  }
  0x3b   : > { %3253 = vmatmul.mubr.msk.bf16.gmra.mrb[8].mxu0 %vm433_vm0, %v3477_v32  ;;  %3210 = vmatprep.mubr.msk.bf16.mxu1 %vm433_vm0, %v3479_v33  ;;  %v1722_v32 = vld [vmem:[%s3869_s24 + $0xc0] sm:$0xff]  ;;  %v1723_v33 = vld [vmem:[%s3869_s24 + $0xc8] sm:$0xff] }
  0x3c   : > { %3285 = vmatpush3.bf16.msra.mxu0 %v3478_v31  ;;  %3256 = vmatprep.mubr.msk.bf16.mxu0 %vm433_vm0, %v3480_v34  ;;  %v3516_v31 = vld [vmem:[%s3737_s14 + $0x98] sm:$0xff]   ;;  %v1724_v34 = vld [vmem:[%s3869_s24 + $0xd0] sm:$0xff] }
  0x3d   : > { %3286 = vmatprep.subr.bf16.mxu0 %v3481_v35  ;;  %3333 = vmatpush3.bf16.msra.mxu1 %v3747_v9  ;;  %v1710_v9 = vld [vmem:[%s3869_s24 + $0x60] sm:$0xff] }
  0x3e   : > { %3327 = vmatprep.subr.bf16.mxu1 %v3759_v13  ;;  %1784 = vrot.lane.b32.xlu1 %v1709_v5, %s3653_s25 }
  0x3f   : > { %1786 = vrot.lane.b32.xlu0 %v1710_v9, %s3653_s25 }
  0x40   : > { %3287 = vmatpush3.bf16.msra.mxu0 %v3481_v35  ;;  %v1725_v35 = vld [vmem:[%s3869_s24 + $0xd8] sm:$0xff] }
  0x41   : > { %3435 = vmatprep.subr.msk.bf16.mxu0 %vm482_vm1, %v3484_v37  ;;  %3334 = vmatpush3.bf16.msra.mxu1 %v3759_v13  ;;  %v1713_v13 = vld [vmem:[%s3869_s24 + $0x78] sm:$0xff]  ;;  %v1727_v37 = vld [vmem:[%s3869_s24 + $0xe8] sm:$0xff] }
  0x42   : > { %3211 = vmatmul.mubr.msk.bf16.gmra.mrb[12].mxu1 %vm433_vm0, %v3482_v36  ;;  %3434 = vmatprep.subr.msk.bf16.mxu1 %vm482_vm1, %v3771_v15  ;;  %v3508_v15 = vld [vmem:[%s3737_s14 + $0x78] sm:$0xff]   ;;  %v1726_v36 = vld [vmem:[%s3869_s24 + $0xe0] sm:$0xff] }
  0x43   : > { %3257 = vmatmul.mubr.msk.bf16.gmra.mrb[12].mxu0 %vm433_vm0, %v3483_v38  ;;  %3214 = vmatprep.mubr.msk.bf16.mxu1 %vm433_vm0, %v3485_v39  ;;  %v1728_v38 = vld [vmem:[%s3869_s24 + $0xf0] sm:$0xff]  ;;  %v1729_v39 = vld [vmem:[%s3869_s24 + $0xf8] sm:$0xff] }
  0x44   : > { %3289 = vmatpush3.bf16.msra.mxu0 %v1308_v41  ;;  %3290 = vmatprep.mubr.msk.bf16.mxu0 %vm433_vm0, %v3486_v40 }
  0x45   : > { %3335 = vmatpush3.bf16.msra.mxu1 %v3781_v18  ;;  %1788 = vrot.lane.b32.xlu1 %v1711_v11, %s3653_s25  ;;  %v3511_v18 = vld [vmem:[%s3737_s14 + $0x80] sm:$0xff]  }
  0x46   : > { %1790 = vrot.lane.b32.xlu0 %v1712_v12, %s3653_s25 }
  0x49   : > { %1792 = vrot.lane.b32.xlu1 %v1713_v13, %s3653_s25 }
  0x4a   : > { %3215 = vmatmul.mubr.msk.bf16.gmra.mrb[16].mxu1 %vm433_vm0, %v3487_v42  ;;  %1794 = vrot.lane.b32.xlu0 %v1714_v17, %s3653_s25 }
  0x4b   : > { %3291 = vmatmul.mubr.msk.bf16.vlgmr.msra.gmra.mrb[0].mxu0 %vm433_vm0, %v3488_v43  ;;  %3218 = vmatprep.mubr.msk.bf16.mxu1 %vm433_vm0, %v3489_v44 }
  0x4c   : > { %3294 = vmatprep.mubr.msk.bf16.mxu0 %vm433_vm0, %v3490_v45 }
  0x4d   : > { %1796 = vrot.lane.b32.xlu1 %v1715_v19, %s3653_s25 }
  0x4e   : > { %1798 = vrot.lane.b32.xlu0 %v1716_v20, %s3653_s25 }
  0x51   : > { %1800 = vrot.lane.b32.xlu1 %v1717_v21, %s3653_s25 }
  0x52   : > { %3219 = vmatmul.mubr.msk.bf16.gmra.mrb[20].mxu1 %vm433_vm0, %v3491_v46  ;;  %1802 = vrot.lane.b32.xlu0 %v1718_v25, %s3653_s25 }
  0x53   : > { %3295 = vmatmul.mubr.msk.bf16.gmra.mrb[4].mxu0 %vm433_vm0, %v3492_v47  ;;  %3222 = vmatprep.mubr.msk.bf16.mxu1 %vm433_vm0, %v3493_v48 }
  0x54   : > { %3298 = vmatprep.mubr.msk.bf16.mxu0 %vm433_vm0, %v3494_v49 }
  0x55   : > { %1804 = vrot.lane.b32.xlu1 %v1719_v27, %s3653_s25 }
  0x56   : > { %1806 = vrot.lane.b32.xlu0 %v1720_v28, %s3653_s25 }
  0x59   : > { %1808 = vrot.lane.b32.xlu1 %v1721_v29, %s3653_s25 }
  0x5a   : > { %3223 = vmatmul.mubr.msk.bf16.gmra.mrb[24].mxu1 %vm433_vm0, %v3495_v54  ;;  %1810 = vrot.lane.b32.xlu0 %v1722_v32, %s3653_s25 }
  0x5b   : > { %3299 = vmatmul.mubr.msk.bf16.gmra.mrb[8].mxu0 %vm433_vm0, %v3496_v55  ;;  %3226 = vmatprep.mubr.msk.bf16.mxu1 %vm433_vm0, %v3497_v56  ;;  %v1503_v55 = vlaneseq }
  0x5c   : > { %3302 = vmatprep.mubr.msk.bf16.mxu0 %vm433_vm0, %v3498_v58 }
  0x5d   : > { %1812 = vrot.lane.b32.xlu1 %v1723_v33, %s3653_s25  ;;  %v4000_v58 = vand.u32 127, %v1503_v55 }
  0x5e   : > { %1814 = vrot.lane.b32.xlu0 %v1724_v34, %s3653_s25 }
  0x5f   : > { %vm1505_vm2 = vcmp.lt.s32.totalorder %v4000_v58, 96 }
  0x61   : > { %1816 = vrot.lane.b32.xlu1 %v1725_v35, %s3653_s25 }
  0x62   : > { %3227 = vmatmul.mubr.msk.bf16.gmra.mrb[28].mxu1 %vm433_vm0, %v3499_v62  ;;  %1818 = vrot.lane.b32.xlu0 %v1726_v36, %s3653_s25 }
  0x63   : > { %3303 = vmatmul.mubr.msk.bf16.gmra.mrb[12].mxu0 %vm433_vm0, %v3500_v63  ;;  %3260 = vmatprep.mubr.msk.bf16.mxu1 %vm433_vm0, %v3501_v0 }
  0x64   : > { %3306 = vmatprep.mubr.msk.bf16.mxu0 %vm433_vm0, %v3503_v2 }
  0x65   : > { %1820 = vrot.lane.b32.xlu1 %v1727_v37, %s3653_s25 }
  0x66   : > { %1822 = vrot.lane.b32.xlu0 %v1728_v38, %s3653_s25 }
  0x69   : > { %1824 = vrot.lane.b32.xlu1 %v1729_v39, %s3653_s25 }
  0x6a   : > { %3261 = vmatmul.mubr.msk.bf16.vlgmr.msra.gmra.mrb[16].mxu1 %vm433_vm0, %v3502_v6 }
  0x6b   : > { %3307 = vmatmul.mubr.msk.bf16.gmra.mrb[16].mxu0 %vm433_vm0, %v3504_v7  ;;  %3264 = vmatprep.mubr.msk.bf16.mxu1 %vm433_vm0, %v3505_v8 }
  0x6c   : > { %3310 = vmatprep.mubr.msk.bf16.mxu0 %vm433_vm0, %v3507_v10 }
  0x72   : > { %3265 = vmatmul.mubr.msk.bf16.gmra.mrb[20].mxu1 %vm433_vm0, %v3506_v14 }
  0x73   : > { %3311 = vmatmul.mubr.msk.bf16.gmra.mrb[20].mxu0 %vm433_vm0, %v3508_v15  ;;  %3268 = vmatprep.mubr.msk.bf16.mxu1 %vm433_vm0, %v3509_v16 }
  0x74   : > { %3314 = vmatprep.mubr.msk.bf16.mxu0 %vm433_vm0, %v3511_v18 }
  0x7a   : > { %3269 = vmatmul.mubr.msk.bf16.gmra.mrb[24].mxu1 %vm433_vm0, %v3510_v22 }
  0x7b   : > { %3315 = vmatmul.mubr.msk.bf16.gmra.mrb[24].mxu0 %vm433_vm0, %v3512_v23  ;;  %3272 = vmatprep.mubr.msk.bf16.mxu1 %vm433_vm0, %v3513_v24 }
  0x7c   : > { %3318 = vmatprep.mubr.msk.bf16.mxu0 %vm433_vm0, %v3515_v26 }
  0x82   : > { %3273 = vmatmul.mubr.msk.bf16.gmra.mrb[28].mxu1 %vm433_vm0, %v3514_v30 }
  0x83   : > { %3319 = vmatmul.mubr.msk.bf16.gmra.mrb[28].mxu0 %vm433_vm0, %v3516_v31 }
  0xfd   : > { %v3200_v40 = vpop.f32.mrb[0].mxu1 }
  0xfe   : > { %v520_v41 = vpop.f32.mrb[1].mxu1  ;;  %v649_v59 = vadd.f32 %v3200_v40, %v3998_v57 }
  0xff   : > { %v3201_v42 = vpop.f32.mrb[2].mxu1  ;;  %v647_v60 = vadd.f32 %v3998_v57, %v520_v41 }
 0x100   : > { %v523_v43 = vpop.f32.mrb[3].mxu1  ;;  %v650_v62 = vadd.f32 %v3201_v42, %v3998_v57 }
 0x101   : > { %v648_v1 = vadd.f32 %v3998_v57, %v523_v43 }
 0x105   : > { %v3204_v44 = vpop.f32.mrb[4].mxu1 }
 0x106   : > { %v536_v45 = vpop.f32.mrb[5].mxu1  ;;  %v653_v13 = vadd.f32 %v3204_v44, %v3998_v57 }
 0x107   : > { %v3205_v46 = vpop.f32.mrb[6].mxu1  ;;  %v651_v15 = vadd.f32 %v3998_v57, %v536_v45 }
 0x108   : > { %v539_v47 = vpop.f32.mrb[7].mxu1  ;;  %v654_v18 = vadd.f32 %v3205_v46, %v3998_v57 }
 0x109   : > { %v652_v21 = vadd.f32 %v3998_v57, %v539_v47 }
 0x10d   : > { %v3208_v48 = vpop.f32.mrb[8].mxu1 }
 0x10e   : > { %v552_v49 = vpop.f32.mrb[9].mxu1  ;;  %v657_v33 = vadd.f32 %v3208_v48, %v3998_v57 }
 0x10f   : > { %v3209_v50 = vpop.f32.mrb[10].mxu1  ;;  %v655_v36 = vadd.f32 %v3998_v57, %v552_v49 }
 0x110   : > { %v3985_v51 = vpop.f32.mrb[11].mxu1  ;;  %v658_v40 = vadd.f32 %v3209_v50, %v3998_v57 }
 0x111   : > { %v656_v45 = vadd.f32 %v3998_v57, %v3985_v51 }
 0x115   : > { %v3987_v52 = vpop.f32.mrb[12].mxu1 }
 0x116   : > { %v3989_v53 = vpop.f32.mrb[13].mxu1 }
 0x117   : > { %v3991_v54 = vpop.f32.mrb[14].mxu1 }
 0x118   : > { %v3993_v56 = vpop.f32.mrb[15].mxu1 }
 0x11e   : > { %v3292_v61 = vpop.f32.mrb[0].mxu0 }
 0x11f   : > { %v3337_v63 = vadd.f32 %v3292_v61, %v649_v59  ;;  %v1344_v0 = vpop.f32.mrb[1].mxu0 }
 0x120   : > { %v3339_v2 = vadd.f32 %v1344_v0, %v647_v60  ;;  %v3293_v3 = vpop.f32.mrb[2].mxu0 }
 0x121   : > { %v1508_v4 = vmul.f32 0.5, %v3337_v63  ;;  %v3341_v5 = vadd.f32 %v3293_v3, %v650_v62  ;;  %v1347_v6 = vpop.f32.mrb[3].mxu0 }
 0x122   : > { %v1506_v7 = vmul.f32 0.5, %v3339_v2  ;;  %v3343_v8 = vadd.f32 %v1347_v6, %v648_v1 }
 0x123   : > { %v1540_v9 = vsel %vm1505_vm2, %v1508_v4, %v3337_v63  ;;  %v1509_v10 = vmul.f32 0.5, %v3341_v5 }
 0x124   : > { %3517 = vtanh.f32 %v1540_v9  ;;  %v1538_v11 = vsel %vm1505_vm2, %v1506_v7, %v3339_v2  ;;  %v1507_v12 = vmul.f32 0.5, %v3343_v8  ;;  %v659_v7 = vadd.f32 %v3998_v57, %v3989_v53 }
 0x125   : > { %3519 = vtanh.f32 %v1538_v11  ;;  %v1541_v14 = vsel %vm1505_vm2, %v1509_v10, %v3341_v5  ;;  %v661_v5 = vadd.f32 %v3987_v52, %v3998_v57  ;;  %v662_v11 = vadd.f32 %v3991_v54, %v3998_v57 }
 0x126   : > { %3521 = vtanh.f32 %v1541_v14  ;;  %v1539_v16 = vsel %vm1505_vm2, %v1507_v12, %v3343_v8  ;;  %v3296_v17 = vpop.f32.mrb[4].mxu0 }
 0x127   : > { %3523 = vtanh.f32 %v1539_v16  ;;  %v3345_v19 = vadd.f32 %v3296_v17, %v653_v13  ;;  %v1360_v20 = vpop.f32.mrb[5].mxu0 }
 0x128   : > { %v3347_v22 = vadd.f32 %v1360_v20, %v651_v15  ;;  %v3297_v23 = vpop.f32.mrb[6].mxu0 }
 0x129   : > { %v1512_v24 = vmul.f32 0.5, %v3345_v19  ;;  %v3349_v25 = vadd.f32 %v3297_v23, %v654_v18  ;;  %v1363_v26 = vpop.f32.mrb[7].mxu0 }
 0x12a   : > { %v1510_v27 = vmul.f32 0.5, %v3347_v22  ;;  %v3351_v28 = vadd.f32 %v1363_v26, %v652_v21 }
 0x12b   : > { %v1544_v29 = vsel %vm1505_vm2, %v1512_v24, %v3345_v19  ;;  %v1513_v30 = vmul.f32 0.5, %v3349_v25  ;;  %v660_v19 = vadd.f32 %v3998_v57, %v3993_v56 }
 0x12c   : > { %3525 = vtanh.f32 %v1544_v29  ;;  %v1542_v31 = vsel %vm1505_vm2, %v1510_v27, %v3347_v22  ;;  %v1511_v32 = vmul.f32 0.5, %v3351_v28 }
 0x12d   : > { %3527 = vtanh.f32 %v1542_v31  ;;  %v1545_v34 = vsel %vm1505_vm2, %v1513_v30, %v3349_v25 }
 0x12e   : > { %v3518_v35 = vpop.eup %3517  ;;  %3529 = vtanh.f32 %v1545_v34  ;;  %v1543_v37 = vsel %vm1505_vm2, %v1511_v32, %v3351_v28  ;;  %v3300_v38 = vpop.f32.mrb[8].mxu0 }
 0x12f   : > { %v3520_v39 = vpop.eup %3519  ;;  %3531 = vtanh.f32 %v1543_v37  ;;  %v3353_v41 = vadd.f32 %v3300_v38, %v657_v33  ;;  %v1376_v42 = vpop.f32.mrb[9].mxu0  ;;  %v1604_v43 = vmul.f32 0.5, %v3518_v35 }
 0x130   : > { %v3522_v44 = vpop.eup %3521  ;;  %v1602_v46 = vmul.f32 0.5, %v3520_v39  ;;  %v3355_v47 = vadd.f32 %v1376_v42, %v655_v36  ;;  %v3301_v48 = vpop.f32.mrb[10].mxu0 }
 0x131   : > { %v3524_v49 = vpop.eup %3523  ;;  %v1516_v55 = vmul.f32 0.5, %v3353_v41  ;;  %v3357_v59 = vadd.f32 %v3301_v48, %v658_v40  ;;  %v1636_v60 = vadd.f32 0.5, %v1604_v43  ;;  %v1379_v61 = vpop.f32.mrb[11].mxu0  ;;  %v1605_v62 = vmul.f32 0.5, %v3522_v44 }
 0x132   : > { %v1634_v63 = vadd.f32 0.5, %v1602_v46  ;;  %v1514_v0 = vmul.f32 0.5, %v3355_v47  ;;  %v3359_v50 = vadd.f32 %v1379_v61, %v656_v45  ;;  %v1603_v1 = vmul.f32 0.5, %v3524_v49 }
 0x133   : > { %v1548_v2 = vsel %vm1505_vm2, %v1516_v55, %v3353_v41  ;;  %v1517_v3 = vmul.f32 0.5, %v3357_v59  ;;  %v4036_v51 = vsel %vm1505_vm2, %v1636_v60, %v3518_v35  ;;  %v1637_v4 = vadd.f32 0.5, %v1605_v62 }
 0x134   : > { %3533 = vtanh.f32 %v1548_v2  ;;  %v1546_v6 = vsel %vm1505_vm2, %v1514_v0, %v3355_v47  ;;  %1926 = vrot.lane.b32.xlu0 %v4036_v51, %s3653_s25  ;;  %v1515_v9 = vmul.f32 0.5, %v3359_v50  ;;  %v1635_v52 = vadd.f32 0.5, %v1603_v1 }
 0x135   : > { %3535 = vtanh.f32 %v1546_v6  ;;  %v1549_v8 = vsel %vm1505_vm2, %v1517_v3, %v3357_v59  ;;  %v4052_v12 = vsel %vm1505_vm2, %v1637_v4, %v3522_v44  ;;  %v4056_v53 = vsel %vm1505_vm2, %v1634_v63, %v3520_v39 }
 0x136   : > { %v3526_v10 = vpop.eup %3525  ;;  %3537 = vtanh.f32 %v1549_v8  ;;  %v3304_v13 = vpop.f32.mrb[12].mxu0  ;;  %v1547_v15 = vsel %vm1505_vm2, %v1515_v9, %v3359_v50  ;;  %1928 = vrot.lane.b32.xlu1 %v4052_v12, %s3653_s25  ;;  %v4068_v24 = vsel %vm1505_vm2, %v1635_v52, %v3524_v49 }
 0x137   : > { %v3528_v14 = vpop.eup %3527  ;;  %v3361_v16 = vadd.f32 %v3304_v13, %v661_v5  ;;  %v1392_v54 = vpop.f32.mrb[13].mxu0  ;;  %v1608_v17 = vmul.f32 0.5, %v3526_v10  ;;  %3539 = vtanh.f32 %v1547_v15 }
 0x138   : > { %v3530_v18 = vpop.eup %3529  ;;  %v1606_v20 = vmul.f32 0.5, %v3528_v14  ;;  %v3363_v21 = vadd.f32 %v1392_v54, %v659_v7  ;;  %v3305_v22 = vpop.f32.mrb[14].mxu0  ;;  %1922 = vrot.lane.b32.xlu0 %v4056_v53, %s3653_s25 }
 0x139   : > { %v3532_v23 = vpop.eup %3531  ;;  %v1520_v25 = vmul.f32 0.5, %v3361_v16  ;;  %v3365_v26 = vadd.f32 %v3305_v22, %v662_v11  ;;  %v1395_v27 = vpop.f32.mrb[15].mxu0  ;;  %v1640_v28 = vadd.f32 0.5, %v1608_v17  ;;  %v1609_v35 = vmul.f32 0.5, %v3530_v18 }
 0x13a   : > { %v1638_v29 = vadd.f32 0.5, %v1606_v20  ;;  %v1518_v30 = vmul.f32 0.5, %v3363_v21  ;;  %v1607_v31 = vmul.f32 0.5, %v3532_v23  ;;  %v3367_v56 = vadd.f32 %v1395_v27, %v660_v19  ;;  %1924 = vrot.lane.b32.xlu1 %v4068_v24, %s3653_s25  ;;  %v4106_v17 = vpop.permute.xlu0 %1762 }
 0x13b   : > { %v1552_v32 = vsel %vm1505_vm2, %v1520_v25, %v3361_v16  ;;  %v1521_v33 = vmul.f32 0.5, %v3365_v26  ;;  %v4076_v34 = vsel %vm1505_vm2, %v1640_v28, %v3526_v10  ;;  %v1641_v42 = vadd.f32 0.5, %v1609_v35 }
 0x13c   : > { %3541 = vtanh.f32 %v1552_v32  ;;  %v1550_v36 = vsel %vm1505_vm2, %v1518_v30, %v3363_v21  ;;  %1934 = vrot.lane.b32.xlu0 %v4076_v34, %s3653_s25  ;;  %v1519_v38 = vmul.f32 0.5, %v3367_v56  ;;  %v1639_v41 = vadd.f32 0.5, %v1607_v31 }
 0x13d   : > { %3543 = vtanh.f32 %v1550_v36  ;;  %v1553_v37 = vsel %vm1505_vm2, %v1521_v33, %v3365_v26  ;;  %v3262_v39 = vpop.f32.mrb[16].mxu1  ;;  %v4086_v46 = vsel %vm1505_vm2, %v1638_v29, %v3528_v14  ;;  %v4094_v61 = vsel %vm1505_vm2, %v1641_v42, %v3530_v18 }
 0x13e   : > { %v3534_v40 = vpop.eup %3533  ;;  %3545 = vtanh.f32 %v1553_v37  ;;  %v996_v43 = vpop.f32.mrb[17].mxu1  ;;  %v1551_v47 = vsel %vm1505_vm2, %v1519_v38, %v3367_v56  ;;  %v3368_v48 = vadd.f32 %v3262_v39, %v3998_v57  ;;  %1936 = vrot.lane.b32.xlu1 %v4094_v61, %s3653_s25  ;;  %v4104_v6 = vsel %vm1505_vm2, %v1639_v41, %v3532_v23 }
 0x13f   : > { %v3308_v44 = vpop.f32.mrb[16].mxu0  ;;  %v3536_v45 = vpop.eup %3535  ;;  %v3370_v49 = vadd.f32 %v3998_v57, %v996_v43  ;;  %3547 = vtanh.f32 %v1551_v47  ;;  %v1612_v8 = vmul.f32 0.5, %v3534_v40 }
 0x140   : > { %v3263_v55 = vpop.f32.mrb[18].mxu1  ;;  %v1408_v59 = vpop.f32.mrb[17].mxu0  ;;  %v1610_v62 = vmul.f32 0.5, %v3536_v45  ;;  %1930 = vrot.lane.b32.xlu0 %v4086_v46, %s3653_s25  ;;  %v3369_v1 = vadd.f32 %v3368_v48, %v3308_v44 }
 0x141   : > { %v3538_v60 = vpop.eup %3537  ;;  %v3372_v63 = vadd.f32 %v3263_v55, %v3998_v57  ;;  %v999_v0 = vpop.f32.mrb[19].mxu1  ;;  %v3371_v3 = vadd.f32 %v3370_v49, %v1408_v59  ;;  %v1644_v16 = vadd.f32 0.5, %v1612_v8 }
 0x142   : > { %v3309_v50 = vpop.f32.mrb[18].mxu0  ;;  %v3374_v2 = vadd.f32 %v3998_v57, %v999_v0  ;;  %v3540_v5 = vpop.eup %3539  ;;  %v1613_v9 = vmul.f32 0.5, %v3538_v60  ;;  %v1524_v10 = vmul.f32 0.5, %v3369_v1  ;;  %v1642_v14 = vadd.f32 0.5, %v1610_v62  ;;  %1932 = vrot.lane.b32.xlu1 %v4104_v6, %s3653_s25 }
 0x143   : > { %v1411_v4 = vpop.f32.mrb[19].mxu0  ;;  %v3373_v7 = vadd.f32 %v3372_v63, %v3309_v50  ;;  %v1611_v11 = vmul.f32 0.5, %v3540_v5  ;;  %v1522_v52 = vmul.f32 0.5, %v3371_v3  ;;  %v4118_v23 = vsel %vm1505_vm2, %v1644_v16, %v3534_v40  ;;  %v4147_v59 = vpop.permute.xlu1 %1766 }
 0x144   : > { %v3375_v13 = vadd.f32 %v3374_v2, %v1411_v4  ;;  %v1645_v54 = vadd.f32 0.5, %v1613_v9  ;;  %v1556_v18 = vsel %vm1505_vm2, %v1524_v10, %v3369_v1  ;;  %1942 = vrot.lane.b32.xlu0 %v4118_v23, %s3653_s25  ;;  %v4130_v33 = vsel %vm1505_vm2, %v1642_v14, %v3536_v45  ;;  %v4149_v50 = vpop.permute.xlu0 %1764 }
 0x145   : > { %v1525_v15 = vmul.f32 0.5, %v3373_v7  ;;  %v1554_v19 = vsel %vm1505_vm2, %v1522_v52, %v3371_v3  ;;  %v3266_v20 = vpop.f32.mrb[20].mxu1  ;;  %3549 = vtanh.f32 %v1556_v18  ;;  %v1643_v29 = vadd.f32 0.5, %v1611_v11 }
 0x146   : > { %v3542_v21 = vpop.eup %3541  ;;  %v1523_v25 = vmul.f32 0.5, %v3375_v13  ;;  %v1012_v26 = vpop.f32.mrb[21].mxu1  ;;  %3551 = vtanh.f32 %v1554_v19  ;;  %v4126_v30 = vsel %vm1505_vm2, %v1645_v54, %v3538_v60  ;;  %v3376_v38 = vadd.f32 %v3266_v20, %v3998_v57 }
 0x147   : > { %v1557_v22 = vsel %vm1505_vm2, %v1525_v15, %v3373_v7  ;;  %v3312_v27 = vpop.f32.mrb[20].mxu0  ;;  %v4120_v28 = vpop.eup %3543  ;;  %1944 = vrot.lane.b32.xlu1 %v4126_v30, %s3653_s25  ;;  %v3378_v40 = vadd.f32 %v3998_v57, %v1012_v26  ;;  %v1616_v45 = vmul.f32 0.5, %v3542_v21  ;;  %v4143_v48 = vsel %vm1505_vm2, %v1643_v29, %v3540_v5 }
 0x148   : > { %v3267_v31 = vpop.f32.mrb[22].mxu1  ;;  %v1424_v56 = vpop.f32.mrb[21].mxu0  ;;  %3553 = vtanh.f32 %v1557_v22  ;;  %v1555_v35 = vsel %vm1505_vm2, %v1523_v25, %v3375_v13  ;;  %v1614_v39 = vmul.f32 0.5, %v4120_v28  ;;  %v3377_v49 = vadd.f32 %v3376_v38, %v3312_v27  ;;  %1938 = vrot.lane.b32.xlu0 %v4130_v33, %s3653_s25 }
 0x149   : > { %v3546_v32 = vpop.eup %3545  ;;  %v1015_v36 = vpop.f32.mrb[23].mxu1  ;;  %3555 = vtanh.f32 %v1555_v35  ;;  %v3380_v43 = vadd.f32 %v3267_v31, %v3998_v57  ;;  %v3379_v55 = vadd.f32 %v3378_v40, %v1424_v56  ;;  %v1648_v63 = vadd.f32 0.5, %v1616_v45 }
 0x14a   : > { %v3313_v37 = vpop.f32.mrb[22].mxu0  ;;  %v3548_v42 = vpop.eup %3547  ;;  %v3382_v44 = vadd.f32 %v3998_v57, %v1015_v36  ;;  %v1617_v47 = vmul.f32 0.5, %v3546_v32  ;;  %v1528_v1 = vmul.f32 0.5, %v3377_v49  ;;  %v1646_v5 = vadd.f32 0.5, %v1614_v39 }
 0x14b   : > { %v1427_v41 = vpop.f32.mrb[23].mxu0  ;;  %v1615_v60 = vmul.f32 0.5, %v3548_v42  ;;  %v3381_v62 = vadd.f32 %v3380_v43, %v3313_v37  ;;  %v1526_v2 = vmul.f32 0.5, %v3379_v55  ;;  %1940 = vrot.lane.b32.xlu1 %v4143_v48, %s3653_s25  ;;  %v4155_v8 = vsel %vm1505_vm2, %v1648_v63, %v3542_v21  ;;  %v4183_v37 = vpop.permute.xlu1 %1768 }
 0x14c   : > { %v3383_v0 = vadd.f32 %v3382_v44, %v1427_v41  ;;  %v1649_v3 = vadd.f32 0.5, %v1617_v47  ;;  %v1560_v52 = vsel %vm1505_vm2, %v1528_v1, %v3377_v49  ;;  %1950 = vrot.lane.b32.xlu0 %v4155_v8, %s3653_s25  ;;  %v4176_v56 = vsel %vm1505_vm2, %v1646_v5, %v4120_v28  ;;  %v4192_v45 = vpop.permute.xlu0 %1770 }
 0x14d   : > { %v3270_v4 = vpop.f32.mrb[24].mxu1  ;;  %v1529_v7 = vmul.f32 0.5, %v3381_v62  ;;  %v1558_v13 = vsel %vm1505_vm2, %v1526_v2, %v3379_v55  ;;  %3557 = vtanh.f32 %v1560_v52  ;;  %v1647_v54 = vadd.f32 0.5, %v1615_v60 }
 0x14e   : > { %v1527_v9 = vmul.f32 0.5, %v3383_v0  ;;  %v1028_v10 = vpop.f32.mrb[25].mxu1  ;;  %v3316_v11 = vpop.f32.mrb[24].mxu0  ;;  %3559 = vtanh.f32 %v1558_v13  ;;  %v4169_v25 = vsel %vm1505_vm2, %v1649_v3, %v3546_v32  ;;  %v3384_v26 = vadd.f32 %v3270_v4, %v3998_v57 }
 0x14f   : > { %v3271_v14 = vpop.f32.mrb[26].mxu1  ;;  %v1440_v15 = vpop.f32.mrb[25].mxu0  ;;  %v1561_v18 = vsel %vm1505_vm2, %v1529_v7, %v3381_v62  ;;  %v3386_v27 = vadd.f32 %v3998_v57, %v1028_v10  ;;  %1952 = vrot.lane.b32.xlu1 %v4169_v25, %s3653_s25  ;;  %v4190_v40 = vsel %vm1505_vm2, %v1647_v54, %v3548_v42 }
 0x150   : > { %v3550_v16 = vpop.eup %3549  ;;  %v1559_v19 = vsel %vm1505_vm2, %v1527_v9, %v3383_v0  ;;  %v1031_v20 = vpop.f32.mrb[27].mxu1  ;;  %3561 = vtanh.f32 %v1561_v18  ;;  %v3388_v35 = vadd.f32 %v3271_v14, %v3998_v57  ;;  %v3385_v38 = vadd.f32 %v3384_v26, %v3316_v11  ;;  %1946 = vrot.lane.b32.xlu0 %v4176_v56, %s3653_s25 }
 0x151   : > { %v3317_v21 = vpop.f32.mrb[26].mxu0  ;;  %v3552_v22 = vpop.eup %3551  ;;  %3563 = vtanh.f32 %v1559_v19  ;;  %v3390_v39 = vadd.f32 %v3998_v57, %v1031_v20  ;;  %v3387_v28 = vadd.f32 %v3386_v27, %v1440_v15  ;;  %v1620_v44 = vmul.f32 0.5, %v3550_v16 }
 0x152   : > { %v1443_v29 = vpop.f32.mrb[27].mxu0  ;;  %v3554_v31 = vpop.eup %3553  ;;  %v1618_v36 = vmul.f32 0.5, %v3552_v22  ;;  %v3389_v43 = vadd.f32 %v3388_v35, %v3317_v21  ;;  %v1532_v47 = vmul.f32 0.5, %v3385_v38 }
 0x153   : > { %v4181_v32 = vpop.eup %3555  ;;  %v1530_v49 = vmul.f32 0.5, %v3387_v28  ;;  %v3391_v60 = vadd.f32 %v3390_v39, %v1443_v29  ;;  %1948 = vrot.lane.b32.xlu1 %v4190_v40, %s3653_s25  ;;  %v1652_v0 = vadd.f32 0.5, %v1620_v44  ;;  %v1621_v1 = vmul.f32 0.5, %v3554_v31  ;;  %v4207_v14 = vpop.permute.xlu1 %1772 }
 0x154   : > { %v1650_v41 = vadd.f32 0.5, %v1618_v36  ;;  %v1619_v55 = vmul.f32 0.5, %v4181_v32  ;;  %v1533_v63 = vmul.f32 0.5, %v3389_v43  ;;  %v1564_v3 = vsel %vm1505_vm2, %v1532_v47, %v3385_v38  ;;  %v4221_v38 = vpop.permute.xlu0 %1774 }
 0x155   : > { %v3274_v62 = vpop.f32.mrb[28].mxu1  ;;  %v1562_v4 = vsel %vm1505_vm2, %v1530_v49, %v3387_v28  ;;  %v1531_v5 = vmul.f32 0.5, %v3391_v60  ;;  %3565 = vtanh.f32 %v1564_v3  ;;  %v4205_v11 = vsel %vm1505_vm2, %v1652_v0, %v3550_v16 }
 0x156   : > { %v1044_v2 = vpop.f32.mrb[29].mxu1  ;;  %v3320_v42 = vpop.f32.mrb[28].mxu0  ;;  %v1565_v10 = vsel %vm1505_vm2, %v1533_v63, %v3389_v43  ;;  %v4211_v15 = vsel %vm1505_vm2, %v1650_v41, %v3552_v22  ;;  %3567 = vtanh.f32 %v1562_v4  ;;  %v1651_v54 = vadd.f32 0.5, %v1619_v55  ;;  %1958 = vrot.lane.b32.xlu0 %v4205_v11, %s3653_s25 }
 0x157   : > { %v3275_v7 = vpop.f32.mrb[30].mxu1  ;;  %v1456_v9 = vpop.f32.mrb[29].mxu0  ;;  %v1563_v18 = vsel %vm1505_vm2, %v1531_v5, %v3391_v60  ;;  %3569 = vtanh.f32 %v1565_v10  ;;  %v3392_v16 = vadd.f32 %v3274_v62, %v3998_v57  ;;  %v1653_v21 = vadd.f32 0.5, %v1621_v1 }
 0x158   : > { %v1047_v52 = vpop.f32.mrb[31].mxu1  ;;  %v3321_v13 = vpop.f32.mrb[30].mxu0  ;;  %v3394_v26 = vadd.f32 %v3998_v57, %v1044_v2  ;;  %3571 = vtanh.f32 %v1563_v18  ;;  %v3396_v22 = vadd.f32 %v3275_v7, %v3998_v57 }
 0x159   : > { %v1459_v19 = vpop.f32.mrb[31].mxu0  ;;  %v3558_v20 = vpop.eup %3557  ;;  %v3398_v29 = vadd.f32 %v3998_v57, %v1047_v52  ;;  %v4225_v39 = vsel %vm1505_vm2, %v1653_v21, %v3554_v31  ;;  %v3393_v28 = vadd.f32 %v3392_v16, %v3320_v42  ;;  %v4240_v42 = vsel %vm1505_vm2, %v1651_v54, %v4181_v32 }
 0x15a   : > { %v3560_v27 = vpop.eup %3559  ;;  %v1624_v35 = vmul.f32 0.5, %v3558_v20  ;;  %v3395_v43 = vadd.f32 %v3394_v26, %v1456_v9  ;;  %1960 = vrot.lane.b32.xlu1 %v4225_v39, %s3653_s25  ;;  %v3397_v47 = vadd.f32 %v3396_v22, %v3321_v13  ;;  %1954 = vrot.lane.b32.xlu0 %v4211_v15, %s3653_s25  ;;  %v4231_v63 = vpop.permute.xlu1 %1776 }
 0x15b   : > { %v3562_v36 = vpop.eup %3561  ;;  %v1622_v41 = vmul.f32 0.5, %v3560_v27  ;;  %v3399_v57 = vadd.f32 %v3398_v29, %v1459_v19  ;;  %v1536_v55 = vmul.f32 0.5, %v3393_v28  ;;  %v4254_v10 = vpop.permute.xlu0 %1778 }
 0x15c   : > { %v3564_v44 = vpop.eup %3563  ;;  %v1656_v49 = vadd.f32 0.5, %v1624_v35  ;;  %v1534_v62 = vmul.f32 0.5, %v3395_v43  ;;  %v1537_v31 = vmul.f32 0.5, %v3397_v47  ;;  %v1625_v2 = vmul.f32 0.5, %v3562_v36 }
 0x15d   : > { %v1654_v60 = vadd.f32 0.5, %v1622_v41  ;;  %v1535_v0 = vmul.f32 0.5, %v3399_v57  ;;  %v1568_v3 = vsel %vm1505_vm2, %v1536_v55, %v3393_v28  ;;  %v1623_v5 = vmul.f32 0.5, %v3564_v44 }
 0x15e   : > { %v4235_v1 = vsel %vm1505_vm2, %v1656_v49, %v3558_v20  ;;  %v1566_v4 = vsel %vm1505_vm2, %v1534_v62, %v3395_v43  ;;  %3573 = vtanh.f32 %v1568_v3  ;;  %v1569_v7 = vsel %vm1505_vm2, %v1537_v31, %v3397_v47  ;;  %1956 = vrot.lane.b32.xlu1 %v4240_v42, %s3653_s25  ;;  %v4264_v22 = vpop.permute.xlu1 %1780 }
 0x15f   : > { %v1567_v9 = vsel %vm1505_vm2, %v1535_v0, %v3399_v57  ;;  %1966 = vrot.lane.b32.xlu0 %v4235_v1, %s3653_s25  ;;  %v3566_v32 = vpop.eup %3565  ;;  %3575 = vtanh.f32 %v1566_v4  ;;  %v1657_v52 = vadd.f32 0.5, %v1625_v2  ;;  %v4258_v54 = vsel %vm1505_vm2, %v1654_v60, %v3560_v27 }
 0x160   : > { %v3568_v13 = vpop.eup %3567  ;;  %3577 = vtanh.f32 %v1569_v7  ;;  %v1628_v18 = vmul.f32 0.5, %v3566_v32  ;;  %v1655_v20 = vadd.f32 0.5, %v1623_v5 }
 0x161   : > { %v3570_v19 = vpop.eup %3569  ;;  %3579 = vtanh.f32 %v1567_v9  ;;  %v4262_v16 = vsel %vm1505_vm2, %v1657_v52, %v3562_v36  ;;  %v1626_v21 = vmul.f32 0.5, %v3568_v13  ;;  %v4274_v36 = vpop.permute.xlu0 %1782 }
 0x162   : > { %v3572_v26 = vpop.eup %3571  ;;  %1968 = vrot.lane.b32.xlu1 %v4262_v16, %s3653_s25  ;;  %v1660_v27 = vadd.f32 0.5, %v1628_v18  ;;  %v1629_v29 = vmul.f32 0.5, %v3570_v19  ;;  %v4278_v43 = vsel %vm1505_vm2, %v1655_v20, %v3564_v44  ;;  %v4288_v55 = vpop.permute.xlu1 %1784 }
 0x163   : > { %1962 = vrot.lane.b32.xlu0 %v4258_v54, %s3653_s25  ;;  %v1627_v35 = vmul.f32 0.5, %v3572_v26  ;;  %v1658_v47 = vadd.f32 0.5, %v1626_v21 }
 0x164   : > { %v4272_v28 = vsel %vm1505_vm2, %v1660_v27, %v3566_v32  ;;  %v1661_v41 = vadd.f32 0.5, %v1629_v29 }
 0x165   : > { %v1659_v60 = vadd.f32 0.5, %v1627_v35  ;;  %v4292_v44 = vsel %vm1505_vm2, %v1658_v47, %v3568_v13  ;;  %v4298_v4 = vpop.permute.xlu0 %1786 }
 0x166   : > { %1964 = vrot.lane.b32.xlu1 %v4278_v43, %s3653_s25  ;;  %v4286_v57 = vsel %vm1505_vm2, %v1661_v41, %v3570_v19  ;;  %v4308_v19 = vpop.permute.xlu1 %1788 }
 0x167   : > { %1974 = vrot.lane.b32.xlu0 %v4272_v28, %s3653_s25  ;;  %v4302_v9 = vsel %vm1505_vm2, %v1659_v60, %v3572_v26 }
 0x168   : > { %v3574_v49 = vpop.eup %3573 }
 0x169   : > { %v3576_v62 = vpop.eup %3575  ;;  %v1632_v31 = vmul.f32 0.5, %v3574_v49  ;;  %v4318_v21 = vpop.permute.xlu0 %1790 }
 0x16a   : > { %v3578_v0 = vpop.eup %3577  ;;  %1976 = vrot.lane.b32.xlu1 %v4286_v57, %s3653_s25  ;;  %v1630_v2 = vmul.f32 0.5, %v3576_v62  ;;  %v4328_v29 = vpop.permute.xlu1 %1792 }
 0x16b   : > { %1970 = vrot.lane.b32.xlu0 %v4292_v44, %s3653_s25  ;;  %v3580_v3 = vpop.eup %3579  ;;  %v1664_v5 = vadd.f32 0.5, %v1632_v31  ;;  %v1633_v7 = vmul.f32 0.5, %v3578_v0 }
 0x16c   : > { %v1662_v32 = vadd.f32 0.5, %v1630_v2  ;;  %v1631_v52 = vmul.f32 0.5, %v3580_v3 }
 0x16d   : > { %v4306_v13 = vsel %vm1505_vm2, %v1664_v5, %v3574_v49  ;;  %v1665_v18 = vadd.f32 0.5, %v1633_v7  ;;  %v4330_v35 = vpop.permute.xlu0 %1794 }
 0x16e   : > { %1972 = vrot.lane.b32.xlu1 %v4302_v9, %s3653_s25  ;;  %v4322_v26 = vsel %vm1505_vm2, %v1662_v32, %v3576_v62  ;;  %v1663_v27 = vadd.f32 0.5, %v1631_v52  ;;  %v4338_v47 = vpop.permute.xlu1 %1796 }
 0x16f   : > { %1982 = vrot.lane.b32.xlu0 %v4306_v13, %s3653_s25  ;;  %v4316_v20 = vsel %vm1505_vm2, %v1665_v18, %v3578_v0 }
 0x170   : > { %v4334_v41 = vsel %vm1505_vm2, %v1663_v27, %v3580_v3 }
 0x171   : > { %v4340_v49 = vpop.permute.xlu0 %1798 }
 0x172   : > { %1984 = vrot.lane.b32.xlu1 %v4316_v20, %s3653_s25  ;;  %v4342_v60 = vpop.permute.xlu1 %1800 }
 0x173   : > { %1978 = vrot.lane.b32.xlu0 %v4322_v26, %s3653_s25 }
 0x175   : > { %v4344_v62 = vpop.permute.xlu0 %1802 }
 0x176   : > { %1980 = vrot.lane.b32.xlu1 %v4334_v41, %s3653_s25  ;;  %4782 = vst [vmem:[#allocation2_spill] sm:$0xff] %v4344_v62  ;;  %v4346_v31 = vpop.permute.xlu1 %1804 }
 0x177   : > { %4783 = vst [vmem:[#allocation3_spill] sm:$0xff] %v4346_v31 }
 0x179   : > { %v4348_v0 = vpop.permute.xlu0 %1806 }
 0x17a   : > { %v4350_v2 = vpop.permute.xlu1 %1808 }
 0x17b   : > { %4784 = vst [vmem:[#allocation4_spill] sm:$0xff] %v4350_v2 }
 0x17d   : > { %v4352_v58 = vpop.permute.xlu0 %1810 }
 0x17e   : > { %4785 = vst [vmem:[#allocation5_spill] sm:$0xff] %v4352_v58  ;;  %v4354_v3 = vpop.permute.xlu1 %1812 }
 0x17f   : > { %4786 = vst [vmem:[#allocation6_spill] sm:$0xff] %v4354_v3 }
 0x181   : > { %v4356_v5 = vpop.permute.xlu0 %1814 }
 0x182   : > { %4787 = vst [vmem:[#allocation7_spill] sm:$0xff] %v4356_v5  ;;  %v4358_v7 = vpop.permute.xlu1 %1816 }
 0x185   : > { %v4360_v32 = vpop.permute.xlu0 %1818 }
 0x186   : > { %4788 = vst [vmem:[#allocation8_spill] sm:$0xff] %v4360_v32  ;;  %v4362_v52 = vpop.permute.xlu1 %1820 }
 0x187   : > { %4789 = vst [vmem:[#allocation9_spill] sm:$0xff] %v4362_v52 }
 0x189   : > { %v4364_v18 = vpop.permute.xlu0 %1822 }
 0x18a   : > { %4790 = vst [vmem:[#allocation10_spill] sm:$0xff] %v4364_v18  ;;  %v4366_v27 = vpop.permute.xlu1 %1824 }
 0x18b   : > { %4791 = vst [vmem:[#allocation11_spill] sm:$0xff] %v4366_v27 }
 0x1a6   : > { %v1927_v31 = vpop.permute.xlu0 %1926 }
 0x1a7   : > { %v2020_v62 = vmul.f32 %v1927_v31, %v4036_v51 }
 0x1a8   : > { %v1929_v2 = vpop.permute.xlu1 %1928 }
 0x1a9   : > { %2086 = vrot.lane.b32.xlu0 %v2020_v62, %s3653_s25  ;;  %v2021_v3 = vmul.f32 %v1929_v2, %v4052_v12 }
 0x1aa   : > { %v1923_v58 = vpop.permute.xlu0 %1922 }
 0x1ab   : > { %v2018_v5 = vmul.f32 %v1923_v58, %v4056_v53  ;;  %2088 = vrot.lane.b32.xlu1 %v2021_v3, %s3653_s25 }
 0x1ac   : > { %v1925_v32 = vpop.permute.xlu1 %1924 }
 0x1ad   : > { %2082 = vrot.lane.b32.xlu0 %v2018_v5, %s3653_s25  ;;  %v2019_v52 = vmul.f32 %v1925_v32, %v4068_v24 }
 0x1ae   : > { %v1935_v18 = vpop.permute.xlu0 %1934 }
 0x1af   : > { %v2024_v27 = vmul.f32 %v1935_v18, %v4076_v34  ;;  %2084 = vrot.lane.b32.xlu1 %v2019_v52, %s3653_s25 }
 0x1b0   : > { %v1937_v31 = vpop.permute.xlu1 %1936 }
 0x1b1   : > { %2094 = vrot.lane.b32.xlu0 %v2024_v27, %s3653_s25  ;;  %v2025_v58 = vmul.f32 %v1937_v31, %v4094_v61 }
 0x1b2   : > { %v1931_v62 = vpop.permute.xlu0 %1930 }
 0x1b3   : > { %v2022_v2 = vmul.f32 %v1931_v62, %v4086_v46  ;;  %2096 = vrot.lane.b32.xlu1 %v2025_v58, %s3653_s25 }
 0x1b4   : > { %v1933_v3 = vpop.permute.xlu1 %1932 }
 0x1b5   : > { %2090 = vrot.lane.b32.xlu0 %v2022_v2, %s3653_s25  ;;  %v2023_v5 = vmul.f32 %v1933_v3, %v4104_v6 }
 0x1b6   : > { %v1943_v32 = vpop.permute.xlu0 %1942 }
 0x1b7   : > { %v2028_v18 = vmul.f32 %v1943_v32, %v4118_v23  ;;  %2092 = vrot.lane.b32.xlu1 %v2023_v5, %s3653_s25 }
 0x1b9   : > { %v1945_v52 = vpop.permute.xlu1 %1944  ;;  %2102 = vrot.lane.b32.xlu0 %v2028_v18, %s3653_s25 }
 0x1ba   : > { %v2029_v27 = vmul.f32 %v1945_v52, %v4126_v30  ;;  %v1939_v62 = vpop.permute.xlu0 %1938 }
 0x1bb   : > { %v2026_v31 = vmul.f32 %v1939_v62, %v4130_v33 }
 0x1bc   : > { %2104 = vrot.lane.b32.xlu1 %v2029_v27, %s3653_s25 }
 0x1bd   : > { %v1941_v2 = vpop.permute.xlu1 %1940  ;;  %2098 = vrot.lane.b32.xlu0 %v2026_v31, %s3653_s25 }
 0x1be   : > { %v2027_v58 = vmul.f32 %v1941_v2, %v4143_v48  ;;  %v1951_v3 = vpop.permute.xlu0 %1950 }
 0x1bf   : > { %v2032_v32 = vmul.f32 %v1951_v3, %v4155_v8 }
 0x1c0   : > { %2100 = vrot.lane.b32.xlu1 %v2027_v58, %s3653_s25 }
 0x1c1   : > { %v1953_v5 = vpop.permute.xlu1 %1952  ;;  %2110 = vrot.lane.b32.xlu0 %v2032_v32, %s3653_s25 }
 0x1c2   : > { %v2033_v18 = vmul.f32 %v1953_v5, %v4169_v25  ;;  %v1947_v52 = vpop.permute.xlu0 %1946 }
 0x1c3   : > { %v2030_v62 = vmul.f32 %v1947_v52, %v4176_v56 }
 0x1c4   : > { %2112 = vrot.lane.b32.xlu1 %v2033_v18, %s3653_s25 }
 0x1c5   : > { %v1949_v27 = vpop.permute.xlu1 %1948  ;;  %2106 = vrot.lane.b32.xlu0 %v2030_v62, %s3653_s25 }
 0x1c6   : > { %v2031_v31 = vmul.f32 %v1949_v27, %v4190_v40 }
 0x1c8   : > { %2108 = vrot.lane.b32.xlu1 %v2031_v31, %s3653_s25  ;;  %v1959_v2 = vpop.permute.xlu0 %1958 }
 0x1c9   : > { %v2036_v58 = vmul.f32 %v1959_v2, %v4205_v11 }
 0x1cb   : > { %2118 = vrot.lane.b32.xlu0 %v2036_v58, %s3653_s25 }
 0x1cc   : > { %v1961_v3 = vpop.permute.xlu1 %1960  ;;  %v1955_v32 = vpop.permute.xlu0 %1954 }
 0x1cd   : > { %v2037_v5 = vmul.f32 %v1961_v3, %v4225_v39  ;;  %v2034_v52 = vmul.f32 %v1955_v32, %v4211_v15 }
 0x1cf   : > { %2120 = vrot.lane.b32.xlu1 %v2037_v5, %s3653_s25  ;;  %2114 = vrot.lane.b32.xlu0 %v2034_v52, %s3653_s25 }
 0x1d0   : > { %v1957_v18 = vpop.permute.xlu1 %1956 }
 0x1d1   : > { %v1967_v62 = vpop.permute.xlu0 %1966  ;;  %v2035_v27 = vmul.f32 %v1957_v18, %v4240_v42 }
 0x1d2   : > { %v2040_v31 = vmul.f32 %v1967_v62, %v4235_v1 }
 0x1d3   : > { %2116 = vrot.lane.b32.xlu1 %v2035_v27, %s3653_s25 }
 0x1d4   : > { %2126 = vrot.lane.b32.xlu0 %v2040_v31, %s3653_s25  ;;  %v1969_v2 = vpop.permute.xlu1 %1968 }
 0x1d5   : > { %v1963_v58 = vpop.permute.xlu0 %1962  ;;  %v2041_v3 = vmul.f32 %v1969_v2, %v4262_v16 }
 0x1d6   : > { %v2038_v32 = vmul.f32 %v1963_v58, %v4258_v54 }
 0x1d7   : > { %2128 = vrot.lane.b32.xlu1 %v2041_v3, %s3653_s25 }
 0x1d8   : > { %2122 = vrot.lane.b32.xlu0 %v2038_v32, %s3653_s25  ;;  %v1965_v5 = vpop.permute.xlu1 %1964 }
 0x1d9   : > { %v1975_v52 = vpop.permute.xlu0 %1974  ;;  %v2039_v18 = vmul.f32 %v1965_v5, %v4278_v43 }
 0x1da   : > { %v2044_v62 = vmul.f32 %v1975_v52, %v4272_v28 }
 0x1db   : > { %2124 = vrot.lane.b32.xlu1 %v2039_v18, %s3653_s25 }
 0x1dc   : > { %2134 = vrot.lane.b32.xlu0 %v2044_v62, %s3653_s25  ;;  %v1977_v27 = vpop.permute.xlu1 %1976 }
 0x1dd   : > { %v1971_v31 = vpop.permute.xlu0 %1970  ;;  %v2045_v2 = vmul.f32 %v1977_v27, %v4286_v57 }
 0x1de   : > { %v2042_v58 = vmul.f32 %v1971_v31, %v4292_v44 }
 0x1df   : > { %2136 = vrot.lane.b32.xlu1 %v2045_v2, %s3653_s25 }
 0x1e0   : > { %2130 = vrot.lane.b32.xlu0 %v2042_v58, %s3653_s25  ;;  %v1973_v3 = vpop.permute.xlu1 %1972 }
 0x1e1   : > { %v1983_v32 = vpop.permute.xlu0 %1982  ;;  %v2043_v5 = vmul.f32 %v1973_v3, %v4302_v9  ;;  %v1860_v3 = vmul.f32 %v4147_v59, %v4036_v51  ;;  %v1864_v59 = vmul.f32 %v4221_v38, %v4076_v34 }
 0x1e2   : > { %v2048_v52 = vmul.f32 %v1983_v32, %v4306_v13 }
 0x1e3   : > { %2132 = vrot.lane.b32.xlu1 %v2043_v5, %s3653_s25 }
 0x1e4   : > { %2142 = vrot.lane.b32.xlu0 %v2048_v52, %s3653_s25  ;;  %v1985_v18 = vpop.permute.xlu1 %1984  ;;  %v1861_v52 = vmul.f32 %v4183_v37, %v4052_v12 }
 0x1e5   : > { %v1979_v62 = vpop.permute.xlu0 %1978  ;;  %v2049_v27 = vmul.f32 %v1985_v18, %v4316_v20  ;;  %v1858_v18 = vmul.f32 %v4106_v17, %v4056_v53 }
 0x1e6   : > { %v2046_v31 = vmul.f32 %v1979_v62, %v4322_v26 }
 0x1e7   : > { %2144 = vrot.lane.b32.xlu1 %v2049_v27, %s3653_s25 }
 0x1e8   : > { %2138 = vrot.lane.b32.xlu0 %v2046_v31, %s3653_s25  ;;  %v1981_v2 = vpop.permute.xlu1 %1980 }
 0x1e9   : > { %v2047_v58 = vmul.f32 %v1981_v2, %v4334_v41 }
 0x1eb   : > { %2140 = vrot.lane.b32.xlu1 %v2047_v58, %s3653_s25  ;;  %v1859_v58 = vmul.f32 %v4149_v50, %v4068_v24  ;;  %v1865_v50 = vmul.f32 %v4231_v63, %v4094_v61 }
 0x21b   : > { %v2087_v32 = vpop.permute.xlu0 %2086 }
 0x21c   : > { %v2180_v5 = vadd.f32 %v2087_v32, %v1860_v3 }
 0x21d   : > { %v2089_v62 = vpop.permute.xlu1 %2088 }
 0x21e   : > { %2663 = vrot.lane.b32.xlu0 %v2180_v5, %s3654_s27  ;;  %v2181_v27 = vadd.f32 %v2089_v62, %v1861_v52  ;;  %3581 = vtanh.f32 %v2180_v5  ;;  %v1862_v52 = vmul.f32 %v4192_v45, %v4086_v46  ;;  %v1863_v5 = vmul.f32 %v4207_v14, %v4104_v6 }
 0x21f   : > { %v2083_v31 = vpop.permute.xlu0 %2082 }
 0x220   : > { %v2178_v2 = vadd.f32 %v2083_v31, %v1858_v18  ;;  %2665 = vrot.lane.b32.xlu1 %v2181_v27, %s3654_s27 }
 0x221   : > { %v2085_v3 = vpop.permute.xlu1 %2084 }
 0x222   : > { %2659 = vrot.lane.b32.xlu0 %v2178_v2, %s3654_s27  ;;  %v2179_v17 = vadd.f32 %v2085_v3, %v1859_v58  ;;  %3583 = vtanh.f32 %v2178_v2  ;;  %v1868_v3 = vmul.f32 %v4274_v36, %v4118_v23 }
 0x223   : > { %v2095_v37 = vpop.permute.xlu0 %2094  ;;  %3585 = vtanh.f32 %v2181_v27 }
 0x224   : > { %v2184_v32 = vadd.f32 %v2095_v37, %v1864_v59  ;;  %2661 = vrot.lane.b32.xlu1 %v2179_v17, %s3654_s27  ;;  %3587 = vtanh.f32 %v2179_v17 }
 0x225   : > { %v2097_v38 = vpop.permute.xlu1 %2096 }
 0x226   : > { %2671 = vrot.lane.b32.xlu0 %v2184_v32, %s3654_s27  ;;  %v2185_v31 = vadd.f32 %v2097_v38, %v1865_v50  ;;  %3589 = vtanh.f32 %v2184_v32  ;;  %v1866_v50 = vmul.f32 %v4254_v10, %v4130_v33 }
 0x227   : > { %v2091_v18 = vpop.permute.xlu0 %2090 }
 0x228   : > { %v2182_v62 = vadd.f32 %v2091_v18, %v1862_v52  ;;  %2673 = vrot.lane.b32.xlu1 %v2185_v31, %s3654_s27  ;;  %v3582_v58 = vpop.eup %3581  ;;  %v1869_v18 = vmul.f32 %v4288_v55, %v4126_v30 }
 0x229   : > { %v2093_v45 = vpop.permute.xlu1 %2092 }
 0x22a   : > { %2667 = vrot.lane.b32.xlu0 %v2182_v62, %s3654_s27  ;;  %v2183_v59 = vadd.f32 %v2093_v45, %v1863_v5  ;;  %3591 = vtanh.f32 %v2182_v62  ;;  %v1867_v5 = vmul.f32 %v4264_v22, %v4143_v48 }
 0x22b   : > { %v2103_v63 = vpop.permute.xlu0 %2102  ;;  %3593 = vtanh.f32 %v2185_v31 }
 0x22c   : > { %2669 = vrot.lane.b32.xlu1 %v2183_v59, %s3654_s27  ;;  %v3584_v27 = vpop.eup %3583  ;;  %v2188_v14 = vadd.f32 %v2103_v63, %v1868_v3  ;;  %3595 = vtanh.f32 %v2183_v59  ;;  %v1873_v3 = vmul.f32 %v4328_v29, %v4169_v25 }
 0x22d   : > { %v3586_v2 = vpop.eup %3585 }
 0x22e   : > { %2278 = vrot.lane.b32.xlu0 %v3582_v58, %s3653_s25  ;;  %v2105_v17 = vpop.permute.xlu1 %2104  ;;  %v3588_v52 = vpop.eup %3587  ;;  %v1872_v58 = vmul.f32 %v4318_v21, %v4155_v8  ;;  %3597 = vtanh.f32 %v2188_v14 }
 0x22f   : > { %v2099_v37 = vpop.permute.xlu0 %2098  ;;  %v2189_v32 = vadd.f32 %v2105_v17, %v1869_v18 }
 0x230   : > { %2280 = vrot.lane.b32.xlu1 %v3586_v2, %s3653_s25  ;;  %v2186_v36 = vadd.f32 %v2099_v37, %v1866_v50  ;;  %v3590_v10 = vpop.eup %3589  ;;  %v1870_v2 = vmul.f32 %v4298_v4, %v4176_v56  ;;  %v1871_v37 = vmul.f32 %v4308_v19, %v4190_v40 }
 0x232   : > { %2274 = vrot.lane.b32.xlu0 %v3584_v27, %s3653_s25  ;;  %v2101_v38 = vpop.permute.xlu1 %2100  ;;  %3599 = vtanh.f32 %v2186_v36 }
 0x233   : > { %v2187_v45 = vadd.f32 %v2101_v38, %v1867_v5  ;;  %v2111_v55 = vpop.permute.xlu0 %2110  ;;  %3601 = vtanh.f32 %v2189_v32  ;;  %v1877_v5 = vmul.f32 %v4342_v60, %v4225_v39  ;;  %v1875_v60 = vmul.f32 %v4338_v47, %v4240_v42 }
 0x234   : > { %2276 = vrot.lane.b32.xlu1 %v3588_v52, %s3653_s25  ;;  %v3592_v62 = vpop.eup %3591  ;;  %v2192_v22 = vadd.f32 %v2111_v55, %v1872_v58 }
 0x235   : > { %v3594_v31 = vpop.eup %3593  ;;  %3603 = vtanh.f32 %v2187_v45 }
 0x236   : > { %2679 = vrot.lane.b32.xlu0 %v2188_v14, %s3654_s27  ;;  %v2113_v63 = vpop.permute.xlu1 %2112  ;;  %v3596_v27 = vpop.eup %3595  ;;  %3605 = vtanh.f32 %v2192_v22 }
 0x237   : > { %v2107_v59 = vpop.permute.xlu0 %2106  ;;  %v2193_v14 = vadd.f32 %v2113_v63, %v1873_v3 }
 0x238   : > { %2681 = vrot.lane.b32.xlu1 %v2189_v32, %s3654_s27  ;;  %v2190_v21 = vadd.f32 %v2107_v59, %v1870_v2  ;;  %v3598_v4 = vpop.eup %3597 }
 0x239   : > { %3607 = vtanh.f32 %v2193_v14 }
 0x23a   : > { %2675 = vrot.lane.b32.xlu0 %v2186_v36, %s3654_s27  ;;  %v2109_v17 = vpop.permute.xlu1 %2108  ;;  %v1876_v36 = vmul.f32 %v4340_v49, %v4205_v11  ;;  %3609 = vtanh.f32 %v2190_v21  ;;  %v1874_v49 = vmul.f32 %v4330_v35, %v4211_v15  ;;  %v1880_v35 = vmul.f32 %v4348_v0, %v4235_v1 }
 0x23b   : > { %v2191_v52 = vadd.f32 %v2109_v17, %v1871_v37  ;;  %v4793_v17 = vld [vmem:[#allocation4_spill] sm:$0xff] }
 0x23c   : > { %2677 = vrot.lane.b32.xlu1 %v2187_v45, %s3654_s27  ;;  %v3600_v29 = vpop.eup %3599  ;;  %v1881_v37 = vmul.f32 %v4793_v17, %v4262_v16 }
 0x23d   : > { %v2119_v50 = vpop.permute.xlu0 %2118  ;;  %v3602_v18 = vpop.eup %3601  ;;  %3611 = vtanh.f32 %v2191_v52 }
 0x23e   : > { %2286 = vrot.lane.b32.xlu0 %v3590_v10, %s3653_s25  ;;  %v2196_v19 = vadd.f32 %v2119_v50, %v1876_v36 }
 0x23f   : > { %v3604_v32 = vpop.eup %3603 }
 0x240   : > { %2288 = vrot.lane.b32.xlu1 %v3594_v31, %s3653_s25  ;;  %v3606_v10 = vpop.eup %3605  ;;  %3613 = vtanh.f32 %v2196_v19 }
 0x241   : > { %v2121_v38 = vpop.permute.xlu1 %2120  ;;  %v2115_v55 = vpop.permute.xlu0 %2114 }
 0x242   : > { %2282 = vrot.lane.b32.xlu0 %v3592_v62, %s3653_s25  ;;  %v2197_v45 = vadd.f32 %v2121_v38, %v1877_v5  ;;  %v2194_v62 = vadd.f32 %v2115_v55, %v1874_v49  ;;  %v4795_v5 = vld [vmem:[#allocation7_spill] sm:$0xff] }
 0x243   : > { %v3608_v31 = vpop.eup %3607 }
 0x244   : > { %2284 = vrot.lane.b32.xlu1 %v3596_v27, %s3653_s25  ;;  %v3610_v63 = vpop.eup %3609  ;;  %3615 = vtanh.f32 %v2194_v62 }
 0x245   : > { %v2117_v58 = vpop.permute.xlu1 %2116  ;;  %3617 = vtanh.f32 %v2197_v45 }
 0x246   : > { %2687 = vrot.lane.b32.xlu0 %v2192_v22, %s3654_s27  ;;  %v2127_v22 = vpop.permute.xlu0 %2126  ;;  %v2195_v59 = vadd.f32 %v2117_v58, %v1875_v60  ;;  %v1885_v60 = vmul.f32 %v4358_v7, %v4286_v57 }
 0x247   : > { %v2200_v27 = vadd.f32 %v2127_v22, %v1880_v35  ;;  %v4797_v35 = vld [vmem:[#allocation6_spill] sm:$0xff] }
 0x248   : > { %2689 = vrot.lane.b32.xlu1 %v2193_v14, %s3654_s27  ;;  %v4792_v14 = vld [vmem:[#allocation2_spill] sm:$0xff]  ;;  %3619 = vtanh.f32 %v2195_v59 }
 0x249   : > { %v2129_v2 = vpop.permute.xlu1 %2128  ;;  %v1878_v47 = vmul.f32 %v4792_v14, %v4258_v54  ;;  %3621 = vtanh.f32 %v2200_v27 }
 0x24a   : > { %2683 = vrot.lane.b32.xlu0 %v2190_v21, %s3654_s27  ;;  %v2123_v3 = vpop.permute.xlu0 %2122  ;;  %v3612_v21 = vpop.eup %3611 }
 0x24b   : > { %v2198_v0 = vadd.f32 %v2123_v3, %v1878_v47  ;;  %v4798_v47 = vld [vmem:[#allocation10_spill] sm:$0xff] }
 0x24c   : > { %2685 = vrot.lane.b32.xlu1 %v2191_v52, %s3654_s27  ;;  %v1888_v17 = vmul.f32 %v4798_v47, %v4306_v13 }
 0x24d   : > { %v2125_v52 = vpop.permute.xlu1 %2124  ;;  %3623 = vtanh.f32 %v2198_v0 }
 0x24e   : > { %2294 = vrot.lane.b32.xlu0 %v3598_v4, %s3653_s25  ;;  %v2201_v4 = vadd.f32 %v2129_v2, %v1881_v37 }
 0x250   : > { %2296 = vrot.lane.b32.xlu1 %v3602_v18, %s3653_s25  ;;  %v3614_v18 = vpop.eup %3613  ;;  %3625 = vtanh.f32 %v2201_v4 }
 0x251   : > { %v2137_v55 = vpop.permute.xlu1 %2136 }
 0x252   : > { %2290 = vrot.lane.b32.xlu0 %v3600_v29, %s3653_s25  ;;  %v4794_v29 = vld [vmem:[#allocation3_spill] sm:$0xff] }
 0x253   : > { %v1879_v50 = vmul.f32 %v4794_v29, %v4278_v43 }
 0x254   : > { %2292 = vrot.lane.b32.xlu1 %v3604_v32, %s3653_s25  ;;  %v3616_v32 = vpop.eup %3615 }
 0x255   : > { %v2199_v36 = vadd.f32 %v2125_v52, %v1879_v50  ;;  %v3618_v38 = vpop.eup %3617 }
 0x256   : > { %2695 = vrot.lane.b32.xlu0 %v2196_v19, %s3654_s27  ;;  %v2135_v19 = vpop.permute.xlu0 %2134 }
 0x257   : > { %3627 = vtanh.f32 %v2199_v36 }
 0x258   : > { %2697 = vrot.lane.b32.xlu1 %v2197_v45, %s3654_s27 }
 0x25a   : > { %2302 = vrot.lane.b32.xlu0 %v3606_v10, %s3653_s25  ;;  %v1884_v10 = vmul.f32 %v4795_v5, %v4272_v28  ;;  %v2131_v49 = vpop.permute.xlu0 %2130 }
 0x25c   : > { %2304 = vrot.lane.b32.xlu1 %v3608_v31, %s3653_s25  ;;  %v2204_v45 = vadd.f32 %v2135_v19, %v1884_v10  ;;  %v4796_v31 = vld [vmem:[#allocation5_spill] sm:$0xff] }
 0x25d   : > { %v1882_v58 = vmul.f32 %v4796_v31, %v4292_v44 }
 0x25e   : > { %2691 = vrot.lane.b32.xlu0 %v2194_v62, %s3654_s27  ;;  %v3620_v62 = vpop.eup %3619  ;;  %v2143_v2 = vpop.permute.xlu0 %2142  ;;  %3629 = vtanh.f32 %v2204_v45 }
 0x25f   : > { %v2202_v22 = vadd.f32 %v2131_v49, %v1882_v58  ;;  %v3622_v3 = vpop.eup %3621  ;;  %v4542_v29 = vadd.f32 %v2143_v2, %v1888_v17 }
 0x260   : > { %2693 = vrot.lane.b32.xlu1 %v2195_v59, %s3654_s27  ;;  %v2133_v59 = vpop.permute.xlu1 %2132  ;;  %v3624_v14 = vpop.eup %3623 }
 0x261   : > { %3631 = vtanh.f32 %v2202_v22 }
 0x262   : > { %2298 = vrot.lane.b32.xlu0 %v3610_v63, %s3653_s25  ;;  %v2205_v63 = vadd.f32 %v2137_v55, %v1885_v60  ;;  %v2139_v37 = vpop.permute.xlu0 %2138 }
 0x264   : > { %2300 = vrot.lane.b32.xlu1 %v3612_v21, %s3653_s25  ;;  %v2145_v7 = vpop.permute.xlu1 %2144  ;;  %3633 = vtanh.f32 %v2205_v63 }
 0x265   : > { %3635 = vtanh.f32 %v4542_v29 }
 0x266   : > { %2703 = vrot.lane.b32.xlu0 %v2200_v27, %s3654_s27  ;;  %v1883_v27 = vmul.f32 %v4797_v35, %v4302_v9 }
 0x268   : > { %2705 = vrot.lane.b32.xlu1 %v2201_v4, %s3654_s27  ;;  %v2203_v21 = vadd.f32 %v2133_v59, %v1883_v27  ;;  %v4799_v4 = vld [vmem:[#allocation8_spill] sm:$0xff] }
 0x269   : > { %v1886_v52 = vmul.f32 %v4799_v4, %v4322_v26 }
 0x26a   : > { %2699 = vrot.lane.b32.xlu0 %v2198_v0, %s3654_s27  ;;  %v3626_v0 = vpop.eup %3625  ;;  %3637 = vtanh.f32 %v2203_v21 }
 0x26b   : > { %v2206_v50 = vadd.f32 %v2139_v37, %v1886_v52 }
 0x26c   : > { %2701 = vrot.lane.b32.xlu1 %v2199_v36, %s3654_s27  ;;  %v4800_v36 = vld [vmem:[#allocation11_spill] sm:$0xff] }
 0x26d   : > { %v1889_v19 = vmul.f32 %v4800_v36, %v4316_v20  ;;  %3639 = vtanh.f32 %v2206_v50 }
 0x26e   : > { %2310 = vrot.lane.b32.xlu0 %v3614_v18, %s3653_s25  ;;  %v3628_v18 = vpop.eup %3627 }
 0x26f   : > { %v4552_v10 = vadd.f32 %v2145_v7, %v1889_v19 }
 0x270   : > { %2312 = vrot.lane.b32.xlu1 %v3618_v38, %s3653_s25  ;;  %v4801_v38 = vld [vmem:[#allocation9_spill] sm:$0xff] }
 0x271   : > { %v1887_v5 = vmul.f32 %v4801_v38, %v4334_v41  ;;  %3641 = vtanh.f32 %v4552_v10 }
 0x272   : > { %2306 = vrot.lane.b32.xlu0 %v3616_v32, %s3653_s25  ;;  %v2141_v32 = vpop.permute.xlu1 %2140 }
 0x273   : > { %v2207_v55 = vadd.f32 %v2141_v32, %v1887_v5 }
 0x274   : > { %2308 = vrot.lane.b32.xlu1 %v3620_v62, %s3653_s25 }
 0x275   : > { %3643 = vtanh.f32 %v2207_v55 }
 0x276   : > { %2711 = vrot.lane.b32.xlu0 %v2204_v45, %s3654_s27  ;;  %v3630_v45 = vpop.eup %3629 }
 0x277   : > { %v3632_v49 = vpop.eup %3631 }
 0x278   : > { %2713 = vrot.lane.b32.xlu1 %v2205_v63, %s3654_s27  ;;  %v3634_v62 = vpop.eup %3633 }
 0x279   : > { %v3636_v58 = vpop.eup %3635 }
 0x27a   : > { %2707 = vrot.lane.b32.xlu0 %v2202_v22, %s3654_s27  ;;  %v3638_v60 = vpop.eup %3637 }
 0x27b   : > { %v3640_v59 = vpop.eup %3639 }
 0x27c   : > { %2709 = vrot.lane.b32.xlu1 %v2203_v21, %s3654_s27  ;;  %v3642_v35 = vpop.eup %3641 }
 0x27e   : > { %2318 = vrot.lane.b32.xlu0 %v3622_v3, %s3653_s25 }
 0x27f   : > { %v3644_v3 = vpop.eup %3643 }
 0x280   : > { %2320 = vrot.lane.b32.xlu1 %v3626_v0, %s3653_s25 }
 0x282   : > { %2314 = vrot.lane.b32.xlu0 %v3624_v14, %s3653_s25 }
 0x284   : > { %2316 = vrot.lane.b32.xlu1 %v3628_v18, %s3653_s25 }
 0x286   : > { %2715 = vrot.lane.b32.xlu0 %v2206_v50, %s3654_s27 }
 0x288   : > { %2717 = vrot.lane.b32.xlu1 %v2207_v55, %s3654_s27 }
 0x28a   : > { %2326 = vrot.lane.b32.xlu0 %v3630_v45, %s3653_s25 }
 0x28c   : > { %2328 = vrot.lane.b32.xlu1 %v3634_v62, %s3653_s25 }
 0x28e   : > { %2322 = vrot.lane.b32.xlu0 %v3632_v49, %s3653_s25 }
 0x290   : > { %v2664_v31 = vpop.permute.xlu0 %2663  ;;  %2324 = vrot.lane.b32.xlu1 %v3638_v60, %s3653_s25 }
 0x291   : > { %2758 = vst.msk [vmem:[%s4563_s30 + $0x10] sm:$0xff] %vm2755_vm3, %v2664_v31 }
 0x292   : > { %2334 = vrot.lane.b32.xlu0 %v3636_v58, %s3653_s25  ;;  %v2666_v22 = vpop.permute.xlu1 %2665 }
 0x293   : > { %2759 = vst.msk [vmem:[%s4563_s30 + $0x18] sm:$0xff] %vm2755_vm3, %v2666_v22 }
 0x294   : > { %v2660_v63 = vpop.permute.xlu0 %2659  ;;  %2336 = vrot.lane.b32.xlu1 %v3642_v35, %s3653_s25 }
 0x295   : > { %2756 = vst.msk [vmem:[%s4563_s30] sm:$0xff] %vm2755_vm3, %v2660_v63 }
 0x296   : > { %2330 = vrot.lane.b32.xlu0 %v3640_v59, %s3653_s25  ;;  %v2662_v27 = vpop.permute.xlu1 %2661 }
 0x297   : > { %2757 = vst.msk [vmem:[%s4563_s30 + $0x8] sm:$0xff] %vm2755_vm3, %v2662_v27 }
 0x298   : > { %v2672_v2 = vpop.permute.xlu0 %2671  ;;  %2332 = vrot.lane.b32.xlu1 %v3644_v3, %s3653_s25 }
 0x299   : > { %2762 = vst.msk [vmem:[%s4563_s30 + $0x30] sm:$0xff] %vm2755_vm3, %v2672_v2 }
 0x29a   : > { %v2674_v7 = vpop.permute.xlu1 %2673 }
 0x29b   : > { %2763 = vst.msk [vmem:[%s4563_s30 + $0x38] sm:$0xff] %vm2755_vm3, %v2674_v7 }
 0x29c   : > { %v2668_v21 = vpop.permute.xlu0 %2667 }
 0x29d   : > { %2760 = vst.msk [vmem:[%s4563_s30 + $0x20] sm:$0xff] %vm2755_vm3, %v2668_v21 }
 0x29e   : > { %v2670_v47 = vpop.permute.xlu1 %2669 }
 0x29f   : > { %2761 = vst.msk [vmem:[%s4563_s30 + $0x28] sm:$0xff] %vm2755_vm3, %v2670_v47 }
 0x2a0   : > { %v2279_v14 = vpop.permute.xlu0 %2278 }
 0x2a1   : > { %v2372_v17 = vmul.f32 %v2279_v14, %v4036_v51 }
 0x2a2   : > { %v2281_v4 = vpop.permute.xlu1 %2280 }
 0x2a3   : > { %v3085_v37 = vpack.c.bf16 %v2372_v17, %v2372_v17  ;;  %v2373_v50 = vmul.f32 %v2281_v4, %v4052_v12 }
 0x2a4   : > { %v2275_v0 = vpop.permute.xlu0 %2274 }
 0x2a5   : > { %v2370_v52 = vmul.f32 %v2275_v0, %v4056_v53  ;;  %2502 = vrot.lane.b32.xlu0 %v3085_v37, %s3655_s6  ;;  %v3086_v36 = vpack.c.bf16 %v2373_v50, %v2373_v50 }
 0x2a6   : > { %v2277_v32 = vpop.permute.xlu1 %2276 }
 0x2a7   : > { %v3083_v18 = vpack.c.bf16 %v2370_v52, %v2370_v52  ;;  %v2371_v51 = vmul.f32 %v2277_v32, %v4068_v24  ;;  %2504 = vrot.lane.b32.xlu1 %v3086_v36, %s3655_s6 }
 0x2a8   : > { %v2680_v19 = vpop.permute.xlu0 %2679 }
 0x2a9   : > { %2766 = vst.msk [vmem:[%s4563_s30 + $0x50] sm:$0xff] %vm2755_vm3, %v2680_v19  ;;  %2498 = vrot.lane.b32.xlu0 %v3083_v18, %s3655_s6  ;;  %v3084_v53 = vpack.c.bf16 %v2371_v51, %v2371_v51 }
 0x2aa   : > { %v2682_v5 = vpop.permute.xlu1 %2681 }
 0x2ab   : > { %2767 = vst.msk [vmem:[%s4563_s30 + $0x58] sm:$0xff] %vm2755_vm3, %v2682_v5  ;;  %2500 = vrot.lane.b32.xlu1 %v3084_v53, %s3655_s6 }
 0x2ac   : > { %v2676_v38 = vpop.permute.xlu0 %2675 }
 0x2ad   : > { %2764 = vst.msk [vmem:[%s4563_s30 + $0x40] sm:$0xff] %vm2755_vm3, %v2676_v38 }
 0x2ae   : > { %v2678_v45 = vpop.permute.xlu1 %2677 }
 0x2af   : > { %2765 = vst.msk [vmem:[%s4563_s30 + $0x48] sm:$0xff] %vm2755_vm3, %v2678_v45 }
 0x2b0   : > { %v2287_v12 = vpop.permute.xlu0 %2286 }
 0x2b1   : > { %v2376_v55 = vmul.f32 %v2287_v12, %v4076_v34 }
 0x2b2   : > { %v2289_v62 = vpop.permute.xlu1 %2288 }
 0x2b3   : > { %v3089_v49 = vpack.c.bf16 %v2376_v55, %v2376_v55  ;;  %v2377_v58 = vmul.f32 %v2289_v62, %v4094_v61 }
 0x2b4   : > { %v2283_v24 = vpop.permute.xlu0 %2282 }
 0x2b5   : > { %v2374_v31 = vmul.f32 %v2283_v24, %v4086_v46  ;;  %2510 = vrot.lane.b32.xlu0 %v3089_v49, %s3655_s6  ;;  %v3090_v22 = vpack.c.bf16 %v2377_v58, %v2377_v58 }
 0x2b6   : > { %v2285_v59 = vpop.permute.xlu1 %2284 }
 0x2b7   : > { %v3087_v60 = vpack.c.bf16 %v2374_v31, %v2374_v31  ;;  %v2375_v34 = vmul.f32 %v2285_v59, %v4104_v6  ;;  %2512 = vrot.lane.b32.xlu1 %v3090_v22, %s3655_s6 }
 0x2b8   : > { %v2688_v63 = vpop.permute.xlu0 %2687 }
 0x2b9   : > { %2770 = vst.msk [vmem:[%s4563_s30 + $0x70] sm:$0xff] %vm2755_vm3, %v2688_v63  ;;  %2506 = vrot.lane.b32.xlu0 %v3087_v60, %s3655_s6  ;;  %v3088_v35 = vpack.c.bf16 %v2375_v34, %v2375_v34 }
 0x2ba   : > { %v2690_v46 = vpop.permute.xlu1 %2689 }
 0x2bb   : > { %2771 = vst.msk [vmem:[%s4563_s30 + $0x78] sm:$0xff] %vm2755_vm3, %v2690_v46  ;;  %2508 = vrot.lane.b32.xlu1 %v3088_v35, %s3655_s6 }
 0x2bc   : > { %v2684_v27 = vpop.permute.xlu0 %2683 }
 0x2bd   : > { %2768 = vst.msk [vmem:[%s4563_s30 + $0x60] sm:$0xff] %vm2755_vm3, %v2684_v27 }
 0x2be   : > { %v2686_v2 = vpop.permute.xlu1 %2685 }
 0x2bf   : > { %2769 = vst.msk [vmem:[%s4563_s30 + $0x68] sm:$0xff] %vm2755_vm3, %v2686_v2 }
 0x2c0   : > { %v2295_v61 = vpop.permute.xlu0 %2294 }
 0x2c1   : > { %v2380_v3 = vmul.f32 %v2295_v61, %v4118_v23 }
 0x2c2   : > { %v2297_v7 = vpop.permute.xlu1 %2296 }
 0x2c3   : > { %v3093_v21 = vpack.c.bf16 %v2380_v3, %v2380_v3  ;;  %v2381_v47 = vmul.f32 %v2297_v7, %v4126_v30 }
 0x2c4   : > { %v2291_v6 = vpop.permute.xlu0 %2290 }
 0x2c5   : > { %v2378_v14 = vmul.f32 %v2291_v6, %v4130_v33  ;;  %2518 = vrot.lane.b32.xlu0 %v3093_v21, %s3655_s6  ;;  %v3094_v37 = vpack.c.bf16 %v2381_v47, %v2381_v47 }
 0x2c6   : > { %v2293_v4 = vpop.permute.xlu1 %2292 }
 0x2c7   : > { %v3091_v17 = vpack.c.bf16 %v2378_v14, %v2378_v14  ;;  %v2379_v23 = vmul.f32 %v2293_v4, %v4143_v48  ;;  %2520 = vrot.lane.b32.xlu1 %v3094_v37, %s3655_s6 }
 0x2c8   : > { %v2696_v0 = vpop.permute.xlu0 %2695 }
 0x2c9   : > { %2774 = vst.msk [vmem:[%s4563_s30 + $0x90] sm:$0xff] %vm2755_vm3, %v2696_v0  ;;  %2514 = vrot.lane.b32.xlu0 %v3091_v17, %s3655_s6  ;;  %v3092_v52 = vpack.c.bf16 %v2379_v23, %v2379_v23 }
 0x2ca   : > { %v2698_v50 = vpop.permute.xlu1 %2697 }
 0x2cb   : > { %2775 = vst.msk [vmem:[%s4563_s30 + $0x98] sm:$0xff] %vm2755_vm3, %v2698_v50  ;;  %2516 = vrot.lane.b32.xlu1 %v3092_v52, %s3655_s6 }
 0x2cc   : > { %v2303_v33 = vpop.permute.xlu0 %2302 }
 0x2cd   : > { %v2384_v18 = vmul.f32 %v2303_v33, %v4155_v8 }
 0x2ce   : > { %v2305_v19 = vpop.permute.xlu1 %2304 }
 0x2cf   : > { %v3097_v30 = vpack.c.bf16 %v2384_v18, %v2384_v18  ;;  %v2385_v48 = vmul.f32 %v2305_v19, %v4169_v25 }
 0x2d0   : > { %v2692_v36 = vpop.permute.xlu0 %2691 }
 0x2d1   : > { %2772 = vst.msk [vmem:[%s4563_s30 + $0x80] sm:$0xff] %vm2755_vm3, %v2692_v36  ;;  %2526 = vrot.lane.b32.xlu0 %v3097_v30, %s3655_s6  ;;  %v3098_v32 = vpack.c.bf16 %v2385_v48, %v2385_v48 }
 0x2d2   : > { %v2694_v53 = vpop.permute.xlu1 %2693 }
 0x2d3   : > { %2773 = vst.msk [vmem:[%s4563_s30 + $0x88] sm:$0xff] %vm2755_vm3, %v2694_v53  ;;  %2528 = vrot.lane.b32.xlu1 %v3098_v32, %s3655_s6 }
 0x2d4   : > { %v2299_v51 = vpop.permute.xlu0 %2298 }
 0x2d5   : > { %v2382_v8 = vmul.f32 %v2299_v51, %v4176_v56 }
 0x2d6   : > { %v2301_v12 = vpop.permute.xlu1 %2300 }
 0x2d7   : > { %v3095_v38 = vpack.c.bf16 %v2382_v8, %v2382_v8  ;;  %v2383_v25 = vmul.f32 %v2301_v12, %v4190_v40 }
 0x2d8   : > { %v2704_v5 = vpop.permute.xlu0 %2703 }
 0x2d9   : > { %2778 = vst.msk [vmem:[%s4563_s30 + $0xb0] sm:$0xff] %vm2755_vm3, %v2704_v5  ;;  %2522 = vrot.lane.b32.xlu0 %v3095_v38, %s3655_s6  ;;  %v3096_v45 = vpack.c.bf16 %v2383_v25, %v2383_v25 }
 0x2da   : > { %v2706_v49 = vpop.permute.xlu1 %2705 }
 0x2db   : > { %2779 = vst.msk [vmem:[%s4563_s30 + $0xb8] sm:$0xff] %vm2755_vm3, %v2706_v49  ;;  %2524 = vrot.lane.b32.xlu1 %v3096_v45, %s3655_s6 }
 0x2dc   : > { %v2700_v55 = vpop.permute.xlu0 %2699 }
 0x2dd   : > { %2776 = vst.msk [vmem:[%s4563_s30 + $0xa0] sm:$0xff] %vm2755_vm3, %v2700_v55 }
 0x2de   : > { %v2702_v24 = vpop.permute.xlu1 %2701 }
 0x2df   : > { %2777 = vst.msk [vmem:[%s4563_s30 + $0xa8] sm:$0xff] %vm2755_vm3, %v2702_v24 }
 0x2e0   : > { %v2311_v56 = vpop.permute.xlu0 %2310 }
 0x2e1   : > { %v2388_v62 = vmul.f32 %v2311_v56, %v4205_v11 }
 0x2e2   : > { %v2313_v40 = vpop.permute.xlu1 %2312 }
 0x2e3   : > { %v3101_v31 = vpack.c.bf16 %v2388_v62, %v2388_v62  ;;  %v2389_v22 = vmul.f32 %v2313_v40, %v4225_v39 }
 0x2e4   : > { %v2307_v58 = vpop.permute.xlu0 %2306 }
 0x2e5   : > { %v2386_v60 = vmul.f32 %v2307_v58, %v4211_v15  ;;  %2534 = vrot.lane.b32.xlu0 %v3101_v31, %s3655_s6  ;;  %v3102_v59 = vpack.c.bf16 %v2389_v22, %v2389_v22 }
 0x2e6   : > { %v2309_v35 = vpop.permute.xlu1 %2308 }
 0x2e7   : > { %v3099_v63 = vpack.c.bf16 %v2386_v60, %v2386_v60  ;;  %v2387_v11 = vmul.f32 %v2309_v35, %v4240_v42  ;;  %2536 = vrot.lane.b32.xlu1 %v3102_v59, %s3655_s6 }
 0x2e8   : > { %v2712_v34 = vpop.permute.xlu0 %2711 }
 0x2e9   : > { %2782 = vst.msk [vmem:[%s4563_s30 + $0xd0] sm:$0xff] %vm2755_vm3, %v2712_v34  ;;  %2530 = vrot.lane.b32.xlu0 %v3099_v63, %s3655_s6  ;;  %v3100_v27 = vpack.c.bf16 %v2387_v11, %v2387_v11 }
 0x2ea   : > { %v2714_v15 = vpop.permute.xlu1 %2713 }
 0x2eb   : > { %2783 = vst.msk [vmem:[%s4563_s30 + $0xd8] sm:$0xff] %vm2755_vm3, %v2714_v15  ;;  %2532 = vrot.lane.b32.xlu1 %v3100_v27, %s3655_s6 }
 0x2ec   : > { %v2708_v46 = vpop.permute.xlu0 %2707 }
 0x2ed   : > { %2780 = vst.msk [vmem:[%s4563_s30 + $0xc0] sm:$0xff] %vm2755_vm3, %v2708_v46 }
 0x2ee   : > { %v2710_v61 = vpop.permute.xlu1 %2709 }
 0x2ef   : > { %2781 = vst.msk [vmem:[%s4563_s30 + $0xc8] sm:$0xff] %vm2755_vm3, %v2710_v61 }
 0x2f0   : > { %v2319_v39 = vpop.permute.xlu0 %2318 }
 0x2f1   : > { %v2392_v2 = vmul.f32 %v2319_v39, %v4235_v1 }
 0x2f2   : > { %v2321_v21 = vpop.permute.xlu1 %2320 }
 0x2f3   : > { %v3105_v3 = vpack.c.bf16 %v2392_v2, %v2392_v2  ;;  %v2393_v7 = vmul.f32 %v2321_v21, %v4262_v16 }
 0x2f4   : > { %v2315_v42 = vpop.permute.xlu0 %2314 }
 0x2f5   : > { %v2390_v6 = vmul.f32 %v2315_v42, %v4258_v54  ;;  %2542 = vrot.lane.b32.xlu0 %v3105_v3, %s3655_s6  ;;  %v3106_v47 = vpack.c.bf16 %v2393_v7, %v2393_v7 }
 0x2f6   : > { %v2317_v37 = vpop.permute.xlu1 %2316 }
 0x2f7   : > { %v3103_v14 = vpack.c.bf16 %v2390_v6, %v2390_v6  ;;  %v2391_v1 = vmul.f32 %v2317_v37, %v4278_v43  ;;  %2544 = vrot.lane.b32.xlu1 %v3106_v47, %s3655_s6 }
 0x2f8   : > { %v2716_v17 = vpop.permute.xlu0 %2715 }
 0x2f9   : > { %2784 = vst.msk [vmem:[%s4563_s30 + $0xe0] sm:$0xff] %vm2755_vm3, %v2716_v17  ;;  %2538 = vrot.lane.b32.xlu0 %v3103_v14, %s3655_s6  ;;  %v3104_v0 = vpack.c.bf16 %v2391_v1, %v2391_v1 }
 0x2fa   : > { %v2718_v23 = vpop.permute.xlu1 %2717 }
 0x2fb   : > { %2785 = vst.msk [vmem:[%s4563_s30 + $0xe8] sm:$0xff] %vm2755_vm3, %v2718_v23  ;;  %2540 = vrot.lane.b32.xlu1 %v3104_v0, %s3655_s6 }
 0x2fc   : > { %v2327_v4 = vpop.permute.xlu0 %2326 }
 0x2fd   : > { %v2396_v54 = vmul.f32 %v2327_v4, %v4272_v28 }
 0x2fe   : > { %v2329_v33 = vpop.permute.xlu1 %2328 }
 0x2ff   : > { %v3109_v16 = vpack.c.bf16 %v2396_v54, %v2396_v54  ;;  %v2397_v43 = vmul.f32 %v2329_v33, %v4286_v57 }
 0x300   : > { %v2323_v52 = vpop.permute.xlu0 %2322 }
 0x301   : > { %v2394_v50 = vmul.f32 %v2323_v52, %v4292_v44  ;;  %2550 = vrot.lane.b32.xlu0 %v3109_v16, %s3655_s6  ;;  %v3110_v30 = vpack.c.bf16 %v2397_v43, %v2397_v43 }
 0x302   : > { %v2325_v19 = vpop.permute.xlu1 %2324 }
 0x303   : > { %v3107_v18 = vpack.c.bf16 %v2394_v50, %v2394_v50  ;;  %v2395_v28 = vmul.f32 %v2325_v19, %v4302_v9  ;;  %2552 = vrot.lane.b32.xlu1 %v3110_v30, %s3655_s6 }
 0x304   : > { %v2335_v36 = vpop.permute.xlu0 %2334 }
 0x305   : > { %v2400_v48 = vmul.f32 %v2335_v36, %v4306_v13  ;;  %2546 = vrot.lane.b32.xlu0 %v3107_v18, %s3655_s6  ;;  %v3108_v51 = vpack.c.bf16 %v2395_v28, %v2395_v28 }
 0x306   : > { %v2337_v53 = vpop.permute.xlu1 %2336 }
 0x307   : > { %v3113_v32 = vpack.c.bf16 %v2400_v48, %v2400_v48  ;;  %v2401_v57 = vmul.f32 %v2337_v53, %v4316_v20  ;;  %2548 = vrot.lane.b32.xlu1 %v3108_v51, %s3655_s6 }
 0x308   : > { %v2331_v44 = vpop.permute.xlu0 %2330 }
 0x309   : > { %v2398_v8 = vmul.f32 %v2331_v44, %v4322_v26  ;;  %2558 = vrot.lane.b32.xlu0 %v3113_v32, %s3655_s6  ;;  %v3114_v38 = vpack.c.bf16 %v2401_v57, %v2401_v57 }
 0x30a   : > { %v2333_v5 = vpop.permute.xlu1 %2332 }
 0x30b   : > { %v3111_v13 = vpack.c.bf16 %v2398_v8, %v2398_v8  ;;  %v2399_v9 = vmul.f32 %v2333_v5, %v4334_v41  ;;  %2560 = vrot.lane.b32.xlu1 %v3114_v38, %s3655_s6 }
 0x30d   : > { %2554 = vrot.lane.b32.xlu0 %v3111_v13, %s3655_s6  ;;  %v3112_v12 = vpack.c.bf16 %v2399_v9, %v2399_v9 }
 0x30f   : > { %2556 = vrot.lane.b32.xlu1 %v3112_v12, %s3655_s6 }
 0x311   : > { %2719 = vrot.lane.b32.xlu0 %v4542_v29, %s3654_s27 }
 0x313   : > { %2721 = vrot.lane.b32.xlu1 %v4552_v10, %s3654_s27 }
 0x317   : > { %v2503_v20 = vpop.permute.xlu0 %2502 }
 0x318   : > { %2597 = vst.msk [vmem:[%s4701_s10 + $0x8] sm:$0xf] %vm2594_vm4, %v2503_v20 }
 0x319   : > { %v2505_v41 = vpop.permute.xlu1 %2504 }
 0x31a   : > { %2598 = vst.msk [vmem:[%s4701_s10 + $0xc] sm:$0xf] %vm2594_vm4, %v2505_v41 }
 0x31b   : > { %v2499_v26 = vpop.permute.xlu0 %2498 }
 0x31c   : > { %2595 = vst.msk [vmem:[%s4701_s10] sm:$0xf] %vm2594_vm4, %v2499_v26 }
 0x31d   : > { %v2501_v29 = vpop.permute.xlu1 %2500 }
 0x31e   : > { %2596 = vst.msk [vmem:[%s4701_s10 + $0x4] sm:$0xf] %vm2594_vm4, %v2501_v29 }
 0x327   : > { %v2511_v25 = vpop.permute.xlu0 %2510 }
 0x328   : > { %2601 = vst.msk [vmem:[%s4701_s10 + $0x18] sm:$0xf] %vm2594_vm4, %v2511_v25 }
 0x329   : > { %v2513_v45 = vpop.permute.xlu1 %2512 }
 0x32a   : > { %2602 = vst.msk [vmem:[%s4701_s10 + $0x1c] sm:$0xf] %vm2594_vm4, %v2513_v45 }
 0x32b   : > { %v2507_v10 = vpop.permute.xlu0 %2506 }
 0x32c   : > { %2599 = vst.msk [vmem:[%s4701_s10 + $0x10] sm:$0xf] %vm2594_vm4, %v2507_v10 }
 0x32d   : > { %v2509_v55 = vpop.permute.xlu1 %2508 }
 0x32e   : > { %2600 = vst.msk [vmem:[%s4701_s10 + $0x14] sm:$0xf] %vm2594_vm4, %v2509_v55 }
 0x337   : > { %v2519_v49 = vpop.permute.xlu0 %2518 }
 0x338   : > { %2605 = vst.msk [vmem:[%s4701_s10 + $0x28] sm:$0xf] %vm2594_vm4, %v2519_v49 }
 0x339   : > { %v2521_v24 = vpop.permute.xlu1 %2520 }
 0x33a   : > { %2606 = vst.msk [vmem:[%s4701_s10 + $0x2c] sm:$0xf] %vm2594_vm4, %v2521_v24 }
 0x33b   : > { %v2515_v56 = vpop.permute.xlu0 %2514 }
 0x33c   : > { %2603 = vst.msk [vmem:[%s4701_s10 + $0x20] sm:$0xf] %vm2594_vm4, %v2515_v56 }
 0x33d   : > { %v2517_v62 = vpop.permute.xlu1 %2516 }
 0x33e   : > { %2604 = vst.msk [vmem:[%s4701_s10 + $0x24] sm:$0xf] %vm2594_vm4, %v2517_v62 }
 0x343   : > { %v2527_v31 = vpop.permute.xlu0 %2526 }
 0x344   : > { %2609 = vst.msk [vmem:[%s4701_s10 + $0x38] sm:$0xf] %vm2594_vm4, %v2527_v31 }
 0x345   : > { %v2529_v58 = vpop.permute.xlu1 %2528 }
 0x346   : > { %2610 = vst.msk [vmem:[%s4701_s10 + $0x3c] sm:$0xf] %vm2594_vm4, %v2529_v58 }
 0x34b   : > { %v2523_v40 = vpop.permute.xlu0 %2522 }
 0x34c   : > { %2607 = vst.msk [vmem:[%s4701_s10 + $0x30] sm:$0xf] %vm2594_vm4, %v2523_v40 }
 0x34d   : > { %v2525_v60 = vpop.permute.xlu1 %2524 }
 0x34e   : > { %2608 = vst.msk [vmem:[%s4701_s10 + $0x34] sm:$0xf] %vm2594_vm4, %v2525_v60 }
 0x357   : > { %v2535_v22 = vpop.permute.xlu0 %2534 }
 0x358   : > { %2613 = vst.msk [vmem:[%s4701_s10 + $0x48] sm:$0xf] %vm2594_vm4, %v2535_v22 }
 0x359   : > { %v2537_v59 = vpop.permute.xlu1 %2536 }
 0x35a   : > { %2614 = vst.msk [vmem:[%s4701_s10 + $0x4c] sm:$0xf] %vm2594_vm4, %v2537_v59 }
 0x35b   : > { %v2531_v63 = vpop.permute.xlu0 %2530 }
 0x35c   : > { %2611 = vst.msk [vmem:[%s4701_s10 + $0x40] sm:$0xf] %vm2594_vm4, %v2531_v63 }
 0x35d   : > { %v2533_v34 = vpop.permute.xlu1 %2532 }
 0x35e   : > { %2612 = vst.msk [vmem:[%s4701_s10 + $0x44] sm:$0xf] %vm2594_vm4, %v2533_v34 }
 0x367   : > { %v2543_v35 = vpop.permute.xlu0 %2542 }
 0x368   : > { %2617 = vst.msk [vmem:[%s4701_s10 + $0x58] sm:$0xf] %vm2594_vm4, %v2543_v35 }
 0x369   : > { %v2545_v27 = vpop.permute.xlu1 %2544 }
 0x36a   : > { %2618 = vst.msk [vmem:[%s4701_s10 + $0x5c] sm:$0xf] %vm2594_vm4, %v2545_v27 }
 0x36b   : > { %v2539_v11 = vpop.permute.xlu0 %2538 }
 0x36c   : > { %2615 = vst.msk [vmem:[%s4701_s10 + $0x50] sm:$0xf] %vm2594_vm4, %v2539_v11 }
 0x36d   : > { %v2541_v46 = vpop.permute.xlu1 %2540 }
 0x36e   : > { %2616 = vst.msk [vmem:[%s4701_s10 + $0x54] sm:$0xf] %vm2594_vm4, %v2541_v46 }
 0x373   : > { %v2551_v15 = vpop.permute.xlu0 %2550 }
 0x374   : > { %2621 = vst.msk [vmem:[%s4701_s10 + $0x68] sm:$0xf] %vm2594_vm4, %v2551_v15 }
 0x375   : > { %v2553_v61 = vpop.permute.xlu1 %2552 }
 0x376   : > { %2622 = vst.msk [vmem:[%s4701_s10 + $0x6c] sm:$0xf] %vm2594_vm4, %v2553_v61 }
 0x377   : > { %v2547_v39 = vpop.permute.xlu0 %2546 }
 0x378   : > { %2619 = vst.msk [vmem:[%s4701_s10 + $0x60] sm:$0xf] %vm2594_vm4, %v2547_v39 }
 0x379   : > { %v2549_v3 = vpop.permute.xlu1 %2548 }
 0x37a   : > { %2620 = vst.msk [vmem:[%s4701_s10 + $0x64] sm:$0xf] %vm2594_vm4, %v2549_v3 }
 0x37b   : > { %v2559_v2 = vpop.permute.xlu0 %2558 }
 0x37c   : > { %2625 = vst.msk [vmem:[%s4701_s10 + $0x78] sm:$0xf] %vm2594_vm4, %v2559_v2 }
 0x37d   : > { %v2561_v21 = vpop.permute.xlu1 %2560 }
 0x37e   : > { %2626 = vst.msk [vmem:[%s4701_s10 + $0x7c] sm:$0xf] %vm2594_vm4, %v2561_v21 }
 0x37f   : > { %v2555_v42 = vpop.permute.xlu0 %2554 }
 0x380   : > { %2623 = vst.msk [vmem:[%s4701_s10 + $0x70] sm:$0xf] %vm2594_vm4, %v2555_v42 }
 0x381   : > { %v2557_v7 = vpop.permute.xlu1 %2556 }
 0x382   : > { %2624 = vst.msk [vmem:[%s4701_s10 + $0x74] sm:$0xf] %vm2594_vm4, %v2557_v7 }
 0x383   : > { %v2720_v6 = vpop.permute.xlu0 %2719 }
 0x384   : > { %2786 = vst.msk [vmem:[%s4563_s30 + $0xf0] sm:$0xff] %vm2755_vm3, %v2720_v6 }
 0x385   : > { %v2722_v14 = vpop.permute.xlu1 %2721 }
 0x386   : > { %2787 = vst.msk [vmem:[%s4563_s30 + $0xf8] sm:$0xff] %vm2755_vm3, %v2722_v14 }
 0x387 PF: > { %s16_s18 = sadd.s32 1, %s3651_s18  }
 0x388   : > { %p13_p4 = scmp.ge.s32.totalorder %s16_s18, 4  }
 0x38a   :  { %15 = sbr.rel (!%p13_p4) target bundleno = 1 (0x1), region = 83 }

// kernel: conv_lstm_forward.4
= control target key start
LH: loop header
LB: loop body
LE: loop exit
PB: predicated region body
PF: predicated region fallthrough
CT: control target
= control target key end

     0   :  { %s5274_s18 = smov 0   ;;  %s6813_s0 = inlined_call_operand.vmem [shape: bf16[2,320,180], index: 0, kind: input, shape index: {}]   ;;  %s6814_s1 = inlined_call_operand.vmem [shape: bf16[5,180,128], index: 1, kind: input, shape index: {}]   ;;  %s6815_s2 = inlined_call_operand.vmem [shape: f32[1,128], index: 2, kind: input, shape index: {}]   ;;  %s6816_s3 = inlined_call_operand.vmem [shape: f32[2,256,32], index: 3, kind: input, shape index: {}]   ;;  %s6817_s4 = inlined_call_operand.vmem [shape: bf16[2,256,32], index: 4, kind: output, shape index: {0}]   ;;  %s6818_s5 = inlined_call_operand.vmem [shape: f32[2,256,32], index: 5, kind: output, shape index: {1}]  }
   0x1 LB: > { %s4217_s19 = sadd.s32 4294967295, %s5238_s18   ;;  %p4221_p0 = scmp.ge.s32.totalorder %s5238_s18, 1  ;;  %s5238_s18 = sphi %s5274_s18, %s16_s18  }
   0x2   : > { %p200_p1 = scmp.lt.s32.totalorder %s5238_s18, 3 }
   0x4   : > { %p201_p2 = pnand %p4221_p0, %p200_p1 }
   0x6   : > { %204 = sbr.rel (%p201_p2) target bundleno = 1099 (0x44b), region = 36 }
   0xd   : > { %v4984_v0 = vld [vmem:[%s6814_s1] sm:$0xff]   ;;  %v5240_v1 = vmov 0   ;;  %v5290_v2 = vld [vmem:[%s6814_s1 + $0xb8] sm:$0xff]   ;;  %v4986_v3 = vld [vmem:[%s6814_s1 + $0x8] sm:$0xff]   ;;  %p238_p3 = scmp.lt.s32.totalorder %s4217_s19, 1  ;;  %vm534_vm0 = vcmask 424960  }
   0xe   : > { %587 = vmatprep.subr.bf16.mxu1 %v5240_v1  ;;  %1613 = vmatprep.subr.bf16.mxu0 %v5240_v1  ;;  %v5300_v4 = vld [vmem:[%s6814_s1 + $0xc0] sm:$0xff]   ;;  %v4988_v5 = vld [vmem:[%s6814_s1 + $0x10] sm:$0xff]   ;;  %v5311_v6 = vld [vmem:[%s6814_s1 + $0xc8] sm:$0xff]   ;;  %vm583_vm1 = vcmask 1041408   ;;  %s5241_s12 = smov 32   ;;  %s5242_s14 = smov 96  }
   0xf   : > { %588 = vmatpush1.bf16.msra.mxu1 %v4984_v0  ;;  %1614 = vmatpush1.bf16.msra.mxu0 %v5290_v2  ;;  %v4990_v7 = vld [vmem:[%s6814_s1 + $0x18] sm:$0xff]   ;;  %v5322_v8 = vld [vmem:[%s6814_s1 + $0xd0] sm:$0xff]   ;;  %s6842_s19 = smov (!%p238_p3, %s4217_s19), 1  ;;  %v4992_v9 = vld [vmem:[%s6814_s1 + $0x20] sm:$0xff]   ;;  %vm4084_vm3 = vcmask 261120   ;;  %s5243_s20 = smov 64  }
  0x10   : > { %589 = vmatprep.subr.bf16.mxu1 %v5240_v1  ;;  %1615 = vmatprep.subr.bf16.mxu0 %v5240_v1  ;;  %v5335_v10 = vld [vmem:[%s6814_s1 + $0xd8] sm:$0xff]   ;;  %s4971_s15 = smul.u32 320, %s6842_s19  ;;  %v4994_v11 = vld [vmem:[%s6814_s1 + $0x28] sm:$0xff]   ;;  %v5347_v12 = vld [vmem:[%s6814_s1 + $0xe0] sm:$0xff]   ;;  %s4656_s8 = sshll.u32 %s6842_s19, 8  ;;  %vm3923_vm4 = vcmask 257024  }
  0x11   : > { %v4996_v13 = vld [vmem:[%s6814_s1 + $0x30] sm:$0xff]   ;;  %v5363_v14 = vld [vmem:[%s6814_s1 + $0xe8] sm:$0xff]   ;;  %v4998_v17 = vld [vmem:[%s6814_s1 + $0x38] sm:$0xff]   ;;  %s5848_s11 = scalar_lea.vmem %s6816_s3, %s4656_s8  ;;  %s6588_s17 = scalar_lea.vmem %s6818_s5, %s4656_s8 }
  0x12   : > { %s5353_s24 = scalar_lea.vmem %s6813_s0, %s4971_s15  ;;  %v5379_v18 = vld [vmem:[%s6814_s1 + $0xf0] sm:$0xff]   ;;  %v5000_v19 = vld [vmem:[%s6814_s1 + $0x40] sm:$0xff]   ;;  %v5392_v20 = vld [vmem:[%s6814_s1 + $0xf8] sm:$0xff]   ;;  %s4657_s21 = sshll.u32 %s6842_s19, 7 }
  0x13   : > { %590 = vmatpush1.bf16.msra.mxu1 %v4986_v3  ;;  %1616 = vmatpush1.bf16.msra.mxu0 %v5300_v4  ;;  %v5010_v15 = vld [vmem:[%s5353_s24 + $0x4] ss:$8 sps:$4 sm:$0xff]   ;;  %v5006_v23 = vld [vmem:[%s6814_s1 + $0x58] ss:$0 sps:$4 sm:$0x33]   ;;  %v5004_v24 = vld [vmem:[%s6814_s1 + $0x50] sm:$0xff]   ;;  %s6731_s25 = scalar_lea.vmem %s6817_s4, %s4657_s21 }
  0x14   : > { %591 = vmatprep.subr.bf16.mxu1 %v5240_v1  ;;  %1617 = vmatprep.subr.bf16.mxu0 %v5240_v1  ;;  %v5368_v16 = vld [vmem:[%s5353_s24 + $0x24] ss:$8 sps:$4 sm:$0xff]   ;;  %v5007_v26 = vld [vmem:[%s6814_s1 + $0x110] ss:$0 sps:$4 sm:$0x33]   ;;  %v585_v27 = vsel %vm583_vm1, %v5006_v23, 0 }
  0x15   : > { %4274 = vmatprep.mubr.msk.bf16.mxu1 %vm534_vm0, %v5010_v15  ;;  %4440 = vmatprep.mubr.msk.bf16.mxu0 %vm534_vm0, %v5368_v16  ;;  %v5002_v21 = vld [vmem:[%s6814_s1 + $0x48] sm:$0xff]   ;;  %v5403_v22 = vld [vmem:[%s6814_s1 + $0x100] sm:$0xff]   ;;  %v5428_v28 = vsel %vm583_vm1, %v5007_v26, 0  ;;  %v5015_v32 = vld [vmem:[%s6814_s1 + $0x114] sm:$0xff]  }
  0x16   : > { %v5417_v25 = vld [vmem:[%s6814_s1 + $0x108] sm:$0xff]   ;;  %v5014_v31 = vld [vmem:[%s6814_s1 + $0x5c] sm:$0xff]   ;;  %v5462_v37 = vld [vmem:[%s5353_s24 + $0x10] ss:$8 sps:$4 sm:$0xff]  }
  0x17   : > { %592 = vmatpush1.bf16.msra.mxu1 %v4988_v5  ;;  %1618 = vmatpush1.bf16.msra.mxu0 %v5311_v6  ;;  %v5008_v29 = vld [vmem:[%s5353_s24] ss:$8 sps:$4 sm:$0xff]   ;;  %v5443_v33 = vld [vmem:[%s5353_s24 + $0x14] ss:$8 sps:$4 sm:$0xff]   ;;  %v5465_v38 = vld [vmem:[%s5353_s24 + $0x30] ss:$8 sps:$4 sm:$0xff]  }
  0x18   : > { %593 = vmatprep.subr.bf16.mxu1 %v5240_v1  ;;  %1619 = vmatprep.subr.bf16.mxu0 %v5240_v1  ;;  %v5432_v30 = vld [vmem:[%s5353_s24 + $0x20] ss:$8 sps:$4 sm:$0xff]   ;;  %v5447_v34 = vld [vmem:[%s5353_s24 + $0x34] ss:$8 sps:$4 sm:$0xff]   ;;  %v5472_v40 = vld [vmem:[%s5353_s24 + $0x44] ss:$8 sps:$4 sm:$0xff]  }
  0x19   : > { %v5023_v35 = vld [vmem:[%s6814_s1 + $0x64] sm:$0xff]   ;;  %v5022_v36 = vld [vmem:[%s6814_s1 + $0x11c] sm:$0xff]   ;;  %v5029_v41 = vld [vmem:[%s6814_s1 + $0x6c] sm:$0xff]  }
  0x1a   : > { %v5024_v39 = vld [vmem:[%s6814_s1 + $0x124] sm:$0xff]   ;;  %v5028_v42 = vld [vmem:[%s6814_s1 + $0x12c] sm:$0xff]   ;;  %v5038_v43 = vld [vmem:[%s6814_s1 + $0x74] sm:$0xff]  }
  0x1b   : > { %594 = vmatpush1.bf16.msra.mxu1 %v4990_v7  ;;  %1620 = vmatpush1.bf16.msra.mxu0 %v5322_v8  ;;  %v5493_v44 = vld [vmem:[%s5353_s24 + $0x40] ss:$8 sps:$4 sm:$0xff]   ;;  %v5497_v45 = vld [vmem:[%s5353_s24 + $0x54] ss:$8 sps:$4 sm:$0xff]   ;;  %v5522_v50 = vld [vmem:[%s5353_s24 + $0x50] ss:$8 sps:$4 sm:$0xff]  }
  0x1c   : > { %595 = vmatprep.subr.bf16.mxu1 %v5240_v1  ;;  %1621 = vmatprep.subr.bf16.mxu0 %v5240_v1  ;;  %v5033_v46 = vld [vmem:[%s6814_s1 + $0x134] sm:$0xff]   ;;  %v5044_v47 = vld [vmem:[%s6814_s1 + $0x7c] sm:$0xff]   ;;  %v5050_v49 = vld [vmem:[%s6814_s1 + $0x84] sm:$0xff]  }
  0x1d   : > { %v5034_v48 = vld [vmem:[%s6814_s1 + $0x13c] sm:$0xff]   ;;  %v5525_v51 = vld [vmem:[%s5353_s24 + $0x64] ss:$8 sps:$4 sm:$0xff]   ;;  %v5058_v56 = vld [vmem:[%s6814_s1 + $0x94] sm:$0xff]  }
  0x1e   : > { %v5039_v52 = vld [vmem:[%s6814_s1 + $0x144] sm:$0xff]   ;;  %v5056_v53 = vld [vmem:[%s6814_s1 + $0x8c] sm:$0xff]   ;;  %v5552_v57 = vld [vmem:[%s5353_s24 + $0x74] ss:$8 sps:$4 sm:$0xff]  }
  0x1f   : > { %596 = vmatpush1.bf16.msra.mxu1 %v4992_v9  ;;  %1622 = vmatpush1.bf16.msra.mxu0 %v5335_v10  ;;  %v5043_v54 = vld [vmem:[%s6814_s1 + $0x14c] sm:$0xff]   ;;  %v5545_v55 = vld [vmem:[%s5353_s24 + $0x60] ss:$8 sps:$4 sm:$0xff]   ;;  %v5045_v58 = vld [vmem:[%s6814_s1 + $0x154] sm:$0xff]  }
  0x20   : > { %597 = vmatprep.subr.bf16.mxu1 %v5240_v1  ;;  %1623 = vmatprep.subr.bf16.mxu0 %v5240_v1  ;;  %v5065_v59 = vld [vmem:[%s6814_s1 + $0x9c] sm:$0xff]   ;;  %v5071_v61 = vld [vmem:[%s6814_s1 + $0xa4] sm:$0xff]   ;;  %v5578_v62 = vld [vmem:[%s5353_s24 + $0x70] ss:$8 sps:$4 sm:$0xff]  }
  0x21   : > { %v5049_v60 = vld [vmem:[%s6814_s1 + $0x15c] sm:$0xff]   ;;  %v5581_v63 = vld [vmem:[%s5353_s24 + $0x84] ss:$8 sps:$4 sm:$0xff]   ;;  %v5083_v7 = vld [vmem:[%s6814_s1 + $0xb4] ss:$0 sps:$4 sm:$0x33]  }
  0x22   : > { %v5054_v0 = vld [vmem:[%s6814_s1 + $0x164] sm:$0xff]   ;;  %v5055_v3 = vld [vmem:[%s6814_s1 + $0x16c] ss:$0 sps:$4 sm:$0x33]   ;;  %v5611_v15 = vld [vmem:[%s5353_s24 + $0x94] ss:$8 sps:$4 sm:$0xff]  }
  0x23   : > { %598 = vmatpush1.bf16.msra.mxu1 %v4994_v11  ;;  %1624 = vmatpush1.bf16.msra.mxu0 %v5347_v12  ;;  %v5076_v5 = vld [vmem:[%s6814_s1 + $0xac] sm:$0xff]   ;;  %v2124_v9 = vsel %vm583_vm1, %v5055_v3, 0  ;;  %v1098_v11 = vsel %vm583_vm1, %v5083_v7, 0  ;;  %v3054_v7 = vld [vmem:[%s5848_s11 + $0xd8] sm:$0xff] }
  0x24   : > { %599 = vmatprep.subr.bf16.mxu1 %v5240_v1  ;;  %1625 = vmatprep.subr.bf16.mxu0 %v5240_v1  ;;  %v5644_v23 = vld [vmem:[%s5353_s24 + $0xa4] ss:$8 sps:$4 sm:$0xff]  }
  0x25   : > { %v5072_v26 = vld [vmem:[%s6814_s1 + $0x188] sm:$0xff]  }
  0x26   : > { %v3052_v3 = vld [vmem:[%s5848_s11 + $0xc8] sm:$0xff] }
  0x27   : > { %600 = vmatpush1.bf16.msra.mxu1 %v4996_v13  ;;  %1626 = vmatpush1.bf16.msra.mxu0 %v5363_v14  ;;  %v5608_v13 = vld [vmem:[%s5353_s24 + $0x80] ss:$8 sps:$4 sm:$0xff]  }
  0x28   : > { %601 = vmatprep.subr.bf16.mxu1 %v5240_v1  ;;  %1627 = vmatprep.subr.bf16.mxu0 %v5240_v1 }
  0x2b   : > { %602 = vmatpush1.bf16.msra.mxu1 %v4998_v17  ;;  %1628 = vmatpush1.bf16.msra.mxu0 %v5379_v18  ;;  %v5622_v17 = vld [vmem:[%s5353_s24 + $0x90] ss:$8 sps:$4 sm:$0xff]  }
  0x2c   : > { %603 = vmatprep.subr.bf16.mxu1 %v5240_v1  ;;  %1629 = vmatprep.subr.bf16.mxu0 %v5240_v1 }
  0x2f   : > { %604 = vmatpush1.bf16.msra.mxu1 %v5000_v19  ;;  %1630 = vmatpush1.bf16.msra.mxu0 %v5392_v20  ;;  %v5057_v19 = vld [vmem:[%s6814_s1 + $0x170] sm:$0xff]  }
  0x30   : > { %605 = vmatprep.subr.bf16.mxu1 %v5240_v1  ;;  %1631 = vmatprep.subr.bf16.mxu0 %v5240_v1 }
  0x33   : > { %606 = vmatpush1.bf16.msra.mxu1 %v5002_v21  ;;  %1632 = vmatpush1.bf16.msra.mxu0 %v5403_v22  ;;  %v5059_v21 = vld [vmem:[%s6814_s1 + $0x178] sm:$0xff]  }
  0x34   : > { %607 = vmatprep.subr.bf16.mxu1 %v5240_v1  ;;  %1633 = vmatprep.subr.bf16.mxu0 %v5240_v1 }
  0x37   : > { %608 = vmatpush1.bf16.msra.mxu1 %v5004_v24  ;;  %1634 = vmatpush1.bf16.msra.mxu0 %v5417_v25  ;;  %v5067_v24 = vld [vmem:[%s6814_s1 + $0x180] sm:$0xff]  }
  0x38   : > { %609 = vmatprep.subr.bf16.mxu1 %v5240_v1  ;;  %1635 = vmatprep.subr.bf16.mxu0 %v5240_v1 }
  0x3b   : > { %610 = vmatpush1.bf16.msra.mxu1 %v585_v27  ;;  %1636 = vmatpush1.bf16.msra.mxu0 %v5428_v28  ;;  %v5661_v27 = vld [vmem:[%s5353_s24 + $0xa0] ss:$8 sps:$4 sm:$0xff]  }
  0x3c   : > { %1100 = vmatprep.subr.bf16.mxu1 %v5240_v1  ;;  %2126 = vmatprep.subr.bf16.mxu0 %v5240_v1 }
  0x3e   : > { %620 = vmatmul.mubr.bf16.vlgmr.msra.gmra.mrb[0].mxu1 %v5008_v29  ;;  %1646 = vmatmul.mubr.bf16.vlgmr.msra.gmra.mrb[0].mxu0 %v5432_v30  ;;  %v5664_v29 = vld [vmem:[%s5353_s24 + $0xb4] ss:$8 sps:$4 sm:$0xff]  }
  0x3f   : > { %1101 = vmatpush1.bf16.msra.mxu1 %v5014_v31  ;;  %2127 = vmatpush1.bf16.msra.mxu0 %v5015_v32  ;;  %v5077_v31 = vld [vmem:[%s6814_s1 + $0x190] sm:$0xff]   ;;  %v5085_v32 = vld [vmem:[%s6814_s1 + $0x198] sm:$0xff]  }
  0x40   : > { %4275 = vmatprep.mubr.msk.bf16.mxu1 %vm534_vm0, %v5443_v33  ;;  %4441 = vmatprep.mubr.msk.bf16.mxu0 %vm534_vm0, %v5447_v34 }
  0x41   : > { %2128 = vmatprep.subr.bf16.mxu0 %v5240_v1  ;;  %1102 = vmatprep.subr.bf16.mxu1 %v5240_v1 }
  0x43   : > { %1103 = vmatpush1.bf16.msra.mxu1 %v5023_v35  ;;  %2129 = vmatpush1.bf16.msra.mxu0 %v5022_v36  ;;  %v5681_v35 = vld [vmem:[%s5353_s24 + $0xb0] ss:$8 sps:$4 sm:$0xff]   ;;  %v5684_v36 = vld [vmem:[%s5353_s24 + $0xc4] ss:$8 sps:$4 sm:$0xff]  }
  0x44   : > { %1104 = vmatprep.subr.bf16.mxu1 %v5240_v1  ;;  %2130 = vmatprep.subr.bf16.mxu0 %v5240_v1 }
  0x46   : > { %628 = vmatmul.mubr.bf16.gmra.mrb[4].mxu1 %v5462_v37  ;;  %1654 = vmatmul.mubr.bf16.gmra.mrb[4].mxu0 %v5465_v38 }
  0x47   : > { %4276 = vmatprep.mubr.msk.bf16.mxu1 %vm534_vm0, %v5368_v16  ;;  %2131 = vmatpush1.bf16.msra.mxu0 %v5024_v39  ;;  %v5086_v39 = vld [vmem:[%s6814_s1 + $0x1a0] sm:$0xff]  }
  0x48   : > { %4442 = vmatprep.mubr.msk.bf16.mxu0 %vm534_vm0, %v5472_v40  ;;  %2132 = vmatprep.subr.bf16.mxu0 %v5240_v1 }
  0x49   : > { %1105 = vmatpush1.bf16.msra.mxu1 %v5029_v41  ;;  %v5087_v41 = vld [vmem:[%s6814_s1 + $0x1a8] sm:$0xff]  }
  0x4a   : > { %1106 = vmatprep.subr.bf16.mxu1 %v5240_v1 }
  0x4b   : > { %2133 = vmatpush1.bf16.msra.mxu0 %v5028_v42  ;;  %v5701_v42 = vld [vmem:[%s5353_s24 + $0xc0] ss:$8 sps:$4 sm:$0xff]  }
  0x4c   : > { %2134 = vmatprep.subr.bf16.mxu0 %v5240_v1 }
  0x4d   : > { %1107 = vmatpush1.bf16.msra.mxu1 %v5038_v43  ;;  %v5704_v43 = vld [vmem:[%s5353_s24 + $0xd4] ss:$8 sps:$4 sm:$0xff]  }
  0x4e   : > { %636 = vmatmul.mubr.bf16.gmra.mrb[8].mxu1 %v5432_v30  ;;  %1108 = vmatprep.subr.bf16.mxu1 %v5240_v1 }
  0x4f   : > { %1662 = vmatmul.mubr.bf16.gmra.mrb[8].mxu0 %v5493_v44  ;;  %4277 = vmatprep.mubr.msk.bf16.mxu1 %vm534_vm0, %v5447_v34 }
  0x50   : > { %4443 = vmatprep.mubr.msk.bf16.mxu0 %vm534_vm0, %v5497_v45  ;;  %2135 = vmatpush1.bf16.msra.mxu0 %v5033_v46  ;;  %v5088_v46 = vld [vmem:[%s6814_s1 + $0x1b0] sm:$0xff]  }
  0x51   : > { %2136 = vmatprep.subr.bf16.mxu0 %v5240_v1  ;;  %1109 = vmatpush1.bf16.msra.mxu1 %v5044_v47  ;;  %v5089_v47 = vld [vmem:[%s6814_s1 + $0x1b8] sm:$0xff]  }
  0x52   : > { %1110 = vmatprep.subr.bf16.mxu1 %v5240_v1 }
  0x54   : > { %2137 = vmatpush1.bf16.msra.mxu0 %v5034_v48  ;;  %v5721_v48 = vld [vmem:[%s5353_s24 + $0xd0] ss:$8 sps:$4 sm:$0xff]  }
  0x55   : > { %2138 = vmatprep.subr.bf16.mxu0 %v5240_v1  ;;  %1111 = vmatpush1.bf16.msra.mxu1 %v5050_v49  ;;  %v5724_v49 = vld [vmem:[%s5353_s24 + $0xe4] ss:$8 sps:$4 sm:$0xff]  }
  0x56   : > { %644 = vmatmul.mubr.bf16.gmra.mrb[12].mxu1 %v5465_v38  ;;  %1112 = vmatprep.subr.bf16.mxu1 %v5240_v1 }
  0x57   : > { %1670 = vmatmul.mubr.bf16.gmra.mrb[12].mxu0 %v5522_v50  ;;  %4278 = vmatprep.mubr.msk.bf16.mxu1 %vm534_vm0, %v5472_v40 }
  0x58   : > { %4444 = vmatprep.mubr.msk.bf16.mxu0 %vm534_vm0, %v5525_v51  ;;  %2139 = vmatpush1.bf16.msra.mxu0 %v5039_v52  ;;  %v5093_v52 = vld [vmem:[%s6814_s1 + $0x1c0] sm:$0xff]  }
  0x59   : > { %2140 = vmatprep.subr.bf16.mxu0 %v5240_v1  ;;  %1113 = vmatpush1.bf16.msra.mxu1 %v5056_v53  ;;  %v5100_v53 = vld [vmem:[%s6814_s1 + $0x1c8] ss:$0 sps:$4 sm:$0x33]  }
  0x5a   : > { %1114 = vmatprep.subr.bf16.mxu1 %v5240_v1 }
  0x5c   : > { %2141 = vmatpush1.bf16.msra.mxu0 %v5043_v54  ;;  %v2637_v54 = vsel %vm583_vm1, %v5100_v53, 0 }
  0x5d   : > { %2142 = vmatprep.subr.bf16.mxu0 %v5240_v1  ;;  %1115 = vmatpush1.bf16.msra.mxu1 %v5058_v56  ;;  %v5742_v56 = vld [vmem:[%s5353_s24 + $0xe0] ss:$8 sps:$4 sm:$0xff]  }
  0x5e   : > { %652 = vmatmul.mubr.bf16.gmra.mrb[16].mxu1 %v5493_v44  ;;  %1116 = vmatprep.subr.bf16.mxu1 %v5240_v1 }
  0x5f   : > { %1678 = vmatmul.mubr.bf16.gmra.mrb[16].mxu0 %v5545_v55  ;;  %4279 = vmatprep.mubr.msk.bf16.mxu1 %vm534_vm0, %v5497_v45 }
  0x60   : > { %4445 = vmatprep.mubr.msk.bf16.mxu0 %vm534_vm0, %v5552_v57  ;;  %2143 = vmatpush1.bf16.msra.mxu0 %v5045_v58  ;;  %v5745_v58 = vld [vmem:[%s5353_s24 + $0xf4] ss:$8 sps:$4 sm:$0xff]  }
  0x61   : > { %2144 = vmatprep.subr.bf16.mxu0 %v5240_v1  ;;  %1117 = vmatpush1.bf16.msra.mxu1 %v5065_v59  ;;  %v5754_v59 = vld [vmem:[%s5353_s24 + $0xf0] ss:$8 sps:$4 sm:$0xff]  }
  0x62   : > { %1118 = vmatprep.subr.bf16.mxu1 %v5240_v1 }
  0x64   : > { %2145 = vmatpush1.bf16.msra.mxu0 %v5049_v60  ;;  %v3047_v60 = vld [vmem:[%s5848_s11 + $0xa0] sm:$0xff] }
  0x65   : > { %2146 = vmatprep.subr.bf16.mxu0 %v5240_v1  ;;  %1119 = vmatpush1.bf16.msra.mxu1 %v5071_v61  ;;  %v3048_v61 = vld [vmem:[%s5848_s11 + $0xa8] sm:$0xff] }
  0x66   : > { %660 = vmatmul.mubr.bf16.gmra.mrb[20].mxu1 %v5522_v50  ;;  %1120 = vmatprep.subr.bf16.mxu1 %v5240_v1 }
  0x67   : > { %1686 = vmatmul.mubr.bf16.gmra.mrb[20].mxu0 %v5578_v62  ;;  %4280 = vmatprep.mubr.msk.bf16.mxu1 %vm534_vm0, %v5525_v51 }
  0x68   : > { %4446 = vmatprep.mubr.msk.bf16.mxu0 %vm534_vm0, %v5581_v63  ;;  %2147 = vmatpush1.bf16.msra.mxu0 %v5054_v0  ;;  %v3051_v0 = vld [vmem:[%s5848_s11 + $0xc0] sm:$0xff] }
  0x69   : > { %2148 = vmatprep.subr.bf16.mxu0 %v5240_v1  ;;  %1121 = vmatpush1.bf16.msra.mxu1 %v5076_v5  ;;  %v3053_v5 = vld [vmem:[%s5848_s11 + $0xd0] sm:$0xff] }
  0x6a   : > { %1122 = vmatprep.subr.bf16.mxu1 %v5240_v1 }
  0x6c   : > { %2149 = vmatpush1.bf16.msra.mxu0 %v2124_v9  ;;  %v3055_v9 = vld [vmem:[%s5848_s11 + $0xe0] sm:$0xff] }
  0x6d   : > { %2639 = vmatprep.subr.bf16.mxu0 %v5240_v1  ;;  %1123 = vmatpush1.bf16.msra.mxu1 %v1098_v11  ;;  %v3056_v11 = vld [vmem:[%s5848_s11 + $0xe8] sm:$0xff] }
  0x6e   : > { %668 = vmatmul.mubr.bf16.gmra.mrb[24].mxu1 %v5545_v55  ;;  %4691 = vmatprep.subr.bf16.mxu1 %v5240_v1 }
  0x6f   : > { %1694 = vmatmul.mubr.bf16.gmra.mrb[24].mxu0 %v5608_v13  ;;  %4281 = vmatprep.mubr.msk.bf16.mxu1 %vm534_vm0, %v5552_v57 }
  0x70   : > { %4447 = vmatprep.mubr.msk.bf16.mxu0 %vm534_vm0, %v5611_v15 }
  0x76   : > { %676 = vmatmul.mubr.bf16.gmra.mrb[28].mxu1 %v5578_v62 }
  0x77   : > { %1702 = vmatmul.mubr.bf16.gmra.mrb[28].mxu0 %v5622_v17  ;;  %4282 = vmatprep.mubr.msk.bf16.mxu1 %vm534_vm0, %v5581_v63 }
  0x78   : > { %4523 = vmatprep.mubr.msk.bf16.mxu0 %vm534_vm0, %v5447_v34 }
  0x7e   : > { %684 = vmatmul.mubr.bf16.gmra.mrb[32].mxu1 %v5608_v13 }
  0x7f   : > { %2159 = vmatmul.mubr.bf16.vlgmr.msra.gmra.mrb[0].mxu0 %v5465_v38  ;;  %4283 = vmatprep.mubr.msk.bf16.mxu1 %vm534_vm0, %v5611_v15 }
  0x80   : > { %2640 = vmatpush1.bf16.msra.mxu0 %v5057_v19  ;;  %4524 = vmatprep.mubr.msk.bf16.mxu0 %vm534_vm0, %v5472_v40  ;;  %v5103_v19 = vld [vmem:[%s5353_s24 + $0x130] ss:$8 sps:$4 sm:$0xff]  }
  0x81   : > { %2641 = vmatprep.subr.bf16.mxu0 %v5240_v1 }
  0x84   : > { %2642 = vmatpush1.bf16.msra.mxu0 %v5059_v21 }
  0x85   : > { %2643 = vmatprep.subr.bf16.mxu0 %v5240_v1 }
  0x86   : > { %692 = vmatmul.mubr.bf16.gmra.mrb[36].mxu1 %v5622_v17 }
  0x87   : > { %2167 = vmatmul.mubr.bf16.gmra.mrb[4].mxu0 %v5493_v44  ;;  %4284 = vmatprep.mubr.msk.bf16.mxu1 %vm534_vm0, %v5644_v23 }
  0x88   : > { %4525 = vmatprep.mubr.msk.bf16.mxu0 %vm534_vm0, %v5497_v45  ;;  %2644 = vmatpush1.bf16.msra.mxu0 %v5067_v24 }
  0x89   : > { %2645 = vmatprep.subr.bf16.mxu0 %v5240_v1 }
  0x8c   : > { %2646 = vmatpush1.bf16.msra.mxu0 %v5072_v26 }
  0x8d   : > { %2647 = vmatprep.subr.bf16.mxu0 %v5240_v1 }
  0x8e   : > { %700 = vmatmul.mubr.bf16.gmra.mrb[40].mxu1 %v5661_v27 }
  0x8f   : > { %2175 = vmatmul.mubr.bf16.gmra.mrb[8].mxu0 %v5522_v50  ;;  %4285 = vmatprep.mubr.msk.bf16.mxu1 %vm534_vm0, %v5664_v29 }
  0x90   : > { %4526 = vmatprep.mubr.msk.bf16.mxu0 %vm534_vm0, %v5525_v51  ;;  %2648 = vmatpush1.bf16.msra.mxu0 %v5077_v31 }
  0x91   : > { %2649 = vmatprep.subr.bf16.mxu0 %v5240_v1 }
  0x94   : > { %2650 = vmatpush1.bf16.msra.mxu0 %v5085_v32 }
  0x95   : > { %2651 = vmatprep.subr.bf16.mxu0 %v5240_v1 }
  0x96   : > { %708 = vmatmul.mubr.bf16.gmra.mrb[44].mxu1 %v5681_v35 }
  0x97   : > { %2183 = vmatmul.mubr.bf16.gmra.mrb[12].mxu0 %v5545_v55  ;;  %4286 = vmatprep.mubr.msk.bf16.mxu1 %vm534_vm0, %v5684_v36 }
  0x98   : > { %4527 = vmatprep.mubr.msk.bf16.mxu0 %vm534_vm0, %v5552_v57  ;;  %2652 = vmatpush1.bf16.msra.mxu0 %v5086_v39 }
  0x99   : > { %2653 = vmatprep.subr.bf16.mxu0 %v5240_v1 }
  0x9c   : > { %2654 = vmatpush1.bf16.msra.mxu0 %v5087_v41 }
  0x9d   : > { %2655 = vmatprep.subr.bf16.mxu0 %v5240_v1 }
  0x9e   : > { %716 = vmatmul.mubr.bf16.gmra.mrb[48].mxu1 %v5701_v42 }
  0x9f   : > { %2191 = vmatmul.mubr.bf16.gmra.mrb[16].mxu0 %v5578_v62  ;;  %4287 = vmatprep.mubr.msk.bf16.mxu1 %vm534_vm0, %v5704_v43 }
  0xa0   : > { %4528 = vmatprep.mubr.msk.bf16.mxu0 %vm534_vm0, %v5581_v63  ;;  %2656 = vmatpush1.bf16.msra.mxu0 %v5088_v46 }
  0xa1   : > { %2657 = vmatprep.subr.bf16.mxu0 %v5240_v1 }
  0xa4   : > { %2658 = vmatpush1.bf16.msra.mxu0 %v5089_v47 }
  0xa5   : > { %2659 = vmatprep.subr.bf16.mxu0 %v5240_v1 }
  0xa6   : > { %724 = vmatmul.mubr.bf16.gmra.mrb[52].mxu1 %v5721_v48 }
  0xa7   : > { %2199 = vmatmul.mubr.bf16.gmra.mrb[20].mxu0 %v5608_v13  ;;  %4288 = vmatprep.mubr.msk.bf16.mxu1 %vm534_vm0, %v5724_v49 }
  0xa8   : > { %4529 = vmatprep.mubr.msk.bf16.mxu0 %vm534_vm0, %v5611_v15  ;;  %2660 = vmatpush1.bf16.msra.mxu0 %v5093_v52 }
  0xa9   : > { %2661 = vmatprep.subr.bf16.mxu0 %v5240_v1 }
  0xac   : > { %2662 = vmatpush1.bf16.msra.mxu0 %v2637_v54 }
  0xae   : > { %732 = vmatmul.mubr.bf16.gmra.mrb[56].mxu1 %v5742_v56 }
  0xaf   : > { %2207 = vmatmul.mubr.bf16.gmra.mrb[24].mxu0 %v5622_v17  ;;  %4289 = vmatprep.mubr.msk.bf16.mxu1 %vm534_vm0, %v5745_v58 }
  0xb0   : > { %4530 = vmatprep.mubr.msk.bf16.mxu0 %vm534_vm0, %v5644_v23 }
  0xb6   : > { %740 = vmatmul.mubr.bf16.gmra.mrb[60].mxu1 %v5754_v59 }
  0xb7   : > { %2215 = vmatmul.mubr.bf16.gmra.mrb[28].mxu0 %v5661_v27  ;;  %4357 = vmatprep.mubr.msk.bf16.mxu1 %vm534_vm0, %v5443_v33  ;;  %v3036_v33 = vld [vmem:[%s5848_s11 + $0x48] sm:$0xff] }
  0xb8   : > { %4531 = vmatprep.mubr.msk.bf16.mxu0 %vm534_vm0, %v5664_v29 }
  0xbe   : > { %1133 = vmatmul.mubr.bf16.vlgmr.msra.gmra.mrb[0].mxu1 %v5462_v37  ;;  %v3038_v37 = vld [vmem:[%s5848_s11 + $0x58] sm:$0xff] }
  0xbf   : > { %2223 = vmatmul.mubr.bf16.gmra.mrb[32].mxu0 %v5681_v35  ;;  %4703 = vmatpush1.bf16.msra.mxu1 %v5290_v2  ;;  %v5801_v2 = vld [vmem:[%s5353_s24 + $0x104] ss:$8 sps:$4 sm:$0xff]  }
  0xc0   : > { %4358 = vmatprep.mubr.msk.bf16.mxu1 %vm534_vm0, %v5368_v16  ;;  %4532 = vmatprep.mubr.msk.bf16.mxu0 %vm534_vm0, %v5684_v36  ;;  %v3029_v16 = vld [vmem:[%s5848_s11 + $0x10] sm:$0xff] }
  0xc1   : > { %4692 = vmatprep.subr.bf16.mxu1 %v5240_v1  ;;  %3095 = vrot.lane.b32.xlu1 %v3029_v16, %s5241_s12  ;;  %v2832_v16 = vlaneseq }
  0xc3   : > { %4704 = vmatpush1.bf16.msra.mxu1 %v5300_v4  ;;  %v5814_v4 = vld [vmem:[%s5353_s24 + $0x100] ss:$8 sps:$4 sm:$0xff]  }
  0xc4   : > { %4693 = vmatprep.subr.bf16.mxu1 %v5240_v1 }
  0xc6   : > { %1141 = vmatmul.mubr.bf16.gmra.mrb[4].mxu1 %v5432_v30  ;;  %v3035_v30 = vld [vmem:[%s5848_s11 + $0x40] sm:$0xff] }
  0xc7   : > { %2231 = vmatmul.mubr.bf16.gmra.mrb[36].mxu0 %v5701_v42  ;;  %4359 = vmatprep.mubr.msk.bf16.mxu1 %vm534_vm0, %v5447_v34  ;;  %v3037_v34 = vld [vmem:[%s5848_s11 + $0x50] sm:$0xff] }
  0xc8   : > { %4533 = vmatprep.mubr.msk.bf16.mxu0 %vm534_vm0, %v5704_v43  ;;  %4705 = vmatpush1.bf16.msra.mxu1 %v5311_v6  ;;  %v5817_v6 = vld [vmem:[%s5353_s24 + $0x114] ss:$8 sps:$4 sm:$0xff]  }
  0xc9   : > { %4694 = vmatprep.subr.bf16.mxu1 %v5240_v1 }
  0xcc   : > { %4706 = vmatpush1.bf16.msra.mxu1 %v5322_v8  ;;  %v5830_v8 = vld [vmem:[%s5353_s24 + $0x110] ss:$8 sps:$4 sm:$0xff]  }
  0xcd   : > { %4695 = vmatprep.subr.bf16.mxu1 %v5240_v1 }
  0xce   : > { %1149 = vmatmul.mubr.bf16.gmra.mrb[8].mxu1 %v5465_v38  ;;  %v3039_v38 = vld [vmem:[%s5848_s11 + $0x60] sm:$0xff] }
  0xcf   : > { %2239 = vmatmul.mubr.bf16.gmra.mrb[40].mxu0 %v5721_v48  ;;  %4360 = vmatprep.mubr.msk.bf16.mxu1 %vm534_vm0, %v5472_v40 }
  0xd0   : > { %4534 = vmatprep.mubr.msk.bf16.mxu0 %vm534_vm0, %v5724_v49  ;;  %4707 = vmatpush1.bf16.msra.mxu1 %v5335_v10  ;;  %v5833_v10 = vld [vmem:[%s5353_s24 + $0x124] ss:$8 sps:$4 sm:$0xff]  }
  0xd1   : > { %4696 = vmatprep.subr.bf16.mxu1 %v5240_v1 }
  0xd4   : > { %4708 = vmatpush1.bf16.msra.mxu1 %v5347_v12  ;;  %v5853_v12 = vld [vmem:[%s5353_s24 + $0x120] ss:$8 sps:$4 sm:$0xff]  }
  0xd5   : > { %4697 = vmatprep.subr.bf16.mxu1 %v5240_v1 }
  0xd6   : > { %1157 = vmatmul.mubr.bf16.gmra.mrb[12].mxu1 %v5493_v44 }
  0xd7   : > { %2247 = vmatmul.mubr.bf16.gmra.mrb[44].mxu0 %v5742_v56  ;;  %4361 = vmatprep.mubr.msk.bf16.mxu1 %vm534_vm0, %v5497_v45 }
  0xd8   : > { %4535 = vmatprep.mubr.msk.bf16.mxu0 %vm534_vm0, %v5745_v58  ;;  %4709 = vmatpush1.bf16.msra.mxu1 %v5363_v14  ;;  %v3028_v14 = vld [vmem:[%s5848_s11 + $0x8] sm:$0xff] }
  0xd9   : > { %4698 = vmatprep.subr.bf16.mxu1 %v5240_v1 }
  0xdc   : > { %4710 = vmatpush1.bf16.msra.mxu1 %v5379_v18  ;;  %v3031_v18 = vld [vmem:[%s5848_s11 + $0x20] sm:$0xff] }
  0xdd   : > { %4699 = vmatprep.subr.bf16.mxu1 %v5240_v1 }
  0xde   : > { %1165 = vmatmul.mubr.bf16.gmra.mrb[16].mxu1 %v5522_v50 }
  0xdf   : > { %2255 = vmatmul.mubr.bf16.gmra.mrb[48].mxu0 %v5754_v59  ;;  %4362 = vmatprep.mubr.msk.bf16.mxu1 %vm534_vm0, %v5525_v51 }
  0xe0   : > { %4536 = vmatprep.mubr.msk.bf16.mxu0 %vm534_vm0, %v5801_v2  ;;  %4711 = vmatpush1.bf16.msra.mxu1 %v5392_v20  ;;  %v3030_v20 = vld [vmem:[%s5848_s11 + $0x18] sm:$0xff] }
  0xe1   : > { %4700 = vmatprep.subr.bf16.mxu1 %v5240_v1  ;;  %3097 = vrot.lane.b32.xlu1 %v3030_v20, %s5241_s12  ;;  %v6040_v20 = vand.u32 127, %v2832_v16 }
  0xe3   : > { %vm2834_vm2 = vcmp.lt.s32.totalorder %v6040_v20, 96 }
  0xe4   : > { %4712 = vmatpush1.bf16.msra.mxu1 %v5403_v22  ;;  %v3033_v22 = vld [vmem:[%s5848_s11 + $0x30] sm:$0xff] }
  0xe5   : > { %4701 = vmatprep.subr.bf16.mxu1 %v5240_v1 }
  0xe6   : > { %1173 = vmatmul.mubr.bf16.gmra.mrb[20].mxu1 %v5545_v55 }
  0xe7   : > { %2263 = vmatmul.mubr.bf16.gmra.mrb[52].mxu0 %v5814_v4  ;;  %4363 = vmatprep.mubr.msk.bf16.mxu1 %vm534_vm0, %v5552_v57 }
  0xe8   : > { %4537 = vmatprep.mubr.msk.bf16.mxu0 %vm534_vm0, %v5817_v6  ;;  %4713 = vmatpush1.bf16.msra.mxu1 %v5417_v25  ;;  %v3032_v25 = vld [vmem:[%s5848_s11 + $0x28] sm:$0xff] }
  0xe9   : > { %4702 = vmatprep.subr.bf16.mxu1 %v5240_v1  ;;  %v3027_v1 = vld [vmem:[%s5848_s11] sm:$0xff]  ;;  %3101 = vrot.lane.b32.xlu1 %v3032_v25, %s5241_s12 }
  0xea   : > { %3091 = vrot.lane.b32.xlu0 %v3027_v1, %s5241_s12 }
  0xec   : > { %4714 = vmatpush1.bf16.msra.mxu1 %v5428_v28  ;;  %v3034_v28 = vld [vmem:[%s5848_s11 + $0x38] sm:$0xff] }
  0xed   : > { %3105 = vrot.lane.b32.xlu1 %v3034_v28, %s5241_s12 }
  0xee   : > { %1181 = vmatmul.mubr.bf16.gmra.mrb[24].mxu1 %v5578_v62  ;;  %3093 = vrot.lane.b32.xlu0 %v3028_v14, %s5241_s12 }
  0xef   : > { %2271 = vmatmul.mubr.bf16.gmra.mrb[56].mxu0 %v5830_v8  ;;  %4364 = vmatprep.mubr.msk.bf16.mxu1 %vm534_vm0, %v5581_v63 }
  0xf0   : > { %4538 = vmatprep.mubr.msk.bf16.mxu0 %vm534_vm0, %v5833_v10 }
  0xf1   : > { %3109 = vrot.lane.b32.xlu1 %v3036_v33, %s5241_s12 }
  0xf2   : > { %3099 = vrot.lane.b32.xlu0 %v3031_v18, %s5241_s12  ;;  %v6038_v18 = vld [vmem:[%s6815_s2] ss:$0 sm:$0xff] }
  0xf5   : > { %3113 = vrot.lane.b32.xlu1 %v3038_v37, %s5241_s12 }
  0xf6   : > { %1189 = vmatmul.mubr.bf16.gmra.mrb[28].mxu1 %v5608_v13  ;;  %3103 = vrot.lane.b32.xlu0 %v3033_v22, %s5241_s12 }
  0xf7   : > { %2279 = vmatmul.mubr.bf16.gmra.mrb[60].mxu0 %v5853_v12  ;;  %4365 = vmatprep.mubr.msk.bf16.mxu1 %vm534_vm0, %v5611_v15 }
  0xf8   : > { %4606 = vmatprep.mubr.msk.bf16.mxu0 %vm534_vm0, %v5472_v40  ;;  %v3040_v40 = vld [vmem:[%s5848_s11 + $0x68] sm:$0xff] }
  0xf9   : > { %3117 = vrot.lane.b32.xlu1 %v3040_v40, %s5241_s12 }
  0xfa   : > { %3107 = vrot.lane.b32.xlu0 %v3035_v30, %s5241_s12 }
  0xfe   : > { %1197 = vmatmul.mubr.bf16.gmra.mrb[32].mxu1 %v5622_v17  ;;  %3111 = vrot.lane.b32.xlu0 %v3037_v34, %s5241_s12 }
  0xff   : > { %2672 = vmatmul.mubr.bf16.vlgmr.msra.gmra.mrb[0].mxu0 %v5493_v44  ;;  %4366 = vmatprep.mubr.msk.bf16.mxu1 %vm534_vm0, %v5644_v23  ;;  %v3041_v44 = vld [vmem:[%s5848_s11 + $0x70] sm:$0xff] }
 0x100   : > { %4607 = vmatprep.mubr.msk.bf16.mxu0 %vm534_vm0, %v5497_v45  ;;  %v3042_v45 = vld [vmem:[%s5848_s11 + $0x78] sm:$0xff] }
 0x101   : > { %3121 = vrot.lane.b32.xlu1 %v3042_v45, %s5241_s12 }
 0x102   : > { %3115 = vrot.lane.b32.xlu0 %v3039_v38, %s5241_s12 }
 0x106   : > { %1205 = vmatmul.mubr.bf16.gmra.mrb[36].mxu1 %v5661_v27  ;;  %3119 = vrot.lane.b32.xlu0 %v3041_v44, %s5241_s12 }
 0x107   : > { %2680 = vmatmul.mubr.bf16.gmra.mrb[4].mxu0 %v5522_v50  ;;  %4367 = vmatprep.mubr.msk.bf16.mxu1 %vm534_vm0, %v5664_v29  ;;  %v3043_v50 = vld [vmem:[%s5848_s11 + $0x80] sm:$0xff] }
 0x108   : > { %4608 = vmatprep.mubr.msk.bf16.mxu0 %vm534_vm0, %v5525_v51  ;;  %v3044_v51 = vld [vmem:[%s5848_s11 + $0x88] sm:$0xff] }
 0x109   : > { %3125 = vrot.lane.b32.xlu1 %v3044_v51, %s5241_s12 }
 0x10a   : > { %3123 = vrot.lane.b32.xlu0 %v3043_v50, %s5241_s12 }
 0x10e   : > { %1213 = vmatmul.mubr.bf16.gmra.mrb[40].mxu1 %v5681_v35 }
 0x10f   : > { %2688 = vmatmul.mubr.bf16.gmra.mrb[8].mxu0 %v5545_v55  ;;  %4368 = vmatprep.mubr.msk.bf16.mxu1 %vm534_vm0, %v5684_v36  ;;  %v3045_v55 = vld [vmem:[%s5848_s11 + $0x90] sm:$0xff] }
 0x110   : > { %4609 = vmatprep.mubr.msk.bf16.mxu0 %vm534_vm0, %v5552_v57  ;;  %v3046_v57 = vld [vmem:[%s5848_s11 + $0x98] sm:$0xff]  ;;  %3127 = vrot.lane.b32.xlu0 %v3045_v55, %s5241_s12 }
 0x111   : > { %3129 = vrot.lane.b32.xlu1 %v3046_v57, %s5241_s12 }
 0x114   : > { %3131 = vrot.lane.b32.xlu0 %v3047_v60, %s5241_s12 }
 0x115   : > { %3133 = vrot.lane.b32.xlu1 %v3048_v61, %s5241_s12 }
 0x116   : > { %1221 = vmatmul.mubr.bf16.gmra.mrb[44].mxu1 %v5701_v42 }
 0x117   : > { %2696 = vmatmul.mubr.bf16.gmra.mrb[12].mxu0 %v5578_v62  ;;  %4369 = vmatprep.mubr.msk.bf16.mxu1 %vm534_vm0, %v5704_v43  ;;  %v3049_v62 = vld [vmem:[%s5848_s11 + $0xb0] sm:$0xff] }
 0x118   : > { %4610 = vmatprep.mubr.msk.bf16.mxu0 %vm534_vm0, %v5581_v63  ;;  %v3050_v63 = vld [vmem:[%s5848_s11 + $0xb8] sm:$0xff]  ;;  %3135 = vrot.lane.b32.xlu0 %v3049_v62, %s5241_s12 }
 0x119   : > { %3137 = vrot.lane.b32.xlu1 %v3050_v63, %s5241_s12 }
 0x11c   : > { %3139 = vrot.lane.b32.xlu0 %v3051_v0, %s5241_s12 }
 0x11d   : > { %3141 = vrot.lane.b32.xlu1 %v3052_v3, %s5241_s12 }
 0x11e   : > { %1229 = vmatmul.mubr.bf16.gmra.mrb[48].mxu1 %v5721_v48 }
 0x11f   : > { %2704 = vmatmul.mubr.bf16.gmra.mrb[16].mxu0 %v5608_v13  ;;  %4370 = vmatprep.mubr.msk.bf16.mxu1 %vm534_vm0, %v5724_v49  ;;  %v3057_v13 = vld [vmem:[%s5848_s11 + $0xf0] sm:$0xff] }
 0x120   : > { %4611 = vmatprep.mubr.msk.bf16.mxu0 %vm534_vm0, %v5611_v15  ;;  %3143 = vrot.lane.b32.xlu0 %v3053_v5, %s5241_s12  ;;  %v3058_v15 = vld [vmem:[%s5848_s11 + $0xf8] sm:$0xff] }
 0x121   : > { %3145 = vrot.lane.b32.xlu1 %v3054_v7, %s5241_s12 }
 0x124   : > { %3147 = vrot.lane.b32.xlu0 %v3055_v9, %s5241_s12 }
 0x125   : > { %3149 = vrot.lane.b32.xlu1 %v3056_v11, %s5241_s12 }
 0x126   : > { %1237 = vmatmul.mubr.bf16.gmra.mrb[52].mxu1 %v5742_v56 }
 0x127   : > { %2712 = vmatmul.mubr.bf16.gmra.mrb[20].mxu0 %v5622_v17  ;;  %4371 = vmatprep.mubr.msk.bf16.mxu1 %vm534_vm0, %v5745_v58  ;;  %v5101_v17 = vld [vmem:[%s5353_s24 + $0x134] ss:$8 sps:$4 sm:$0xff]  }
 0x128   : > { %4612 = vmatprep.mubr.msk.bf16.mxu0 %vm534_vm0, %v5644_v23  ;;  %3151 = vrot.lane.b32.xlu0 %v3057_v13, %s5241_s12 }
 0x129   : > { %3153 = vrot.lane.b32.xlu1 %v3058_v15, %s5241_s12 }
 0x12e   : > { %1245 = vmatmul.mubr.bf16.gmra.mrb[56].mxu1 %v5754_v59 }
 0x12f   : > { %2720 = vmatmul.mubr.bf16.gmra.mrb[24].mxu0 %v5661_v27  ;;  %4372 = vmatprep.mubr.msk.bf16.mxu1 %vm534_vm0, %v5801_v2 }
 0x130   : > { %4613 = vmatprep.mubr.msk.bf16.mxu0 %vm534_vm0, %v5664_v29 }
 0x136   : > { %1253 = vmatmul.mubr.bf16.gmra.mrb[60].mxu1 %v5814_v4 }
 0x137   : > { %2728 = vmatmul.mubr.bf16.gmra.mrb[28].mxu0 %v5681_v35  ;;  %4448 = vmatprep.mubr.msk.bf16.mxu1 %vm534_vm0, %v5644_v23 }
 0x138   : > { %4614 = vmatprep.mubr.msk.bf16.mxu0 %vm534_vm0, %v5684_v36 }
 0x13e   : > { %1710 = vmatmul.mubr.bf16.vlgmr.msra.gmra.mrb[32].mxu1 %v5661_v27 }
 0x13f   : > { %2736 = vmatmul.mubr.bf16.gmra.mrb[32].mxu0 %v5701_v42  ;;  %4449 = vmatprep.mubr.msk.bf16.mxu1 %vm534_vm0, %v5664_v29 }
 0x140   : > { %4615 = vmatprep.mubr.msk.bf16.mxu0 %vm534_vm0, %v5704_v43 }
 0x146   : > { %1718 = vmatmul.mubr.bf16.gmra.mrb[36].mxu1 %v5681_v35 }
 0x147   : > { %2744 = vmatmul.mubr.bf16.gmra.mrb[36].mxu0 %v5721_v48  ;;  %4450 = vmatprep.mubr.msk.bf16.mxu1 %vm534_vm0, %v5684_v36 }
 0x148   : > { %4616 = vmatprep.mubr.msk.bf16.mxu0 %vm534_vm0, %v5724_v49 }
 0x14e   : > { %1726 = vmatmul.mubr.bf16.gmra.mrb[40].mxu1 %v5701_v42 }
 0x14f   : > { %2752 = vmatmul.mubr.bf16.gmra.mrb[40].mxu0 %v5742_v56  ;;  %4451 = vmatprep.mubr.msk.bf16.mxu1 %vm534_vm0, %v5704_v43 }
 0x150   : > { %4617 = vmatprep.mubr.msk.bf16.mxu0 %vm534_vm0, %v5745_v58 }
 0x156   : > { %1734 = vmatmul.mubr.bf16.gmra.mrb[44].mxu1 %v5721_v48 }
 0x157   : > { %2760 = vmatmul.mubr.bf16.gmra.mrb[44].mxu0 %v5754_v59  ;;  %4452 = vmatprep.mubr.msk.bf16.mxu1 %vm534_vm0, %v5724_v49 }
 0x158   : > { %4618 = vmatprep.mubr.msk.bf16.mxu0 %vm534_vm0, %v5801_v2 }
 0x15e   : > { %1742 = vmatmul.mubr.bf16.gmra.mrb[48].mxu1 %v5742_v56 }
 0x15f   : > { %2768 = vmatmul.mubr.bf16.gmra.mrb[48].mxu0 %v5814_v4  ;;  %4453 = vmatprep.mubr.msk.bf16.mxu1 %vm534_vm0, %v5745_v58 }
 0x160   : > { %4619 = vmatprep.mubr.msk.bf16.mxu0 %vm534_vm0, %v5817_v6 }
 0x166   : > { %1750 = vmatmul.mubr.bf16.gmra.mrb[52].mxu1 %v5754_v59 }
 0x167   : > { %2776 = vmatmul.mubr.bf16.gmra.mrb[52].mxu0 %v5830_v8  ;;  %4454 = vmatprep.mubr.msk.bf16.mxu1 %vm534_vm0, %v5801_v2 }
 0x168   : > { %4620 = vmatprep.mubr.msk.bf16.mxu0 %vm534_vm0, %v5833_v10 }
 0x16e   : > { %1758 = vmatmul.mubr.bf16.gmra.mrb[56].mxu1 %v5814_v4 }
 0x16f   : > { %2784 = vmatmul.mubr.bf16.gmra.mrb[56].mxu0 %v5853_v12  ;;  %4455 = vmatprep.mubr.msk.bf16.mxu1 %vm534_vm0, %v5817_v6 }
 0x170   : > { %4621 = vmatprep.mubr.msk.bf16.mxu0 %vm534_vm0, %v5101_v17 }
 0x176   : > { %1766 = vmatmul.mubr.bf16.gmra.mrb[60].mxu1 %v5830_v8 }
 0x177   : > { %2792 = vmatmul.mubr.bf16.gmra.mrb[60].mxu0 %v5103_v19 }
 0x191   : > { %v1134_v21 = vpop.f32.mrb[0].mxu1 }
 0x192   : > { %v1136_v23 = vpop.f32.mrb[1].mxu1  ;;  %v4715_v22 = vadd.f32 %v6038_v18, %v1134_v21 }
 0x193   : > { %v1137_v24 = vpop.f32.mrb[2].mxu1 }
 0x194   : > { %v1139_v26 = vpop.f32.mrb[3].mxu1  ;;  %v4717_v28 = vadd.f32 %v6038_v18, %v1137_v24 }
 0x199   : > { %v1142_v27 = vpop.f32.mrb[4].mxu1 }
 0x19a   : > { %v1144_v29 = vpop.f32.mrb[5].mxu1  ;;  %v4719_v50 = vadd.f32 %v6038_v18, %v1142_v27 }
 0x19b   : > { %v1145_v31 = vpop.f32.mrb[6].mxu1 }
 0x19c   : > { %v1147_v32 = vpop.f32.mrb[7].mxu1  ;;  %v4721_v57 = vadd.f32 %v6038_v18, %v1145_v31 }
 0x1a1   : > { %v1150_v35 = vpop.f32.mrb[8].mxu1 }
 0x1a2   : > { %v1152_v36 = vpop.f32.mrb[9].mxu1  ;;  %v4723_v9 = vadd.f32 %v6038_v18, %v1150_v35 }
 0x1a3   : > { %v1153_v39 = vpop.f32.mrb[10].mxu1 }
 0x1a4   : > { %v1155_v41 = vpop.f32.mrb[11].mxu1  ;;  %v4725_v17 = vadd.f32 %v6038_v18, %v1153_v39 }
 0x1a9   : > { %v6015_v42 = vpop.f32.mrb[12].mxu1 }
 0x1aa   : > { %v1160_v43 = vpop.f32.mrb[13].mxu1  ;;  %v4727_v39 = vadd.f32 %v6038_v18, %v6015_v42 }
 0x1ab   : > { %v6017_v46 = vpop.f32.mrb[14].mxu1 }
 0x1ac   : > { %v1163_v47 = vpop.f32.mrb[15].mxu1 }
 0x1b1   : > { %v6019_v48 = vpop.f32.mrb[16].mxu1 }
 0x1b2   : > { %v1168_v49 = vpop.f32.mrb[17].mxu1 }
 0x1b3   : > { %v6021_v52 = vpop.f32.mrb[18].mxu1 }
 0x1b4   : > { %v1171_v53 = vpop.f32.mrb[19].mxu1 }
 0x1b9   : > { %v6023_v54 = vpop.f32.mrb[20].mxu1 }
 0x1ba   : > { %v1176_v56 = vpop.f32.mrb[21].mxu1 }
 0x1bb   : > { %v6025_v58 = vpop.f32.mrb[22].mxu1 }
 0x1bc   : > { %v1179_v59 = vpop.f32.mrb[23].mxu1 }
 0x1c1   : > { %v6027_v2 = vpop.f32.mrb[24].mxu1 }
 0x1c2   : > { %v1184_v4 = vpop.f32.mrb[25].mxu1 }
 0x1c3   : > { %v6029_v6 = vpop.f32.mrb[26].mxu1  ;;  %v4729_v4 = vadd.f32 %v6038_v18, %v6017_v46  ;;  %v4731_v46 = vadd.f32 %v6038_v18, %v6019_v48 }
 0x1c4   : > { %v1187_v8 = vpop.f32.mrb[27].mxu1 }
 0x1c9   : > { %v6031_v10 = vpop.f32.mrb[28].mxu1 }
 0x1ca   : > { %v1192_v1 = vpop.f32.mrb[29].mxu1 }
 0x1cb   : > { %v6033_v12 = vpop.f32.mrb[30].mxu1 }
 0x1cc   : > { %v1195_v14 = vpop.f32.mrb[31].mxu1 }
 0x1d2   : > { %v2673_v25 = vpop.f32.mrb[0].mxu0 }
 0x1d3   : > { %v4716_v30 = vadd.f32 %v4715_v22, %v2673_v25  ;;  %v2675_v33 = vpop.f32.mrb[1].mxu0 }
 0x1d4   : > { %v2676_v34 = vpop.f32.mrb[2].mxu0 }
 0x1d5   : > { %v2835_v37 = vmul.f32 0.5, %v4716_v30  ;;  %v4718_v38 = vadd.f32 %v4717_v28, %v2676_v34  ;;  %v2678_v40 = vpop.f32.mrb[3].mxu0 }
 0x1d7   : > { %v2867_v44 = vsel %vm2834_vm2, %v2835_v37, %v4716_v30  ;;  %v2836_v45 = vmul.f32 0.5, %v4718_v38 }
 0x1d8   : > { %5104 = vtanh.f32 %v2867_v44 }
 0x1d9   : > { %v2868_v51 = vsel %vm2834_vm2, %v2836_v45, %v4718_v38 }
 0x1da   : > { %5106 = vtanh.f32 %v2868_v51  ;;  %v2681_v55 = vpop.f32.mrb[4].mxu0 }
 0x1db   : > { %v4720_v60 = vadd.f32 %v4719_v50, %v2681_v55  ;;  %v2683_v61 = vpop.f32.mrb[5].mxu0  ;;  %v4733_v55 = vadd.f32 %v6038_v18, %v6021_v52  ;;  %v4735_v52 = vadd.f32 %v6038_v18, %v6023_v54 }
 0x1dc   : > { %v2684_v62 = vpop.f32.mrb[6].mxu0 }
 0x1dd   : > { %v2837_v63 = vmul.f32 0.5, %v4720_v60  ;;  %v4722_v0 = vadd.f32 %v4721_v57, %v2684_v62  ;;  %v2686_v3 = vpop.f32.mrb[7].mxu0 }
 0x1df   : > { %v2869_v5 = vsel %vm2834_vm2, %v2837_v63, %v4720_v60  ;;  %v2838_v7 = vmul.f32 0.5, %v4722_v0 }
 0x1e0   : > { %5108 = vtanh.f32 %v2869_v5 }
 0x1e1   : > { %v2870_v11 = vsel %vm2834_vm2, %v2838_v7, %v4722_v0 }
 0x1e2   : > { %v5105_v13 = vpop.eup %5104  ;;  %5110 = vtanh.f32 %v2870_v11  ;;  %v2689_v15 = vpop.f32.mrb[8].mxu0 }
 0x1e3   : > { %v4724_v19 = vadd.f32 %v4723_v9, %v2689_v15  ;;  %v2691_v21 = vpop.f32.mrb[9].mxu0  ;;  %v2931_v23 = vmul.f32 0.5, %v5105_v13 }
 0x1e4   : > { %v5107_v24 = vpop.eup %5106  ;;  %v2692_v26 = vpop.f32.mrb[10].mxu0 }
 0x1e5   : > { %v2839_v27 = vmul.f32 0.5, %v4724_v19  ;;  %v4726_v29 = vadd.f32 %v4725_v17, %v2692_v26  ;;  %v2963_v31 = vadd.f32 0.5, %v2931_v23  ;;  %v2694_v32 = vpop.f32.mrb[11].mxu0  ;;  %v2932_v36 = vmul.f32 0.5, %v5107_v24 }
 0x1e7   : > { %v2871_v35 = vsel %vm2834_vm2, %v2839_v27, %v4724_v19  ;;  %v2840_v41 = vmul.f32 0.5, %v4726_v29  ;;  %v6061_v43 = vsel %vm2834_vm2, %v2963_v31, %v5105_v13  ;;  %v2964_v47 = vadd.f32 0.5, %v2932_v36 }
 0x1e8   : > { %5112 = vtanh.f32 %v2871_v35  ;;  %3251 = vrot.lane.b32.xlu0 %v6061_v43, %s5241_s12 }
 0x1e9   : > { %v2872_v49 = vsel %vm2834_vm2, %v2840_v41, %v4726_v29  ;;  %v6071_v53 = vsel %vm2834_vm2, %v2964_v47, %v5107_v24  ;;  %v4737_v24 = vadd.f32 %v6038_v18, %v6025_v58  ;;  %v4739_v58 = vadd.f32 %v6038_v18, %v6027_v2 }
 0x1ea   : > { %v5109_v56 = vpop.eup %5108  ;;  %5114 = vtanh.f32 %v2872_v49  ;;  %v2697_v59 = vpop.f32.mrb[12].mxu0  ;;  %3253 = vrot.lane.b32.xlu1 %v6071_v53, %s5241_s12 }
 0x1eb   : > { %v4728_v8 = vadd.f32 %v4727_v39, %v2697_v59  ;;  %v2699_v1 = vpop.f32.mrb[13].mxu0  ;;  %v2933_v14 = vmul.f32 0.5, %v5109_v56 }
 0x1ec   : > { %v5111_v42 = vpop.eup %5110  ;;  %v2700_v16 = vpop.f32.mrb[14].mxu0 }
 0x1ed   : > { %v2841_v22 = vmul.f32 0.5, %v4728_v8  ;;  %v4730_v25 = vadd.f32 %v4729_v4, %v2700_v16  ;;  %v2965_v28 = vadd.f32 0.5, %v2933_v14  ;;  %v2702_v30 = vpop.f32.mrb[15].mxu0  ;;  %v2934_v33 = vmul.f32 0.5, %v5111_v42  ;;  %v6133_v14 = vpop.permute.xlu0 %3091 }
 0x1ee   : > { %v4741_v16 = vadd.f32 %v6038_v18, %v6029_v6 }
 0x1ef   : > { %v2873_v34 = vsel %vm2834_vm2, %v2841_v22, %v4728_v8  ;;  %v2842_v37 = vmul.f32 0.5, %v4730_v25  ;;  %v6081_v38 = vsel %vm2834_vm2, %v2965_v28, %v5109_v56  ;;  %v2966_v40 = vadd.f32 0.5, %v2934_v33  ;;  %v6139_v22 = vpop.permute.xlu1 %3095 }
 0x1f0   : > { %5116 = vtanh.f32 %v2873_v34  ;;  %3255 = vrot.lane.b32.xlu0 %v6081_v38, %s5241_s12 }
 0x1f1   : > { %v2874_v44 = vsel %vm2834_vm2, %v2842_v37, %v4730_v25  ;;  %v6091_v45 = vsel %vm2834_vm2, %v2966_v40, %v5111_v42 }
 0x1f2   : > { %v5113_v50 = vpop.eup %5112  ;;  %5118 = vtanh.f32 %v2874_v44  ;;  %v2705_v51 = vpop.f32.mrb[16].mxu0  ;;  %3257 = vrot.lane.b32.xlu1 %v6091_v45, %s5241_s12 }
 0x1f3   : > { %v4732_v57 = vadd.f32 %v4731_v46, %v2705_v51  ;;  %v2707_v60 = vpop.f32.mrb[17].mxu0  ;;  %v2935_v61 = vmul.f32 0.5, %v5113_v50 }
 0x1f4   : > { %v5115_v48 = vpop.eup %5114  ;;  %v2708_v62 = vpop.f32.mrb[18].mxu0  ;;  %v4743_v60 = vadd.f32 %v6038_v18, %v6031_v10 }
 0x1f5   : > { %v2843_v63 = vmul.f32 0.5, %v4732_v57  ;;  %v4734_v0 = vadd.f32 %v4733_v55, %v2708_v62  ;;  %v2710_v3 = vpop.f32.mrb[19].mxu0  ;;  %v2967_v5 = vadd.f32 0.5, %v2935_v61  ;;  %v2936_v7 = vmul.f32 0.5, %v5115_v48  ;;  %v6153_v61 = vpop.permute.xlu1 %3097 }
 0x1f6   : > { %v4745_v3 = vadd.f32 %v6038_v18, %v6033_v12 }
 0x1f7   : > { %v2875_v9 = vsel %vm2834_vm2, %v2843_v63, %v4732_v57  ;;  %v2844_v11 = vmul.f32 0.5, %v4734_v0  ;;  %v6101_v13 = vsel %vm2834_vm2, %v2967_v5, %v5113_v50  ;;  %v2968_v15 = vadd.f32 0.5, %v2936_v7  ;;  %v6147_v57 = vpop.permute.xlu0 %3093 }
 0x1f8   : > { %5120 = vtanh.f32 %v2875_v9  ;;  %3259 = vrot.lane.b32.xlu0 %v6101_v13, %s5241_s12 }
 0x1f9   : > { %v2876_v17 = vsel %vm2834_vm2, %v2844_v11, %v4734_v0  ;;  %v6111_v19 = vsel %vm2834_vm2, %v2968_v15, %v5115_v48 }
 0x1fa   : > { %v5117_v21 = vpop.eup %5116  ;;  %5122 = vtanh.f32 %v2876_v17  ;;  %v2713_v23 = vpop.f32.mrb[20].mxu0  ;;  %3261 = vrot.lane.b32.xlu1 %v6111_v19, %s5241_s12 }
 0x1fb   : > { %v4736_v26 = vadd.f32 %v4735_v52, %v2713_v23  ;;  %v2715_v27 = vpop.f32.mrb[21].mxu0  ;;  %v2937_v29 = vmul.f32 0.5, %v5117_v21  ;;  %v6165_v11 = vpop.permute.xlu0 %3099 }
 0x1fc   : > { %v5119_v54 = vpop.eup %5118  ;;  %v2716_v31 = vpop.f32.mrb[22].mxu0 }
 0x1fd   : > { %v2845_v32 = vmul.f32 0.5, %v4736_v26  ;;  %v4738_v36 = vadd.f32 %v4737_v24, %v2716_v31  ;;  %v2718_v35 = vpop.f32.mrb[23].mxu0  ;;  %v2969_v41 = vadd.f32 0.5, %v2937_v29  ;;  %v2938_v47 = vmul.f32 0.5, %v5119_v54  ;;  %v6167_v52 = vpop.permute.xlu1 %3101 }
 0x1ff   : > { %v2877_v39 = vsel %vm2834_vm2, %v2845_v32, %v4736_v26  ;;  %v2846_v49 = vmul.f32 0.5, %v4738_v36  ;;  %v6121_v56 = vsel %vm2834_vm2, %v2969_v41, %v5117_v21  ;;  %v2970_v59 = vadd.f32 0.5, %v2938_v47  ;;  %v6175_v31 = vpop.permute.xlu0 %3103 }
 0x200   : > { %5124 = vtanh.f32 %v2877_v39  ;;  %3263 = vrot.lane.b32.xlu0 %v6121_v56, %s5241_s12 }
 0x201   : > { %v2878_v4 = vsel %vm2834_vm2, %v2846_v49, %v4738_v36  ;;  %v6131_v8 = vsel %vm2834_vm2, %v2970_v59, %v5119_v54  ;;  %v6179_v32 = vpop.permute.xlu1 %3105 }
 0x202   : > { %v5121_v1 = vpop.eup %5120  ;;  %5126 = vtanh.f32 %v2878_v4  ;;  %v2721_v42 = vpop.f32.mrb[24].mxu0  ;;  %3265 = vrot.lane.b32.xlu1 %v6131_v8, %s5241_s12 }
 0x203   : > { %v4740_v2 = vadd.f32 %v4739_v58, %v2721_v42  ;;  %v2723_v25 = vpop.f32.mrb[25].mxu0  ;;  %v2939_v28 = vmul.f32 0.5, %v5121_v1 }
 0x204   : > { %v5123_v30 = vpop.eup %5122  ;;  %v2724_v33 = vpop.f32.mrb[26].mxu0 }
 0x205   : > { %v2847_v34 = vmul.f32 0.5, %v4740_v2  ;;  %v4742_v37 = vadd.f32 %v4741_v16, %v2724_v33  ;;  %v2726_v40 = vpop.f32.mrb[27].mxu0  ;;  %v2971_v46 = vadd.f32 0.5, %v2939_v28  ;;  %v2940_v44 = vmul.f32 0.5, %v5123_v30 }
 0x207   : > { %v2879_v50 = vsel %vm2834_vm2, %v2847_v34, %v4740_v2  ;;  %v2848_v51 = vmul.f32 0.5, %v4742_v37  ;;  %v6145_v55 = vsel %vm2834_vm2, %v2971_v46, %v5121_v1  ;;  %v2972_v6 = vadd.f32 0.5, %v2940_v44 }
 0x208   : > { %5128 = vtanh.f32 %v2879_v50  ;;  %3267 = vrot.lane.b32.xlu0 %v6145_v55, %s5241_s12 }
 0x209   : > { %v2880_v48 = vsel %vm2834_vm2, %v2848_v51, %v4742_v37  ;;  %v6159_v62 = vsel %vm2834_vm2, %v2972_v6, %v5123_v30  ;;  %v6191_v30 = vpop.permute.xlu0 %3107  ;;  %v6197_v51 = vpop.permute.xlu1 %3109 }
 0x20a   : > { %v5125_v63 = vpop.eup %5124  ;;  %5130 = vtanh.f32 %v2880_v48  ;;  %v2729_v0 = vpop.f32.mrb[28].mxu0  ;;  %3269 = vrot.lane.b32.xlu1 %v6159_v62, %s5241_s12 }
 0x20b   : > { %v4744_v5 = vadd.f32 %v4743_v60, %v2729_v0  ;;  %v2731_v10 = vpop.f32.mrb[29].mxu0  ;;  %v2941_v7 = vmul.f32 0.5, %v5125_v63 }
 0x20c   : > { %v5127_v9 = vpop.eup %5126  ;;  %v2732_v15 = vpop.f32.mrb[30].mxu0 }
 0x20d   : > { %v2849_v17 = vmul.f32 0.5, %v4744_v5  ;;  %v4746_v21 = vadd.f32 %v4745_v3, %v2732_v15  ;;  %v2734_v23 = vpop.f32.mrb[31].mxu0  ;;  %v2973_v24 = vadd.f32 0.5, %v2941_v7  ;;  %v2942_v26 = vmul.f32 0.5, %v5127_v9  ;;  %v6203_v48 = vpop.permute.xlu0 %3111 }
 0x20f   : > { %v2881_v27 = vsel %vm2834_vm2, %v2849_v17, %v4744_v5  ;;  %v2850_v29 = vmul.f32 0.5, %v4746_v21  ;;  %v6173_v12 = vsel %vm2834_vm2, %v2973_v24, %v5125_v63  ;;  %v2974_v54 = vadd.f32 0.5, %v2942_v26 }
 0x210   : > { %5132 = vtanh.f32 %v2881_v27  ;;  %3271 = vrot.lane.b32.xlu0 %v6173_v12, %s5241_s12 }
 0x211   : > { %v2882_v36 = vsel %vm2834_vm2, %v2850_v29, %v4746_v21  ;;  %v6185_v35 = vsel %vm2834_vm2, %v2974_v54, %v5127_v9  ;;  %v1711_v41 = vpop.f32.mrb[32].mxu1  ;;  %v6215_v54 = vpop.permute.xlu1 %3113 }
 0x212   : > { %v5129_v47 = vpop.eup %5128  ;;  %5134 = vtanh.f32 %v2882_v36  ;;  %v2737_v39 = vpop.f32.mrb[32].mxu0  ;;  %3273 = vrot.lane.b32.xlu1 %v6185_v35, %s5241_s12  ;;  %v4747_v49 = vadd.f32 %v6038_v18, %v1711_v41 }
 0x213   : > { %v1713_v59 = vpop.f32.mrb[33].mxu1  ;;  %v2739_v58 = vpop.f32.mrb[33].mxu0  ;;  %v2943_v1 = vmul.f32 0.5, %v5129_v47 }
 0x214   : > { %v1714_v4 = vpop.f32.mrb[34].mxu1  ;;  %v5131_v42 = vpop.eup %5130  ;;  %v4748_v16 = vadd.f32 %v4747_v49, %v2737_v39 }
 0x215   : > { %v4749_v2 = vadd.f32 %v6038_v18, %v1714_v4  ;;  %v2740_v25 = vpop.f32.mrb[34].mxu0  ;;  %v1716_v28 = vpop.f32.mrb[35].mxu1  ;;  %v2975_v34 = vadd.f32 0.5, %v2943_v1  ;;  %v2944_v37 = vmul.f32 0.5, %v5131_v42 }
 0x216   : > { %v2742_v33 = vpop.f32.mrb[35].mxu0  ;;  %v2851_v40 = vmul.f32 0.5, %v4748_v16  ;;  %v6221_v4 = vpop.permute.xlu0 %3115 }
 0x217   : > { %v4750_v46 = vadd.f32 %v4749_v2, %v2740_v25  ;;  %v6195_v44 = vsel %vm2834_vm2, %v2975_v34, %v5129_v47  ;;  %v2976_v50 = vadd.f32 0.5, %v2944_v37 }
 0x218   : > { %v2883_v6 = vsel %vm2834_vm2, %v2851_v40, %v4748_v16  ;;  %3275 = vrot.lane.b32.xlu0 %v6195_v44, %s5241_s12  ;;  %v6227_v16 = vpop.permute.xlu1 %3117 }
 0x219   : > { %v2852_v60 = vmul.f32 0.5, %v4750_v46  ;;  %5136 = vtanh.f32 %v2883_v6  ;;  %v6207_v63 = vsel %vm2834_vm2, %v2976_v50, %v5131_v42  ;;  %v1719_v0 = vpop.f32.mrb[36].mxu1 }
 0x21a   : > { %v5133_v3 = vpop.eup %5132  ;;  %v2745_v10 = vpop.f32.mrb[36].mxu0  ;;  %3277 = vrot.lane.b32.xlu1 %v6207_v63, %s5241_s12  ;;  %v4751_v7 = vadd.f32 %v6038_v18, %v1719_v0 }
 0x21b   : > { %v2884_v5 = vsel %vm2834_vm2, %v2852_v60, %v4750_v46  ;;  %v1721_v9 = vpop.f32.mrb[37].mxu1  ;;  %v2747_v15 = vpop.f32.mrb[37].mxu0  ;;  %v2945_v21 = vmul.f32 0.5, %v5133_v3 }
 0x21c   : > { %5138 = vtanh.f32 %v2884_v5  ;;  %v1722_v17 = vpop.f32.mrb[38].mxu1  ;;  %v5135_v23 = vpop.eup %5134  ;;  %v4752_v24 = vadd.f32 %v4751_v7, %v2745_v10 }
 0x21d   : > { %v4753_v26 = vadd.f32 %v6038_v18, %v1722_v17  ;;  %v2748_v27 = vpop.f32.mrb[38].mxu0  ;;  %v1724_v29 = vpop.f32.mrb[39].mxu1  ;;  %v2977_v41 = vadd.f32 0.5, %v2945_v21  ;;  %v2946_v47 = vmul.f32 0.5, %v5135_v23 }
 0x21e   : > { %v2750_v36 = vpop.f32.mrb[39].mxu0  ;;  %v2853_v39 = vmul.f32 0.5, %v4752_v24  ;;  %v6239_v7 = vpop.permute.xlu0 %3119 }
 0x21f   : > { %v4754_v49 = vadd.f32 %v4753_v26, %v2748_v27  ;;  %v6219_v59 = vsel %vm2834_vm2, %v2977_v41, %v5133_v3  ;;  %v2978_v58 = vadd.f32 0.5, %v2946_v47 }
 0x220   : > { %v2885_v1 = vsel %vm2834_vm2, %v2853_v39, %v4752_v24  ;;  %3279 = vrot.lane.b32.xlu0 %v6219_v59, %s5241_s12  ;;  %v6241_v24 = vpop.permute.xlu1 %3121 }
 0x221   : > { %v2854_v42 = vmul.f32 0.5, %v4754_v49  ;;  %5140 = vtanh.f32 %v2885_v1  ;;  %v6231_v2 = vsel %vm2834_vm2, %v2978_v58, %v5135_v23  ;;  %v1727_v25 = vpop.f32.mrb[40].mxu1 }
 0x222   : > { %v2753_v33 = vpop.f32.mrb[40].mxu0  ;;  %3281 = vrot.lane.b32.xlu1 %v6231_v2, %s5241_s12  ;;  %v4755_v34 = vadd.f32 %v6038_v18, %v1727_v25  ;;  %v1729_v37 = vpop.f32.mrb[41].mxu1 }
 0x223   : > { %v2886_v28 = vsel %vm2834_vm2, %v2854_v42, %v4754_v49  ;;  %v5137_v40 = vpop.eup %5136  ;;  %v2755_v46 = vpop.f32.mrb[41].mxu0 }
 0x224   : > { %5142 = vtanh.f32 %v2886_v28  ;;  %v1730_v50 = vpop.f32.mrb[42].mxu1  ;;  %v4756_v6 = vadd.f32 %v4755_v34, %v2753_v33  ;;  %v2756_v0 = vpop.f32.mrb[42].mxu0  ;;  %v2947_v5 = vmul.f32 0.5, %v5137_v40 }
 0x225   : > { %v4757_v60 = vadd.f32 %v6038_v18, %v1730_v50  ;;  %v1732_v3 = vpop.f32.mrb[43].mxu1  ;;  %v2758_v9 = vpop.f32.mrb[43].mxu0 }
 0x226   : > { %v5139_v10 = vpop.eup %5138  ;;  %v2855_v15 = vmul.f32 0.5, %v4756_v6  ;;  %v2979_v21 = vadd.f32 0.5, %v2947_v5  ;;  %v6249_v41 = vpop.permute.xlu0 %3123 }
 0x227   : > { %v4758_v17 = vadd.f32 %v4757_v60, %v2756_v0  ;;  %v2948_v23 = vmul.f32 0.5, %v5139_v10  ;;  %v6263_v60 = vpop.permute.xlu1 %3125 }
 0x228   : > { %v2887_v26 = vsel %vm2834_vm2, %v2855_v15, %v4756_v6  ;;  %v6247_v29 = vsel %vm2834_vm2, %v2979_v21, %v5137_v40 }
 0x229   : > { %v2856_v27 = vmul.f32 0.5, %v4758_v17  ;;  %v2980_v36 = vadd.f32 0.5, %v2948_v23  ;;  %5144 = vtanh.f32 %v2887_v26  ;;  %3283 = vrot.lane.b32.xlu0 %v6247_v29, %s5241_s12  ;;  %v1735_v47 = vpop.f32.mrb[44].mxu1 }
 0x22a   : > { %v2761_v49 = vpop.f32.mrb[44].mxu0  ;;  %v4759_v58 = vadd.f32 %v6038_v18, %v1735_v47  ;;  %v1737_v42 = vpop.f32.mrb[45].mxu1 }
 0x22b   : > { %v2888_v39 = vsel %vm2834_vm2, %v2856_v27, %v4758_v17  ;;  %v6258_v1 = vsel %vm2834_vm2, %v2980_v36, %v5139_v10  ;;  %v5141_v25 = vpop.eup %5140  ;;  %v2763_v28 = vpop.f32.mrb[45].mxu0 }
 0x22c   : > { %5146 = vtanh.f32 %v2888_v39  ;;  %3285 = vrot.lane.b32.xlu1 %v6258_v1, %s5241_s12  ;;  %v1738_v33 = vpop.f32.mrb[46].mxu1  ;;  %v4760_v34 = vadd.f32 %v4759_v58, %v2761_v49  ;;  %v2764_v37 = vpop.f32.mrb[46].mxu0  ;;  %v2949_v50 = vmul.f32 0.5, %v5141_v25 }
 0x22d   : > { %v4761_v40 = vadd.f32 %v6038_v18, %v1738_v33  ;;  %v1740_v46 = vpop.f32.mrb[47].mxu1  ;;  %v2766_v0 = vpop.f32.mrb[47].mxu0 }
 0x22e   : > { %v5143_v6 = vpop.eup %5142  ;;  %v2857_v3 = vmul.f32 0.5, %v4760_v34  ;;  %v2981_v10 = vadd.f32 0.5, %v2949_v50  ;;  %v6267_v21 = vpop.permute.xlu0 %3127 }
 0x22f   : > { %v4762_v5 = vadd.f32 %v4761_v40, %v2764_v37  ;;  %v2950_v9 = vmul.f32 0.5, %v5143_v6  ;;  %6819 = vst [vmem:[#allocation2_spill] sm:$0xff] %v6267_v21  ;;  %v6275_v36 = vpop.permute.xlu1 %3129 }
 0x230   : > { %v2889_v15 = vsel %vm2834_vm2, %v2857_v3, %v4760_v34  ;;  %v6271_v23 = vsel %vm2834_vm2, %v2981_v10, %v5141_v25  ;;  %6820 = vst [vmem:[#allocation3_spill] sm:$0xff] %v6275_v36 }
 0x231   : > { %v2858_v17 = vmul.f32 0.5, %v4762_v5  ;;  %v2982_v26 = vadd.f32 0.5, %v2950_v9  ;;  %5148 = vtanh.f32 %v2889_v15  ;;  %3287 = vrot.lane.b32.xlu0 %v6271_v23, %s5241_s12  ;;  %v1743_v27 = vpop.f32.mrb[48].mxu1 }
 0x232   : > { %v2769_v39 = vpop.f32.mrb[48].mxu0  ;;  %v4763_v49 = vadd.f32 %v6038_v18, %v1743_v27  ;;  %v1745_v42 = vpop.f32.mrb[49].mxu1 }
 0x233   : > { %v2890_v47 = vsel %vm2834_vm2, %v2858_v17, %v4762_v5  ;;  %v6282_v58 = vsel %vm2834_vm2, %v2982_v26, %v5143_v6  ;;  %v5145_v25 = vpop.eup %5144  ;;  %v2771_v28 = vpop.f32.mrb[49].mxu0 }
 0x234   : > { %5150 = vtanh.f32 %v2890_v47  ;;  %3289 = vrot.lane.b32.xlu1 %v6282_v58, %s5241_s12  ;;  %v1746_v33 = vpop.f32.mrb[50].mxu1  ;;  %v4764_v34 = vadd.f32 %v4763_v49, %v2769_v39  ;;  %v2772_v37 = vpop.f32.mrb[50].mxu0  ;;  %v2951_v50 = vmul.f32 0.5, %v5145_v25 }
 0x235   : > { %v4765_v40 = vadd.f32 %v6038_v18, %v1746_v33  ;;  %v1748_v46 = vpop.f32.mrb[51].mxu1  ;;  %v2774_v3 = vpop.f32.mrb[51].mxu0 }
 0x236   : > { %v5147_v0 = vpop.eup %5146  ;;  %v6287_v5 = vpop.permute.xlu0 %3131  ;;  %v2859_v6 = vmul.f32 0.5, %v4764_v34  ;;  %v2983_v9 = vadd.f32 0.5, %v2951_v50 }
 0x237   : > { %6821 = vst [vmem:[#allocation4_spill] sm:$0xff] %v6287_v5  ;;  %v4766_v10 = vadd.f32 %v4765_v40, %v2772_v37  ;;  %v2952_v15 = vmul.f32 0.5, %v5147_v0  ;;  %v6295_v47 = vpop.permute.xlu1 %3133 }
 0x238   : > { %v2891_v17 = vsel %vm2834_vm2, %v2859_v6, %v4764_v34  ;;  %v6293_v27 = vsel %vm2834_vm2, %v2983_v9, %v5145_v25  ;;  %6822 = vst [vmem:[#allocation5_spill] sm:$0xff] %v6295_v47 }
 0x239   : > { %v2860_v26 = vmul.f32 0.5, %v4766_v10  ;;  %v2984_v39 = vadd.f32 0.5, %v2952_v15  ;;  %5152 = vtanh.f32 %v2891_v17  ;;  %3291 = vrot.lane.b32.xlu0 %v6293_v27, %s5241_s12  ;;  %v1751_v49 = vpop.f32.mrb[52].mxu1 }
 0x23a   : > { %v6299_v42 = vpop.permute.xlu0 %3135  ;;  %v2777_v33 = vpop.f32.mrb[52].mxu0  ;;  %v4767_v34 = vadd.f32 %v6038_v18, %v1751_v49 }
 0x23b   : > { %6823 = vst [vmem:[#allocation6_spill] sm:$0xff] %v6299_v42  ;;  %v2892_v28 = vsel %vm2834_vm2, %v2860_v26, %v4766_v10  ;;  %v6306_v25 = vsel %vm2834_vm2, %v2984_v39, %v5147_v0  ;;  %v1753_v37 = vpop.f32.mrb[53].mxu1  ;;  %v5149_v40 = vpop.eup %5148 }
 0x23c   : > { %5154 = vtanh.f32 %v2892_v28  ;;  %v2779_v46 = vpop.f32.mrb[53].mxu0  ;;  %3293 = vrot.lane.b32.xlu1 %v6306_v25, %s5241_s12  ;;  %v1754_v50 = vpop.f32.mrb[54].mxu1  ;;  %v4768_v3 = vadd.f32 %v4767_v34, %v2777_v33  ;;  %v2953_v15 = vmul.f32 0.5, %v5149_v40 }
 0x23d   : > { %v2780_v6 = vpop.f32.mrb[54].mxu0  ;;  %v4769_v9 = vadd.f32 %v6038_v18, %v1754_v50  ;;  %v1756_v10 = vpop.f32.mrb[55].mxu1 }
 0x23e   : > { %v5151_v17 = vpop.eup %5150  ;;  %v2782_v26 = vpop.f32.mrb[55].mxu0  ;;  %v2861_v0 = vmul.f32 0.5, %v4768_v3  ;;  %v2985_v37 = vadd.f32 0.5, %v2953_v15 }
 0x23f   : > { %v6311_v49 = vpop.permute.xlu1 %3137  ;;  %v4770_v39 = vadd.f32 %v4769_v9, %v2780_v6  ;;  %v2954_v42 = vmul.f32 0.5, %v5151_v17  ;;  %v6319_v50 = vpop.permute.xlu0 %3139 }
 0x240   : > { %6824 = vst [vmem:[#allocation7_spill] sm:$0xff] %v6311_v49  ;;  %v2893_v28 = vsel %vm2834_vm2, %v2861_v0, %v4768_v3  ;;  %v6317_v33 = vsel %vm2834_vm2, %v2985_v37, %v5149_v40  ;;  %6825 = vst [vmem:[#allocation8_spill] sm:$0xff] %v6319_v50 }
 0x241   : > { %v2862_v46 = vmul.f32 0.5, %v4770_v39  ;;  %v2986_v34 = vadd.f32 0.5, %v2954_v42  ;;  %5156 = vtanh.f32 %v2893_v28  ;;  %3295 = vrot.lane.b32.xlu0 %v6317_v33, %s5241_s12  ;;  %v1759_v10 = vpop.f32.mrb[56].mxu1 }
 0x242   : > { %v2785_v9 = vpop.f32.mrb[56].mxu0  ;;  %v4771_v3 = vadd.f32 %v6038_v18, %v1759_v10  ;;  %v1761_v42 = vpop.f32.mrb[57].mxu1 }
 0x243   : > { %v6323_v26 = vpop.permute.xlu1 %3141  ;;  %v2894_v6 = vsel %vm2834_vm2, %v2862_v46, %v4770_v39  ;;  %v6330_v40 = vsel %vm2834_vm2, %v2986_v34, %v5151_v17  ;;  %v5153_v15 = vpop.eup %5152 }
 0x244   : > { %6826 = vst [vmem:[#allocation9_spill] sm:$0xff] %v6323_v26  ;;  %5158 = vtanh.f32 %v2894_v6  ;;  %v2787_v0 = vpop.f32.mrb[57].mxu0  ;;  %3297 = vrot.lane.b32.xlu1 %v6330_v40, %s5241_s12  ;;  %v1762_v37 = vpop.f32.mrb[58].mxu1  ;;  %v4772_v28 = vadd.f32 %v4771_v3, %v2785_v9  ;;  %v2955_v46 = vmul.f32 0.5, %v5153_v15 }
 0x245   : > { %v2788_v26 = vpop.f32.mrb[58].mxu0  ;;  %v4773_v50 = vadd.f32 %v6038_v18, %v1762_v37  ;;  %v1764_v39 = vpop.f32.mrb[59].mxu1 }
 0x246   : > { %v5155_v49 = vpop.eup %5154  ;;  %v2790_v10 = vpop.f32.mrb[59].mxu0  ;;  %v2863_v47 = vmul.f32 0.5, %v4772_v28  ;;  %v2987_v17 = vadd.f32 0.5, %v2955_v46 }
 0x247   : > { %v4774_v5 = vadd.f32 %v4773_v50, %v2788_v26  ;;  %v2956_v34 = vmul.f32 0.5, %v5155_v49  ;;  %v6341_v3 = vpop.permute.xlu0 %3143  ;;  %v6345_v39 = vpop.permute.xlu1 %3145 }
 0x248   : > { %v2895_v6 = vsel %vm2834_vm2, %v2863_v47, %v4772_v28  ;;  %v6339_v0 = vsel %vm2834_vm2, %v2987_v17, %v5153_v15  ;;  %6827 = vst [vmem:[#allocation10_spill] sm:$0xff] %v6341_v3  ;;  %6828 = vst [vmem:[#allocation11_spill] sm:$0xff] %v6345_v39 }
 0x249   : > { %v2864_v42 = vmul.f32 0.5, %v4774_v5  ;;  %v2988_v9 = vadd.f32 0.5, %v2956_v34  ;;  %5160 = vtanh.f32 %v2895_v6  ;;  %3299 = vrot.lane.b32.xlu0 %v6339_v0, %s5241_s12  ;;  %v1767_v37 = vpop.f32.mrb[60].mxu1 }
 0x24a   : > { %v2793_v26 = vpop.f32.mrb[60].mxu0  ;;  %v4775_v47 = vadd.f32 %v6038_v18, %v1767_v37  ;;  %v1769_v28 = vpop.f32.mrb[61].mxu1 }
 0x24b   : > { %v2896_v50 = vsel %vm2834_vm2, %v2864_v42, %v4774_v5  ;;  %v6352_v15 = vsel %vm2834_vm2, %v2988_v9, %v5155_v49  ;;  %v5157_v46 = vpop.eup %5156  ;;  %v2795_v10 = vpop.f32.mrb[61].mxu0 }
 0x24c   : > { %5162 = vtanh.f32 %v2896_v50  ;;  %3301 = vrot.lane.b32.xlu1 %v6352_v15, %s5241_s12  ;;  %v1770_v17 = vpop.f32.mrb[62].mxu1  ;;  %v4776_v34 = vadd.f32 %v4775_v47, %v2793_v26  ;;  %v2796_v6 = vpop.f32.mrb[62].mxu0  ;;  %v2957_v42 = vmul.f32 0.5, %v5157_v46 }
 0x24d   : > { %v4777_v39 = vadd.f32 %v6038_v18, %v1770_v17  ;;  %v1772_v5 = vpop.f32.mrb[63].mxu1  ;;  %v2798_v37 = vpop.f32.mrb[63].mxu0 }
 0x24e   : > { %v5159_v3 = vpop.eup %5158  ;;  %v2865_v36 = vmul.f32 0.5, %v4776_v34  ;;  %v2989_v49 = vadd.f32 0.5, %v2957_v42  ;;  %v6357_v28 = vpop.permute.xlu0 %3147 }
 0x24f   : > { %v4778_v21 = vadd.f32 %v4777_v39, %v2796_v6  ;;  %v2958_v9 = vmul.f32 0.5, %v5159_v3  ;;  %v6365_v18 = vpop.permute.xlu1 %3149 }
 0x250   : > { %v2897_v50 = vsel %vm2834_vm2, %v2865_v36, %v4776_v34  ;;  %v6363_v26 = vsel %vm2834_vm2, %v2989_v49, %v5157_v46 }
 0x251   : > { %v2866_v10 = vmul.f32 0.5, %v4778_v21  ;;  %v2990_v47 = vadd.f32 0.5, %v2958_v9  ;;  %5164 = vtanh.f32 %v2897_v50  ;;  %3303 = vrot.lane.b32.xlu0 %v6363_v26, %s5241_s12 }
 0x252   : > { %v6377_v34 = vpop.permute.xlu0 %3151 }
 0x253   : > { %v2898_v39 = vsel %vm2834_vm2, %v2866_v10, %v4778_v21  ;;  %v6373_v17 = vsel %vm2834_vm2, %v2990_v47, %v5159_v3  ;;  %v5161_v36 = vpop.eup %5160  ;;  %v6379_v37 = vpop.permute.xlu1 %3153 }
 0x254   : > { %5166 = vtanh.f32 %v2898_v39  ;;  %3305 = vrot.lane.b32.xlu1 %v6373_v17, %s5241_s12  ;;  %v2959_v46 = vmul.f32 0.5, %v5161_v36  ;;  %6829 = vst [vmem:[#allocation12_spill] sm:$0xff] %v6379_v37 }
 0x256   : > { %v5163_v6 = vpop.eup %5162  ;;  %v2991_v5 = vadd.f32 0.5, %v2959_v46 }
 0x257   : > { %v2960_v42 = vmul.f32 0.5, %v5163_v6 }
 0x258   : > { %v6383_v21 = vsel %vm2834_vm2, %v2991_v5, %v5161_v36 }
 0x259   : > { %v2992_v49 = vadd.f32 0.5, %v2960_v42  ;;  %3307 = vrot.lane.b32.xlu0 %v6383_v21, %s5241_s12 }
 0x25a   : > { %v3252_v9 = vpop.permute.xlu0 %3251 }
 0x25b   : > { %v6389_v3 = vsel %vm2834_vm2, %v2992_v49, %v5163_v6  ;;  %v5165_v50 = vpop.eup %5164  ;;  %v3347_v10 = vmul.f32 %v3252_v9, %v6061_v43 }
 0x25c   : > { %3309 = vrot.lane.b32.xlu1 %v6389_v3, %s5241_s12  ;;  %v2961_v47 = vmul.f32 0.5, %v5165_v50  ;;  %v3254_v39 = vpop.permute.xlu1 %3253 }
 0x25d   : > { %v3348_v36 = vmul.f32 %v3254_v39, %v6071_v53  ;;  %3411 = vrot.lane.b32.xlu0 %v3347_v10, %s5241_s12 }
 0x25e   : > { %v5167_v46 = vpop.eup %5166  ;;  %v2993_v5 = vadd.f32 0.5, %v2961_v47 }
 0x25f   : > { %v2962_v42 = vmul.f32 0.5, %v5167_v46 }
 0x260   : > { %3413 = vrot.lane.b32.xlu1 %v3348_v36, %s5241_s12  ;;  %v6399_v6 = vsel %vm2834_vm2, %v2993_v5, %v5165_v50 }
 0x261   : > { %v2994_v49 = vadd.f32 0.5, %v2962_v42  ;;  %3311 = vrot.lane.b32.xlu0 %v6399_v6, %s5241_s12 }
 0x262   : > { %v3256_v37 = vpop.permute.xlu0 %3255 }
 0x263   : > { %v6405_v9 = vsel %vm2834_vm2, %v2994_v49, %v5167_v46  ;;  %v3349_v39 = vmul.f32 %v3256_v37, %v6081_v38 }
 0x264   : > { %3313 = vrot.lane.b32.xlu1 %v6405_v9, %s5241_s12  ;;  %v3258_v10 = vpop.permute.xlu1 %3257 }
 0x265   : > { %v3350_v47 = vmul.f32 %v3258_v10, %v6091_v45  ;;  %3415 = vrot.lane.b32.xlu0 %v3349_v39, %s5241_s12 }
 0x268   : > { %3417 = vrot.lane.b32.xlu1 %v3350_v47, %s5241_s12 }
 0x26a   : > { %v3260_v50 = vpop.permute.xlu0 %3259 }
 0x26b   : > { %v3351_v36 = vmul.f32 %v3260_v50, %v6101_v13 }
 0x26c   : > { %v3262_v5 = vpop.permute.xlu1 %3261 }
 0x26d   : > { %v3352_v20 = vmul.f32 %v3262_v5, %v6111_v19  ;;  %3419 = vrot.lane.b32.xlu0 %v3351_v36, %s5241_s12 }
 0x26f   : > { %3421 = vrot.lane.b32.xlu1 %v3352_v20, %s5241_s12 }
 0x272   : > { %v3264_v37 = vpop.permute.xlu0 %3263 }
 0x273   : > { %v3353_v46 = vmul.f32 %v3264_v37, %v6121_v56 }
 0x274   : > { %v3266_v42 = vpop.permute.xlu1 %3265 }
 0x275   : > { %v3354_v49 = vmul.f32 %v3266_v42, %v6131_v8  ;;  %3423 = vrot.lane.b32.xlu0 %v3353_v46, %s5241_s12 }
 0x277   : > { %3425 = vrot.lane.b32.xlu1 %v3354_v49, %s5241_s12 }
 0x27a   : > { %v3268_v39 = vpop.permute.xlu0 %3267 }
 0x27b   : > { %v3355_v10 = vmul.f32 %v3268_v39, %v6145_v55 }
 0x27c   : > { %v3270_v47 = vpop.permute.xlu1 %3269 }
 0x27d   : > { %v3356_v50 = vmul.f32 %v3270_v47, %v6159_v62  ;;  %3427 = vrot.lane.b32.xlu0 %v3355_v10, %s5241_s12 }
 0x27f   : > { %3429 = vrot.lane.b32.xlu1 %v3356_v50, %s5241_s12 }
 0x282   : > { %v3272_v36 = vpop.permute.xlu0 %3271 }
 0x283   : > { %v3357_v5 = vmul.f32 %v3272_v36, %v6173_v12 }
 0x284   : > { %v3274_v20 = vpop.permute.xlu1 %3273 }
 0x285   : > { %v3358_v37 = vmul.f32 %v3274_v20, %v6185_v35  ;;  %3431 = vrot.lane.b32.xlu0 %v3357_v5, %s5241_s12 }
 0x287   : > { %3433 = vrot.lane.b32.xlu1 %v3358_v37, %s5241_s12 }
 0x28a   : > { %v3276_v46 = vpop.permute.xlu0 %3275 }
 0x28b   : > { %v3359_v42 = vmul.f32 %v3276_v46, %v6195_v44 }
 0x28c   : > { %v3278_v49 = vpop.permute.xlu1 %3277 }
 0x28d   : > { %v3360_v39 = vmul.f32 %v3278_v49, %v6207_v63  ;;  %3435 = vrot.lane.b32.xlu0 %v3359_v42, %s5241_s12 }
 0x28f   : > { %3437 = vrot.lane.b32.xlu1 %v3360_v39, %s5241_s12 }
 0x292   : > { %v3280_v10 = vpop.permute.xlu0 %3279 }
 0x293   : > { %v3361_v47 = vmul.f32 %v3280_v10, %v6219_v59 }
 0x294   : > { %v3282_v50 = vpop.permute.xlu1 %3281 }
 0x295   : > { %v3362_v36 = vmul.f32 %v3282_v50, %v6231_v2  ;;  %3439 = vrot.lane.b32.xlu0 %v3361_v47, %s5241_s12 }
 0x297   : > { %3441 = vrot.lane.b32.xlu1 %v3362_v36, %s5241_s12 }
 0x29b   : > { %v3284_v5 = vpop.permute.xlu0 %3283 }
 0x29c   : > { %v3363_v20 = vmul.f32 %v3284_v5, %v6247_v29 }
 0x29e   : > { %v3286_v37 = vpop.permute.xlu1 %3285  ;;  %3443 = vrot.lane.b32.xlu0 %v3363_v20, %s5241_s12 }
 0x29f   : > { %v3364_v46 = vmul.f32 %v3286_v37, %v6258_v1 }
 0x2a1   : > { %3445 = vrot.lane.b32.xlu1 %v3364_v46, %s5241_s12 }
 0x2a3   : > { %v3288_v42 = vpop.permute.xlu0 %3287 }
 0x2a4   : > { %v3365_v49 = vmul.f32 %v3288_v42, %v6271_v23 }
 0x2a6   : > { %v3290_v39 = vpop.permute.xlu1 %3289  ;;  %3447 = vrot.lane.b32.xlu0 %v3365_v49, %s5241_s12 }
 0x2a7   : > { %v3366_v10 = vmul.f32 %v3290_v39, %v6282_v58 }
 0x2a9   : > { %3449 = vrot.lane.b32.xlu1 %v3366_v10, %s5241_s12 }
 0x2ab   : > { %v3292_v47 = vpop.permute.xlu0 %3291 }
 0x2ac   : > { %v3367_v50 = vmul.f32 %v3292_v47, %v6293_v27 }
 0x2ae   : > { %v3294_v36 = vpop.permute.xlu1 %3293  ;;  %3451 = vrot.lane.b32.xlu0 %v3367_v50, %s5241_s12 }
 0x2af   : > { %v3368_v5 = vmul.f32 %v3294_v36, %v6306_v25 }
 0x2b1   : > { %3453 = vrot.lane.b32.xlu1 %v3368_v5, %s5241_s12 }
 0x2b3   : > { %v3296_v20 = vpop.permute.xlu0 %3295 }
 0x2b4   : > { %v3369_v37 = vmul.f32 %v3296_v20, %v6317_v33 }
 0x2b6   : > { %v3298_v46 = vpop.permute.xlu1 %3297  ;;  %3455 = vrot.lane.b32.xlu0 %v3369_v37, %s5241_s12 }
 0x2b7   : > { %v3370_v42 = vmul.f32 %v3298_v46, %v6330_v40 }
 0x2b9   : > { %3457 = vrot.lane.b32.xlu1 %v3370_v42, %s5241_s12 }
 0x2bb   : > { %v3300_v49 = vpop.permute.xlu0 %3299 }
 0x2bc   : > { %v3371_v39 = vmul.f32 %v3300_v49, %v6339_v0  ;;  %v3187_v49 = vmul.f32 %v6133_v14, %v6061_v43 }
 0x2be   : > { %v3302_v10 = vpop.permute.xlu1 %3301  ;;  %3459 = vrot.lane.b32.xlu0 %v3371_v39, %s5241_s12 }
 0x2bf   : > { %v3372_v47 = vmul.f32 %v3302_v10, %v6352_v15 }
 0x2c1   : > { %3461 = vrot.lane.b32.xlu1 %v3372_v47, %s5241_s12  ;;  %v3188_v47 = vmul.f32 %v6147_v57, %v6071_v53 }
 0x2c3   : > { %v3304_v50 = vpop.permute.xlu0 %3303 }
 0x2c4   : > { %v3373_v36 = vmul.f32 %v3304_v50, %v6363_v26 }
 0x2c6   : > { %v3306_v5 = vpop.permute.xlu1 %3305  ;;  %3463 = vrot.lane.b32.xlu0 %v3373_v36, %s5241_s12 }
 0x2c7   : > { %v3374_v20 = vmul.f32 %v3306_v5, %v6373_v17 }
 0x2c9   : > { %3465 = vrot.lane.b32.xlu1 %v3374_v20, %s5241_s12 }
 0x2cb   : > { %v3308_v37 = vpop.permute.xlu0 %3307 }
 0x2cc   : > { %v3375_v46 = vmul.f32 %v3308_v37, %v6383_v21 }
 0x2ce   : > { %v3310_v42 = vpop.permute.xlu1 %3309  ;;  %3467 = vrot.lane.b32.xlu0 %v3375_v46, %s5241_s12  ;;  %v3189_v46 = vmul.f32 %v6139_v22, %v6081_v38 }
 0x2cf   : > { %v3376_v39 = vmul.f32 %v3310_v42, %v6389_v3  ;;  %v3412_v10 = vpop.permute.xlu0 %3411 }
 0x2d0   : > { %v3507_v50 = vadd.f32 %v3412_v10, %v3187_v49  ;;  %v3190_v49 = vmul.f32 %v6153_v61, %v6091_v45  ;;  %v3192_v61 = vmul.f32 %v6167_v52, %v6111_v19  ;;  %v3194_v52 = vmul.f32 %v6179_v32, %v6131_v8 }
 0x2d1   : > { %3469 = vrot.lane.b32.xlu1 %v3376_v39, %s5241_s12  ;;  %v3196_v32 = vmul.f32 %v6197_v51, %v6159_v62  ;;  %v3198_v51 = vmul.f32 %v6215_v54, %v6185_v35  ;;  %v3200_v54 = vmul.f32 %v6227_v16, %v6207_v63  ;;  %v3202_v16 = vmul.f32 %v6241_v24, %v6231_v2 }
 0x2d2   : > { %v3414_v36 = vpop.permute.xlu1 %3413  ;;  %5168 = vtanh.f32 %v3507_v50  ;;  %3988 = vrot.lane.b32.xlu0 %v3507_v50, %s5242_s14  ;;  %v3204_v24 = vmul.f32 %v6263_v60, %v6258_v1 }
 0x2d3   : > { %v3508_v5 = vadd.f32 %v3414_v36, %v3188_v47  ;;  %v3312_v20 = vpop.permute.xlu0 %3311  ;;  %v3191_v36 = vmul.f32 %v6165_v11, %v6101_v13  ;;  %v3193_v11 = vmul.f32 %v6175_v31, %v6121_v56  ;;  %v3195_v31 = vmul.f32 %v6191_v30, %v6145_v55 }
 0x2d4   : > { %v3377_v14 = vmul.f32 %v3312_v20, %v6399_v6  ;;  %v3197_v30 = vmul.f32 %v6203_v48, %v6173_v12  ;;  %v3199_v48 = vmul.f32 %v6221_v4, %v6195_v44  ;;  %v3201_v4 = vmul.f32 %v6239_v7, %v6219_v59 }
 0x2d5   : > { %5170 = vtanh.f32 %v3508_v5  ;;  %3990 = vrot.lane.b32.xlu1 %v3508_v5, %s5242_s14 }
 0x2d6   : > { %v3314_v37 = vpop.permute.xlu1 %3313  ;;  %3471 = vrot.lane.b32.xlu0 %v3377_v14, %s5241_s12 }
 0x2d7   : > { %v3378_v57 = vmul.f32 %v3314_v37, %v6405_v9  ;;  %v3416_v42 = vpop.permute.xlu0 %3415 }
 0x2d8   : > { %v3509_v39 = vadd.f32 %v3416_v42, %v3189_v46 }
 0x2d9   : > { %3473 = vrot.lane.b32.xlu1 %v3378_v57, %s5241_s12 }
 0x2da   : > { %v3418_v10 = vpop.permute.xlu1 %3417  ;;  %5172 = vtanh.f32 %v3509_v39  ;;  %3992 = vrot.lane.b32.xlu0 %v3509_v39, %s5242_s14 }
 0x2db   : > { %v3510_v47 = vadd.f32 %v3418_v10, %v3190_v49 }
 0x2dc   : > { %v5169_v50 = vpop.eup %5168 }
 0x2dd   : > { %5174 = vtanh.f32 %v3510_v47  ;;  %3994 = vrot.lane.b32.xlu1 %v3510_v47, %s5242_s14 }
 0x2de   : > { %3603 = vrot.lane.b32.xlu0 %v5169_v50, %s5241_s12 }
 0x2df   : > { %v5171_v22 = vpop.eup %5170  ;;  %v3420_v5 = vpop.permute.xlu0 %3419 }
 0x2e0   : > { %v3511_v20 = vadd.f32 %v3420_v5, %v3191_v36 }
 0x2e1   : > { %3605 = vrot.lane.b32.xlu1 %v5171_v22, %s5241_s12  ;;  %v3422_v14 = vpop.permute.xlu1 %3421 }
 0x2e2   : > { %v3512_v37 = vadd.f32 %v3422_v14, %v3192_v61  ;;  %3996 = vrot.lane.b32.xlu0 %v3511_v20, %s5242_s14  ;;  %5176 = vtanh.f32 %v3511_v20 }
 0x2e4   : > { %v5173_v46 = vpop.eup %5172  ;;  %5178 = vtanh.f32 %v3512_v37 }
 0x2e5   : > { %3998 = vrot.lane.b32.xlu1 %v3512_v37, %s5242_s14 }
 0x2e6   : > { %3607 = vrot.lane.b32.xlu0 %v5173_v46, %s5241_s12 }
 0x2e7   : > { %v5175_v57 = vpop.eup %5174  ;;  %v3424_v42 = vpop.permute.xlu0 %3423 }
 0x2e8   : > { %v3513_v49 = vadd.f32 %v3424_v42, %v3193_v11 }
 0x2e9   : > { %3609 = vrot.lane.b32.xlu1 %v5175_v57, %s5241_s12  ;;  %v3426_v39 = vpop.permute.xlu1 %3425 }
 0x2ea   : > { %v3514_v10 = vadd.f32 %v3426_v39, %v3194_v52  ;;  %4000 = vrot.lane.b32.xlu0 %v3513_v49, %s5242_s14  ;;  %5180 = vtanh.f32 %v3513_v49 }
 0x2ec   : > { %v5177_v47 = vpop.eup %5176  ;;  %5182 = vtanh.f32 %v3514_v10 }
 0x2ed   : > { %4002 = vrot.lane.b32.xlu1 %v3514_v10, %s5242_s14 }
 0x2ee   : > { %3611 = vrot.lane.b32.xlu0 %v5177_v47, %s5241_s12  ;;  %v5179_v50 = vpop.eup %5178 }
 0x2ef   : > { %v3428_v22 = vpop.permute.xlu0 %3427 }
 0x2f0   : > { %v3515_v36 = vadd.f32 %v3428_v22, %v3195_v31 }
 0x2f1   : > { %3613 = vrot.lane.b32.xlu1 %v5179_v50, %s5241_s12  ;;  %v3430_v5 = vpop.permute.xlu1 %3429 }
 0x2f2   : > { %v3516_v61 = vadd.f32 %v3430_v5, %v3196_v32  ;;  %4004 = vrot.lane.b32.xlu0 %v3515_v36, %s5242_s14  ;;  %5184 = vtanh.f32 %v3515_v36 }
 0x2f4   : > { %v5181_v20 = vpop.eup %5180  ;;  %5186 = vtanh.f32 %v3516_v61 }
 0x2f5   : > { %4006 = vrot.lane.b32.xlu1 %v3516_v61, %s5242_s14 }
 0x2f6   : > { %3615 = vrot.lane.b32.xlu0 %v5181_v20, %s5241_s12  ;;  %v5183_v14 = vpop.eup %5182  ;;  %v3203_v20 = vmul.f32 %v6249_v41, %v6247_v29 }
 0x2f7   : > { %v3432_v37 = vpop.permute.xlu0 %3431 }
 0x2f8   : > { %v3517_v46 = vadd.f32 %v3432_v37, %v3197_v30 }
 0x2f9   : > { %3617 = vrot.lane.b32.xlu1 %v5183_v14, %s5241_s12  ;;  %v3434_v57 = vpop.permute.xlu1 %3433 }
 0x2fa   : > { %v3518_v11 = vadd.f32 %v3434_v57, %v3198_v51  ;;  %4008 = vrot.lane.b32.xlu0 %v3517_v46, %s5242_s14  ;;  %5188 = vtanh.f32 %v3517_v46  ;;  %v6830_v57 = vld [vmem:[#allocation2_spill] sm:$0xff] }
 0x2fc   : > { %v5185_v42 = vpop.eup %5184  ;;  %5190 = vtanh.f32 %v3518_v11 }
 0x2fd   : > { %4010 = vrot.lane.b32.xlu1 %v3518_v11, %s5242_s14  ;;  %v3205_v11 = vmul.f32 %v6830_v57, %v6271_v23 }
 0x2fe   : > { %3619 = vrot.lane.b32.xlu0 %v5185_v42, %s5241_s12  ;;  %v5187_v52 = vpop.eup %5186 }
 0x2ff   : > { %v3436_v49 = vpop.permute.xlu0 %3435 }
 0x300   : > { %v3519_v39 = vadd.f32 %v3436_v49, %v3199_v48  ;;  %v6831_v48 = vld [vmem:[#allocation3_spill] sm:$0xff] }
 0x301   : > { %3621 = vrot.lane.b32.xlu1 %v5187_v52, %s5241_s12  ;;  %v3438_v10 = vpop.permute.xlu1 %3437  ;;  %v3206_v60 = vmul.f32 %v6831_v48, %v6282_v58 }
 0x302   : > { %v3520_v47 = vadd.f32 %v3438_v10, %v3200_v54  ;;  %4012 = vrot.lane.b32.xlu0 %v3519_v39, %s5242_s14  ;;  %5192 = vtanh.f32 %v3519_v39 }
 0x304   : > { %v5189_v31 = vpop.eup %5188  ;;  %5194 = vtanh.f32 %v3520_v47 }
 0x305   : > { %4014 = vrot.lane.b32.xlu1 %v3520_v47, %s5242_s14  ;;  %v6832_v47 = vld [vmem:[#allocation4_spill] sm:$0xff] }
 0x306   : > { %3623 = vrot.lane.b32.xlu0 %v5189_v31, %s5241_s12  ;;  %v5191_v50 = vpop.eup %5190  ;;  %v3207_v31 = vmul.f32 %v6832_v47, %v6293_v27 }
 0x307   : > { %v3440_v22 = vpop.permute.xlu0 %3439 }
 0x308   : > { %v3521_v32 = vadd.f32 %v3440_v22, %v3201_v4 }
 0x309   : > { %3625 = vrot.lane.b32.xlu1 %v5191_v50, %s5241_s12  ;;  %v3442_v36 = vpop.permute.xlu1 %3441  ;;  %v6833_v50 = vld [vmem:[#allocation5_spill] sm:$0xff] }
 0x30a   : > { %v3522_v5 = vadd.f32 %v3442_v36, %v3202_v16  ;;  %4016 = vrot.lane.b32.xlu0 %v3521_v32, %s5242_s14  ;;  %5196 = vtanh.f32 %v3521_v32  ;;  %v3208_v22 = vmul.f32 %v6833_v50, %v6306_v25 }
 0x30c   : > { %v5193_v61 = vpop.eup %5192  ;;  %5198 = vtanh.f32 %v3522_v5 }
 0x30d   : > { %4018 = vrot.lane.b32.xlu1 %v3522_v5, %s5242_s14 }
 0x30e   : > { %3627 = vrot.lane.b32.xlu0 %v5193_v61, %s5241_s12  ;;  %v5195_v7 = vpop.eup %5194 }
 0x310   : > { %v3444_v30 = vpop.permute.xlu0 %3443 }
 0x311   : > { %3629 = vrot.lane.b32.xlu1 %v5195_v7, %s5241_s12  ;;  %v3523_v14 = vadd.f32 %v3444_v30, %v3203_v20  ;;  %v6834_v7 = vld [vmem:[#allocation6_spill] sm:$0xff] }
 0x312   : > { %v3209_v20 = vmul.f32 %v6834_v7, %v6317_v33 }
 0x313   : > { %v3446_v37 = vpop.permute.xlu1 %3445  ;;  %5200 = vtanh.f32 %v3523_v14  ;;  %4020 = vrot.lane.b32.xlu0 %v3523_v14, %s5242_s14 }
 0x314   : > { %v3524_v51 = vadd.f32 %v3446_v37, %v3204_v24  ;;  %v5197_v46 = vpop.eup %5196  ;;  %v6835_v24 = vld [vmem:[#allocation7_spill] sm:$0xff] }
 0x315   : > { %v3210_v14 = vmul.f32 %v6835_v24, %v6330_v40  ;;  %v3216_v24 = vmul.f32 %v6365_v18, %v6389_v3 }
 0x316   : > { %5202 = vtanh.f32 %v3524_v51  ;;  %4022 = vrot.lane.b32.xlu1 %v3524_v51, %s5242_s14  ;;  %v5199_v41 = vpop.eup %5198 }
 0x317   : > { %3631 = vrot.lane.b32.xlu0 %v5197_v46, %s5241_s12 }
 0x318   : > { %v3448_v42 = vpop.permute.xlu0 %3447 }
 0x319   : > { %v3525_v52 = vadd.f32 %v3448_v42, %v3205_v11 }
 0x31a   : > { %3633 = vrot.lane.b32.xlu1 %v5199_v41, %s5241_s12  ;;  %v6836_v41 = vld [vmem:[#allocation8_spill] sm:$0xff] }
 0x31b   : > { %v3450_v49 = vpop.permute.xlu1 %3449  ;;  %5204 = vtanh.f32 %v3525_v52  ;;  %4024 = vrot.lane.b32.xlu0 %v3525_v52, %s5242_s14  ;;  %v3211_v42 = vmul.f32 %v6836_v41, %v6339_v0 }
 0x31c   : > { %v3526_v54 = vadd.f32 %v3450_v49, %v3206_v60  ;;  %v6837_v60 = vld [vmem:[#allocation9_spill] sm:$0xff] }
 0x31d   : > { %v5201_v39 = vpop.eup %5200  ;;  %v3212_v52 = vmul.f32 %v6837_v60, %v6352_v15 }
 0x31e   : > { %5206 = vtanh.f32 %v3526_v54  ;;  %4026 = vrot.lane.b32.xlu1 %v3526_v54, %s5242_s14 }
 0x31f   : > { %3635 = vrot.lane.b32.xlu0 %v5201_v39, %s5241_s12 }
 0x320   : > { %v5203_v10 = vpop.eup %5202  ;;  %v3452_v4 = vpop.permute.xlu0 %3451 }
 0x321   : > { %v3527_v16 = vadd.f32 %v3452_v4, %v3207_v31  ;;  %v6838_v31 = vld [vmem:[#allocation10_spill] sm:$0xff] }
 0x322   : > { %3637 = vrot.lane.b32.xlu1 %v5203_v10, %s5241_s12  ;;  %v3213_v4 = vmul.f32 %v6838_v31, %v6363_v26 }
 0x323   : > { %v3454_v32 = vpop.permute.xlu1 %3453  ;;  %5208 = vtanh.f32 %v3527_v16  ;;  %4028 = vrot.lane.b32.xlu0 %v3527_v16, %s5242_s14 }
 0x324   : > { %v3528_v36 = vadd.f32 %v3454_v32, %v3208_v22  ;;  %v6839_v22 = vld [vmem:[#allocation11_spill] sm:$0xff] }
 0x325   : > { %v5205_v5 = vpop.eup %5204  ;;  %v3214_v16 = vmul.f32 %v6839_v22, %v6373_v17 }
 0x326   : > { %5210 = vtanh.f32 %v3528_v36  ;;  %4030 = vrot.lane.b32.xlu1 %v3528_v36, %s5242_s14 }
 0x327   : > { %3639 = vrot.lane.b32.xlu0 %v5205_v5, %s5241_s12 }
 0x328   : > { %v5207_v61 = vpop.eup %5206  ;;  %v3456_v30 = vpop.permute.xlu0 %3455 }
 0x329   : > { %v3529_v37 = vadd.f32 %v3456_v30, %v3209_v20  ;;  %v3215_v20 = vmul.f32 %v6357_v28, %v6383_v21 }
 0x32a   : > { %3641 = vrot.lane.b32.xlu1 %v5207_v61, %s5241_s12 }
 0x32b   : > { %v3458_v51 = vpop.permute.xlu1 %3457  ;;  %5212 = vtanh.f32 %v3529_v37  ;;  %4032 = vrot.lane.b32.xlu0 %v3529_v37, %s5242_s14 }
 0x32c   : > { %v3530_v46 = vadd.f32 %v3458_v51, %v3210_v14 }
 0x32d   : > { %v5209_v57 = vpop.eup %5208 }
 0x32e   : > { %5214 = vtanh.f32 %v3530_v46  ;;  %4034 = vrot.lane.b32.xlu1 %v3530_v46, %s5242_s14 }
 0x32f   : > { %3643 = vrot.lane.b32.xlu0 %v5209_v57, %s5241_s12 }
 0x330   : > { %v5211_v11 = vpop.eup %5210  ;;  %v3460_v48 = vpop.permute.xlu0 %3459 }
 0x331   : > { %v3531_v49 = vadd.f32 %v3460_v48, %v3211_v42  ;;  %v6840_v42 = vld [vmem:[#allocation12_spill] sm:$0xff] }
 0x332   : > { %3645 = vrot.lane.b32.xlu1 %v5211_v11, %s5241_s12  ;;  %v3217_v11 = vmul.f32 %v6377_v34, %v6399_v6  ;;  %v3218_v48 = vmul.f32 %v6840_v42, %v6405_v9 }
 0x333   : > { %v3462_v54 = vpop.permute.xlu1 %3461  ;;  %5216 = vtanh.f32 %v3531_v49  ;;  %4036 = vrot.lane.b32.xlu0 %v3531_v49, %s5242_s14 }
 0x334   : > { %v3532_v39 = vadd.f32 %v3462_v54, %v3212_v52 }
 0x335   : > { %v5213_v10 = vpop.eup %5212 }
 0x336   : > { %5218 = vtanh.f32 %v3532_v39  ;;  %4038 = vrot.lane.b32.xlu1 %v3532_v39, %s5242_s14 }
 0x337   : > { %3647 = vrot.lane.b32.xlu0 %v5213_v10, %s5241_s12 }
 0x338   : > { %v5215_v47 = vpop.eup %5214  ;;  %v3464_v50 = vpop.permute.xlu0 %3463 }
 0x339   : > { %v3533_v32 = vadd.f32 %v3464_v50, %v3213_v4 }
 0x33a   : > { %3649 = vrot.lane.b32.xlu1 %v5215_v47, %s5241_s12 }
 0x33b   : > { %v3466_v36 = vpop.permute.xlu1 %3465  ;;  %5220 = vtanh.f32 %v3533_v32  ;;  %4040 = vrot.lane.b32.xlu0 %v3533_v32, %s5242_s14 }
 0x33c   : > { %v3534_v5 = vadd.f32 %v3466_v36, %v3214_v16 }
 0x33d   : > { %v5217_v61 = vpop.eup %5216 }
 0x33e   : > { %5222 = vtanh.f32 %v3534_v5  ;;  %4042 = vrot.lane.b32.xlu1 %v3534_v5, %s5242_s14 }
 0x33f   : > { %3651 = vrot.lane.b32.xlu0 %v5217_v61, %s5241_s12 }
 0x340   : > { %v5219_v7 = vpop.eup %5218  ;;  %v3468_v30 = vpop.permute.xlu0 %3467 }
 0x341   : > { %v3535_v14 = vadd.f32 %v3468_v30, %v3215_v20 }
 0x342   : > { %3653 = vrot.lane.b32.xlu1 %v5219_v7, %s5241_s12 }
 0x343   : > { %v3470_v37 = vpop.permute.xlu1 %3469  ;;  %5224 = vtanh.f32 %v3535_v14  ;;  %4044 = vrot.lane.b32.xlu0 %v3535_v14, %s5242_s14 }
 0x344   : > { %v3536_v28 = vadd.f32 %v3470_v37, %v3216_v24  ;;  %v3989_v51 = vpop.permute.xlu0 %3988 }
 0x345   : > { %v5221_v46 = vpop.eup %5220  ;;  %4085 = vst.msk [vmem:[%s6588_s17] sm:$0xff] %vm4084_vm3, %v3989_v51 }
 0x346   : > { %5226 = vtanh.f32 %v3536_v28  ;;  %4046 = vrot.lane.b32.xlu1 %v3536_v28, %s5242_s14 }
 0x347   : > { %v3991_v18 = vpop.permute.xlu1 %3990  ;;  %3655 = vrot.lane.b32.xlu0 %v5221_v46, %s5241_s12 }
 0x348   : > { %v5223_v57 = vpop.eup %5222  ;;  %4086 = vst.msk [vmem:[%s6588_s17 + $0x8] sm:$0xff] %vm4084_vm3, %v3991_v18  ;;  %v3472_v41 = vpop.permute.xlu0 %3471 }
 0x349   : > { %v6602_v60 = vadd.f32 %v3472_v41, %v3217_v11 }
 0x34a   : > { %3657 = vrot.lane.b32.xlu1 %v5223_v57, %s5241_s12 }
 0x34b   : > { %v3474_v52 = vpop.permute.xlu1 %3473  ;;  %5228 = vtanh.f32 %v6602_v60 }
 0x34c   : > { %v6604_v49 = vadd.f32 %v3474_v52, %v3218_v48  ;;  %v3993_v54 = vpop.permute.xlu0 %3992 }
 0x34d   : > { %v5225_v39 = vpop.eup %5224  ;;  %4087 = vst.msk [vmem:[%s6588_s17 + $0x10] sm:$0xff] %vm4084_vm3, %v3993_v54 }
 0x34e   : > { %3659 = vrot.lane.b32.xlu0 %v5225_v39, %s5241_s12  ;;  %5230 = vtanh.f32 %v6604_v49 }
 0x34f   : > { %v3995_v34 = vpop.permute.xlu1 %3994 }
 0x350   : > { %v5227_v10 = vpop.eup %5226  ;;  %4088 = vst.msk [vmem:[%s6588_s17 + $0x18] sm:$0xff] %vm4084_vm3, %v3995_v34  ;;  %v3604_v47 = vpop.permute.xlu0 %3603 }
 0x351   : > { %3661 = vrot.lane.b32.xlu1 %v5227_v10, %s5241_s12  ;;  %v3699_v31 = vmul.f32 %v3604_v47, %v6061_v43 }
 0x353   : > { %v3606_v4 = vpop.permute.xlu1 %3605  ;;  %v4659_v50 = vpack.c.bf16 %v3699_v31, %v3699_v31 }
 0x354   : > { %v3700_v22 = vmul.f32 %v3606_v4, %v6071_v53  ;;  %v3997_v16 = vpop.permute.xlu0 %3996 }
 0x355   : > { %4089 = vst.msk [vmem:[%s6588_s17 + $0x20] sm:$0xff] %vm4084_vm3, %v3997_v16  ;;  %3827 = vrot.lane.b32.xlu0 %v4659_v50, %s5243_s20  ;;  %v5229_v5 = vpop.eup %5228 }
 0x356   : > { %v4660_v32 = vpack.c.bf16 %v3700_v22, %v3700_v22 }
 0x357   : > { %v3999_v36 = vpop.permute.xlu1 %3998 }
 0x358   : > { %4090 = vst.msk [vmem:[%s6588_s17 + $0x28] sm:$0xff] %vm4084_vm3, %v3999_v36  ;;  %3829 = vrot.lane.b32.xlu1 %v4660_v32, %s5243_s20  ;;  %v3608_v43 = vpop.permute.xlu0 %3607  ;;  %v5231_v53 = vpop.eup %5230 }
 0x359   : > { %v3701_v61 = vmul.f32 %v3608_v43, %v6081_v38  ;;  %3663 = vrot.lane.b32.xlu0 %v5229_v5, %s5241_s12 }
 0x35b   : > { %v3610_v7 = vpop.permute.xlu1 %3609  ;;  %v4661_v20 = vpack.c.bf16 %v3701_v61, %v3701_v61 }
 0x35c   : > { %v3702_v30 = vmul.f32 %v3610_v7, %v6091_v45  ;;  %3665 = vrot.lane.b32.xlu1 %v5231_v53, %s5241_s12  ;;  %v4001_v24 = vpop.permute.xlu0 %4000 }
 0x35d   : > { %4091 = vst.msk [vmem:[%s6588_s17 + $0x30] sm:$0xff] %vm4084_vm3, %v4001_v24  ;;  %3831 = vrot.lane.b32.xlu0 %v4661_v20, %s5243_s20 }
 0x35e   : > { %v4662_v14 = vpack.c.bf16 %v3702_v30, %v3702_v30 }
 0x35f   : > { %v4003_v37 = vpop.permute.xlu1 %4002 }
 0x360   : > { %4092 = vst.msk [vmem:[%s6588_s17 + $0x38] sm:$0xff] %vm4084_vm3, %v4003_v37  ;;  %3833 = vrot.lane.b32.xlu1 %v4662_v14, %s5243_s20  ;;  %v3612_v38 = vpop.permute.xlu0 %3611 }
 0x361   : > { %v3703_v28 = vmul.f32 %v3612_v38, %v6101_v13 }
 0x363   : > { %v3614_v51 = vpop.permute.xlu1 %3613  ;;  %v4663_v45 = vpack.c.bf16 %v3703_v28, %v3703_v28 }
 0x364   : > { %v3704_v46 = vmul.f32 %v3614_v51, %v6111_v19  ;;  %v4005_v18 = vpop.permute.xlu0 %4004 }
 0x365   : > { %4093 = vst.msk [vmem:[%s6588_s17 + $0x40] sm:$0xff] %vm4084_vm3, %v4005_v18  ;;  %3835 = vrot.lane.b32.xlu0 %v4663_v45, %s5243_s20 }
 0x366   : > { %v4664_v57 = vpack.c.bf16 %v3704_v46, %v3704_v46 }
 0x367   : > { %v4007_v11 = vpop.permute.xlu1 %4006 }
 0x368   : > { %4094 = vst.msk [vmem:[%s6588_s17 + $0x48] sm:$0xff] %vm4084_vm3, %v4007_v11  ;;  %3837 = vrot.lane.b32.xlu1 %v4664_v57, %s5243_s20  ;;  %v3616_v41 = vpop.permute.xlu0 %3615 }
 0x369   : > { %v3705_v13 = vmul.f32 %v3616_v41, %v6121_v56 }
 0x36b   : > { %v3618_v42 = vpop.permute.xlu1 %3617  ;;  %v4665_v48 = vpack.c.bf16 %v3705_v13, %v3705_v13 }
 0x36c   : > { %v3706_v19 = vmul.f32 %v3618_v42, %v6131_v8  ;;  %v4009_v52 = vpop.permute.xlu0 %4008 }
 0x36d   : > { %4095 = vst.msk [vmem:[%s6588_s17 + $0x50] sm:$0xff] %vm4084_vm3, %v4009_v52  ;;  %3839 = vrot.lane.b32.xlu0 %v4665_v48, %s5243_s20 }
 0x36e   : > { %v4666_v54 = vpack.c.bf16 %v3706_v19, %v3706_v19 }
 0x36f   : > { %v4011_v39 = vpop.permute.xlu1 %4010 }
 0x370   : > { %4096 = vst.msk [vmem:[%s6588_s17 + $0x58] sm:$0xff] %vm4084_vm3, %v4011_v39  ;;  %3841 = vrot.lane.b32.xlu1 %v4666_v54, %s5243_s20  ;;  %v3620_v34 = vpop.permute.xlu0 %3619 }
 0x371   : > { %v3707_v56 = vmul.f32 %v3620_v34, %v6145_v55 }
 0x373   : > { %v3622_v10 = vpop.permute.xlu1 %3621  ;;  %v4667_v47 = vpack.c.bf16 %v3707_v56, %v3707_v56 }
 0x374   : > { %v3708_v8 = vmul.f32 %v3622_v10, %v6159_v62  ;;  %v4013_v31 = vpop.permute.xlu0 %4012 }
 0x375   : > { %4097 = vst.msk [vmem:[%s6588_s17 + $0x60] sm:$0xff] %vm4084_vm3, %v4013_v31  ;;  %3843 = vrot.lane.b32.xlu0 %v4667_v47, %s5243_s20 }
 0x376   : > { %v4668_v4 = vpack.c.bf16 %v3708_v8, %v3708_v8 }
 0x377   : > { %v4015_v50 = vpop.permute.xlu1 %4014 }
 0x378   : > { %4098 = vst.msk [vmem:[%s6588_s17 + $0x68] sm:$0xff] %vm4084_vm3, %v4015_v50  ;;  %3845 = vrot.lane.b32.xlu1 %v4668_v4, %s5243_s20  ;;  %v3624_v22 = vpop.permute.xlu0 %3623 }
 0x379   : > { %v3709_v55 = vmul.f32 %v3624_v22, %v6173_v12 }
 0x37b   : > { %v3626_v16 = vpop.permute.xlu1 %3625  ;;  %v4669_v32 = vpack.c.bf16 %v3709_v55, %v3709_v55 }
 0x37c   : > { %v3710_v36 = vmul.f32 %v3626_v16, %v6185_v35  ;;  %v4017_v62 = vpop.permute.xlu0 %4016 }
 0x37d   : > { %4099 = vst.msk [vmem:[%s6588_s17 + $0x70] sm:$0xff] %vm4084_vm3, %v4017_v62  ;;  %3847 = vrot.lane.b32.xlu0 %v4669_v32, %s5243_s20 }
 0x37e   : > { %v4670_v5 = vpack.c.bf16 %v3710_v36, %v3710_v36 }
 0x37f   : > { %v4019_v43 = vpop.permute.xlu1 %4018 }
 0x380   : > { %4100 = vst.msk [vmem:[%s6588_s17 + $0x78] sm:$0xff] %vm4084_vm3, %v4019_v43  ;;  %3849 = vrot.lane.b32.xlu1 %v4670_v5, %s5243_s20  ;;  %v3628_v61 = vpop.permute.xlu0 %3627 }
 0x381   : > { %v3711_v12 = vmul.f32 %v3628_v61, %v6195_v44 }
 0x383   : > { %v3630_v53 = vpop.permute.xlu1 %3629  ;;  %v4671_v7 = vpack.c.bf16 %v3711_v12, %v3711_v12 }
 0x384   : > { %v3712_v35 = vmul.f32 %v3630_v53, %v6207_v63 }
 0x385   : > { %v4021_v30 = vpop.permute.xlu0 %4020  ;;  %3851 = vrot.lane.b32.xlu0 %v4671_v7, %s5243_s20 }
 0x386   : > { %v4672_v20 = vpack.c.bf16 %v3712_v35, %v3712_v35  ;;  %4101 = vst.msk [vmem:[%s6588_s17 + $0x80] sm:$0xff] %vm4084_vm3, %v4021_v30 }
 0x388   : > { %v4023_v24 = vpop.permute.xlu1 %4022  ;;  %3853 = vrot.lane.b32.xlu1 %v4672_v20, %s5243_s20 }
 0x389   : > { %4102 = vst.msk [vmem:[%s6588_s17 + $0x88] sm:$0xff] %vm4084_vm3, %v4023_v24  ;;  %v3632_v14 = vpop.permute.xlu0 %3631 }
 0x38a   : > { %v3713_v44 = vmul.f32 %v3632_v14, %v6219_v59 }
 0x38c   : > { %v3634_v37 = vpop.permute.xlu1 %3633  ;;  %v4673_v38 = vpack.c.bf16 %v3713_v44, %v3713_v44 }
 0x38d   : > { %v3714_v63 = vmul.f32 %v3634_v37, %v6231_v2  ;;  %v4025_v28 = vpop.permute.xlu0 %4024 }
 0x38e   : > { %4103 = vst.msk [vmem:[%s6588_s17 + $0x90] sm:$0xff] %vm4084_vm3, %v4025_v28  ;;  %3855 = vrot.lane.b32.xlu0 %v4673_v38, %s5243_s20 }
 0x38f   : > { %v4674_v51 = vpack.c.bf16 %v3714_v63, %v3714_v63 }
 0x390   : > { %v4027_v45 = vpop.permute.xlu1 %4026 }
 0x391   : > { %4104 = vst.msk [vmem:[%s6588_s17 + $0x98] sm:$0xff] %vm4084_vm3, %v4027_v45  ;;  %3857 = vrot.lane.b32.xlu1 %v4674_v51, %s5243_s20  ;;  %v3636_v46 = vpop.permute.xlu0 %3635 }
 0x392   : > { %v3715_v59 = vmul.f32 %v3636_v46, %v6247_v29 }
 0x394   : > { %v3638_v18 = vpop.permute.xlu1 %3637  ;;  %v4675_v57 = vpack.c.bf16 %v3715_v59, %v3715_v59 }
 0x395   : > { %v3716_v2 = vmul.f32 %v3638_v18, %v6258_v1  ;;  %v4029_v11 = vpop.permute.xlu0 %4028 }
 0x396   : > { %4105 = vst.msk [vmem:[%s6588_s17 + $0xa0] sm:$0xff] %vm4084_vm3, %v4029_v11  ;;  %3859 = vrot.lane.b32.xlu0 %v4675_v57, %s5243_s20 }
 0x397   : > { %v4676_v41 = vpack.c.bf16 %v3716_v2, %v3716_v2 }
 0x398   : > { %v4031_v13 = vpop.permute.xlu1 %4030 }
 0x399   : > { %4106 = vst.msk [vmem:[%s6588_s17 + $0xa8] sm:$0xff] %vm4084_vm3, %v4031_v13  ;;  %3861 = vrot.lane.b32.xlu1 %v4676_v41, %s5243_s20  ;;  %v3640_v42 = vpop.permute.xlu0 %3639 }
 0x39a   : > { %v3717_v29 = vmul.f32 %v3640_v42, %v6271_v23 }
 0x39c   : > { %v3642_v48 = vpop.permute.xlu1 %3641  ;;  %v4677_v19 = vpack.c.bf16 %v3717_v29, %v3717_v29 }
 0x39d   : > { %v3718_v1 = vmul.f32 %v3642_v48, %v6282_v58  ;;  %v4033_v52 = vpop.permute.xlu0 %4032 }
 0x39e   : > { %4107 = vst.msk [vmem:[%s6588_s17 + $0xb0] sm:$0xff] %vm4084_vm3, %v4033_v52  ;;  %3863 = vrot.lane.b32.xlu0 %v4677_v19, %s5243_s20 }
 0x39f   : > { %v4678_v54 = vpack.c.bf16 %v3718_v1, %v3718_v1 }
 0x3a0   : > { %v4035_v39 = vpop.permute.xlu1 %4034 }
 0x3a1   : > { %4108 = vst.msk [vmem:[%s6588_s17 + $0xb8] sm:$0xff] %vm4084_vm3, %v4035_v39  ;;  %3865 = vrot.lane.b32.xlu1 %v4678_v54, %s5243_s20  ;;  %v3644_v34 = vpop.permute.xlu0 %3643 }
 0x3a2   : > { %v3719_v23 = vmul.f32 %v3644_v34, %v6293_v27 }
 0x3a4   : > { %v3646_v56 = vpop.permute.xlu1 %3645  ;;  %v4679_v10 = vpack.c.bf16 %v3719_v23, %v3719_v23 }
 0x3a5   : > { %v3720_v58 = vmul.f32 %v3646_v56, %v6306_v25  ;;  %v4037_v47 = vpop.permute.xlu0 %4036 }
 0x3a6   : > { %4109 = vst.msk [vmem:[%s6588_s17 + $0xc0] sm:$0xff] %vm4084_vm3, %v4037_v47  ;;  %3867 = vrot.lane.b32.xlu0 %v4679_v10, %s5243_s20 }
 0x3a7   : > { %v4680_v8 = vpack.c.bf16 %v3720_v58, %v3720_v58 }
 0x3a8   : > { %v4039_v31 = vpop.permute.xlu1 %4038 }
 0x3a9   : > { %4110 = vst.msk [vmem:[%s6588_s17 + $0xc8] sm:$0xff] %vm4084_vm3, %v4039_v31  ;;  %3869 = vrot.lane.b32.xlu1 %v4680_v8, %s5243_s20  ;;  %v3648_v4 = vpop.permute.xlu0 %3647 }
 0x3aa   : > { %v3721_v27 = vmul.f32 %v3648_v4, %v6317_v33 }
 0x3ac   : > { %v3650_v50 = vpop.permute.xlu1 %3649  ;;  %v4681_v22 = vpack.c.bf16 %v3721_v27, %v3721_v27 }
 0x3ad   : > { %v3722_v25 = vmul.f32 %v3650_v50, %v6330_v40  ;;  %v4041_v55 = vpop.permute.xlu0 %4040 }
 0x3ae   : > { %4111 = vst.msk [vmem:[%s6588_s17 + $0xd0] sm:$0xff] %vm4084_vm3, %v4041_v55  ;;  %3871 = vrot.lane.b32.xlu0 %v4681_v22, %s5243_s20 }
 0x3af   : > { %v4682_v16 = vpack.c.bf16 %v3722_v25, %v3722_v25 }
 0x3b0   : > { %v4043_v32 = vpop.permute.xlu1 %4042 }
 0x3b1   : > { %4112 = vst.msk [vmem:[%s6588_s17 + $0xd8] sm:$0xff] %vm4084_vm3, %v4043_v32  ;;  %3873 = vrot.lane.b32.xlu1 %v4682_v16, %s5243_s20  ;;  %v3652_v36 = vpop.permute.xlu0 %3651 }
 0x3b2   : > { %v3723_v33 = vmul.f32 %v3652_v36, %v6339_v0 }
 0x3b4   : > { %v3654_v62 = vpop.permute.xlu1 %3653  ;;  %v4683_v5 = vpack.c.bf16 %v3723_v33, %v3723_v33 }
 0x3b5   : > { %v3724_v43 = vmul.f32 %v3654_v62, %v6352_v15  ;;  %v4045_v40 = vpop.permute.xlu0 %4044 }
 0x3b6   : > { %4113 = vst.msk [vmem:[%s6588_s17 + $0xe0] sm:$0xff] %vm4084_vm3, %v4045_v40  ;;  %3875 = vrot.lane.b32.xlu0 %v4683_v5, %s5243_s20 }
 0x3b7   : > { %v4684_v61 = vpack.c.bf16 %v3724_v43, %v3724_v43 }
 0x3b8   : > { %v4047_v12 = vpop.permute.xlu1 %4046 }
 0x3b9   : > { %4114 = vst.msk [vmem:[%s6588_s17 + $0xe8] sm:$0xff] %vm4084_vm3, %v4047_v12  ;;  %3877 = vrot.lane.b32.xlu1 %v4684_v61, %s5243_s20  ;;  %v3656_v53 = vpop.permute.xlu0 %3655 }
 0x3ba   : > { %v3725_v7 = vmul.f32 %v3656_v53, %v6363_v26 }
 0x3bc   : > { %v3658_v0 = vpop.permute.xlu1 %3657  ;;  %v4685_v35 = vpack.c.bf16 %v3725_v7, %v3725_v7 }
 0x3bd   : > { %v3726_v20 = vmul.f32 %v3658_v0, %v6373_v17 }
 0x3be   : > { %3879 = vrot.lane.b32.xlu0 %v4685_v35, %s5243_s20 }
 0x3bf   : > { %v4686_v15 = vpack.c.bf16 %v3726_v20, %v3726_v20 }
 0x3c0   : > { %v3660_v30 = vpop.permute.xlu0 %3659 }
 0x3c1   : > { %3881 = vrot.lane.b32.xlu1 %v4686_v15, %s5243_s20  ;;  %v3727_v24 = vmul.f32 %v3660_v30, %v6383_v21 }
 0x3c3   : > { %v3662_v14 = vpop.permute.xlu1 %3661  ;;  %v4687_v44 = vpack.c.bf16 %v3727_v24, %v3727_v24 }
 0x3c4   : > { %v3728_v37 = vmul.f32 %v3662_v14, %v6389_v3 }
 0x3c5   : > { %3883 = vrot.lane.b32.xlu0 %v4687_v44, %s5243_s20 }
 0x3c6   : > { %v4688_v38 = vpack.c.bf16 %v3728_v37, %v3728_v37 }
 0x3c7   : > { %v3828_v26 = vpop.permute.xlu0 %3827 }
 0x3c8   : > { %3885 = vrot.lane.b32.xlu1 %v4688_v38, %s5243_s20  ;;  %3924 = vst.msk [vmem:[%s6731_s25] sm:$0xf] %vm3923_vm4, %v3828_v26 }
 0x3ca   : > { %v3830_v17 = vpop.permute.xlu1 %3829 }
 0x3cb   : > { %3925 = vst.msk [vmem:[%s6731_s25 + $0x4] sm:$0xf] %vm3923_vm4, %v3830_v17  ;;  %v3664_v21 = vpop.permute.xlu0 %3663 }
 0x3cc   : > { %v3729_v3 = vmul.f32 %v3664_v21, %v6399_v6 }
 0x3ce   : > { %v3666_v63 = vpop.permute.xlu1 %3665  ;;  %v4689_v28 = vpack.c.bf16 %v3729_v3, %v3729_v3 }
 0x3cf   : > { %v3730_v51 = vmul.f32 %v3666_v63, %v6405_v9  ;;  %v3832_v45 = vpop.permute.xlu0 %3831 }
 0x3d0   : > { %3926 = vst.msk [vmem:[%s6731_s25 + $0x8] sm:$0xf] %vm3923_vm4, %v3832_v45  ;;  %3887 = vrot.lane.b32.xlu0 %v4689_v28, %s5243_s20 }
 0x3d1   : > { %v4690_v46 = vpack.c.bf16 %v3730_v51, %v3730_v51 }
 0x3d2   : > { %v3834_v59 = vpop.permute.xlu1 %3833 }
 0x3d3   : > { %3927 = vst.msk [vmem:[%s6731_s25 + $0xc] sm:$0xf] %vm3923_vm4, %v3834_v59  ;;  %3889 = vrot.lane.b32.xlu1 %v4690_v46, %s5243_s20 }
 0x3d4   : > { %4048 = vrot.lane.b32.xlu0 %v6602_v60, %s5242_s14 }
 0x3d7   : > { %4050 = vrot.lane.b32.xlu1 %v6604_v49, %s5242_s14  ;;  %v3836_v6 = vpop.permute.xlu0 %3835 }
 0x3d8   : > { %3928 = vst.msk [vmem:[%s6731_s25 + $0x10] sm:$0xf] %vm3923_vm4, %v3836_v6 }
 0x3da   : > { %v3838_v9 = vpop.permute.xlu1 %3837 }
 0x3db   : > { %3929 = vst.msk [vmem:[%s6731_s25 + $0x14] sm:$0xf] %vm3923_vm4, %v3838_v9 }
 0x3df   : > { %v3840_v18 = vpop.permute.xlu0 %3839 }
 0x3e0   : > { %3930 = vst.msk [vmem:[%s6731_s25 + $0x18] sm:$0xf] %vm3923_vm4, %v3840_v18 }
 0x3e2   : > { %v3842_v57 = vpop.permute.xlu1 %3841 }
 0x3e3   : > { %3931 = vst.msk [vmem:[%s6731_s25 + $0x1c] sm:$0xf] %vm3923_vm4, %v3842_v57 }
 0x3e7   : > { %v3844_v60 = vpop.permute.xlu0 %3843 }
 0x3e8   : > { %3932 = vst.msk [vmem:[%s6731_s25 + $0x20] sm:$0xf] %vm3923_vm4, %v3844_v60 }
 0x3ea   : > { %v3846_v49 = vpop.permute.xlu1 %3845 }
 0x3eb   : > { %3933 = vst.msk [vmem:[%s6731_s25 + $0x24] sm:$0xf] %vm3923_vm4, %v3846_v49 }
 0x3ef   : > { %v3848_v2 = vpop.permute.xlu0 %3847 }
 0x3f0   : > { %3934 = vst.msk [vmem:[%s6731_s25 + $0x28] sm:$0xf] %vm3923_vm4, %v3848_v2 }
 0x3f2   : > { %v3850_v11 = vpop.permute.xlu1 %3849 }
 0x3f3   : > { %3935 = vst.msk [vmem:[%s6731_s25 + $0x2c] sm:$0xf] %vm3923_vm4, %v3850_v11 }
 0x3f7   : > { %v3852_v41 = vpop.permute.xlu0 %3851 }
 0x3f8   : > { %3936 = vst.msk [vmem:[%s6731_s25 + $0x30] sm:$0xf] %vm3923_vm4, %v3852_v41 }
 0x3fa   : > { %v3854_v13 = vpop.permute.xlu1 %3853 }
 0x3fb   : > { %3937 = vst.msk [vmem:[%s6731_s25 + $0x34] sm:$0xf] %vm3923_vm4, %v3854_v13 }
 0x400   : > { %v3856_v42 = vpop.permute.xlu0 %3855 }
 0x401   : > { %3938 = vst.msk [vmem:[%s6731_s25 + $0x38] sm:$0xf] %vm3923_vm4, %v3856_v42 }
 0x403   : > { %v3858_v29 = vpop.permute.xlu1 %3857 }
 0x404   : > { %3939 = vst.msk [vmem:[%s6731_s25 + $0x3c] sm:$0xf] %vm3923_vm4, %v3858_v29 }
 0x408   : > { %v3860_v48 = vpop.permute.xlu0 %3859 }
 0x409   : > { %3940 = vst.msk [vmem:[%s6731_s25 + $0x40] sm:$0xf] %vm3923_vm4, %v3860_v48 }
 0x40b   : > { %v3862_v19 = vpop.permute.xlu1 %3861 }
 0x40c   : > { %3941 = vst.msk [vmem:[%s6731_s25 + $0x44] sm:$0xf] %vm3923_vm4, %v3862_v19 }
 0x410   : > { %v3864_v1 = vpop.permute.xlu0 %3863 }
 0x411   : > { %3942 = vst.msk [vmem:[%s6731_s25 + $0x48] sm:$0xf] %vm3923_vm4, %v3864_v1 }
 0x413   : > { %v3866_v52 = vpop.permute.xlu1 %3865 }
 0x414   : > { %3943 = vst.msk [vmem:[%s6731_s25 + $0x4c] sm:$0xf] %vm3923_vm4, %v3866_v52 }
 0x418   : > { %v3868_v54 = vpop.permute.xlu0 %3867 }
 0x419   : > { %3944 = vst.msk [vmem:[%s6731_s25 + $0x50] sm:$0xf] %vm3923_vm4, %v3868_v54 }
 0x41b   : > { %v3870_v39 = vpop.permute.xlu1 %3869 }
 0x41c   : > { %3945 = vst.msk [vmem:[%s6731_s25 + $0x54] sm:$0xf] %vm3923_vm4, %v3870_v39 }
 0x420   : > { %v3872_v34 = vpop.permute.xlu0 %3871 }
 0x421   : > { %3946 = vst.msk [vmem:[%s6731_s25 + $0x58] sm:$0xf] %vm3923_vm4, %v3872_v34 }
 0x423   : > { %v3874_v23 = vpop.permute.xlu1 %3873 }
 0x424   : > { %3947 = vst.msk [vmem:[%s6731_s25 + $0x5c] sm:$0xf] %vm3923_vm4, %v3874_v23 }
 0x428   : > { %v3876_v56 = vpop.permute.xlu0 %3875 }
 0x429   : > { %3948 = vst.msk [vmem:[%s6731_s25 + $0x60] sm:$0xf] %vm3923_vm4, %v3876_v56 }
 0x42b   : > { %v3878_v10 = vpop.permute.xlu1 %3877 }
 0x42c   : > { %3949 = vst.msk [vmem:[%s6731_s25 + $0x64] sm:$0xf] %vm3923_vm4, %v3878_v10 }
 0x430   : > { %v3880_v58 = vpop.permute.xlu0 %3879 }
 0x431   : > { %3950 = vst.msk [vmem:[%s6731_s25 + $0x68] sm:$0xf] %vm3923_vm4, %v3880_v58 }
 0x433   : > { %v3882_v47 = vpop.permute.xlu1 %3881 }
 0x434   : > { %3951 = vst.msk [vmem:[%s6731_s25 + $0x6c] sm:$0xf] %vm3923_vm4, %v3882_v47 }
 0x437   : > { %v3884_v8 = vpop.permute.xlu0 %3883 }
 0x438   : > { %3952 = vst.msk [vmem:[%s6731_s25 + $0x70] sm:$0xf] %vm3923_vm4, %v3884_v8 }
 0x43a   : > { %v3886_v31 = vpop.permute.xlu1 %3885 }
 0x43b   : > { %3953 = vst.msk [vmem:[%s6731_s25 + $0x74] sm:$0xf] %vm3923_vm4, %v3886_v31 }
 0x442   : > { %v3888_v4 = vpop.permute.xlu0 %3887 }
 0x443   : > { %3954 = vst.msk [vmem:[%s6731_s25 + $0x78] sm:$0xf] %vm3923_vm4, %v3888_v4 }
 0x445   : > { %v3890_v27 = vpop.permute.xlu1 %3889 }
 0x446   : > { %3955 = vst.msk [vmem:[%s6731_s25 + $0x7c] sm:$0xf] %vm3923_vm4, %v3890_v27  ;;  %v4049_v50 = vpop.permute.xlu0 %4048 }
 0x447   : > { %4115 = vst.msk [vmem:[%s6588_s17 + $0xf0] sm:$0xff] %vm4084_vm3, %v4049_v50 }
 0x449   : > { %v4051_v22 = vpop.permute.xlu1 %4050 }
 0x44a   : > { %4116 = vst.msk [vmem:[%s6588_s17 + $0xf8] sm:$0xff] %vm4084_vm3, %v4051_v22 }
 0x44b PF: > { %s16_s18 = sadd.s32 1, %s5238_s18  }
 0x44c   : > { %p13_p4 = scmp.ge.s32.totalorder %s16_s18, 4  }
 0x44e   :  { %15 = sbr.rel (!%p13_p4) target bundleno = 1 (0x1), region = 85 }

// kernel: conv_lstm_forward.5
= control target key start
LH: loop header
LB: loop body
LE: loop exit
PB: predicated region body
PF: predicated region fallthrough
CT: control target
= control target key end

     0   :  { %12 = vsyncpa [#allocation3], 0  ;;  %s6613_s0 = inlined_call_operand.vmem [shape: bf16[2,288,108], index: 0, kind: input, shape index: {}]   ;;  %s6614_s1 = inlined_call_operand.vmem [shape: bf16[3,108,128], index: 1, kind: input, shape index: {}]   ;;  %s6615_s2 = inlined_call_operand.vmem [shape: f32[1,128], index: 2, kind: input, shape index: {}]   ;;  %s6616_s3 = inlined_call_operand.vmem [shape: f32[2,256,32], index: 3, kind: input, shape index: {}]   ;;  %s6617_s4 = inlined_call_operand.hbm [shape: f32[2,256,32], index: 4, kind: output, shape index: {0}]   ;;  %s6618_s5 = inlined_call_operand.hbm [shape: f32[2,256,32], index: 5, kind: output, shape index: {1}]   ;;  %s6619_s6 = inlined_call_operand.hbm [shape: f32[2,256,32], index: 6, kind: output, shape index: {2}]  }
   0x1   :  { %14 = vsyncpa [#allocation3 + $0x1], 0 }
   0x2   :  { %15 = vsyncpa [#allocation5], 0 }
   0x3   :  { %17 = vsyncpa [#allocation5 + $0x1], 0  ;;  %s4784_s21 = smov 0   ;;  %s4786_s22 = smov 0  }
   0x4   :  { %s4788_s23 = smov 0   ;;  %s4790_s24 = smov 0  }
   0x5 LB: > { %s4805_s25 = sadd.s32 4294967295, %s4739_s24   ;;  %s6633_s26 = sadd.s32 4294967294, %s4739_s24   ;;  %s4739_s24 = sphi %s4790_s24, %s6686_s24   ;;  %s4735_s23 = sphi %s4788_s23, %s6685_s23   ;;  %s4731_s22 = sphi %s4786_s22, %s6684_s22   ;;  %s4727_s21 = sphi %s4784_s21, %s6683_s21  }
   0x6   : > { %s4809_s27 = sadd.s32 1, %s4739_s24   ;;  %s124_s28 = sadd.s32 1, %s4735_s23 }
   0x7   : > { %s121_s29 = ssub.s32 %s4739_s24, %s4809_s27  ;;  %p134_p0 = scmp.ne.s32.totalorder %s4735_s23, %s4731_s22 }
   0x8   : > { %p122_p1 = scmp.eq.s32.totalorder %s121_s29, 0  ;;  %p135_p2 = scmp.eq.s32.totalorder %s4805_s25, 1 }
   0x9   : > { %p140_p3 = scmp.ne.s32.totalorder %s4731_s22, %s4727_s21  ;;  %p141_p4 = scmp.eq.s32.totalorder %s6633_s26, 1 }
   0xa   : > { %s4822_s30 = scalar_select %p122_p1, %s4735_s23, %s124_s28  }
   0xb   : > { %p4824_p5 = por %p135_p2, %p134_p0  ;;  %p4828_p6 = por %p141_p4, %p140_p3 }
   0xc   : > { %p3684_p7 = scmp.ge.s32.totalorder %s4739_s24, 1  ;;  %p233_p8 = scmp.lt.s32.totalorder %s4739_s24, 3 }
   0xe   : > { %p234_p9 = pnand %p3684_p7, %p233_p8 }
  0x10   : > { %237 = sbr.rel (%p234_p9) target bundleno = 1421 (0x58d), region = 36 }
  0x17   : > { %v4228_v0 = vld [vmem:[%s6614_s1] sm:$0xff]   ;;  %v4840_v1 = vld [vmem:[%s6614_s1 + $0x38] sm:$0xff]   ;;  %p278_p10 = scmp.lt.s32.totalorder %s4805_s25, 1  ;;  %v4230_v2 = vld [vmem:[%s6614_s1 + $0x8] sm:$0xff]   ;;  %vm463_vm0 = vcmask 883712   ;;  %vm512_vm1 = vcmask 1045504  }
  0x18   : > { %3921 = vmatprep.subr.bf16.mxu1 %v4228_v0  ;;  %3967 = vmatprep.subr.bf16.mxu0 %v4840_v1  ;;  %v4850_v3 = vld [vmem:[%s6614_s1 + $0x40] sm:$0xff]   ;;  %v4232_v4 = vld [vmem:[%s6614_s1 + $0x10] sm:$0xff]   ;;  %v4863_v5 = vld [vmem:[%s6614_s1 + $0x48] sm:$0xff]   ;;  %s4742_s10 = smov 96   ;;  %s261_s11 = sand.u32 1, %s4731_s22   ;;  %vm2560_vm3 = vcmask 261120  }
  0x19   : > { %3922 = vmatpush3.bf16.msra.mxu1 %v4228_v0  ;;  %s4853_s17 = scalar_select %p278_p10, %s4805_s25, 1  ;;  %3968 = vmatpush3.bf16.msra.mxu0 %v4840_v1  ;;  %v4234_v6 = vld [vmem:[%s6614_s1 + $0x18] sm:$0xff]   ;;  %v4874_v7 = vld [vmem:[%s6614_s1 + $0x50] sm:$0xff]   ;;  %v4236_v8 = vld [vmem:[%s6614_s1 + $0x20] sm:$0xff]   ;;  %vm2593_vm4 = vcmask 785920  }
  0x1a   : > { %3923 = vmatprep.subr.bf16.mxu1 %v4230_v2  ;;  %3969 = vmatprep.subr.bf16.mxu0 %v4850_v3  ;;  %v4889_v9 = vld [vmem:[%s6614_s1 + $0x58] sm:$0xff]   ;;  %v4238_v12 = vld [vmem:[%s6614_s1 + $0x28] sm:$0xff]   ;;  %v4901_v13 = vld [vmem:[%s6614_s1 + $0x60] sm:$0xff]   ;;  %s5694_s12 = sshll.u32 %s261_s11, 8  ;;  %s4743_s14 = smov 64  }
  0x1b   : > { %s4173_s29 = smul.u32 144, %s4853_s17  ;;  %v4240_v14 = vld [vmem:[%s6614_s1 + $0x30] sm:$0x3f]   ;;  %v4913_v15 = vld [vmem:[%s6614_s1 + $0x68] sm:$0x3f]   ;;  %v4247_v23 = vld [vmem:[%s6614_s1 + $0x78] sm:$0xff]  }
  0x1c   : > { %v514_v16 = vsel %vm512_vm1, %v4240_v14, 0  ;;  %v4923_v18 = vsel %vm512_vm1, %v4913_v15, 0  ;;  %v4246_v19 = vld [vmem:[%s6614_s1 + $0x70] sm:$0xff]   ;;  %v4252_v25 = vld [vmem:[%s6614_s1 + $0x80] sm:$0xff]   ;;  %v4253_v29 = vld [vmem:[%s6614_s1 + $0x88] sm:$0xff]   ;;  %s3848_s19 = sshll.u32 %s4853_s17, 8 }
  0x1d   : > { %3924 = vmatpush3.bf16.msra.mxu1 %v4230_v2  ;;  %3970 = vmatpush3.bf16.msra.mxu0 %v4850_v3  ;;  %s4879_s15 = scalar_lea.vmem %s6613_s0, %s4173_s29  ;;  %v4258_v31 = vld [vmem:[%s6614_s1 + $0x90] sm:$0xff]   ;;  %v4261_v35 = vld [vmem:[%s6614_s1 + $0x98] sm:$0xff]   ;;  %v4264_v37 = vld [vmem:[%s6614_s1 + $0xa0] sm:$0x3f]   ;;  %s5009_s29 = scalar_lea.vmem %s6616_s3, %s3848_s19 }
  0x1e   : > { %3925 = vmatprep.subr.bf16.mxu1 %v4232_v4  ;;  %3971 = vmatprep.subr.bf16.mxu0 %v4863_v5  ;;  %v4242_v10 = vld [vmem:[%s4879_s15] sm:$0xff]   ;;  %v4243_v11 = vld [vmem:[%s4879_s15 + $0x8] sm:$0xff]   ;;  %v4245_v20 = vld [vmem:[%s4879_s15 + $0x10] sm:$0xff]   ;;  %v1338_v41 = vsel %vm512_vm1, %v4264_v37, 0  ;;  %s4741_s17 = smov 32   ;;  %s5699_s13 = scalar_lea.vmem [#allocation4], %s5694_s12 }
  0x1f   : > { %3935 = vmatprep.mubr.msk.bf16.mxu1 %vm463_vm0, %v4242_v10  ;;  %3981 = vmatprep.mubr.msk.bf16.mxu0 %vm463_vm0, %v4243_v11  ;;  %v4244_v17 = vld [vmem:[%s4879_s15 + $0x8] sm:$0xff]   ;;  %v4248_v21 = vld [vmem:[%s4879_s15 + $0x10] sm:$0xff]   ;;  %v4249_v22 = vld [vmem:[%s4879_s15 + $0x18] sm:$0xff]   ;;  %s6336_s16 = scalar_lea.vmem [#allocation2], %s5694_s12  ;;  %s3495_s18 = sand.u32 1, %s4805_s25  }
  0x20   : > { %v4250_v24 = vld [vmem:[%s4879_s15 + $0x18] sm:$0xff]   ;;  %v4251_v26 = vld [vmem:[%s4879_s15 + $0x20] sm:$0xff]   ;;  %v4255_v28 = vld [vmem:[%s4879_s15 + $0x28] sm:$0xff]   ;;  %s6342_s19 = sshll.u32 %s4805_s25, 12  ;;  %s6348_s20 = scalar_lea.vmem [#allocation6], %s5694_s12 }
  0x21   : > { %3926 = vmatpush3.bf16.msra.mxu1 %v4232_v4  ;;  %3972 = vmatpush3.bf16.msra.mxu0 %v4863_v5  ;;  %v4254_v27 = vld [vmem:[%s4879_s15 + $0x20] sm:$0xff]   ;;  %v4256_v30 = vld [vmem:[%s4879_s15 + $0x28] sm:$0xff]   ;;  %v4257_v32 = vld [vmem:[%s4879_s15 + $0x30] sm:$0xff]  }
  0x22   : > { %3927 = vmatprep.subr.bf16.mxu1 %v4234_v6  ;;  %3973 = vmatprep.subr.bf16.mxu0 %v4874_v7  ;;  %v4259_v33 = vld [vmem:[%s4879_s15 + $0x30] sm:$0xff]   ;;  %v4260_v34 = vld [vmem:[%s4879_s15 + $0x38] sm:$0xff]   ;;  %v4263_v38 = vld [vmem:[%s4879_s15 + $0x40] sm:$0xff]  }
  0x23   : > { %v4262_v36 = vld [vmem:[%s4879_s15 + $0x38] sm:$0xff]   ;;  %v4265_v39 = vld [vmem:[%s4879_s15 + $0x40] sm:$0xff]   ;;  %v4266_v40 = vld [vmem:[%s4879_s15 + $0x10] sm:$0xff]  }
  0x24   : > { %v4267_v42 = vld [vmem:[%s4879_s15 + $0x48] sm:$0xff]   ;;  %v4268_v43 = vld [vmem:[%s4879_s15 + $0x18] sm:$0xff]   ;;  %v4269_v44 = vld [vmem:[%s4879_s15 + $0x50] sm:$0xff]  }
  0x25   : > { %3928 = vmatpush3.bf16.msra.mxu1 %v4234_v6  ;;  %3974 = vmatpush3.bf16.msra.mxu0 %v4874_v7  ;;  %v4270_v45 = vld [vmem:[%s4879_s15 + $0x20] sm:$0xff]   ;;  %v4271_v46 = vld [vmem:[%s4879_s15 + $0x58] sm:$0xff]   ;;  %v4272_v47 = vld [vmem:[%s4879_s15 + $0x28] sm:$0xff]  }
  0x26   : > { %3929 = vmatprep.subr.bf16.mxu1 %v4236_v8  ;;  %3975 = vmatprep.subr.bf16.mxu0 %v4889_v9  ;;  %v4273_v48 = vld [vmem:[%s4879_s15 + $0x60] sm:$0xff]   ;;  %v4274_v49 = vld [vmem:[%s4879_s15 + $0x30] sm:$0xff]   ;;  %v1729_v52 = vld [vmem:[%s5009_s29 + $0x8] sm:$0xff] }
  0x27   : > { %v1728_v50 = vld [vmem:[%s5009_s29] sm:$0xff]  ;;  %v1730_v51 = vld [vmem:[%s5009_s29 + $0x10] sm:$0xff]  ;;  %v1731_v53 = vld [vmem:[%s5009_s29 + $0x18] sm:$0xff] }
  0x28   : > { %1792 = vrot.lane.b32.xlu0 %v1728_v50, %s4741_s17  ;;  %1796 = vrot.lane.b32.xlu1 %v1730_v51, %s4741_s17  ;;  %v4275_v54 = vld [vmem:[%s4879_s15 + $0x68] sm:$0xff]   ;;  %v4276_v55 = vld [vmem:[%s4879_s15 + $0x38] sm:$0xff]  }
  0x29   : > { %3930 = vmatpush3.bf16.msra.mxu1 %v4236_v8  ;;  %3976 = vmatpush3.bf16.msra.mxu0 %v4889_v9  ;;  %v4277_v56 = vld [vmem:[%s4879_s15 + $0x70] sm:$0xff]   ;;  %v1732_v57 = vld [vmem:[%s5009_s29 + $0x20] sm:$0xff]  ;;  %v1733_v59 = vld [vmem:[%s5009_s29 + $0x28] sm:$0xff] }
  0x2a   : > { %3931 = vmatprep.subr.bf16.mxu1 %v4238_v12  ;;  %3977 = vmatprep.subr.bf16.mxu0 %v4901_v13  ;;  %v4278_v58 = vld [vmem:[%s4879_s15 + $0x40] sm:$0xff]   ;;  %v1734_v60 = vld [vmem:[%s5009_s29 + $0x30] sm:$0xff]  ;;  %v1735_v61 = vld [vmem:[%s5009_s29 + $0x38] sm:$0xff] }
  0x2b   : > { %v4279_v62 = vld [vmem:[%s4879_s15 + $0x78] sm:$0xff]   ;;  %v4280_v63 = vld [vmem:[%s4879_s15 + $0x48] sm:$0xff]   ;;  %v4283_v2 = vld [vmem:[%s4879_s15 + $0x50] sm:$0xff]  }
  0x2c   : > { %1794 = vrot.lane.b32.xlu0 %v1729_v52, %s4741_s17  ;;  %1798 = vrot.lane.b32.xlu1 %v1731_v53, %s4741_s17  ;;  %v4281_v0 = vld [vmem:[%s4879_s15 + $0x48] sm:$0xff]   ;;  %v1738_v4 = vld [vmem:[%s5009_s29 + $0x50] sm:$0xff] }
  0x2d   : > { %3932 = vmatpush3.bf16.msra.mxu1 %v4238_v12  ;;  %3978 = vmatpush3.bf16.msra.mxu0 %v4901_v13  ;;  %v4282_v6 = vld [vmem:[%s4879_s15 + $0x50] sm:$0xff]   ;;  %v4285_v8 = vld [vmem:[%s4879_s15 + $0x58] sm:$0xff]   ;;  %v4287_v10 = vld [vmem:[%s4879_s15 + $0x60] sm:$0xff]  }
  0x2e   : > { %4169 = vmatprep.subr.msk.bf16.mxu1 %vm512_vm1, %v4240_v14  ;;  %4170 = vmatprep.subr.msk.bf16.mxu0 %vm512_vm1, %v4913_v15  ;;  %v1741_v11 = vld [vmem:[%s5009_s29 + $0x68] sm:$0xff]  ;;  %v1742_v12 = vld [vmem:[%s5009_s29 + $0x70] sm:$0xff]  ;;  %v4286_v14 = vld [vmem:[%s4879_s15 + $0x60] sm:$0xff]  }
  0x30   : > { %1800 = vrot.lane.b32.xlu0 %v1732_v57, %s4741_s17  ;;  %1802 = vrot.lane.b32.xlu1 %v1733_v59, %s4741_s17  ;;  %v5138_v57 = vld [vmem:[%s6615_s2] ss:$0 sm:$0xff] }
  0x31   : > { %3934 = vmatpush3.bf16.msra.mxu1 %v514_v16  ;;  %3980 = vmatpush3.bf16.msra.mxu0 %v4923_v18  ;;  %v4289_v16 = vld [vmem:[%s4879_s15 + $0x68] sm:$0xff]  }
  0x32   : > { %4059 = vmatprep.subr.bf16.mxu1 %v4840_v1  ;;  %4013 = vmatprep.subr.bf16.mxu0 %v4246_v19 }
  0x34   : > { %3936 = vmatmul.mubr.msk.bf16.vlgmr.msra.gmra.mrb[0].mxu1 %vm463_vm0, %v4244_v17  ;;  %3982 = vmatmul.mubr.msk.bf16.vlgmr.msra.gmra.mrb[0].mxu0 %vm463_vm0, %v4245_v20  ;;  %v1744_v17 = vld [vmem:[%s5009_s29 + $0x80] sm:$0xff]  ;;  %v1746_v20 = vld [vmem:[%s5009_s29 + $0x90] sm:$0xff] }
  0x35   : > { %3939 = vmatprep.mubr.msk.bf16.mxu1 %vm463_vm0, %v4248_v21  ;;  %4014 = vmatpush3.bf16.msra.mxu0 %v4246_v19  ;;  %v1745_v19 = vld [vmem:[%s5009_s29 + $0x88] sm:$0xff]  ;;  %v1747_v21 = vld [vmem:[%s5009_s29 + $0x98] sm:$0xff] }
  0x36   : > { %3985 = vmatprep.mubr.msk.bf16.mxu0 %vm463_vm0, %v4249_v22  ;;  %4015 = vmatprep.subr.bf16.mxu0 %v4247_v23  ;;  %v4290_v22 = vld [vmem:[%s4879_s15 + $0x70] sm:$0xff]  }
  0x37   : > { %4066 = vmatpush3.bf16.msra.mxu1 %v4840_v1  ;;  %1804 = vrot.lane.b32.xlu0 %v1734_v60, %s4741_s17  ;;  %v1736_v1 = vld [vmem:[%s5009_s29 + $0x40] sm:$0xff] }
  0x38   : > { %4060 = vmatprep.subr.bf16.mxu1 %v4850_v3  ;;  %1806 = vrot.lane.b32.xlu1 %v1735_v61, %s4741_s17 }
  0x39   : > { %4016 = vmatpush3.bf16.msra.mxu0 %v4247_v23  ;;  %v4292_v23 = vld [vmem:[%s4879_s15 + $0x78] sm:$0xff]  }
  0x3a   : > { %4017 = vmatprep.subr.bf16.mxu0 %v4252_v25 }
  0x3b   : > { %4067 = vmatpush3.bf16.msra.mxu1 %v4850_v3  ;;  %v1737_v3 = vld [vmem:[%s5009_s29 + $0x48] sm:$0xff]  ;;  %1808 = vrot.lane.b32.xlu0 %v1736_v1, %s4741_s17 }
  0x3c   : > { %3940 = vmatmul.mubr.msk.bf16.gmra.mrb[4].mxu1 %vm463_vm0, %v4250_v24  ;;  %4061 = vmatprep.subr.bf16.mxu1 %v4863_v5  ;;  %v4293_v24 = vld [vmem:[%s4879_s15 + $0x78] sm:$0xff]  }
  0x3d   : > { %3986 = vmatmul.mubr.msk.bf16.gmra.mrb[4].mxu0 %vm463_vm0, %v4251_v26  ;;  %3943 = vmatprep.mubr.msk.bf16.mxu1 %vm463_vm0, %v4254_v27  ;;  %v4295_v26 = vld [vmem:[%s4879_s15 + $0x80] sm:$0xff]   ;;  %v1749_v27 = vld [vmem:[%s5009_s29 + $0xa8] sm:$0xff] }
  0x3e   : > { %4018 = vmatpush3.bf16.msra.mxu0 %v4252_v25  ;;  %3989 = vmatprep.mubr.msk.bf16.mxu0 %vm463_vm0, %v4255_v28  ;;  %v1748_v25 = vld [vmem:[%s5009_s29 + $0xa0] sm:$0xff]  ;;  %v1750_v28 = vld [vmem:[%s5009_s29 + $0xb0] sm:$0xff] }
  0x3f   : > { %4019 = vmatprep.subr.bf16.mxu0 %v4253_v29  ;;  %4068 = vmatpush3.bf16.msra.mxu1 %v4863_v5  ;;  %v1739_v5 = vld [vmem:[%s5009_s29 + $0x58] sm:$0xff] }
  0x40   : > { %4062 = vmatprep.subr.bf16.mxu1 %v4874_v7  ;;  %1810 = vrot.lane.b32.xlu1 %v1737_v3, %s4741_s17 }
  0x41   : > { %1812 = vrot.lane.b32.xlu0 %v1738_v4, %s4741_s17 }
  0x42   : > { %4020 = vmatpush3.bf16.msra.mxu0 %v4253_v29  ;;  %v1751_v29 = vld [vmem:[%s5009_s29 + $0xb8] sm:$0xff] }
  0x43   : > { %4021 = vmatprep.subr.bf16.mxu0 %v4258_v31  ;;  %4069 = vmatpush3.bf16.msra.mxu1 %v4874_v7  ;;  %v4284_v7 = vld [vmem:[%s4879_s15 + $0x58] sm:$0xff]  }
  0x44   : > { %3944 = vmatmul.mubr.msk.bf16.gmra.mrb[8].mxu1 %vm463_vm0, %v4256_v30  ;;  %4063 = vmatprep.subr.bf16.mxu1 %v4889_v9  ;;  %v4294_v30 = vld [vmem:[%s4879_s15 + $0x80] sm:$0xff]  }
  0x45   : > { %3990 = vmatmul.mubr.msk.bf16.gmra.mrb[8].mxu0 %vm463_vm0, %v4257_v32  ;;  %3947 = vmatprep.mubr.msk.bf16.mxu1 %vm463_vm0, %v4259_v33  ;;  %v1752_v32 = vld [vmem:[%s5009_s29 + $0xc0] sm:$0xff]  ;;  %v1753_v33 = vld [vmem:[%s5009_s29 + $0xc8] sm:$0xff] }
  0x46   : > { %4022 = vmatpush3.bf16.msra.mxu0 %v4258_v31  ;;  %3993 = vmatprep.mubr.msk.bf16.mxu0 %vm463_vm0, %v4260_v34  ;;  %v4296_v31 = vld [vmem:[%s4879_s15 + $0x88] sm:$0xff]   ;;  %v1754_v34 = vld [vmem:[%s5009_s29 + $0xd0] sm:$0xff] }
  0x47   : > { %4023 = vmatprep.subr.bf16.mxu0 %v4261_v35  ;;  %4070 = vmatpush3.bf16.msra.mxu1 %v4889_v9  ;;  %v1740_v9 = vld [vmem:[%s5009_s29 + $0x60] sm:$0xff] }
  0x48   : > { %4064 = vmatprep.subr.bf16.mxu1 %v4901_v13  ;;  %1814 = vrot.lane.b32.xlu1 %v1739_v5, %s4741_s17 }
  0x49   : > { %1816 = vrot.lane.b32.xlu0 %v1740_v9, %s4741_s17 }
  0x4a   : > { %4024 = vmatpush3.bf16.msra.mxu0 %v4261_v35  ;;  %v1755_v35 = vld [vmem:[%s5009_s29 + $0xd8] sm:$0xff] }
  0x4b   : > { %4172 = vmatprep.subr.msk.bf16.mxu0 %vm512_vm1, %v4264_v37  ;;  %4071 = vmatpush3.bf16.msra.mxu1 %v4901_v13  ;;  %v1743_v13 = vld [vmem:[%s5009_s29 + $0x78] sm:$0xff]  ;;  %v1757_v37 = vld [vmem:[%s5009_s29 + $0xe8] sm:$0xff] }
  0x4c   : > { %3948 = vmatmul.mubr.msk.bf16.gmra.mrb[12].mxu1 %vm463_vm0, %v4262_v36  ;;  %4171 = vmatprep.subr.msk.bf16.mxu1 %vm512_vm1, %v4913_v15  ;;  %v4288_v15 = vld [vmem:[%s4879_s15 + $0x68] sm:$0xff]   ;;  %v1756_v36 = vld [vmem:[%s5009_s29 + $0xe0] sm:$0xff] }
  0x4d   : > { %3994 = vmatmul.mubr.msk.bf16.gmra.mrb[12].mxu0 %vm463_vm0, %v4263_v38  ;;  %3951 = vmatprep.mubr.msk.bf16.mxu1 %vm463_vm0, %v4265_v39  ;;  %v1758_v38 = vld [vmem:[%s5009_s29 + $0xf0] sm:$0xff]  ;;  %v1759_v39 = vld [vmem:[%s5009_s29 + $0xf8] sm:$0xff]  ;;  %s6357_s29 = scalar_lea.hbm %s6618_s5, %s6342_s19 }
  0x4e   : > { %4026 = vmatpush3.bf16.msra.mxu0 %v1338_v41  ;;  %4027 = vmatprep.mubr.msk.bf16.mxu0 %vm463_vm0, %v4266_v40 }
  0x4f   : > { %4072 = vmatpush3.bf16.msra.mxu1 %v4923_v18  ;;  %1818 = vrot.lane.b32.xlu1 %v1741_v11, %s4741_s17  ;;  %v4291_v18 = vld [vmem:[%s4879_s15 + $0x70] sm:$0xff]   ;;  %s6366_s15 = scalar_lea.sflag [#allocation5], %s3495_s18 }
  0x50   : > { %1820 = vrot.lane.b32.xlu0 %v1742_v12, %s4741_s17 }
  0x53   : > { %1822 = vrot.lane.b32.xlu1 %v1743_v13, %s4741_s17 }
  0x54   : > { %3952 = vmatmul.mubr.msk.bf16.gmra.mrb[16].mxu1 %vm463_vm0, %v4267_v42  ;;  %1824 = vrot.lane.b32.xlu0 %v1744_v17, %s4741_s17 }
  0x55   : > { %4028 = vmatmul.mubr.msk.bf16.vlgmr.msra.gmra.mrb[0].mxu0 %vm463_vm0, %v4268_v43  ;;  %3955 = vmatprep.mubr.msk.bf16.mxu1 %vm463_vm0, %v4269_v44 }
  0x56   : > { %4031 = vmatprep.mubr.msk.bf16.mxu0 %vm463_vm0, %v4270_v45 }
  0x57   : > { %1826 = vrot.lane.b32.xlu1 %v1745_v19, %s4741_s17 }
  0x58   : > { %1828 = vrot.lane.b32.xlu0 %v1746_v20, %s4741_s17 }
  0x5b   : > { %1830 = vrot.lane.b32.xlu1 %v1747_v21, %s4741_s17 }
  0x5c   : > { %3956 = vmatmul.mubr.msk.bf16.gmra.mrb[20].mxu1 %vm463_vm0, %v4271_v46  ;;  %1832 = vrot.lane.b32.xlu0 %v1748_v25, %s4741_s17 }
  0x5d   : > { %4032 = vmatmul.mubr.msk.bf16.gmra.mrb[4].mxu0 %vm463_vm0, %v4272_v47  ;;  %3959 = vmatprep.mubr.msk.bf16.mxu1 %vm463_vm0, %v4273_v48 }
  0x5e   : > { %4035 = vmatprep.mubr.msk.bf16.mxu0 %vm463_vm0, %v4274_v49 }
  0x5f   : > { %1834 = vrot.lane.b32.xlu1 %v1749_v27, %s4741_s17 }
  0x60   : > { %1836 = vrot.lane.b32.xlu0 %v1750_v28, %s4741_s17 }
  0x63   : > { %1838 = vrot.lane.b32.xlu1 %v1751_v29, %s4741_s17 }
  0x64   : > { %3960 = vmatmul.mubr.msk.bf16.gmra.mrb[24].mxu1 %vm463_vm0, %v4275_v54  ;;  %1840 = vrot.lane.b32.xlu0 %v1752_v32, %s4741_s17 }
  0x65   : > { %4036 = vmatmul.mubr.msk.bf16.gmra.mrb[8].mxu0 %vm463_vm0, %v4276_v55  ;;  %3963 = vmatprep.mubr.msk.bf16.mxu1 %vm463_vm0, %v4277_v56  ;;  %v1533_v55 = vlaneseq }
  0x66   : > { %4039 = vmatprep.mubr.msk.bf16.mxu0 %vm463_vm0, %v4278_v58 }
  0x67   : > { %1842 = vrot.lane.b32.xlu1 %v1753_v33, %s4741_s17  ;;  %v5140_v58 = vand.u32 127, %v1533_v55 }
  0x68   : > { %1844 = vrot.lane.b32.xlu0 %v1754_v34, %s4741_s17 }
  0x69   : > { %vm1535_vm2 = vcmp.lt.s32.totalorder %v5140_v58, 96 }
  0x6b   : > { %1846 = vrot.lane.b32.xlu1 %v1755_v35, %s4741_s17 }
  0x6c   : > { %3964 = vmatmul.mubr.msk.bf16.gmra.mrb[28].mxu1 %vm463_vm0, %v4279_v62  ;;  %1848 = vrot.lane.b32.xlu0 %v1756_v36, %s4741_s17 }
  0x6d   : > { %4040 = vmatmul.mubr.msk.bf16.gmra.mrb[12].mxu0 %vm463_vm0, %v4280_v63  ;;  %3997 = vmatprep.mubr.msk.bf16.mxu1 %vm463_vm0, %v4281_v0 }
  0x6e   : > { %4043 = vmatprep.mubr.msk.bf16.mxu0 %vm463_vm0, %v4283_v2 }
  0x6f   : > { %1850 = vrot.lane.b32.xlu1 %v1757_v37, %s4741_s17 }
  0x70   : > { %1852 = vrot.lane.b32.xlu0 %v1758_v38, %s4741_s17 }
  0x73   : > { %1854 = vrot.lane.b32.xlu1 %v1759_v39, %s4741_s17 }
  0x74   : > { %3998 = vmatmul.mubr.msk.bf16.vlgmr.msra.gmra.mrb[16].mxu1 %vm463_vm0, %v4282_v6 }
  0x75   : > { %4044 = vmatmul.mubr.msk.bf16.gmra.mrb[16].mxu0 %vm463_vm0, %v4284_v7  ;;  %4001 = vmatprep.mubr.msk.bf16.mxu1 %vm463_vm0, %v4285_v8 }
  0x76   : > { %4047 = vmatprep.mubr.msk.bf16.mxu0 %vm463_vm0, %v4287_v10 }
  0x7c   : > { %4002 = vmatmul.mubr.msk.bf16.gmra.mrb[20].mxu1 %vm463_vm0, %v4286_v14 }
  0x7d   : > { %4048 = vmatmul.mubr.msk.bf16.gmra.mrb[20].mxu0 %vm463_vm0, %v4288_v15  ;;  %4005 = vmatprep.mubr.msk.bf16.mxu1 %vm463_vm0, %v4289_v16 }
  0x7e   : > { %4051 = vmatprep.mubr.msk.bf16.mxu0 %vm463_vm0, %v4291_v18 }
  0x84   : > { %4006 = vmatmul.mubr.msk.bf16.gmra.mrb[24].mxu1 %vm463_vm0, %v4290_v22 }
  0x85   : > { %4052 = vmatmul.mubr.msk.bf16.gmra.mrb[24].mxu0 %vm463_vm0, %v4292_v23  ;;  %4009 = vmatprep.mubr.msk.bf16.mxu1 %vm463_vm0, %v4293_v24 }
  0x86   : > { %4055 = vmatprep.mubr.msk.bf16.mxu0 %vm463_vm0, %v4295_v26 }
  0x8c   : > { %4010 = vmatmul.mubr.msk.bf16.gmra.mrb[28].mxu1 %vm463_vm0, %v4294_v30 }
  0x8d   : > { %4056 = vmatmul.mubr.msk.bf16.gmra.mrb[28].mxu0 %vm463_vm0, %v4296_v31 }
 0x107   : > { %v3937_v40 = vpop.f32.mrb[0].mxu1 }
 0x108   : > { %v550_v41 = vpop.f32.mrb[1].mxu1  ;;  %v679_v59 = vadd.f32 %v3937_v40, %v5138_v57 }
 0x109   : > { %v3938_v42 = vpop.f32.mrb[2].mxu1  ;;  %v677_v60 = vadd.f32 %v5138_v57, %v550_v41 }
 0x10a   : > { %v553_v43 = vpop.f32.mrb[3].mxu1  ;;  %v680_v62 = vadd.f32 %v3938_v42, %v5138_v57 }
 0x10b   : > { %v678_v1 = vadd.f32 %v5138_v57, %v553_v43 }
 0x10f   : > { %v3941_v44 = vpop.f32.mrb[4].mxu1 }
 0x110   : > { %v566_v45 = vpop.f32.mrb[5].mxu1  ;;  %v683_v13 = vadd.f32 %v3941_v44, %v5138_v57 }
 0x111   : > { %v3942_v46 = vpop.f32.mrb[6].mxu1  ;;  %v681_v15 = vadd.f32 %v5138_v57, %v566_v45 }
 0x112   : > { %v569_v47 = vpop.f32.mrb[7].mxu1  ;;  %v684_v18 = vadd.f32 %v3942_v46, %v5138_v57 }
 0x113   : > { %v682_v21 = vadd.f32 %v5138_v57, %v569_v47 }
 0x117   : > { %v3945_v48 = vpop.f32.mrb[8].mxu1 }
 0x118   : > { %v582_v49 = vpop.f32.mrb[9].mxu1  ;;  %v687_v33 = vadd.f32 %v3945_v48, %v5138_v57 }
 0x119   : > { %v3946_v50 = vpop.f32.mrb[10].mxu1  ;;  %v685_v36 = vadd.f32 %v5138_v57, %v582_v49 }
 0x11a   : > { %v5125_v51 = vpop.f32.mrb[11].mxu1  ;;  %v688_v40 = vadd.f32 %v3946_v50, %v5138_v57 }
 0x11b   : > { %v686_v45 = vadd.f32 %v5138_v57, %v5125_v51 }
 0x11f   : > { %v5127_v52 = vpop.f32.mrb[12].mxu1 }
 0x120   : > { %v5129_v53 = vpop.f32.mrb[13].mxu1 }
 0x121   : > { %v5131_v54 = vpop.f32.mrb[14].mxu1 }
 0x122   : > { %v5133_v56 = vpop.f32.mrb[15].mxu1 }
 0x128   : > { %v4029_v61 = vpop.f32.mrb[0].mxu0 }
 0x129   : > { %v4074_v63 = vadd.f32 %v4029_v61, %v679_v59  ;;  %v1374_v0 = vpop.f32.mrb[1].mxu0 }
 0x12a   : > { %v4076_v2 = vadd.f32 %v1374_v0, %v677_v60  ;;  %v4030_v3 = vpop.f32.mrb[2].mxu0 }
 0x12b   : > { %v1538_v4 = vmul.f32 0.5, %v4074_v63  ;;  %v4078_v5 = vadd.f32 %v4030_v3, %v680_v62  ;;  %v1377_v6 = vpop.f32.mrb[3].mxu0 }
 0x12c   : > { %v1536_v7 = vmul.f32 0.5, %v4076_v2  ;;  %v4080_v8 = vadd.f32 %v1377_v6, %v678_v1 }
 0x12d   : > { %v1570_v9 = vsel %vm1535_vm2, %v1538_v4, %v4074_v63  ;;  %v1539_v10 = vmul.f32 0.5, %v4078_v5 }
 0x12e   : > { %4297 = vtanh.f32 %v1570_v9  ;;  %v1568_v11 = vsel %vm1535_vm2, %v1536_v7, %v4076_v2  ;;  %v1537_v12 = vmul.f32 0.5, %v4080_v8  ;;  %v689_v7 = vadd.f32 %v5138_v57, %v5129_v53 }
 0x12f   : > { %4299 = vtanh.f32 %v1568_v11  ;;  %v1571_v14 = vsel %vm1535_vm2, %v1539_v10, %v4078_v5  ;;  %v691_v5 = vadd.f32 %v5127_v52, %v5138_v57  ;;  %v692_v11 = vadd.f32 %v5131_v54, %v5138_v57 }
 0x130   : > { %4301 = vtanh.f32 %v1571_v14  ;;  %v1569_v16 = vsel %vm1535_vm2, %v1537_v12, %v4080_v8  ;;  %v4033_v17 = vpop.f32.mrb[4].mxu0 }
 0x131   : > { %4303 = vtanh.f32 %v1569_v16  ;;  %v4082_v19 = vadd.f32 %v4033_v17, %v683_v13  ;;  %v1390_v20 = vpop.f32.mrb[5].mxu0 }
 0x132   : > { %v4084_v22 = vadd.f32 %v1390_v20, %v681_v15  ;;  %v4034_v23 = vpop.f32.mrb[6].mxu0 }
 0x133   : > { %v1542_v24 = vmul.f32 0.5, %v4082_v19  ;;  %v4086_v25 = vadd.f32 %v4034_v23, %v684_v18  ;;  %v1393_v26 = vpop.f32.mrb[7].mxu0 }
 0x134   : > { %v1540_v27 = vmul.f32 0.5, %v4084_v22  ;;  %v4088_v28 = vadd.f32 %v1393_v26, %v682_v21 }
 0x135   : > { %v1574_v29 = vsel %vm1535_vm2, %v1542_v24, %v4082_v19  ;;  %v1543_v30 = vmul.f32 0.5, %v4086_v25  ;;  %v690_v19 = vadd.f32 %v5138_v57, %v5133_v56 }
 0x136   : > { %4305 = vtanh.f32 %v1574_v29  ;;  %v1572_v31 = vsel %vm1535_vm2, %v1540_v27, %v4084_v22  ;;  %v1541_v32 = vmul.f32 0.5, %v4088_v28 }
 0x137   : > { %4307 = vtanh.f32 %v1572_v31  ;;  %v1575_v34 = vsel %vm1535_vm2, %v1543_v30, %v4086_v25 }
 0x138   : > { %v4298_v35 = vpop.eup %4297  ;;  %4309 = vtanh.f32 %v1575_v34  ;;  %v1573_v37 = vsel %vm1535_vm2, %v1541_v32, %v4088_v28  ;;  %v4037_v38 = vpop.f32.mrb[8].mxu0 }
 0x139   : > { %v4300_v39 = vpop.eup %4299  ;;  %4311 = vtanh.f32 %v1573_v37  ;;  %v4090_v41 = vadd.f32 %v4037_v38, %v687_v33  ;;  %v1406_v42 = vpop.f32.mrb[9].mxu0  ;;  %v1634_v43 = vmul.f32 0.5, %v4298_v35 }
 0x13a   : > { %v4302_v44 = vpop.eup %4301  ;;  %v1632_v46 = vmul.f32 0.5, %v4300_v39  ;;  %v4092_v47 = vadd.f32 %v1406_v42, %v685_v36  ;;  %v4038_v48 = vpop.f32.mrb[10].mxu0 }
 0x13b   : > { %v4304_v49 = vpop.eup %4303  ;;  %v1546_v55 = vmul.f32 0.5, %v4090_v41  ;;  %v4094_v59 = vadd.f32 %v4038_v48, %v688_v40  ;;  %v1666_v60 = vadd.f32 0.5, %v1634_v43  ;;  %v1409_v61 = vpop.f32.mrb[11].mxu0  ;;  %v1635_v62 = vmul.f32 0.5, %v4302_v44 }
 0x13c   : > { %v1664_v63 = vadd.f32 0.5, %v1632_v46  ;;  %v1544_v0 = vmul.f32 0.5, %v4092_v47  ;;  %v4096_v50 = vadd.f32 %v1409_v61, %v686_v45  ;;  %v1633_v1 = vmul.f32 0.5, %v4304_v49 }
 0x13d   : > { %v1578_v2 = vsel %vm1535_vm2, %v1546_v55, %v4090_v41  ;;  %v1547_v3 = vmul.f32 0.5, %v4094_v59  ;;  %v5176_v51 = vsel %vm1535_vm2, %v1666_v60, %v4298_v35  ;;  %v1667_v4 = vadd.f32 0.5, %v1635_v62 }
 0x13e   : > { %4313 = vtanh.f32 %v1578_v2  ;;  %v1576_v6 = vsel %vm1535_vm2, %v1544_v0, %v4092_v47  ;;  %1956 = vrot.lane.b32.xlu0 %v5176_v51, %s4741_s17  ;;  %v1545_v9 = vmul.f32 0.5, %v4096_v50  ;;  %v1665_v52 = vadd.f32 0.5, %v1633_v1 }
 0x13f   : > { %4315 = vtanh.f32 %v1576_v6  ;;  %v1579_v8 = vsel %vm1535_vm2, %v1547_v3, %v4094_v59  ;;  %v5192_v12 = vsel %vm1535_vm2, %v1667_v4, %v4302_v44  ;;  %v5196_v53 = vsel %vm1535_vm2, %v1664_v63, %v4300_v39 }
 0x140   : > { %v4306_v10 = vpop.eup %4305  ;;  %4317 = vtanh.f32 %v1579_v8  ;;  %v4041_v13 = vpop.f32.mrb[12].mxu0  ;;  %v1577_v15 = vsel %vm1535_vm2, %v1545_v9, %v4096_v50  ;;  %1958 = vrot.lane.b32.xlu1 %v5192_v12, %s4741_s17  ;;  %v5208_v24 = vsel %vm1535_vm2, %v1665_v52, %v4304_v49 }
 0x141   : > { %v4308_v14 = vpop.eup %4307  ;;  %v4098_v16 = vadd.f32 %v4041_v13, %v691_v5  ;;  %v1422_v54 = vpop.f32.mrb[13].mxu0  ;;  %v1638_v17 = vmul.f32 0.5, %v4306_v10  ;;  %4319 = vtanh.f32 %v1577_v15 }
 0x142   : > { %v4310_v18 = vpop.eup %4309  ;;  %v1636_v20 = vmul.f32 0.5, %v4308_v14  ;;  %v4100_v21 = vadd.f32 %v1422_v54, %v689_v7  ;;  %v4042_v22 = vpop.f32.mrb[14].mxu0  ;;  %1952 = vrot.lane.b32.xlu0 %v5196_v53, %s4741_s17 }
 0x143   : > { %v4312_v23 = vpop.eup %4311  ;;  %v1550_v25 = vmul.f32 0.5, %v4098_v16  ;;  %v4102_v26 = vadd.f32 %v4042_v22, %v692_v11  ;;  %v1425_v27 = vpop.f32.mrb[15].mxu0  ;;  %v1670_v28 = vadd.f32 0.5, %v1638_v17  ;;  %v1639_v35 = vmul.f32 0.5, %v4310_v18 }
 0x144   : > { %v1668_v29 = vadd.f32 0.5, %v1636_v20  ;;  %v1548_v30 = vmul.f32 0.5, %v4100_v21  ;;  %v1637_v31 = vmul.f32 0.5, %v4312_v23  ;;  %v4104_v56 = vadd.f32 %v1425_v27, %v690_v19  ;;  %1954 = vrot.lane.b32.xlu1 %v5208_v24, %s4741_s17  ;;  %v5246_v17 = vpop.permute.xlu0 %1792 }
 0x145   : > { %v1582_v32 = vsel %vm1535_vm2, %v1550_v25, %v4098_v16  ;;  %v1551_v33 = vmul.f32 0.5, %v4102_v26  ;;  %v5216_v34 = vsel %vm1535_vm2, %v1670_v28, %v4306_v10  ;;  %v1671_v42 = vadd.f32 0.5, %v1639_v35 }
 0x146   : > { %4321 = vtanh.f32 %v1582_v32  ;;  %v1580_v36 = vsel %vm1535_vm2, %v1548_v30, %v4100_v21  ;;  %1964 = vrot.lane.b32.xlu0 %v5216_v34, %s4741_s17  ;;  %v1549_v38 = vmul.f32 0.5, %v4104_v56  ;;  %v1669_v41 = vadd.f32 0.5, %v1637_v31 }
 0x147   : > { %4323 = vtanh.f32 %v1580_v36  ;;  %v1583_v37 = vsel %vm1535_vm2, %v1551_v33, %v4102_v26  ;;  %v3999_v39 = vpop.f32.mrb[16].mxu1  ;;  %v5226_v46 = vsel %vm1535_vm2, %v1668_v29, %v4308_v14  ;;  %v5234_v61 = vsel %vm1535_vm2, %v1671_v42, %v4310_v18 }
 0x148   : > { %v4314_v40 = vpop.eup %4313  ;;  %4325 = vtanh.f32 %v1583_v37  ;;  %v1026_v43 = vpop.f32.mrb[17].mxu1  ;;  %v1581_v47 = vsel %vm1535_vm2, %v1549_v38, %v4104_v56  ;;  %v4105_v48 = vadd.f32 %v3999_v39, %v5138_v57  ;;  %1966 = vrot.lane.b32.xlu1 %v5234_v61, %s4741_s17  ;;  %v5244_v6 = vsel %vm1535_vm2, %v1669_v41, %v4312_v23 }
 0x149   : > { %v4045_v44 = vpop.f32.mrb[16].mxu0  ;;  %v4316_v45 = vpop.eup %4315  ;;  %v4107_v49 = vadd.f32 %v5138_v57, %v1026_v43  ;;  %4327 = vtanh.f32 %v1581_v47  ;;  %v1642_v8 = vmul.f32 0.5, %v4314_v40 }
 0x14a   : > { %v4000_v55 = vpop.f32.mrb[18].mxu1  ;;  %v1438_v59 = vpop.f32.mrb[17].mxu0  ;;  %v1640_v62 = vmul.f32 0.5, %v4316_v45  ;;  %1960 = vrot.lane.b32.xlu0 %v5226_v46, %s4741_s17  ;;  %v4106_v1 = vadd.f32 %v4105_v48, %v4045_v44 }
 0x14b   : > { %v4318_v60 = vpop.eup %4317  ;;  %v4109_v63 = vadd.f32 %v4000_v55, %v5138_v57  ;;  %v1029_v0 = vpop.f32.mrb[19].mxu1  ;;  %v4108_v3 = vadd.f32 %v4107_v49, %v1438_v59  ;;  %v1674_v16 = vadd.f32 0.5, %v1642_v8 }
 0x14c   : > { %v4046_v50 = vpop.f32.mrb[18].mxu0  ;;  %v4111_v2 = vadd.f32 %v5138_v57, %v1029_v0  ;;  %v4320_v5 = vpop.eup %4319  ;;  %v1643_v9 = vmul.f32 0.5, %v4318_v60  ;;  %v1554_v10 = vmul.f32 0.5, %v4106_v1  ;;  %v1672_v14 = vadd.f32 0.5, %v1640_v62  ;;  %1962 = vrot.lane.b32.xlu1 %v5244_v6, %s4741_s17 }
 0x14d   : > { %v1441_v4 = vpop.f32.mrb[19].mxu0  ;;  %v4110_v7 = vadd.f32 %v4109_v63, %v4046_v50  ;;  %v1641_v11 = vmul.f32 0.5, %v4320_v5  ;;  %v1552_v52 = vmul.f32 0.5, %v4108_v3  ;;  %v5258_v23 = vsel %vm1535_vm2, %v1674_v16, %v4314_v40  ;;  %v5287_v59 = vpop.permute.xlu1 %1796 }
 0x14e   : > { %v4112_v13 = vadd.f32 %v4111_v2, %v1441_v4  ;;  %v1675_v54 = vadd.f32 0.5, %v1643_v9  ;;  %v1586_v18 = vsel %vm1535_vm2, %v1554_v10, %v4106_v1  ;;  %1972 = vrot.lane.b32.xlu0 %v5258_v23, %s4741_s17  ;;  %v5270_v33 = vsel %vm1535_vm2, %v1672_v14, %v4316_v45  ;;  %v5289_v50 = vpop.permute.xlu0 %1794 }
 0x14f   : > { %v1555_v15 = vmul.f32 0.5, %v4110_v7  ;;  %v1584_v19 = vsel %vm1535_vm2, %v1552_v52, %v4108_v3  ;;  %v4003_v20 = vpop.f32.mrb[20].mxu1  ;;  %4329 = vtanh.f32 %v1586_v18  ;;  %v1673_v29 = vadd.f32 0.5, %v1641_v11 }
 0x150   : > { %v4322_v21 = vpop.eup %4321  ;;  %v1553_v25 = vmul.f32 0.5, %v4112_v13  ;;  %v1042_v26 = vpop.f32.mrb[21].mxu1  ;;  %4331 = vtanh.f32 %v1584_v19  ;;  %v5266_v30 = vsel %vm1535_vm2, %v1675_v54, %v4318_v60  ;;  %v4113_v38 = vadd.f32 %v4003_v20, %v5138_v57 }
 0x151   : > { %v1587_v22 = vsel %vm1535_vm2, %v1555_v15, %v4110_v7  ;;  %v4049_v27 = vpop.f32.mrb[20].mxu0  ;;  %v5260_v28 = vpop.eup %4323  ;;  %1974 = vrot.lane.b32.xlu1 %v5266_v30, %s4741_s17  ;;  %v4115_v40 = vadd.f32 %v5138_v57, %v1042_v26  ;;  %v1646_v45 = vmul.f32 0.5, %v4322_v21  ;;  %v5283_v48 = vsel %vm1535_vm2, %v1673_v29, %v4320_v5 }
 0x152   : > { %v4004_v31 = vpop.f32.mrb[22].mxu1  ;;  %v1454_v56 = vpop.f32.mrb[21].mxu0  ;;  %4333 = vtanh.f32 %v1587_v22  ;;  %v1585_v35 = vsel %vm1535_vm2, %v1553_v25, %v4112_v13  ;;  %v1644_v39 = vmul.f32 0.5, %v5260_v28  ;;  %v4114_v49 = vadd.f32 %v4113_v38, %v4049_v27  ;;  %1968 = vrot.lane.b32.xlu0 %v5270_v33, %s4741_s17 }
 0x153   : > { %v4326_v32 = vpop.eup %4325  ;;  %v1045_v36 = vpop.f32.mrb[23].mxu1  ;;  %4335 = vtanh.f32 %v1585_v35  ;;  %v4117_v43 = vadd.f32 %v4004_v31, %v5138_v57  ;;  %v4116_v55 = vadd.f32 %v4115_v40, %v1454_v56  ;;  %v1678_v63 = vadd.f32 0.5, %v1646_v45 }
 0x154   : > { %v4050_v37 = vpop.f32.mrb[22].mxu0  ;;  %v4328_v42 = vpop.eup %4327  ;;  %v4119_v44 = vadd.f32 %v5138_v57, %v1045_v36  ;;  %v1647_v47 = vmul.f32 0.5, %v4326_v32  ;;  %v1558_v1 = vmul.f32 0.5, %v4114_v49  ;;  %v1676_v5 = vadd.f32 0.5, %v1644_v39 }
 0x155   : > { %v1457_v41 = vpop.f32.mrb[23].mxu0  ;;  %v1645_v60 = vmul.f32 0.5, %v4328_v42  ;;  %v4118_v62 = vadd.f32 %v4117_v43, %v4050_v37  ;;  %v1556_v2 = vmul.f32 0.5, %v4116_v55  ;;  %1970 = vrot.lane.b32.xlu1 %v5283_v48, %s4741_s17  ;;  %v5295_v8 = vsel %vm1535_vm2, %v1678_v63, %v4322_v21  ;;  %v5323_v37 = vpop.permute.xlu1 %1798 }
 0x156   : > { %v4120_v0 = vadd.f32 %v4119_v44, %v1457_v41  ;;  %v1679_v3 = vadd.f32 0.5, %v1647_v47  ;;  %v1590_v52 = vsel %vm1535_vm2, %v1558_v1, %v4114_v49  ;;  %1980 = vrot.lane.b32.xlu0 %v5295_v8, %s4741_s17  ;;  %v5316_v56 = vsel %vm1535_vm2, %v1676_v5, %v5260_v28  ;;  %v5332_v45 = vpop.permute.xlu0 %1800 }
 0x157   : > { %v4007_v4 = vpop.f32.mrb[24].mxu1  ;;  %v1559_v7 = vmul.f32 0.5, %v4118_v62  ;;  %v1588_v13 = vsel %vm1535_vm2, %v1556_v2, %v4116_v55  ;;  %4337 = vtanh.f32 %v1590_v52  ;;  %v1677_v54 = vadd.f32 0.5, %v1645_v60 }
 0x158   : > { %v1557_v9 = vmul.f32 0.5, %v4120_v0  ;;  %v1058_v10 = vpop.f32.mrb[25].mxu1  ;;  %v4053_v11 = vpop.f32.mrb[24].mxu0  ;;  %4339 = vtanh.f32 %v1588_v13  ;;  %v5309_v25 = vsel %vm1535_vm2, %v1679_v3, %v4326_v32  ;;  %v4121_v26 = vadd.f32 %v4007_v4, %v5138_v57 }
 0x159   : > { %v4008_v14 = vpop.f32.mrb[26].mxu1  ;;  %v1470_v15 = vpop.f32.mrb[25].mxu0  ;;  %v1591_v18 = vsel %vm1535_vm2, %v1559_v7, %v4118_v62  ;;  %v4123_v27 = vadd.f32 %v5138_v57, %v1058_v10  ;;  %1982 = vrot.lane.b32.xlu1 %v5309_v25, %s4741_s17  ;;  %v5330_v40 = vsel %vm1535_vm2, %v1677_v54, %v4328_v42 }
 0x15a   : > { %v4330_v16 = vpop.eup %4329  ;;  %v1589_v19 = vsel %vm1535_vm2, %v1557_v9, %v4120_v0  ;;  %v1061_v20 = vpop.f32.mrb[27].mxu1  ;;  %4341 = vtanh.f32 %v1591_v18  ;;  %v4125_v35 = vadd.f32 %v4008_v14, %v5138_v57  ;;  %v4122_v38 = vadd.f32 %v4121_v26, %v4053_v11  ;;  %1976 = vrot.lane.b32.xlu0 %v5316_v56, %s4741_s17 }
 0x15b   : > { %v4054_v21 = vpop.f32.mrb[26].mxu0  ;;  %v4332_v22 = vpop.eup %4331  ;;  %4343 = vtanh.f32 %v1589_v19  ;;  %v4127_v39 = vadd.f32 %v5138_v57, %v1061_v20  ;;  %v4124_v28 = vadd.f32 %v4123_v27, %v1470_v15  ;;  %v1650_v44 = vmul.f32 0.5, %v4330_v16 }
 0x15c   : > { %v1473_v29 = vpop.f32.mrb[27].mxu0  ;;  %v4334_v31 = vpop.eup %4333  ;;  %v1648_v36 = vmul.f32 0.5, %v4332_v22  ;;  %v4126_v43 = vadd.f32 %v4125_v35, %v4054_v21  ;;  %v1562_v47 = vmul.f32 0.5, %v4122_v38 }
 0x15d   : > { %v5321_v32 = vpop.eup %4335  ;;  %v1560_v49 = vmul.f32 0.5, %v4124_v28  ;;  %v4128_v60 = vadd.f32 %v4127_v39, %v1473_v29  ;;  %1978 = vrot.lane.b32.xlu1 %v5330_v40, %s4741_s17  ;;  %v1682_v0 = vadd.f32 0.5, %v1650_v44  ;;  %v1651_v1 = vmul.f32 0.5, %v4334_v31  ;;  %v5347_v14 = vpop.permute.xlu1 %1802 }
 0x15e   : > { %v1680_v41 = vadd.f32 0.5, %v1648_v36  ;;  %v1649_v55 = vmul.f32 0.5, %v5321_v32  ;;  %v1563_v63 = vmul.f32 0.5, %v4126_v43  ;;  %v1594_v3 = vsel %vm1535_vm2, %v1562_v47, %v4122_v38  ;;  %v5361_v38 = vpop.permute.xlu0 %1804 }
 0x15f   : > { %v4011_v62 = vpop.f32.mrb[28].mxu1  ;;  %v1592_v4 = vsel %vm1535_vm2, %v1560_v49, %v4124_v28  ;;  %v1561_v5 = vmul.f32 0.5, %v4128_v60  ;;  %4345 = vtanh.f32 %v1594_v3  ;;  %v5345_v11 = vsel %vm1535_vm2, %v1682_v0, %v4330_v16 }
 0x160   : > { %v1074_v2 = vpop.f32.mrb[29].mxu1  ;;  %v4057_v42 = vpop.f32.mrb[28].mxu0  ;;  %v1595_v10 = vsel %vm1535_vm2, %v1563_v63, %v4126_v43  ;;  %v5351_v15 = vsel %vm1535_vm2, %v1680_v41, %v4332_v22  ;;  %4347 = vtanh.f32 %v1592_v4  ;;  %v1681_v54 = vadd.f32 0.5, %v1649_v55  ;;  %1988 = vrot.lane.b32.xlu0 %v5345_v11, %s4741_s17 }
 0x161   : > { %v4012_v7 = vpop.f32.mrb[30].mxu1  ;;  %v1486_v9 = vpop.f32.mrb[29].mxu0  ;;  %v1593_v18 = vsel %vm1535_vm2, %v1561_v5, %v4128_v60  ;;  %4349 = vtanh.f32 %v1595_v10  ;;  %v4129_v16 = vadd.f32 %v4011_v62, %v5138_v57  ;;  %v1683_v21 = vadd.f32 0.5, %v1651_v1 }
 0x162   : > { %v1077_v52 = vpop.f32.mrb[31].mxu1  ;;  %v4058_v13 = vpop.f32.mrb[30].mxu0  ;;  %v4131_v26 = vadd.f32 %v5138_v57, %v1074_v2  ;;  %4351 = vtanh.f32 %v1593_v18  ;;  %v4133_v22 = vadd.f32 %v4012_v7, %v5138_v57 }
 0x163   : > { %v1489_v19 = vpop.f32.mrb[31].mxu0  ;;  %v4338_v20 = vpop.eup %4337  ;;  %v4135_v29 = vadd.f32 %v5138_v57, %v1077_v52  ;;  %v5365_v39 = vsel %vm1535_vm2, %v1683_v21, %v4334_v31  ;;  %v4130_v28 = vadd.f32 %v4129_v16, %v4057_v42  ;;  %v5380_v42 = vsel %vm1535_vm2, %v1681_v54, %v5321_v32 }
 0x164   : > { %v4340_v27 = vpop.eup %4339  ;;  %v1654_v35 = vmul.f32 0.5, %v4338_v20  ;;  %v4132_v43 = vadd.f32 %v4131_v26, %v1486_v9  ;;  %1990 = vrot.lane.b32.xlu1 %v5365_v39, %s4741_s17  ;;  %v4134_v47 = vadd.f32 %v4133_v22, %v4058_v13  ;;  %1984 = vrot.lane.b32.xlu0 %v5351_v15, %s4741_s17  ;;  %v5371_v63 = vpop.permute.xlu1 %1806 }
 0x165   : > { %v4342_v36 = vpop.eup %4341  ;;  %v1652_v41 = vmul.f32 0.5, %v4340_v27  ;;  %v4136_v57 = vadd.f32 %v4135_v29, %v1489_v19  ;;  %v1566_v55 = vmul.f32 0.5, %v4130_v28  ;;  %v5394_v10 = vpop.permute.xlu0 %1808 }
 0x166   : > { %v4344_v44 = vpop.eup %4343  ;;  %v1686_v49 = vadd.f32 0.5, %v1654_v35  ;;  %v1564_v62 = vmul.f32 0.5, %v4132_v43  ;;  %v1567_v31 = vmul.f32 0.5, %v4134_v47  ;;  %v1655_v2 = vmul.f32 0.5, %v4342_v36 }
 0x167   : > { %v1684_v60 = vadd.f32 0.5, %v1652_v41  ;;  %v1565_v0 = vmul.f32 0.5, %v4136_v57  ;;  %v1598_v3 = vsel %vm1535_vm2, %v1566_v55, %v4130_v28  ;;  %v1653_v5 = vmul.f32 0.5, %v4344_v44 }
 0x168   : > { %v5375_v1 = vsel %vm1535_vm2, %v1686_v49, %v4338_v20  ;;  %v1596_v4 = vsel %vm1535_vm2, %v1564_v62, %v4132_v43  ;;  %4353 = vtanh.f32 %v1598_v3  ;;  %v1599_v7 = vsel %vm1535_vm2, %v1567_v31, %v4134_v47  ;;  %1986 = vrot.lane.b32.xlu1 %v5380_v42, %s4741_s17  ;;  %v5404_v22 = vpop.permute.xlu1 %1810 }
 0x169   : > { %v1597_v9 = vsel %vm1535_vm2, %v1565_v0, %v4136_v57  ;;  %1996 = vrot.lane.b32.xlu0 %v5375_v1, %s4741_s17  ;;  %v4346_v32 = vpop.eup %4345  ;;  %4355 = vtanh.f32 %v1596_v4  ;;  %v1687_v52 = vadd.f32 0.5, %v1655_v2  ;;  %v5398_v54 = vsel %vm1535_vm2, %v1684_v60, %v4340_v27 }
 0x16a   : > { %v4348_v13 = vpop.eup %4347  ;;  %4357 = vtanh.f32 %v1599_v7  ;;  %v1658_v18 = vmul.f32 0.5, %v4346_v32  ;;  %v1685_v20 = vadd.f32 0.5, %v1653_v5 }
 0x16b   : > { %v4350_v19 = vpop.eup %4349  ;;  %4359 = vtanh.f32 %v1597_v9  ;;  %v5402_v16 = vsel %vm1535_vm2, %v1687_v52, %v4342_v36  ;;  %v1656_v21 = vmul.f32 0.5, %v4348_v13  ;;  %v5414_v36 = vpop.permute.xlu0 %1812 }
 0x16c   : > { %v4352_v26 = vpop.eup %4351  ;;  %1998 = vrot.lane.b32.xlu1 %v5402_v16, %s4741_s17  ;;  %v1690_v27 = vadd.f32 0.5, %v1658_v18  ;;  %v1659_v29 = vmul.f32 0.5, %v4350_v19  ;;  %v5418_v43 = vsel %vm1535_vm2, %v1685_v20, %v4344_v44  ;;  %v5428_v55 = vpop.permute.xlu1 %1814 }
 0x16d   : > { %1992 = vrot.lane.b32.xlu0 %v5398_v54, %s4741_s17  ;;  %v1657_v35 = vmul.f32 0.5, %v4352_v26  ;;  %v1688_v47 = vadd.f32 0.5, %v1656_v21 }
 0x16e   : > { %v5412_v28 = vsel %vm1535_vm2, %v1690_v27, %v4346_v32  ;;  %v1691_v41 = vadd.f32 0.5, %v1659_v29 }
 0x16f   : > { %v1689_v60 = vadd.f32 0.5, %v1657_v35  ;;  %v5432_v44 = vsel %vm1535_vm2, %v1688_v47, %v4348_v13  ;;  %v5438_v4 = vpop.permute.xlu0 %1816 }
 0x170   : > { %1994 = vrot.lane.b32.xlu1 %v5418_v43, %s4741_s17  ;;  %v5426_v57 = vsel %vm1535_vm2, %v1691_v41, %v4350_v19  ;;  %v5448_v19 = vpop.permute.xlu1 %1818 }
 0x171   : > { %2004 = vrot.lane.b32.xlu0 %v5412_v28, %s4741_s17  ;;  %v5442_v9 = vsel %vm1535_vm2, %v1689_v60, %v4352_v26 }
 0x172   : > { %v4354_v49 = vpop.eup %4353 }
 0x173   : > { %v4356_v62 = vpop.eup %4355  ;;  %v1662_v31 = vmul.f32 0.5, %v4354_v49  ;;  %v5458_v21 = vpop.permute.xlu0 %1820 }
 0x174   : > { %v4358_v0 = vpop.eup %4357  ;;  %2006 = vrot.lane.b32.xlu1 %v5426_v57, %s4741_s17  ;;  %v1660_v2 = vmul.f32 0.5, %v4356_v62  ;;  %v5468_v29 = vpop.permute.xlu1 %1822 }
 0x175   : > { %2000 = vrot.lane.b32.xlu0 %v5432_v44, %s4741_s17  ;;  %v4360_v3 = vpop.eup %4359  ;;  %v1694_v5 = vadd.f32 0.5, %v1662_v31  ;;  %v1663_v7 = vmul.f32 0.5, %v4358_v0 }
 0x176   : > { %v1692_v32 = vadd.f32 0.5, %v1660_v2  ;;  %v1661_v52 = vmul.f32 0.5, %v4360_v3 }
 0x177   : > { %v5446_v13 = vsel %vm1535_vm2, %v1694_v5, %v4354_v49  ;;  %v1695_v18 = vadd.f32 0.5, %v1663_v7  ;;  %v5470_v35 = vpop.permute.xlu0 %1824 }
 0x178   : > { %2002 = vrot.lane.b32.xlu1 %v5442_v9, %s4741_s17  ;;  %v5462_v26 = vsel %vm1535_vm2, %v1692_v32, %v4356_v62  ;;  %v1693_v27 = vadd.f32 0.5, %v1661_v52  ;;  %v5478_v47 = vpop.permute.xlu1 %1826 }
 0x179   : > { %2012 = vrot.lane.b32.xlu0 %v5446_v13, %s4741_s17  ;;  %v5456_v20 = vsel %vm1535_vm2, %v1695_v18, %v4358_v0 }
 0x17a   : > { %v5474_v41 = vsel %vm1535_vm2, %v1693_v27, %v4360_v3 }
 0x17b   : > { %v5480_v49 = vpop.permute.xlu0 %1828 }
 0x17c   : > { %2014 = vrot.lane.b32.xlu1 %v5456_v20, %s4741_s17  ;;  %v5482_v60 = vpop.permute.xlu1 %1830 }
 0x17d   : > { %2008 = vrot.lane.b32.xlu0 %v5462_v26, %s4741_s17 }
 0x17f   : > { %v5484_v62 = vpop.permute.xlu0 %1832 }
 0x180   : > { %2010 = vrot.lane.b32.xlu1 %v5474_v41, %s4741_s17  ;;  %6636 = vst [vmem:[#allocation9_spill] sm:$0xff] %v5484_v62  ;;  %v5486_v31 = vpop.permute.xlu1 %1834 }
 0x181   : > { %6637 = vst [vmem:[#allocation10_spill] sm:$0xff] %v5486_v31 }
 0x183   : > { %v5488_v0 = vpop.permute.xlu0 %1836 }
 0x184   : > { %v5490_v2 = vpop.permute.xlu1 %1838 }
 0x185   : > { %6638 = vst [vmem:[#allocation11_spill] sm:$0xff] %v5490_v2 }
 0x187   : > { %v5492_v58 = vpop.permute.xlu0 %1840 }
 0x188   : > { %6639 = vst [vmem:[#allocation12_spill] sm:$0xff] %v5492_v58  ;;  %v5494_v3 = vpop.permute.xlu1 %1842 }
 0x189   : > { %6640 = vst [vmem:[#allocation13_spill] sm:$0xff] %v5494_v3 }
 0x18b   : > { %v5496_v5 = vpop.permute.xlu0 %1844 }
 0x18c   : > { %6641 = vst [vmem:[#allocation14_spill] sm:$0xff] %v5496_v5  ;;  %v5498_v7 = vpop.permute.xlu1 %1846 }
 0x18f   : > { %v5500_v32 = vpop.permute.xlu0 %1848 }
 0x190   : > { %6642 = vst [vmem:[#allocation15_spill] sm:$0xff] %v5500_v32  ;;  %v5502_v52 = vpop.permute.xlu1 %1850 }
 0x191   : > { %6643 = vst [vmem:[#allocation16_spill] sm:$0xff] %v5502_v52 }
 0x193   : > { %v5504_v18 = vpop.permute.xlu0 %1852 }
 0x194   : > { %6644 = vst [vmem:[#allocation17_spill] sm:$0xff] %v5504_v18  ;;  %v5506_v27 = vpop.permute.xlu1 %1854 }
 0x195   : > { %6645 = vst [vmem:[#allocation18_spill] sm:$0xff] %v5506_v27 }
 0x1b0   : > { %v1957_v31 = vpop.permute.xlu0 %1956 }
 0x1b1   : > { %v2050_v62 = vmul.f32 %v1957_v31, %v5176_v51 }
 0x1b2   : > { %v1959_v2 = vpop.permute.xlu1 %1958 }
 0x1b3   : > { %2116 = vrot.lane.b32.xlu0 %v2050_v62, %s4741_s17  ;;  %v2051_v3 = vmul.f32 %v1959_v2, %v5192_v12 }
 0x1b4   : > { %v1953_v58 = vpop.permute.xlu0 %1952 }
 0x1b5   : > { %v2048_v5 = vmul.f32 %v1953_v58, %v5196_v53  ;;  %2118 = vrot.lane.b32.xlu1 %v2051_v3, %s4741_s17 }
 0x1b6   : > { %v1955_v32 = vpop.permute.xlu1 %1954 }
 0x1b7   : > { %2112 = vrot.lane.b32.xlu0 %v2048_v5, %s4741_s17  ;;  %v2049_v52 = vmul.f32 %v1955_v32, %v5208_v24 }
 0x1b8   : > { %v1965_v18 = vpop.permute.xlu0 %1964 }
 0x1b9   : > { %v2054_v27 = vmul.f32 %v1965_v18, %v5216_v34  ;;  %2114 = vrot.lane.b32.xlu1 %v2049_v52, %s4741_s17 }
 0x1ba   : > { %v1967_v31 = vpop.permute.xlu1 %1966 }
 0x1bb   : > { %2124 = vrot.lane.b32.xlu0 %v2054_v27, %s4741_s17  ;;  %v2055_v58 = vmul.f32 %v1967_v31, %v5234_v61 }
 0x1bc   : > { %v1961_v62 = vpop.permute.xlu0 %1960 }
 0x1bd   : > { %v2052_v2 = vmul.f32 %v1961_v62, %v5226_v46  ;;  %2126 = vrot.lane.b32.xlu1 %v2055_v58, %s4741_s17 }
 0x1be   : > { %v1963_v3 = vpop.permute.xlu1 %1962 }
 0x1bf   : > { %2120 = vrot.lane.b32.xlu0 %v2052_v2, %s4741_s17  ;;  %v2053_v5 = vmul.f32 %v1963_v3, %v5244_v6 }
 0x1c0   : > { %v1973_v32 = vpop.permute.xlu0 %1972 }
 0x1c1   : > { %v2058_v18 = vmul.f32 %v1973_v32, %v5258_v23  ;;  %2122 = vrot.lane.b32.xlu1 %v2053_v5, %s4741_s17 }
 0x1c3   : > { %v1975_v52 = vpop.permute.xlu1 %1974  ;;  %2132 = vrot.lane.b32.xlu0 %v2058_v18, %s4741_s17 }
 0x1c4   : > { %v2059_v27 = vmul.f32 %v1975_v52, %v5266_v30  ;;  %v1969_v62 = vpop.permute.xlu0 %1968 }
 0x1c5   : > { %v2056_v31 = vmul.f32 %v1969_v62, %v5270_v33 }
 0x1c6   : > { %2134 = vrot.lane.b32.xlu1 %v2059_v27, %s4741_s17 }
 0x1c7   : > { %v1971_v2 = vpop.permute.xlu1 %1970  ;;  %2128 = vrot.lane.b32.xlu0 %v2056_v31, %s4741_s17 }
 0x1c8   : > { %v2057_v58 = vmul.f32 %v1971_v2, %v5283_v48  ;;  %v1981_v3 = vpop.permute.xlu0 %1980 }
 0x1c9   : > { %v2062_v32 = vmul.f32 %v1981_v3, %v5295_v8 }
 0x1ca   : > { %2130 = vrot.lane.b32.xlu1 %v2057_v58, %s4741_s17 }
 0x1cb   : > { %v1983_v5 = vpop.permute.xlu1 %1982  ;;  %2140 = vrot.lane.b32.xlu0 %v2062_v32, %s4741_s17 }
 0x1cc   : > { %v2063_v18 = vmul.f32 %v1983_v5, %v5309_v25  ;;  %v1977_v52 = vpop.permute.xlu0 %1976 }
 0x1cd   : > { %v2060_v62 = vmul.f32 %v1977_v52, %v5316_v56 }
 0x1ce   : > { %2142 = vrot.lane.b32.xlu1 %v2063_v18, %s4741_s17 }
 0x1cf   : > { %v1979_v27 = vpop.permute.xlu1 %1978  ;;  %2136 = vrot.lane.b32.xlu0 %v2060_v62, %s4741_s17 }
 0x1d0   : > { %v2061_v31 = vmul.f32 %v1979_v27, %v5330_v40 }
 0x1d2   : > { %2138 = vrot.lane.b32.xlu1 %v2061_v31, %s4741_s17  ;;  %v1989_v2 = vpop.permute.xlu0 %1988 }
 0x1d3   : > { %v2066_v58 = vmul.f32 %v1989_v2, %v5345_v11 }
 0x1d5   : > { %2148 = vrot.lane.b32.xlu0 %v2066_v58, %s4741_s17 }
 0x1d6   : > { %v1991_v3 = vpop.permute.xlu1 %1990  ;;  %v1985_v32 = vpop.permute.xlu0 %1984 }
 0x1d7   : > { %v2067_v5 = vmul.f32 %v1991_v3, %v5365_v39  ;;  %v2064_v52 = vmul.f32 %v1985_v32, %v5351_v15 }
 0x1d9   : > { %2150 = vrot.lane.b32.xlu1 %v2067_v5, %s4741_s17  ;;  %2144 = vrot.lane.b32.xlu0 %v2064_v52, %s4741_s17 }
 0x1da   : > { %v1987_v18 = vpop.permute.xlu1 %1986 }
 0x1db   : > { %v1997_v62 = vpop.permute.xlu0 %1996  ;;  %v2065_v27 = vmul.f32 %v1987_v18, %v5380_v42 }
 0x1dc   : > { %v2070_v31 = vmul.f32 %v1997_v62, %v5375_v1 }
 0x1dd   : > { %2146 = vrot.lane.b32.xlu1 %v2065_v27, %s4741_s17 }
 0x1de   : > { %2156 = vrot.lane.b32.xlu0 %v2070_v31, %s4741_s17  ;;  %v1999_v2 = vpop.permute.xlu1 %1998 }
 0x1df   : > { %v1993_v58 = vpop.permute.xlu0 %1992  ;;  %v2071_v3 = vmul.f32 %v1999_v2, %v5402_v16 }
 0x1e0   : > { %v2068_v32 = vmul.f32 %v1993_v58, %v5398_v54 }
 0x1e1   : > { %2158 = vrot.lane.b32.xlu1 %v2071_v3, %s4741_s17 }
 0x1e2   : > { %2152 = vrot.lane.b32.xlu0 %v2068_v32, %s4741_s17  ;;  %v1995_v5 = vpop.permute.xlu1 %1994 }
 0x1e3   : > { %v2005_v52 = vpop.permute.xlu0 %2004  ;;  %v2069_v18 = vmul.f32 %v1995_v5, %v5418_v43 }
 0x1e4   : > { %v2074_v62 = vmul.f32 %v2005_v52, %v5412_v28 }
 0x1e5   : > { %2154 = vrot.lane.b32.xlu1 %v2069_v18, %s4741_s17 }
 0x1e6   : > { %2164 = vrot.lane.b32.xlu0 %v2074_v62, %s4741_s17  ;;  %v2007_v27 = vpop.permute.xlu1 %2006 }
 0x1e7   : > { %v2001_v31 = vpop.permute.xlu0 %2000  ;;  %v2075_v2 = vmul.f32 %v2007_v27, %v5426_v57 }
 0x1e8   : > { %v2072_v58 = vmul.f32 %v2001_v31, %v5432_v44 }
 0x1e9   : > { %2166 = vrot.lane.b32.xlu1 %v2075_v2, %s4741_s17 }
 0x1ea   : > { %2160 = vrot.lane.b32.xlu0 %v2072_v58, %s4741_s17  ;;  %v2003_v3 = vpop.permute.xlu1 %2002 }
 0x1eb   : > { %v2013_v32 = vpop.permute.xlu0 %2012  ;;  %v2073_v5 = vmul.f32 %v2003_v3, %v5442_v9  ;;  %v1890_v3 = vmul.f32 %v5287_v59, %v5176_v51  ;;  %v1894_v59 = vmul.f32 %v5361_v38, %v5216_v34 }
 0x1ec   : > { %v2078_v52 = vmul.f32 %v2013_v32, %v5446_v13 }
 0x1ed   : > { %2162 = vrot.lane.b32.xlu1 %v2073_v5, %s4741_s17 }
 0x1ee   : > { %2172 = vrot.lane.b32.xlu0 %v2078_v52, %s4741_s17  ;;  %v2015_v18 = vpop.permute.xlu1 %2014  ;;  %v1891_v52 = vmul.f32 %v5323_v37, %v5192_v12 }
 0x1ef   : > { %v2009_v62 = vpop.permute.xlu0 %2008  ;;  %v2079_v27 = vmul.f32 %v2015_v18, %v5456_v20  ;;  %v1888_v18 = vmul.f32 %v5246_v17, %v5196_v53 }
 0x1f0   : > { %v2076_v31 = vmul.f32 %v2009_v62, %v5462_v26 }
 0x1f1   : > { %2174 = vrot.lane.b32.xlu1 %v2079_v27, %s4741_s17 }
 0x1f2   : > { %2168 = vrot.lane.b32.xlu0 %v2076_v31, %s4741_s17  ;;  %v2011_v2 = vpop.permute.xlu1 %2010 }
 0x1f3   : > { %v2077_v58 = vmul.f32 %v2011_v2, %v5474_v41 }
 0x1f5   : > { %2170 = vrot.lane.b32.xlu1 %v2077_v58, %s4741_s17  ;;  %v1889_v58 = vmul.f32 %v5289_v50, %v5208_v24  ;;  %v1895_v50 = vmul.f32 %v5371_v63, %v5234_v61 }
 0x225   : > { %v2117_v32 = vpop.permute.xlu0 %2116 }
 0x226   : > { %v2210_v5 = vadd.f32 %v2117_v32, %v1890_v3 }
 0x227   : > { %v2119_v62 = vpop.permute.xlu1 %2118 }
 0x228   : > { %2468 = vrot.lane.b32.xlu0 %v2210_v5, %s4742_s10  ;;  %v2211_v27 = vadd.f32 %v2119_v62, %v1891_v52  ;;  %4361 = vtanh.f32 %v2210_v5  ;;  %v1892_v52 = vmul.f32 %v5332_v45, %v5226_v46  ;;  %v1893_v5 = vmul.f32 %v5347_v14, %v5244_v6 }
 0x229   : > { %v2113_v31 = vpop.permute.xlu0 %2112 }
 0x22a   : > { %v2208_v2 = vadd.f32 %v2113_v31, %v1888_v18  ;;  %2470 = vrot.lane.b32.xlu1 %v2211_v27, %s4742_s10 }
 0x22b   : > { %v2115_v3 = vpop.permute.xlu1 %2114 }
 0x22c   : > { %2464 = vrot.lane.b32.xlu0 %v2208_v2, %s4742_s10  ;;  %v2209_v17 = vadd.f32 %v2115_v3, %v1889_v58  ;;  %4363 = vtanh.f32 %v2208_v2  ;;  %v1898_v3 = vmul.f32 %v5414_v36, %v5258_v23 }
 0x22d   : > { %v2125_v37 = vpop.permute.xlu0 %2124  ;;  %4365 = vtanh.f32 %v2211_v27 }
 0x22e   : > { %v2214_v32 = vadd.f32 %v2125_v37, %v1894_v59  ;;  %2466 = vrot.lane.b32.xlu1 %v2209_v17, %s4742_s10  ;;  %4367 = vtanh.f32 %v2209_v17 }
 0x22f   : > { %v2127_v38 = vpop.permute.xlu1 %2126 }
 0x230   : > { %2476 = vrot.lane.b32.xlu0 %v2214_v32, %s4742_s10  ;;  %v2215_v31 = vadd.f32 %v2127_v38, %v1895_v50  ;;  %4369 = vtanh.f32 %v2214_v32  ;;  %v1896_v50 = vmul.f32 %v5394_v10, %v5270_v33 }
 0x231   : > { %v2121_v18 = vpop.permute.xlu0 %2120 }
 0x232   : > { %v2212_v62 = vadd.f32 %v2121_v18, %v1892_v52  ;;  %2478 = vrot.lane.b32.xlu1 %v2215_v31, %s4742_s10  ;;  %v4362_v58 = vpop.eup %4361  ;;  %v1899_v18 = vmul.f32 %v5428_v55, %v5266_v30 }
 0x233   : > { %v2123_v45 = vpop.permute.xlu1 %2122 }
 0x234   : > { %2472 = vrot.lane.b32.xlu0 %v2212_v62, %s4742_s10  ;;  %v2213_v59 = vadd.f32 %v2123_v45, %v1893_v5  ;;  %4371 = vtanh.f32 %v2212_v62  ;;  %v1897_v5 = vmul.f32 %v5404_v22, %v5283_v48 }
 0x235   : > { %v2133_v63 = vpop.permute.xlu0 %2132  ;;  %4373 = vtanh.f32 %v2215_v31 }
 0x236   : > { %2474 = vrot.lane.b32.xlu1 %v2213_v59, %s4742_s10  ;;  %v4364_v27 = vpop.eup %4363  ;;  %v2218_v14 = vadd.f32 %v2133_v63, %v1898_v3  ;;  %4375 = vtanh.f32 %v2213_v59  ;;  %v1903_v3 = vmul.f32 %v5468_v29, %v5309_v25 }
 0x237   : > { %v4366_v2 = vpop.eup %4365 }
 0x238   : > { %2308 = vrot.lane.b32.xlu0 %v4362_v58, %s4741_s17  ;;  %v2135_v17 = vpop.permute.xlu1 %2134  ;;  %v4368_v52 = vpop.eup %4367  ;;  %v1902_v58 = vmul.f32 %v5458_v21, %v5295_v8  ;;  %4377 = vtanh.f32 %v2218_v14 }
 0x239   : > { %v2129_v37 = vpop.permute.xlu0 %2128  ;;  %v2219_v32 = vadd.f32 %v2135_v17, %v1899_v18 }
 0x23a   : > { %2310 = vrot.lane.b32.xlu1 %v4366_v2, %s4741_s17  ;;  %v2216_v36 = vadd.f32 %v2129_v37, %v1896_v50  ;;  %v4370_v10 = vpop.eup %4369  ;;  %v1900_v2 = vmul.f32 %v5438_v4, %v5316_v56  ;;  %v1901_v37 = vmul.f32 %v5448_v19, %v5330_v40 }
 0x23c   : > { %2304 = vrot.lane.b32.xlu0 %v4364_v27, %s4741_s17  ;;  %v2131_v38 = vpop.permute.xlu1 %2130  ;;  %4379 = vtanh.f32 %v2216_v36 }
 0x23d   : > { %v2217_v45 = vadd.f32 %v2131_v38, %v1897_v5  ;;  %v2141_v55 = vpop.permute.xlu0 %2140  ;;  %4381 = vtanh.f32 %v2219_v32  ;;  %v1907_v5 = vmul.f32 %v5482_v60, %v5365_v39  ;;  %v1905_v60 = vmul.f32 %v5478_v47, %v5380_v42 }
 0x23e   : > { %2306 = vrot.lane.b32.xlu1 %v4368_v52, %s4741_s17  ;;  %v4372_v62 = vpop.eup %4371  ;;  %v2222_v22 = vadd.f32 %v2141_v55, %v1902_v58 }
 0x23f   : > { %v4374_v31 = vpop.eup %4373  ;;  %4383 = vtanh.f32 %v2217_v45 }
 0x240   : > { %2484 = vrot.lane.b32.xlu0 %v2218_v14, %s4742_s10  ;;  %v2143_v63 = vpop.permute.xlu1 %2142  ;;  %v4376_v27 = vpop.eup %4375  ;;  %4385 = vtanh.f32 %v2222_v22 }
 0x241   : > { %v2137_v59 = vpop.permute.xlu0 %2136  ;;  %v2223_v14 = vadd.f32 %v2143_v63, %v1903_v3 }
 0x242   : > { %2486 = vrot.lane.b32.xlu1 %v2219_v32, %s4742_s10  ;;  %v2220_v21 = vadd.f32 %v2137_v59, %v1900_v2  ;;  %v4378_v4 = vpop.eup %4377 }
 0x243   : > { %4387 = vtanh.f32 %v2223_v14 }
 0x244   : > { %2480 = vrot.lane.b32.xlu0 %v2216_v36, %s4742_s10  ;;  %v2139_v17 = vpop.permute.xlu1 %2138  ;;  %v1906_v36 = vmul.f32 %v5480_v49, %v5345_v11  ;;  %4389 = vtanh.f32 %v2220_v21  ;;  %v1904_v49 = vmul.f32 %v5470_v35, %v5351_v15  ;;  %v1910_v35 = vmul.f32 %v5488_v0, %v5375_v1 }
 0x245   : > { %v2221_v52 = vadd.f32 %v2139_v17, %v1901_v37  ;;  %v6647_v17 = vld [vmem:[#allocation11_spill] sm:$0xff] }
 0x246   : > { %2482 = vrot.lane.b32.xlu1 %v2217_v45, %s4742_s10  ;;  %v4380_v29 = vpop.eup %4379  ;;  %v1911_v37 = vmul.f32 %v6647_v17, %v5402_v16 }
 0x247   : > { %v2149_v50 = vpop.permute.xlu0 %2148  ;;  %v4382_v18 = vpop.eup %4381  ;;  %4391 = vtanh.f32 %v2221_v52 }
 0x248   : > { %2316 = vrot.lane.b32.xlu0 %v4370_v10, %s4741_s17  ;;  %v2226_v19 = vadd.f32 %v2149_v50, %v1906_v36 }
 0x249   : > { %v4384_v32 = vpop.eup %4383 }
 0x24a   : > { %2318 = vrot.lane.b32.xlu1 %v4374_v31, %s4741_s17  ;;  %v4386_v10 = vpop.eup %4385  ;;  %4393 = vtanh.f32 %v2226_v19 }
 0x24b   : > { %v2151_v38 = vpop.permute.xlu1 %2150  ;;  %v2145_v55 = vpop.permute.xlu0 %2144 }
 0x24c   : > { %2312 = vrot.lane.b32.xlu0 %v4372_v62, %s4741_s17  ;;  %v2227_v45 = vadd.f32 %v2151_v38, %v1907_v5  ;;  %v2224_v62 = vadd.f32 %v2145_v55, %v1904_v49  ;;  %v6649_v5 = vld [vmem:[#allocation14_spill] sm:$0xff] }
 0x24d   : > { %v4388_v31 = vpop.eup %4387 }
 0x24e   : > { %2314 = vrot.lane.b32.xlu1 %v4376_v27, %s4741_s17  ;;  %v4390_v63 = vpop.eup %4389  ;;  %4395 = vtanh.f32 %v2224_v62 }
 0x24f   : > { %v2147_v58 = vpop.permute.xlu1 %2146  ;;  %4397 = vtanh.f32 %v2227_v45 }
 0x250   : > { %2492 = vrot.lane.b32.xlu0 %v2222_v22, %s4742_s10  ;;  %v2157_v22 = vpop.permute.xlu0 %2156  ;;  %v2225_v59 = vadd.f32 %v2147_v58, %v1905_v60  ;;  %v1915_v60 = vmul.f32 %v5498_v7, %v5426_v57 }
 0x251   : > { %v2230_v27 = vadd.f32 %v2157_v22, %v1910_v35  ;;  %v6651_v35 = vld [vmem:[#allocation13_spill] sm:$0xff] }
 0x252   : > { %2494 = vrot.lane.b32.xlu1 %v2223_v14, %s4742_s10  ;;  %v6646_v14 = vld [vmem:[#allocation9_spill] sm:$0xff]  ;;  %4399 = vtanh.f32 %v2225_v59 }
 0x253   : > { %v2159_v2 = vpop.permute.xlu1 %2158  ;;  %v1908_v47 = vmul.f32 %v6646_v14, %v5398_v54  ;;  %4401 = vtanh.f32 %v2230_v27 }
 0x254   : > { %2488 = vrot.lane.b32.xlu0 %v2220_v21, %s4742_s10  ;;  %v2153_v3 = vpop.permute.xlu0 %2152  ;;  %v4392_v21 = vpop.eup %4391 }
 0x255   : > { %v2228_v0 = vadd.f32 %v2153_v3, %v1908_v47  ;;  %v6652_v47 = vld [vmem:[#allocation17_spill] sm:$0xff] }
 0x256   : > { %2490 = vrot.lane.b32.xlu1 %v2221_v52, %s4742_s10  ;;  %v1918_v17 = vmul.f32 %v6652_v47, %v5446_v13 }
 0x257   : > { %v2155_v52 = vpop.permute.xlu1 %2154  ;;  %4403 = vtanh.f32 %v2228_v0 }
 0x258   : > { %2324 = vrot.lane.b32.xlu0 %v4378_v4, %s4741_s17  ;;  %v2231_v4 = vadd.f32 %v2159_v2, %v1911_v37 }
 0x25a   : > { %2326 = vrot.lane.b32.xlu1 %v4382_v18, %s4741_s17  ;;  %v4394_v18 = vpop.eup %4393  ;;  %4405 = vtanh.f32 %v2231_v4 }
 0x25b   : > { %v2167_v55 = vpop.permute.xlu1 %2166 }
 0x25c   : > { %2320 = vrot.lane.b32.xlu0 %v4380_v29, %s4741_s17  ;;  %v6648_v29 = vld [vmem:[#allocation10_spill] sm:$0xff] }
 0x25d   : > { %v1909_v50 = vmul.f32 %v6648_v29, %v5418_v43  ;;  %v6653_v29 = vld [vmem:[#allocation15_spill] sm:$0xff] }
 0x25e   : > { %2322 = vrot.lane.b32.xlu1 %v4384_v32, %s4741_s17  ;;  %v4396_v32 = vpop.eup %4395 }
 0x25f   : > { %v2229_v36 = vadd.f32 %v2155_v52, %v1909_v50  ;;  %v4398_v38 = vpop.eup %4397  ;;  %v1916_v50 = vmul.f32 %v6653_v29, %v5462_v26 }
 0x260   : > { %2500 = vrot.lane.b32.xlu0 %v2226_v19, %s4742_s10  ;;  %v2165_v19 = vpop.permute.xlu0 %2164 }
 0x261   : > { %4407 = vtanh.f32 %v2229_v36 }
 0x262   : > { %2502 = vrot.lane.b32.xlu1 %v2227_v45, %s4742_s10 }
 0x264   : > { %2332 = vrot.lane.b32.xlu0 %v4386_v10, %s4741_s17  ;;  %v1914_v10 = vmul.f32 %v6649_v5, %v5412_v28  ;;  %v2161_v49 = vpop.permute.xlu0 %2160  ;;  %v6655_v5 = vld [vmem:[#allocation16_spill] sm:$0xff] }
 0x266   : > { %2334 = vrot.lane.b32.xlu1 %v4388_v31, %s4741_s17  ;;  %v2234_v45 = vadd.f32 %v2165_v19, %v1914_v10  ;;  %v6650_v31 = vld [vmem:[#allocation12_spill] sm:$0xff]  ;;  %v1917_v10 = vmul.f32 %v6655_v5, %v5474_v41 }
 0x267   : > { %v1912_v58 = vmul.f32 %v6650_v31, %v5432_v44 }
 0x268   : > { %2496 = vrot.lane.b32.xlu0 %v2224_v62, %s4742_s10  ;;  %v4400_v62 = vpop.eup %4399  ;;  %v2173_v7 = vpop.permute.xlu0 %2172  ;;  %4409 = vtanh.f32 %v2234_v45 }
 0x269   : > { %v2232_v22 = vadd.f32 %v2161_v49, %v1912_v58  ;;  %v4402_v2 = vpop.eup %4401  ;;  %v2238_v37 = vadd.f32 %v2173_v7, %v1918_v17 }
 0x26a   : > { %2498 = vrot.lane.b32.xlu1 %v2225_v59, %s4742_s10  ;;  %v2163_v59 = vpop.permute.xlu1 %2162 }
 0x26b   : > { %4411 = vtanh.f32 %v2232_v22 }
 0x26c   : > { %2328 = vrot.lane.b32.xlu0 %v4390_v63, %s4741_s17  ;;  %v2235_v63 = vadd.f32 %v2167_v55, %v1915_v60 }
 0x26e   : > { %2330 = vrot.lane.b32.xlu1 %v4392_v21, %s4741_s17  ;;  %v4404_v21 = vpop.eup %4403  ;;  %4413 = vtanh.f32 %v2235_v63 }
 0x26f   : > { %v4406_v14 = vpop.eup %4405  ;;  %4415 = vtanh.f32 %v2238_v37 }
 0x270   : > { %2508 = vrot.lane.b32.xlu0 %v2230_v27, %s4742_s10  ;;  %v1913_v27 = vmul.f32 %v6651_v35, %v5442_v9  ;;  %v4408_v52 = vpop.eup %4407 }
 0x272   : > { %2510 = vrot.lane.b32.xlu1 %v2231_v4, %s4742_s10  ;;  %v2233_v3 = vadd.f32 %v2163_v59, %v1913_v27  ;;  %v2169_v4 = vpop.permute.xlu0 %2168 }
 0x273   : > { %v2236_v19 = vadd.f32 %v2169_v4, %v1916_v50 }
 0x274   : > { %2504 = vrot.lane.b32.xlu0 %v2228_v0, %s4742_s10  ;;  %v2175_v0 = vpop.permute.xlu1 %2174  ;;  %4417 = vtanh.f32 %v2233_v3 }
 0x275   : > { %4419 = vtanh.f32 %v2236_v19 }
 0x276   : > { %2506 = vrot.lane.b32.xlu1 %v2229_v36, %s4742_s10 }
 0x278   : > { %2340 = vrot.lane.b32.xlu0 %v4394_v18, %s4741_s17  ;;  %v6654_v18 = vld [vmem:[#allocation18_spill] sm:$0xff] }
 0x279   : > { %v1919_v36 = vmul.f32 %v6654_v18, %v5456_v20 }
 0x27a   : > { %2342 = vrot.lane.b32.xlu1 %v4398_v38, %s4741_s17  ;;  %v2171_v38 = vpop.permute.xlu1 %2170 }
 0x27b   : > { %v2237_v55 = vadd.f32 %v2171_v38, %v1917_v10 }
 0x27c   : > { %2336 = vrot.lane.b32.xlu0 %v4396_v32, %s4741_s17  ;;  %v2239_v32 = vadd.f32 %v2175_v0, %v1919_v36 }
 0x27e   : > { %2338 = vrot.lane.b32.xlu1 %v4400_v62, %s4741_s17  ;;  %4421 = vtanh.f32 %v2239_v32 }
 0x27f   : > { %4423 = vtanh.f32 %v2237_v55 }
 0x280   : > { %2516 = vrot.lane.b32.xlu0 %v2234_v45, %s4742_s10  ;;  %v4410_v45 = vpop.eup %4409 }
 0x281   : > { %v4412_v62 = vpop.eup %4411 }
 0x282   : > { %2518 = vrot.lane.b32.xlu1 %v2235_v63, %s4742_s10  ;;  %v4414_v31 = vpop.eup %4413 }
 0x284   : > { %2512 = vrot.lane.b32.xlu0 %v2232_v22, %s4742_s10  ;;  %v4416_v22 = vpop.eup %4415 }
 0x285   : > { %v4418_v63 = vpop.eup %4417 }
 0x286   : > { %2514 = vrot.lane.b32.xlu1 %v2233_v3, %s4742_s10  ;;  %v4420_v27 = vpop.eup %4419 }
 0x288   : > { %2348 = vrot.lane.b32.xlu0 %v4402_v2, %s4741_s17  ;;  %v4422_v2 = vpop.eup %4421 }
 0x28a   : > { %2350 = vrot.lane.b32.xlu1 %v4406_v14, %s4741_s17 }
 0x28c   : > { %2344 = vrot.lane.b32.xlu0 %v4404_v21, %s4741_s17  ;;  %v4424_v21 = vpop.eup %4423 }
 0x28e   : > { %2346 = vrot.lane.b32.xlu1 %v4408_v52, %s4741_s17 }
 0x290   : > { %2524 = vrot.lane.b32.xlu0 %v2238_v37, %s4742_s10 }
 0x292   : > { %2526 = vrot.lane.b32.xlu1 %v2239_v32, %s4742_s10 }
 0x294   : > { %2520 = vrot.lane.b32.xlu0 %v2236_v19, %s4742_s10 }
 0x296   : > { %2522 = vrot.lane.b32.xlu1 %v2237_v55, %s4742_s10  ;;  %s4744_s10 = smov [#allocation4]  }
 0x297   : > { %s4621_s12 = sshll.u32 %s4744_s10, 4  ;;  %s4622_s12 = int_to_ptr.vmem [resolvable:$false] %s4621_s12 }
 0x298   : > { %2356 = vrot.lane.b32.xlu0 %v4410_v45, %s4741_s17 }
 0x29a   : > { %v2469_v49 = vpop.permute.xlu0 %2468  ;;  %2358 = vrot.lane.b32.xlu1 %v4414_v31, %s4741_s17 }
 0x29b   : > { %2563 = vst.msk [vmem:[%s5699_s13 + $0x10] sm:$0xff] %vm2560_vm3, %v2469_v49 }
 0x29c   : > { %2352 = vrot.lane.b32.xlu0 %v4412_v62, %s4741_s17  ;;  %v2471_v58 = vpop.permute.xlu1 %2470 }
 0x29d   : > { %2564 = vst.msk [vmem:[%s5699_s13 + $0x18] sm:$0xff] %vm2560_vm3, %v2471_v58 }
 0x29e   : > { %v2465_v60 = vpop.permute.xlu0 %2464  ;;  %2354 = vrot.lane.b32.xlu1 %v4418_v63, %s4741_s17 }
 0x29f   : > { %2561 = vst.msk [vmem:[%s5699_s13] sm:$0xff] %vm2560_vm3, %v2465_v60 }
 0x2a0   : > { %2364 = vrot.lane.b32.xlu0 %v4416_v22, %s4741_s17  ;;  %v2467_v59 = vpop.permute.xlu1 %2466 }
 0x2a1   : > { %2562 = vst.msk [vmem:[%s5699_s13 + $0x8] sm:$0xff] %vm2560_vm3, %v2467_v59 }
 0x2a2   : > { %v2477_v35 = vpop.permute.xlu0 %2476  ;;  %2366 = vrot.lane.b32.xlu1 %v4422_v2, %s4741_s17 }
 0x2a3   : > { %2567 = vst.msk [vmem:[%s5699_s13 + $0x30] sm:$0xff] %vm2560_vm3, %v2477_v35 }
 0x2a4   : > { %2360 = vrot.lane.b32.xlu0 %v4420_v27, %s4741_s17  ;;  %v2479_v7 = vpop.permute.xlu1 %2478 }
 0x2a5   : > { %2568 = vst.msk [vmem:[%s5699_s13 + $0x38] sm:$0xff] %vm2560_vm3, %v2479_v7 }
 0x2a6   : > { %v2473_v3 = vpop.permute.xlu0 %2472  ;;  %2362 = vrot.lane.b32.xlu1 %v4424_v21, %s4741_s17  ;;  %s3530_s17 = sshll.u32 %s5699_s13, 4  ;;  %s6362_s17 = int_to_ptr.vmem [resolvable:$true] %s3530_s17 }
 0x2a7   : > { %2565 = vst.msk [vmem:[%s5699_s13 + $0x20] sm:$0xff] %vm2560_vm3, %v2473_v3  ;;  %s4617_s9 = scalar_lea.vmem %s6362_s17, 4096  ;;  %p4624_p0 = scmp.lt.s32.totalorder %s6362_s17, %s4622_s12 }
 0x2a8   : > { %v2475_v47 = vpop.permute.xlu1 %2474  ;;  %p4618_p11 = scmp.ne.s32.totalorder %s6362_s17, %s4617_s9 }
 0x2a9   : > { %2566 = vst.msk [vmem:[%s5699_s13 + $0x28] sm:$0xff] %vm2560_vm3, %v2475_v47 }
 0x2aa   : > { %v2309_v14 = vpop.permute.xlu0 %2308  ;;  %p4619_p12 = pnand %p4618_p11, %p4824_p5 }
 0x2ab   : > { %v5733_v36 = vmul.f32 %v2309_v14, %v5176_v51 }
 0x2ac   : > { %v2311_v37 = vpop.permute.xlu1 %2310  ;;  %p4620_p13 = pneg %p4619_p12 }
 0x2ad   : > { %v2600_v10 = vsel %vm2593_vm4, %v5733_v36, -inf  ;;  %v5743_v55 = vmul.f32 %v2311_v37, %v5192_v12 }
 0x2ae   : > { %v2305_v17 = vpop.permute.xlu0 %2304 }
 0x2af   : > { %v5736_v38 = vmul.f32 %v2305_v17, %v5196_v53  ;;  %v2603_v12 = vsel %vm2593_vm4, %v5743_v55, -inf }
 0x2b0   : > { %v2307_v4 = vpop.permute.xlu1 %2306 }
 0x2b1   : > { %v2594_v49 = vsel %vm2593_vm4, %v5736_v38, -inf  ;;  %v5750_v53 = vmul.f32 %v2307_v4, %v5208_v24 }
 0x2b2   : > { %v2485_v0 = vpop.permute.xlu0 %2484 }
 0x2b3   : > { %2571 = vst.msk [vmem:[%s5699_s13 + $0x50] sm:$0xff] %vm2560_vm3, %v2485_v0  ;;  %v2597_v24 = vsel %vm2593_vm4, %v5750_v53, -inf }
 0x2b4   : > { %v2487_v29 = vpop.permute.xlu1 %2486 }
 0x2b5   : > { %2572 = vst.msk [vmem:[%s5699_s13 + $0x58] sm:$0xff] %vm2560_vm3, %v2487_v29 }
 0x2b6   : > { %v2481_v52 = vpop.permute.xlu0 %2480 }
 0x2b7   : > { %2569 = vst.msk [vmem:[%s5699_s13 + $0x40] sm:$0xff] %vm2560_vm3, %v2481_v52 }
 0x2b8   : > { %v2483_v18 = vpop.permute.xlu1 %2482 }
 0x2b9   : > { %2570 = vst.msk [vmem:[%s5699_s13 + $0x48] sm:$0xff] %vm2560_vm3, %v2483_v18 }
 0x2ba   : > { %v2317_v50 = vpop.permute.xlu0 %2316 }
 0x2bb   : > { %v5760_v22 = vmul.f32 %v2317_v50, %v5216_v34 }
 0x2bc   : > { %v2319_v32 = vpop.permute.xlu1 %2318 }
 0x2bd   : > { %v5755_v31 = vmul.f32 %v2319_v32, %v5234_v61  ;;  %v2612_v34 = vsel %vm2593_vm4, %v5760_v22, -inf }
 0x2be   : > { %v2313_v19 = vpop.permute.xlu0 %2312 }
 0x2bf   : > { %v2615_v59 = vsel %vm2593_vm4, %v5755_v31, -inf  ;;  %v5772_v27 = vmul.f32 %v2313_v19, %v5226_v46 }
 0x2c0   : > { %v2315_v45 = vpop.permute.xlu1 %2314 }
 0x2c1   : > { %v5767_v63 = vmul.f32 %v2315_v45, %v5244_v6  ;;  %v2606_v21 = vsel %vm2593_vm4, %v5772_v27, -inf }
 0x2c2   : > { %v2493_v5 = vpop.permute.xlu0 %2492 }
 0x2c3   : > { %2575 = vst.msk [vmem:[%s5699_s13 + $0x70] sm:$0xff] %vm2560_vm3, %v2493_v5  ;;  %2601 = vmax.xlane.f32.xlu0 %v2600_v10  ;;  %v2609_v6 = vsel %vm2593_vm4, %v5767_v63, -inf }
 0x2c4   : > { %v2495_v62 = vpop.permute.xlu1 %2494 }
 0x2c5   : > { %2576 = vst.msk [vmem:[%s5699_s13 + $0x78] sm:$0xff] %vm2560_vm3, %v2495_v62 }
 0x2c6   : > { %v2489_v51 = vpop.permute.xlu0 %2488 }
 0x2c7   : > { %2573 = vst.msk [vmem:[%s5699_s13 + $0x60] sm:$0xff] %vm2560_vm3, %v2489_v51  ;;  %2595 = vmax.xlane.f32.xlu0 %v2594_v49 }
 0x2c8   : > { %v2491_v60 = vpop.permute.xlu1 %2490 }
 0x2c9   : > { %2574 = vst.msk [vmem:[%s5699_s13 + $0x68] sm:$0xff] %vm2560_vm3, %v2491_v60 }
 0x2ca   : > { %v2325_v58 = vpop.permute.xlu0 %2324  ;;  %2598 = vmax.xlane.f32.xlu1 %v2597_v24 }
 0x2cb   : > { %2604 = vmax.xlane.f32.xlu0 %v2603_v12  ;;  %v5784_v46 = vmul.f32 %v2325_v58, %v5258_v23 }
 0x2cc   : > { %v2327_v35 = vpop.permute.xlu1 %2326 }
 0x2cd   : > { %v5777_v2 = vmul.f32 %v2327_v35, %v5266_v30  ;;  %v2624_v23 = vsel %vm2593_vm4, %v5784_v46, -inf }
 0x2ce   : > { %v2321_v61 = vpop.permute.xlu0 %2320  ;;  %2613 = vmax.xlane.f32.xlu1 %v2612_v34 }
 0x2cf   : > { %2616 = vmax.xlane.f32.xlu0 %v2615_v59  ;;  %v2627_v47 = vsel %vm2593_vm4, %v5777_v2, -inf  ;;  %v5794_v37 = vmul.f32 %v2321_v61, %v5270_v33 }
 0x2d0   : > { %v2323_v7 = vpop.permute.xlu1 %2322 }
 0x2d1   : > { %v5789_v14 = vmul.f32 %v2323_v7, %v5283_v48  ;;  %v2618_v29 = vsel %vm2593_vm4, %v5794_v37, -inf }
 0x2d2   : > { %v2501_v3 = vpop.permute.xlu0 %2500  ;;  %2607 = vmax.xlane.f32.xlu1 %v2606_v21 }
 0x2d3   : > { %2579 = vst.msk [vmem:[%s5699_s13 + $0x90] sm:$0xff] %vm2560_vm3, %v2501_v3  ;;  %2610 = vmax.xlane.f32.xlu0 %v2609_v6  ;;  %v2621_v48 = vsel %vm2593_vm4, %v5789_v14, -inf }
 0x2d4   : > { %v2503_v17 = vpop.permute.xlu1 %2502 }
 0x2d5   : > { %2580 = vst.msk [vmem:[%s5699_s13 + $0x98] sm:$0xff] %vm2560_vm3, %v2503_v17 }
 0x2d6   : > { %v2333_v30 = vpop.permute.xlu0 %2332  ;;  %2625 = vmax.xlane.f32.xlu1 %v2624_v23 }
 0x2d7   : > { %2628 = vmax.xlane.f32.xlu0 %v2627_v47  ;;  %v5805_v52 = vmul.f32 %v2333_v30, %v5295_v8 }
 0x2d8   : > { %v2335_v4 = vpop.permute.xlu1 %2334 }
 0x2d9   : > { %v5808_v33 = vmul.f32 %v2335_v4, %v5309_v25  ;;  %v2636_v8 = vsel %vm2593_vm4, %v5805_v52, -inf }
 0x2da   : > { %v2497_v0 = vpop.permute.xlu0 %2496  ;;  %2619 = vmax.xlane.f32.xlu1 %v2618_v29 }
 0x2db   : > { %2577 = vst.msk [vmem:[%s5699_s13 + $0x80] sm:$0xff] %vm2560_vm3, %v2497_v0  ;;  %2622 = vmax.xlane.f32.xlu0 %v2621_v48  ;;  %v2639_v18 = vsel %vm2593_vm4, %v5808_v33, -inf }
 0x2dc   : > { %v2499_v19 = vpop.permute.xlu1 %2498 }
 0x2dd   : > { %2578 = vst.msk [vmem:[%s5699_s13 + $0x88] sm:$0xff] %vm2560_vm3, %v2499_v19 }
 0x2de   : > { %v2329_v50 = vpop.permute.xlu0 %2328  ;;  %2637 = vmax.xlane.f32.xlu1 %v2636_v8 }
 0x2df   : > { %v5815_v32 = vmul.f32 %v2329_v50, %v5316_v56  ;;  %2640 = vmax.xlane.f32.xlu0 %v2639_v18 }
 0x2e0   : > { %v2331_v10 = vpop.permute.xlu1 %2330 }
 0x2e1   : > { %v2630_v5 = vsel %vm2593_vm4, %v5815_v32, -inf  ;;  %v5826_v45 = vmul.f32 %v2331_v10, %v5330_v40 }
 0x2e2   : > { %v2509_v25 = vpop.permute.xlu0 %2508  ;;  %2631 = vmax.xlane.f32.xlu1 %v2630_v5 }
 0x2e3   : > { %2583 = vst.msk [vmem:[%s5699_s13 + $0xb0] sm:$0xff] %vm2560_vm3, %v2509_v25  ;;  %v2633_v56 = vsel %vm2593_vm4, %v5826_v45, -inf }
 0x2e4   : > { %2634 = vmax.xlane.f32.xlu0 %v2633_v56  ;;  %v2511_v49 = vpop.permute.xlu1 %2510 }
 0x2e5   : > { %2584 = vst.msk [vmem:[%s5699_s13 + $0xb8] sm:$0xff] %vm2560_vm3, %v2511_v49 }
 0x2e6   : > { %v2505_v51 = vpop.permute.xlu0 %2504 }
 0x2e7   : > { %2581 = vst.msk [vmem:[%s5699_s13 + $0xa0] sm:$0xff] %vm2560_vm3, %v2505_v51 }
 0x2e8   : > { %v2507_v58 = vpop.permute.xlu1 %2506 }
 0x2e9   : > { %2582 = vst.msk [vmem:[%s5699_s13 + $0xa8] sm:$0xff] %vm2560_vm3, %v2507_v58 }
 0x2ea   : > { %v2341_v62 = vpop.permute.xlu0 %2340 }
 0x2eb   : > { %v5835_v12 = vmul.f32 %v2341_v62, %v5345_v11 }
 0x2ec   : > { %v2343_v24 = vpop.permute.xlu1 %2342 }
 0x2ed   : > { %v2648_v40 = vsel %vm2593_vm4, %v5835_v12, -inf  ;;  %v5845_v59 = vmul.f32 %v2343_v24, %v5365_v39 }
 0x2ee   : > { %v2337_v60 = vpop.permute.xlu0 %2336  ;;  %2649 = vmax.xlane.f32.xlu1 %v2648_v40 }
 0x2ef   : > { %v5842_v61 = vmul.f32 %v2337_v60, %v5351_v15  ;;  %v2651_v35 = vsel %vm2593_vm4, %v5845_v59, -inf }
 0x2f0   : > { %2652 = vmax.xlane.f32.xlu0 %v2651_v35  ;;  %v2339_v3 = vpop.permute.xlu1 %2338 }
 0x2f1   : > { %v2642_v11 = vsel %vm2593_vm4, %v5842_v61, -inf  ;;  %v5854_v6 = vmul.f32 %v2339_v3, %v5380_v42 }
 0x2f2   : > { %v2517_v34 = vpop.permute.xlu0 %2516  ;;  %2643 = vmax.xlane.f32.xlu1 %v2642_v11 }
 0x2f3   : > { %2587 = vst.msk [vmem:[%s5699_s13 + $0xd0] sm:$0xff] %vm2560_vm3, %v2517_v34  ;;  %v2645_v15 = vsel %vm2593_vm4, %v5854_v6, -inf }
 0x2f4   : > { %2646 = vmax.xlane.f32.xlu0 %v2645_v15  ;;  %v2519_v7 = vpop.permute.xlu1 %2518 }
 0x2f5   : > { %2588 = vst.msk [vmem:[%s5699_s13 + $0xd8] sm:$0xff] %vm2560_vm3, %v2519_v7 }
 0x2f6   : > { %v2513_v39 = vpop.permute.xlu0 %2512 }
 0x2f7   : > { %2585 = vst.msk [vmem:[%s5699_s13 + $0xc0] sm:$0xff] %vm2560_vm3, %v2513_v39 }
 0x2f8   : > { %v2515_v30 = vpop.permute.xlu1 %2514 }
 0x2f9   : > { %2586 = vst.msk [vmem:[%s5699_s13 + $0xc8] sm:$0xff] %vm2560_vm3, %v2515_v30 }
 0x2fa   : > { %v2349_v21 = vpop.permute.xlu0 %2348 }
 0x2fb   : > { %v5863_v47 = vmul.f32 %v2349_v21, %v5375_v1 }
 0x2fc   : > { %v2351_v23 = vpop.permute.xlu1 %2350 }
 0x2fd   : > { %v2660_v42 = vsel %vm2593_vm4, %v5863_v47, -inf  ;;  %v5873_v48 = vmul.f32 %v2351_v23, %v5402_v16 }
 0x2fe   : > { %v2345_v17 = vpop.permute.xlu0 %2344  ;;  %2661 = vmax.xlane.f32.xlu1 %v2660_v42 }
 0x2ff   : > { %v5870_v0 = vmul.f32 %v2345_v17, %v5398_v54  ;;  %v2663_v4 = vsel %vm2593_vm4, %v5873_v48, -inf }
 0x300   : > { %2664 = vmax.xlane.f32.xlu0 %v2663_v4  ;;  %v2347_v50 = vpop.permute.xlu1 %2346 }
 0x301   : > { %v2654_v1 = vsel %vm2593_vm4, %v5870_v0, -inf  ;;  %v5882_v18 = vmul.f32 %v2347_v50, %v5418_v43 }
 0x302   : > { %v2525_v29 = vpop.permute.xlu0 %2524  ;;  %2655 = vmax.xlane.f32.xlu1 %v2654_v1 }
 0x303   : > { %2591 = vst.msk [vmem:[%s5699_s13 + $0xf0] sm:$0xff] %vm2560_vm3, %v2525_v29  ;;  %v2657_v54 = vsel %vm2593_vm4, %v5882_v18, -inf }
 0x304   : > { %2658 = vmax.xlane.f32.xlu0 %v2657_v54  ;;  %v2527_v19 = vpop.permute.xlu1 %2526 }
 0x305   : > { %2592 = vst.msk [vmem:[%s5699_s13 + $0xf8] sm:$0xff] %vm2560_vm3, %v2527_v19 }
 0x306   : > { %v2521_v16 = vpop.permute.xlu0 %2520 }
 0x307   : > { %2589 = vst.msk [vmem:[%s5699_s13 + $0xe0] sm:$0xff] %vm2560_vm3, %v2521_v16 }
 0x308   : > { %v2523_v25 = vpop.permute.xlu1 %2522 }
 0x309   : > { %2590 = vst.msk [vmem:[%s5699_s13 + $0xe8] sm:$0xff] %vm2560_vm3, %v2523_v25  ;;  %s4623_s13 = scalar_lea.vmem %s4622_s12, 8192 }
 0x30a   : > { %v2357_v8 = vpop.permute.xlu0 %2356  ;;  %p4625_p1 = scmp.lt.s32.totalorder %s4623_s13, %s4617_s9 }
 0x30b   : > { %v5891_v5 = vmul.f32 %v2357_v8, %v5412_v28 }
 0x30c   : > { %v2359_v56 = vpop.permute.xlu1 %2358  ;;  %p4626_p2 = por %p4625_p1, %p4624_p0 }
 0x30d   : > { %v2672_v43 = vsel %vm2593_vm4, %v5891_v5, -inf  ;;  %v5901_v49 = vmul.f32 %v2359_v56, %v5426_v57 }
 0x30e   : > { %v2353_v10 = vpop.permute.xlu0 %2352  ;;  %2673 = vmax.xlane.f32.xlu1 %v2672_v43  ;;  %p4627_p3 = pnand %p4626_p2, %p4620_p13 }
 0x30f   : > { %v5898_v51 = vmul.f32 %v2353_v10, %v5432_v44  ;;  %v2675_v28 = vsel %vm2593_vm4, %v5901_v49, -inf }
 0x310   : > { %2676 = vmax.xlane.f32.xlu0 %v2675_v28  ;;  %v2355_v40 = vpop.permute.xlu1 %2354 }
 0x311   : > { %v2666_v62 = vsel %vm2593_vm4, %v5898_v51, -inf  ;;  %v5911_v24 = vmul.f32 %v2355_v40, %v5442_v9 }
 0x312   : > { %v2365_v58 = vpop.permute.xlu0 %2364  ;;  %2667 = vmax.xlane.f32.xlu1 %v2666_v62 }
 0x313   : > { %v5908_v60 = vmul.f32 %v2365_v58, %v5446_v13  ;;  %v2669_v44 = vsel %vm2593_vm4, %v5911_v24, -inf }
 0x314   : > { %2670 = vmax.xlane.f32.xlu0 %v2669_v44  ;;  %v2367_v35 = vpop.permute.xlu1 %2366 }
 0x315   : > { %v2684_v57 = vsel %vm2593_vm4, %v5908_v60, -inf  ;;  %v5921_v3 = vmul.f32 %v2367_v35, %v5456_v20 }
 0x316   : > { %v2361_v11 = vpop.permute.xlu0 %2360  ;;  %2685 = vmax.xlane.f32.xlu1 %v2684_v57 }
 0x317   : > { %v5918_v34 = vmul.f32 %v2361_v11, %v5462_v26  ;;  %v2687_v13 = vsel %vm2593_vm4, %v5921_v3, -inf }
 0x318   : > { %2688 = vmax.xlane.f32.xlu0 %v2687_v13  ;;  %v2363_v15 = vpop.permute.xlu1 %2362 }
 0x319   : > { %v2678_v9 = vsel %vm2593_vm4, %v5918_v34, -inf  ;;  %v5928_v39 = vmul.f32 %v2363_v15, %v5474_v41 }
 0x31a   : > { %2679 = vmax.xlane.f32.xlu1 %v2678_v9 }
 0x31b   : > { %v2681_v7 = vsel %vm2593_vm4, %v5928_v39, -inf }
 0x31c   : > { %2682 = vmax.xlane.f32.xlu0 %v2681_v7 }
 0x350   : > { %v2602_v26 = vpop.xlane.xlu0 %2601 }
 0x351   : > { %v5933_v20 = vsub.f32 %v5733_v36, %v2602_v26 }
 0x353   : > { %v2726_v21 = vmul.f32 1.442695, %v5933_v20 }
 0x354   : > { %v2596_v30 = vpop.xlane.xlu0 %2595 }
 0x355   : > { %4425 = vpow2.f32 %v2726_v21  ;;  %v5937_v42 = vsub.f32 %v5736_v38, %v2596_v30 }
 0x357   : > { %v2722_v17 = vmul.f32 1.442695, %v5937_v42  ;;  %v2599_v1 = vpop.xlane.xlu1 %2598 }
 0x358   : > { %v2605_v23 = vpop.xlane.xlu0 %2604  ;;  %v5944_v4 = vsub.f32 %v5750_v53, %v2599_v1 }
 0x359   : > { %4427 = vpow2.f32 %v2722_v17  ;;  %v5941_v41 = vsub.f32 %v5743_v55, %v2605_v23 }
 0x35a   : > { %v2724_v50 = vmul.f32 1.442695, %v5944_v4 }
 0x35b   : > { %v2728_v36 = vmul.f32 1.442695, %v5941_v41  ;;  %v2614_v54 = vpop.xlane.xlu1 %2613 }
 0x35c   : > { %v2617_v29 = vpop.xlane.xlu0 %2616  ;;  %v5954_v55 = vsub.f32 %v5760_v22, %v2614_v54 }
 0x35d   : > { %4429 = vpow2.f32 %v2728_v36  ;;  %v5949_v38 = vsub.f32 %v5755_v31, %v2617_v29 }
 0x35e   : > { %4431 = vpow2.f32 %v2724_v50  ;;  %v2734_v8 = vmul.f32 1.442695, %v5954_v55 }
 0x35f   : > { %v5951_v16 = vpop.eup %4425  ;;  %v2736_v19 = vmul.f32 1.442695, %v5949_v38  ;;  %v2608_v25 = vpop.xlane.xlu1 %2607 }
 0x360   : > { %v2611_v53 = vpop.xlane.xlu0 %2610  ;;  %2822 = vrot.lane.b32.xlu1 %v5951_v16, %s4743_s14  ;;  %v5966_v22 = vsub.f32 %v5772_v27, %v2608_v25 }
 0x361   : > { %4433 = vpow2.f32 %v2736_v19  ;;  %v5961_v31 = vsub.f32 %v5767_v63, %v2611_v53 }
 0x362   : > { %4435 = vpow2.f32 %v2734_v8  ;;  %v2730_v62 = vmul.f32 1.442695, %v5966_v22 }
 0x363   : > { %v5963_v43 = vpop.eup %4427  ;;  %v2732_v10 = vmul.f32 1.442695, %v5961_v31  ;;  %v2626_v63 = vpop.xlane.xlu1 %2625 }
 0x364   : > { %v2629_v56 = vpop.xlane.xlu0 %2628  ;;  %2818 = vrot.lane.b32.xlu1 %v5963_v43, %s4743_s14  ;;  %v5978_v40 = vsub.f32 %v5784_v46, %v2626_v63 }
 0x365   : > { %4437 = vpow2.f32 %v2732_v10  ;;  %v5973_v28 = vsub.f32 %v5777_v2, %v2629_v56 }
 0x366   : > { %4439 = vpow2.f32 %v2730_v62  ;;  %v2742_v11 = vmul.f32 1.442695, %v5978_v40 }
 0x367   : > { %v5975_v58 = vpop.eup %4429  ;;  %v2744_v27 = vmul.f32 1.442695, %v5973_v28  ;;  %v2620_v35 = vpop.xlane.xlu1 %2619 }
 0x368   : > { %v2623_v57 = vpop.xlane.xlu0 %2622  ;;  %2824 = vrot.lane.b32.xlu1 %v5975_v58, %s4743_s14  ;;  %v5983_v44 = vpop.eup %4431  ;;  %v5994_v9 = vsub.f32 %v5794_v37, %v2620_v35 }
 0x369   : > { %4441 = vpow2.f32 %v2744_v27  ;;  %v5987_v2 = vsub.f32 %v5789_v14, %v2623_v57  ;;  %2820 = vrot.lane.b32.xlu0 %v5983_v44, %s4743_s14 }
 0x36a   : > { %4443 = vpow2.f32 %v2742_v11  ;;  %v2738_v14 = vmul.f32 1.442695, %v5994_v9 }
 0x36b   : > { %v5991_v46 = vpop.eup %4433  ;;  %v2740_v13 = vmul.f32 1.442695, %v5987_v2  ;;  %v2638_v21 = vpop.xlane.xlu1 %2637 }
 0x36c   : > { %v2641_v15 = vpop.xlane.xlu0 %2640  ;;  %2832 = vrot.lane.b32.xlu1 %v5991_v46, %s4743_s14  ;;  %v5999_v7 = vpop.eup %4435  ;;  %v6010_v30 = vsub.f32 %v5805_v52, %v2638_v21 }
 0x36d   : > { %4445 = vpow2.f32 %v2740_v13  ;;  %v6003_v26 = vsub.f32 %v5808_v33, %v2641_v15  ;;  %2830 = vrot.lane.b32.xlu0 %v5999_v7, %s4743_s14 }
 0x36e   : > { %4447 = vpow2.f32 %v2738_v14  ;;  %v2750_v33 = vmul.f32 1.442695, %v6010_v30 }
 0x36f   : > { %v6007_v37 = vpop.eup %4437  ;;  %v2752_v17 = vmul.f32 1.442695, %v6003_v26  ;;  %v2632_v1 = vpop.xlane.xlu1 %2631 }
 0x370   : > { %2828 = vrot.lane.b32.xlu1 %v6007_v37, %s4743_s14  ;;  %v6015_v23 = vpop.eup %4439  ;;  %v6023_v52 = vsub.f32 %v5815_v32, %v2632_v1 }
 0x371   : > { %4449 = vpow2.f32 %v2752_v17  ;;  %2826 = vrot.lane.b32.xlu0 %v6015_v23, %s4743_s14  ;;  %v2635_v29 = vpop.xlane.xlu0 %2634 }
 0x372   : > { %4451 = vpow2.f32 %v2750_v33  ;;  %v2746_v54 = vmul.f32 1.442695, %v6023_v52  ;;  %v6031_v19 = vsub.f32 %v5826_v45, %v2635_v29 }
 0x373   : > { %v6020_v36 = vpop.eup %4441 }
 0x374   : > { %2840 = vrot.lane.b32.xlu1 %v6020_v36, %s4743_s14  ;;  %v6027_v50 = vpop.eup %4443  ;;  %4453 = vpow2.f32 %v2746_v54  ;;  %v2748_v32 = vmul.f32 1.442695, %v6031_v19 }
 0x375   : > { %2838 = vrot.lane.b32.xlu0 %v6027_v50, %s4743_s14 }
 0x376   : > { %4455 = vpow2.f32 %v2748_v32 }
 0x377   : > { %v6035_v53 = vpop.eup %4445 }
 0x378   : > { %2836 = vrot.lane.b32.xlu1 %v6035_v53, %s4743_s14  ;;  %v6040_v8 = vpop.eup %4447 }
 0x379   : > { %2834 = vrot.lane.b32.xlu0 %v6040_v8, %s4743_s14 }
 0x37b   : > { %v6044_v25 = vpop.eup %4449  ;;  %v2650_v45 = vpop.xlane.xlu1 %2649 }
 0x37c   : > { %v6047_v10 = vsub.f32 %v5835_v12, %v2650_v45  ;;  %2848 = vrot.lane.b32.xlu1 %v6044_v25, %s4743_s14  ;;  %v6051_v56 = vpop.eup %4451 }
 0x37d   : > { %2846 = vrot.lane.b32.xlu0 %v6051_v56, %s4743_s14  ;;  %v2653_v27 = vpop.xlane.xlu0 %2652 }
 0x37e   : > { %v2758_v62 = vmul.f32 1.442695, %v6047_v10  ;;  %v6059_v11 = vpop.eup %4453  ;;  %v6062_v12 = vsub.f32 %v5845_v59, %v2653_v27 }
 0x37f   : > { %v2644_v63 = vpop.xlane.xlu1 %2643 }
 0x380   : > { %4457 = vpow2.f32 %v2758_v62  ;;  %v6057_v57 = vsub.f32 %v5842_v61, %v2644_v63  ;;  %v6067_v13 = vpop.eup %4455  ;;  %v2760_v15 = vmul.f32 1.442695, %v6062_v12 }
 0x381   : > { %2842 = vrot.lane.b32.xlu0 %v6059_v11, %s4743_s14  ;;  %2844 = vrot.lane.b32.xlu1 %v6067_v13, %s4743_s14  ;;  %v2647_v61 = vpop.xlane.xlu0 %2646 }
 0x382   : > { %v2754_v35 = vmul.f32 1.442695, %v6057_v57  ;;  %v6073_v14 = vsub.f32 %v5854_v6, %v2647_v61 }
 0x384   : > { %4459 = vpow2.f32 %v2754_v35  ;;  %v2756_v59 = vmul.f32 1.442695, %v6073_v14 }
 0x385   : > { %4461 = vpow2.f32 %v2760_v15 }
 0x386   : > { %4463 = vpow2.f32 %v2756_v59 }
 0x38a   : > { %v6076_v21 = vpop.eup %4457 }
 0x38b   : > { %2854 = vrot.lane.b32.xlu0 %v6076_v21, %s4743_s14  ;;  %v2662_v17 = vpop.xlane.xlu1 %2661 }
 0x38c   : > { %v6081_v33 = vsub.f32 %v5863_v47, %v2662_v17 }
 0x38d   : > { %v2665_v32 = vpop.xlane.xlu0 %2664 }
 0x38e   : > { %v6083_v1 = vpop.eup %4459  ;;  %v2766_v29 = vmul.f32 1.442695, %v6081_v33  ;;  %v6096_v47 = vsub.f32 %v5873_v48, %v2665_v32 }
 0x38f   : > { %v6086_v54 = vpop.eup %4461  ;;  %2850 = vrot.lane.b32.xlu0 %v6083_v1, %s4743_s14  ;;  %v2656_v6 = vpop.xlane.xlu1 %2655 }
 0x390   : > { %4465 = vpow2.f32 %v2766_v29  ;;  %2856 = vrot.lane.b32.xlu1 %v6086_v54, %s4743_s14  ;;  %v6093_v45 = vsub.f32 %v5870_v0, %v2656_v6  ;;  %v6099_v63 = vpop.eup %4463  ;;  %v2768_v27 = vmul.f32 1.442695, %v6096_v47 }
 0x391   : > { %v2659_v35 = vpop.xlane.xlu0 %2658 }
 0x392   : > { %v2762_v62 = vmul.f32 1.442695, %v6093_v45  ;;  %v6105_v15 = vsub.f32 %v5882_v18, %v2659_v35 }
 0x394   : > { %4467 = vpow2.f32 %v2762_v62  ;;  %2852 = vrot.lane.b32.xlu1 %v6099_v63, %s4743_s14  ;;  %v2764_v0 = vmul.f32 1.442695, %v6105_v15 }
 0x395   : > { %4469 = vpow2.f32 %v2768_v27 }
 0x396   : > { %4471 = vpow2.f32 %v2764_v0 }
 0x39a   : > { %v6108_v48 = vpop.eup %4465 }
 0x39b   : > { %2862 = vrot.lane.b32.xlu0 %v6108_v48, %s4743_s14  ;;  %v2674_v61 = vpop.xlane.xlu1 %2673 }
 0x39c   : > { %v6113_v59 = vsub.f32 %v5891_v5, %v2674_v61 }
 0x39d   : > { %v2677_v32 = vpop.xlane.xlu0 %2676 }
 0x39e   : > { %6656 = vst [vmem:[#allocation9_spill] sm:$0xff] %v6113_v59  ;;  %v6115_v17 = vpop.eup %4467  ;;  %v2774_v29 = vmul.f32 1.442695, %v6113_v59  ;;  %v6128_v5 = vsub.f32 %v5901_v49, %v2677_v32 }
 0x39f   : > { %v6118_v6 = vpop.eup %4469  ;;  %2858 = vrot.lane.b32.xlu0 %v6115_v17, %s4743_s14  ;;  %v2668_v18 = vpop.xlane.xlu1 %2667 }
 0x3a0   : > { %4473 = vpow2.f32 %v2774_v29  ;;  %2864 = vrot.lane.b32.xlu1 %v6118_v6, %s4743_s14  ;;  %v6125_v62 = vsub.f32 %v5898_v51, %v2668_v18  ;;  %6658 = vst [vmem:[#allocation10_spill] sm:$0xff] %v6128_v5  ;;  %v6131_v35 = vpop.eup %4471  ;;  %v2776_v0 = vmul.f32 1.442695, %v6128_v5 }
 0x3a1   : > { %v2671_v29 = vpop.xlane.xlu0 %2670 }
 0x3a2   : > { %6657 = vst [vmem:[#allocation11_spill] sm:$0xff] %v6125_v62  ;;  %v2770_v27 = vmul.f32 1.442695, %v6125_v62  ;;  %v6140_v51 = vsub.f32 %v5911_v24, %v2671_v29 }
 0x3a3   : > { %v2686_v61 = vpop.xlane.xlu1 %2685 }
 0x3a4   : > { %4475 = vpow2.f32 %v2770_v27  ;;  %2860 = vrot.lane.b32.xlu1 %v6131_v35, %s4743_s14  ;;  %v6137_v59 = vsub.f32 %v5908_v60, %v2686_v61  ;;  %6660 = vst [vmem:[#allocation12_spill] sm:$0xff] %v6140_v51  ;;  %v2772_v18 = vmul.f32 1.442695, %v6140_v51 }
 0x3a5   : > { %4477 = vpow2.f32 %v2776_v0  ;;  %v2689_v62 = vpop.xlane.xlu0 %2688 }
 0x3a6   : > { %6659 = vst [vmem:[#allocation14_spill] sm:$0xff] %v6137_v59  ;;  %v2782_v49 = vmul.f32 1.442695, %v6137_v59  ;;  %v6148_v5 = vsub.f32 %v5921_v3, %v2689_v62 }
 0x3a7   : > { %v2680_v32 = vpop.xlane.xlu1 %2679 }
 0x3a8   : > { %4479 = vpow2.f32 %v2782_v49  ;;  %v6145_v27 = vsub.f32 %v5918_v34, %v2680_v32  ;;  %6662 = vst [vmem:[#allocation17_spill] sm:$0xff] %v6148_v5  ;;  %v2784_v24 = vmul.f32 1.442695, %v6148_v5 }
 0x3a9   : > { %4481 = vpow2.f32 %v2772_v18  ;;  %v2683_v61 = vpop.xlane.xlu0 %2682 }
 0x3aa   : > { %6661 = vst [vmem:[#allocation13_spill] sm:$0xff] %v6145_v27  ;;  %v6150_v60 = vpop.eup %4473  ;;  %v2778_v0 = vmul.f32 1.442695, %v6145_v27  ;;  %v6157_v29 = vsub.f32 %v5928_v39, %v2683_v61 }
 0x3ab   : > { %2870 = vrot.lane.b32.xlu0 %v6150_v60, %s4743_s14 }
 0x3ac   : > { %4483 = vpow2.f32 %v2778_v0  ;;  %6663 = vst [vmem:[#allocation15_spill] sm:$0xff] %v6157_v29  ;;  %v2780_v3 = vmul.f32 1.442695, %v6157_v29 }
 0x3ad   : > { %4485 = vpow2.f32 %v2784_v24 }
 0x3ae   : > { %v6159_v34 = vpop.eup %4475  ;;  %4487 = vpow2.f32 %v2780_v3 }
 0x3af   : > { %v6161_v49 = vpop.eup %4477  ;;  %2866 = vrot.lane.b32.xlu0 %v6159_v34, %s4743_s14 }
 0x3b0   : > { %2872 = vrot.lane.b32.xlu1 %v6161_v49, %s4743_s14 }
 0x3b2   : > { %v6168_v62 = vpop.eup %4479 }
 0x3b3   : > { %6664 = vst [vmem:[#allocation18_spill] sm:$0xff] %v6168_v62  ;;  %v6170_v18 = vpop.eup %4481  ;;  %2878 = vrot.lane.b32.xlu0 %v6168_v62, %s4743_s14 }
 0x3b4   : > { %6665 = vst [vmem:[#allocation16_spill] sm:$0xff] %v6170_v18  ;;  %2868 = vrot.lane.b32.xlu1 %v6170_v18, %s4743_s14 }
 0x3b6   : > { %v6176_v39 = vpop.eup %4483 }
 0x3b7   : > { %6666 = vst [vmem:[#allocation19_spill] sm:$0xff] %v6176_v39  ;;  %v6178_v32 = vpop.eup %4485  ;;  %2874 = vrot.lane.b32.xlu0 %v6176_v39, %s4743_s14 }
 0x3b8   : > { %6667 = vst [vmem:[#allocation20_spill] sm:$0xff] %v6178_v32  ;;  %2880 = vrot.lane.b32.xlu1 %v6178_v32, %s4743_s14  ;;  %v6184_v0 = vpop.eup %4487 }
 0x3b9   : > { %6668 = vst [vmem:[#allocation21_spill] sm:$0xff] %v6184_v0 }
 0x3bc   : > { %2876 = vrot.lane.b32.xlu1 %v6184_v0, %s4743_s14 }
 0x3d2   : > { %v2823_v24 = vpop.permute.xlu1 %2822 }
 0x3d3   : > { %v2920_v61 = vsel %vm2560_vm3, %v2823_v24, 0.0 }
 0x3d6   : > { %2921 = vadd.xlane.f32.xlu0 %v2920_v61  ;;  %v2819_v3 = vpop.permute.xlu1 %2818 }
 0x3d7   : > { %v2914_v5 = vsel %vm2560_vm3, %v2819_v3, 0.0 }
 0x3da   : > { %2915 = vadd.xlane.f32.xlu0 %v2914_v5  ;;  %v2825_v59 = vpop.permute.xlu1 %2824 }
 0x3db   : > { %v2821_v29 = vpop.permute.xlu0 %2820  ;;  %v2923_v27 = vsel %vm2560_vm3, %v2825_v59, 0.0 }
 0x3dc   : > { %v2917_v32 = vsel %vm2560_vm3, %v2821_v29, 0.0 }
 0x3de   : > { %2924 = vadd.xlane.f32.xlu0 %v2923_v27  ;;  %v2833_v39 = vpop.permute.xlu1 %2832 }
 0x3df   : > { %v2831_v62 = vpop.permute.xlu0 %2830  ;;  %v2935_v0 = vsel %vm2560_vm3, %v2833_v39, 0.0 }
 0x3e0   : > { %2918 = vadd.xlane.f32.xlu1 %v2917_v32  ;;  %v2932_v24 = vsel %vm2560_vm3, %v2831_v62, 0.0 }
 0x3e2   : > { %2936 = vadd.xlane.f32.xlu0 %v2935_v0  ;;  %v2829_v51 = vpop.permute.xlu1 %2828 }
 0x3e3   : > { %v2827_v61 = vpop.permute.xlu0 %2826  ;;  %v2929_v5 = vsel %vm2560_vm3, %v2829_v51, 0.0 }
 0x3e4   : > { %2933 = vadd.xlane.f32.xlu1 %v2932_v24  ;;  %v2926_v59 = vsel %vm2560_vm3, %v2827_v61, 0.0 }
 0x3e6   : > { %2930 = vadd.xlane.f32.xlu0 %v2929_v5  ;;  %v2841_v3 = vpop.permute.xlu1 %2840 }
 0x3e7   : > { %v2839_v27 = vpop.permute.xlu0 %2838  ;;  %v2947_v29 = vsel %vm2560_vm3, %v2841_v3, 0.0 }
 0x3e8   : > { %2927 = vadd.xlane.f32.xlu1 %v2926_v59  ;;  %v2944_v39 = vsel %vm2560_vm3, %v2839_v27, 0.0 }
 0x3ea   : > { %2948 = vadd.xlane.f32.xlu0 %v2947_v29  ;;  %v2837_v32 = vpop.permute.xlu1 %2836 }
 0x3eb   : > { %v2835_v0 = vpop.permute.xlu0 %2834  ;;  %v2941_v62 = vsel %vm2560_vm3, %v2837_v32, 0.0 }
 0x3ec   : > { %2945 = vadd.xlane.f32.xlu1 %v2944_v39  ;;  %v2938_v51 = vsel %vm2560_vm3, %v2835_v0, 0.0 }
 0x3ee   : > { %2942 = vadd.xlane.f32.xlu0 %v2941_v62  ;;  %v2849_v24 = vpop.permute.xlu1 %2848 }
 0x3ef   : > { %v2847_v5 = vpop.permute.xlu0 %2846  ;;  %v2959_v61 = vsel %vm2560_vm3, %v2849_v24, 0.0 }
 0x3f0   : > { %2939 = vadd.xlane.f32.xlu1 %v2938_v51  ;;  %v2956_v59 = vsel %vm2560_vm3, %v2847_v5, 0.0 }
 0x3f2   : > { %2960 = vadd.xlane.f32.xlu0 %v2959_v61 }
 0x3f3   : > { %v2843_v3 = vpop.permute.xlu0 %2842  ;;  %v2845_v29 = vpop.permute.xlu1 %2844 }
 0x3f4   : > { %2957 = vadd.xlane.f32.xlu1 %v2956_v59  ;;  %v2950_v27 = vsel %vm2560_vm3, %v2843_v3, 0.0  ;;  %v2953_v39 = vsel %vm2560_vm3, %v2845_v29, 0.0 }
 0x3f6   : > { %2954 = vadd.xlane.f32.xlu0 %v2953_v39 }
 0x3f8   : > { %2951 = vadd.xlane.f32.xlu1 %v2950_v27 }
 0x3fd   : > { %v2855_v32 = vpop.permute.xlu0 %2854 }
 0x3fe   : > { %v2968_v62 = vsel %vm2560_vm3, %v2855_v32, 0.0 }
 0x3ff   : > { %2969 = vadd.xlane.f32.xlu1 %v2968_v62 }
 0x401   : > { %v2851_v0 = vpop.permute.xlu0 %2850 }
 0x402   : > { %v2857_v51 = vpop.permute.xlu1 %2856  ;;  %v2962_v24 = vsel %vm2560_vm3, %v2851_v0, 0.0 }
 0x403   : > { %v2971_v61 = vsel %vm2560_vm3, %v2857_v51, 0.0  ;;  %2963 = vadd.xlane.f32.xlu1 %v2962_v24 }
 0x404   : > { %2972 = vadd.xlane.f32.xlu0 %v2971_v61 }
 0x406   : > { %v2853_v5 = vpop.permute.xlu1 %2852 }
 0x407   : > { %v2965_v59 = vsel %vm2560_vm3, %v2853_v5, 0.0 }
 0x408   : > { %2966 = vadd.xlane.f32.xlu0 %v2965_v59 }
 0x40d   : > { %v2863_v3 = vpop.permute.xlu0 %2862 }
 0x40e   : > { %v2980_v29 = vsel %vm2560_vm3, %v2863_v3, 0.0 }
 0x40f   : > { %2981 = vadd.xlane.f32.xlu1 %v2980_v29 }
 0x411   : > { %v2859_v27 = vpop.permute.xlu0 %2858 }
 0x412   : > { %v2865_v39 = vpop.permute.xlu1 %2864  ;;  %v2974_v32 = vsel %vm2560_vm3, %v2859_v27, 0.0 }
 0x413   : > { %v2983_v62 = vsel %vm2560_vm3, %v2865_v39, 0.0  ;;  %2975 = vadd.xlane.f32.xlu1 %v2974_v32 }
 0x414   : > { %2984 = vadd.xlane.f32.xlu0 %v2983_v62 }
 0x416   : > { %v2861_v0 = vpop.permute.xlu1 %2860 }
 0x417   : > { %v2977_v51 = vsel %vm2560_vm3, %v2861_v0, 0.0 }
 0x418   : > { %2978 = vadd.xlane.f32.xlu0 %v2977_v51 }
 0x41d   : > { %v2871_v24 = vpop.permute.xlu0 %2870 }
 0x41e   : > { %v2992_v61 = vsel %vm2560_vm3, %v2871_v24, 0.0 }
 0x41f   : > { %2993 = vadd.xlane.f32.xlu1 %v2992_v61 }
 0x421   : > { %v2867_v5 = vpop.permute.xlu0 %2866 }
 0x422   : > { %v2873_v59 = vpop.permute.xlu1 %2872  ;;  %v2986_v3 = vsel %vm2560_vm3, %v2867_v5, 0.0 }
 0x423   : > { %v2995_v29 = vsel %vm2560_vm3, %v2873_v59, 0.0  ;;  %2987 = vadd.xlane.f32.xlu1 %v2986_v3 }
 0x424   : > { %2996 = vadd.xlane.f32.xlu0 %v2995_v29 }
 0x425   : > { %v2879_v27 = vpop.permute.xlu0 %2878 }
 0x426   : > { %v2869_v39 = vpop.permute.xlu1 %2868  ;;  %v3004_v32 = vsel %vm2560_vm3, %v2879_v27, 0.0 }
 0x427   : > { %v2989_v62 = vsel %vm2560_vm3, %v2869_v39, 0.0  ;;  %3005 = vadd.xlane.f32.xlu1 %v3004_v32 }
 0x428   : > { %2990 = vadd.xlane.f32.xlu0 %v2989_v62 }
 0x429   : > { %v2875_v0 = vpop.permute.xlu0 %2874 }
 0x42a   : > { %v2881_v51 = vpop.permute.xlu1 %2880  ;;  %v2998_v24 = vsel %vm2560_vm3, %v2875_v0, 0.0 }
 0x42b   : > { %v3007_v61 = vsel %vm2560_vm3, %v2881_v51, 0.0  ;;  %2999 = vadd.xlane.f32.xlu1 %v2998_v24 }
 0x42c   : > { %3008 = vadd.xlane.f32.xlu0 %v3007_v61 }
 0x42e   : > { %v2877_v5 = vpop.permute.xlu1 %2876 }
 0x42f   : > { %v3001_v59 = vsel %vm2560_vm3, %v2877_v5, 0.0 }
 0x430   : > { %3002 = vadd.xlane.f32.xlu0 %v3001_v59 }
 0x463   : > { %v2922_v3 = vpop.xlane.xlu0 %2921 }
 0x464   : > { %4489 = vrcp.f32 %v2922_v3 }
 0x465   : > { %4491 = vlog2.f32 %v2922_v3 }
 0x467   : > { %v2916_v29 = vpop.xlane.xlu0 %2915 }
 0x468   : > { %4493 = vrcp.f32 %v2916_v29 }
 0x469   : > { %4495 = vlog2.f32 %v2916_v29 }
 0x46b   : > { %v2925_v27 = vpop.xlane.xlu0 %2924 }
 0x46c   : > { %4497 = vrcp.f32 %v2925_v27 }
 0x46d   : > { %v2919_v39 = vpop.xlane.xlu1 %2918  ;;  %4499 = vlog2.f32 %v2925_v27 }
 0x46e   : > { %v4490_v32 = vpop.eup %4489  ;;  %4501 = vrcp.f32 %v2919_v39 }
 0x46f   : > { %v4492_v62 = vpop.eup %4491  ;;  %4503 = vlog2.f32 %v2919_v39  ;;  %v3044_v0 = vmul.f32 %v4490_v32, %v5951_v16  ;;  %v2937_v61 = vpop.xlane.xlu0 %2936 }
 0x470   : > { %v3239_v51 = vmul.f32 0.6931472, %v4492_v62 }
 0x471   : > { %v2934_v24 = vpop.xlane.xlu1 %2933  ;;  %3110 = vrot.lane.b32.xlu1 %v3044_v0, %s4743_s14 }
 0x472   : > { %v4494_v5 = vpop.eup %4493  ;;  %v3300_v59 = vsub.f32 %v5933_v20, %v3239_v51  ;;  %4505 = vrcp.f32 %v2934_v24 }
 0x473   : > { %v3042_v3 = vmul.f32 %v4494_v5, %v5963_v43  ;;  %v4496_v29 = vpop.eup %4495  ;;  %4507 = vrcp.f32 %v2937_v61  ;;  %v2931_v32 = vpop.xlane.xlu0 %2930 }
 0x474   : > { %3366 = vrot.lane.b32.xlu0 %v3300_v59, %s4743_s14  ;;  %4509 = vlog2.f32 %v2934_v24  ;;  %v3235_v51 = vmul.f32 0.6931472, %v4496_v29 }
 0x475   : > { %v2928_v27 = vpop.xlane.xlu1 %2927  ;;  %3106 = vrot.lane.b32.xlu1 %v3042_v3, %s4743_s14 }
 0x476   : > { %v4498_v39 = vpop.eup %4497  ;;  %4511 = vrcp.f32 %v2928_v27  ;;  %v3298_v24 = vsub.f32 %v5937_v42, %v3235_v51 }
 0x477   : > { %v4500_v16 = vpop.eup %4499  ;;  %v3045_v62 = vmul.f32 %v4498_v39, %v5975_v58  ;;  %4513 = vlog2.f32 %v2937_v61  ;;  %v2949_v39 = vpop.xlane.xlu0 %2948 }
 0x478   : > { %v4502_v0 = vpop.eup %4501  ;;  %v3241_v18 = vmul.f32 0.6931472, %v4500_v16  ;;  %4515 = vrcp.f32 %v2931_v32 }
 0x479   : > { %v4504_v20 = vpop.eup %4503  ;;  %v3043_v43 = vmul.f32 %v4502_v0, %v5983_v44  ;;  %3112 = vrot.lane.b32.xlu1 %v3045_v62, %s4743_s14  ;;  %4517 = vlog2.f32 %v2928_v27  ;;  %v2946_v61 = vpop.xlane.xlu1 %2945 }
 0x47a   : > { %v3237_v5 = vmul.f32 0.6931472, %v4504_v20  ;;  %v3301_v59 = vsub.f32 %v5941_v41, %v3241_v18  ;;  %4519 = vlog2.f32 %v2931_v32 }
 0x47b   : > { %3108 = vrot.lane.b32.xlu0 %v3043_v43, %s4743_s14  ;;  %4521 = vrcp.f32 %v2946_v61 }
 0x47c   : > { %v4506_v58 = vpop.eup %4505  ;;  %v3299_v3 = vsub.f32 %v5944_v4, %v3237_v5  ;;  %4523 = vrcp.f32 %v2949_v39 }
 0x47d   : > { %3368 = vrot.lane.b32.xlu1 %v3301_v59, %s4743_s14  ;;  %v4508_v44 = vpop.eup %4507  ;;  %v3048_v16 = vmul.f32 %v4506_v58, %v5999_v7  ;;  %v2940_v4 = vpop.xlane.xlu1 %2939  ;;  %4525 = vlog2.f32 %v2946_v61 }
 0x47e   : > { %v4510_v29 = vpop.eup %4509  ;;  %v3049_v42 = vmul.f32 %v4508_v44, %v5991_v46  ;;  %v2943_v7 = vpop.xlane.xlu0 %2942  ;;  %4527 = vrcp.f32 %v2940_v4 }
 0x47f   : > { %3362 = vrot.lane.b32.xlu0 %v3298_v24, %s4743_s14  ;;  %v3247_v32 = vmul.f32 0.6931472, %v4510_v29  ;;  %4529 = vlog2.f32 %v2949_v39 }
 0x480   : > { %v4512_v41 = vpop.eup %4511  ;;  %4531 = vrcp.f32 %v2943_v7 }
 0x481   : > { %3364 = vrot.lane.b32.xlu1 %v3299_v3, %s4743_s14  ;;  %v4514_v18 = vpop.eup %4513  ;;  %v3046_v62 = vmul.f32 %v4512_v41, %v6015_v23  ;;  %v3304_v46 = vsub.f32 %v5954_v55, %v3247_v32  ;;  %4533 = vlog2.f32 %v2940_v4  ;;  %v2958_v55 = vpop.xlane.xlu1 %2957 }
 0x482   : > { %v4516_v27 = vpop.eup %4515  ;;  %v3249_v20 = vmul.f32 0.6931472, %v4514_v18  ;;  %4535 = vlog2.f32 %v2943_v7  ;;  %v2961_v44 = vpop.xlane.xlu0 %2960 }
 0x483   : > { %3118 = vrot.lane.b32.xlu0 %v3048_v16, %s4743_s14  ;;  %v4518_v0 = vpop.eup %4517  ;;  %v3047_v51 = vmul.f32 %v4516_v27, %v6007_v37  ;;  %4537 = vrcp.f32 %v2958_v55 }
 0x484   : > { %v4520_v43 = vpop.eup %4519  ;;  %v3243_v5 = vmul.f32 0.6931472, %v4518_v0  ;;  %v3305_v23 = vsub.f32 %v5949_v38, %v3249_v20  ;;  %4539 = vrcp.f32 %v2961_v44 }
 0x485   : > { %3120 = vrot.lane.b32.xlu1 %v3049_v42, %s4743_s14  ;;  %v3245_v59 = vmul.f32 0.6931472, %v4520_v43  ;;  %v4522_v37 = vpop.eup %4521  ;;  %4541 = vlog2.f32 %v2958_v55 }
 0x486   : > { %v3302_v24 = vsub.f32 %v5966_v22, %v3243_v5  ;;  %v4524_v3 = vpop.eup %4523  ;;  %v3052_v38 = vmul.f32 %v4522_v37, %v6027_v50  ;;  %v2955_v50 = vpop.xlane.xlu0 %2954 }
 0x487   : > { %3114 = vrot.lane.b32.xlu0 %v3046_v62, %s4743_s14  ;;  %v3303_v58 = vsub.f32 %v5961_v31, %v3245_v59  ;;  %v4526_v61 = vpop.eup %4525  ;;  %v3053_v22 = vmul.f32 %v4524_v3, %v6020_v36  ;;  %v2952_v31 = vpop.xlane.xlu1 %2951 }
 0x488   : > { %v4528_v29 = vpop.eup %4527  ;;  %v3255_v41 = vmul.f32 0.6931472, %v4526_v61  ;;  %4543 = vrcp.f32 %v2952_v31 }
 0x489   : > { %3116 = vrot.lane.b32.xlu1 %v3047_v51, %s4743_s14  ;;  %v4530_v39 = vpop.eup %4529  ;;  %v3050_v18 = vmul.f32 %v4528_v29, %v6040_v8  ;;  %4545 = vlog2.f32 %v2961_v44 }
 0x48a   : > { %v4532_v16 = vpop.eup %4531  ;;  %v3257_v27 = vmul.f32 0.6931472, %v4530_v39  ;;  %v3308_v36 = vsub.f32 %v5978_v40, %v3255_v41  ;;  %4547 = vrcp.f32 %v2955_v50 }
 0x48b   : > { %3374 = vrot.lane.b32.xlu0 %v3304_v46, %s4743_s14  ;;  %v4534_v42 = vpop.eup %4533  ;;  %v3051_v32 = vmul.f32 %v4532_v16, %v6035_v53  ;;  %4549 = vlog2.f32 %v2952_v31 }
 0x48c   : > { %v4536_v4 = vpop.eup %4535  ;;  %v3251_v62 = vmul.f32 0.6931472, %v4534_v42  ;;  %v3309_v8 = vsub.f32 %v5973_v28, %v3257_v27  ;;  %4551 = vlog2.f32 %v2955_v50  ;;  %v2970_v40 = vpop.xlane.xlu1 %2969 }
 0x48d   : > { %3376 = vrot.lane.b32.xlu1 %v3305_v23, %s4743_s14  ;;  %v3253_v0 = vmul.f32 0.6931472, %v4536_v4  ;;  %v4538_v53 = vpop.eup %4537  ;;  %4553 = vrcp.f32 %v2970_v40 }
 0x48e   : > { %v3306_v20 = vsub.f32 %v5994_v9, %v3251_v62  ;;  %v4540_v51 = vpop.eup %4539  ;;  %v3056_v28 = vmul.f32 %v4538_v53, %v6051_v56 }
 0x48f   : > { %3370 = vrot.lane.b32.xlu0 %v3302_v24, %s4743_s14  ;;  %v3307_v7 = vsub.f32 %v5987_v2, %v3253_v0  ;;  %v4542_v43 = vpop.eup %4541  ;;  %v3057_v9 = vmul.f32 %v4540_v51, %v6044_v25 }
 0x490   : > { %v3263_v24 = vmul.f32 0.6931472, %v4542_v43  ;;  %v2964_v2 = vpop.xlane.xlu1 %2963 }
 0x491   : > { %3372 = vrot.lane.b32.xlu1 %v3303_v58, %s4743_s14  ;;  %v2973_v46 = vpop.xlane.xlu0 %2972 }
 0x492   : > { %v4544_v5 = vpop.eup %4543  ;;  %4555 = vrcp.f32 %v2973_v46  ;;  %v3312_v25 = vsub.f32 %v6010_v30, %v3263_v24 }
 0x493   : > { %3126 = vrot.lane.b32.xlu0 %v3052_v38, %s4743_s14  ;;  %v4546_v23 = vpop.eup %4545  ;;  %v3054_v37 = vmul.f32 %v4544_v5, %v6059_v11  ;;  %4557 = vlog2.f32 %v2970_v40 }
 0x494   : > { %v4548_v59 = vpop.eup %4547  ;;  %v3265_v55 = vmul.f32 0.6931472, %v4546_v23  ;;  %4559 = vrcp.f32 %v2964_v2 }
 0x495   : > { %3128 = vrot.lane.b32.xlu1 %v3053_v22, %s4743_s14  ;;  %v4550_v58 = vpop.eup %4549  ;;  %v2967_v56 = vpop.xlane.xlu0 %2966  ;;  %v3055_v3 = vmul.f32 %v4548_v59, %v6067_v13  ;;  %4561 = vlog2.f32 %v2973_v46 }
 0x496   : > { %v4552_v61 = vpop.eup %4551  ;;  %v3259_v44 = vmul.f32 0.6931472, %v4550_v58  ;;  %4563 = vrcp.f32 %v2967_v56  ;;  %v3313_v11 = vsub.f32 %v6003_v26, %v3265_v55 }
 0x497   : > { %3122 = vrot.lane.b32.xlu0 %v3050_v18, %s4743_s14  ;;  %v3261_v38 = vmul.f32 0.6931472, %v4552_v61  ;;  %4565 = vlog2.f32 %v2964_v2  ;;  %v4554_v13 = vpop.eup %4553 }
 0x498   : > { %v3310_v29 = vsub.f32 %v6023_v52, %v3259_v44  ;;  %4567 = vlog2.f32 %v2967_v56  ;;  %v3060_v26 = vmul.f32 %v4554_v13, %v6076_v21 }
 0x499   : > { %3124 = vrot.lane.b32.xlu1 %v3051_v32, %s4743_s14  ;;  %v3311_v39 = vsub.f32 %v6031_v19, %v3261_v38 }
 0x49b   : > { %3382 = vrot.lane.b32.xlu0 %v3308_v36, %s4743_s14 }
 0x49c   : > { %v2982_v30 = vpop.xlane.xlu1 %2981  ;;  %v4556_v22 = vpop.eup %4555 }
 0x49d   : > { %3384 = vrot.lane.b32.xlu1 %v3309_v8, %s4743_s14  ;;  %v4558_v16 = vpop.eup %4557  ;;  %v3061_v52 = vmul.f32 %v4556_v22, %v6086_v54  ;;  %4569 = vrcp.f32 %v2982_v30  ;;  %v6669_v22 = vld [vmem:[#allocation16_spill] sm:$0xff] }
 0x49e   : > { %v4560_v31 = vpop.eup %4559  ;;  %v3271_v27 = vmul.f32 0.6931472, %v4558_v16 }
 0x49f   : > { %3378 = vrot.lane.b32.xlu0 %v3306_v20, %s4743_s14  ;;  %v4562_v18 = vpop.eup %4561  ;;  %v3058_v50 = vmul.f32 %v4560_v31, %v6083_v1 }
 0x4a0   : > { %v4564_v42 = vpop.eup %4563  ;;  %v2976_v19 = vpop.xlane.xlu1 %2975  ;;  %v3273_v4 = vmul.f32 0.6931472, %v4562_v18  ;;  %v3316_v54 = vsub.f32 %v6047_v10, %v3271_v27 }
 0x4a1   : > { %3380 = vrot.lane.b32.xlu1 %v3307_v7, %s4743_s14  ;;  %v2985_v41 = vpop.xlane.xlu0 %2984  ;;  %v4566_v32 = vpop.eup %4565  ;;  %v3059_v36 = vmul.f32 %v4564_v42, %v6099_v63  ;;  %v6672_v42 = vld [vmem:[#allocation11_spill] sm:$0xff] }
 0x4a2   : > { %4571 = vrcp.f32 %v2985_v41  ;;  %v4568_v62 = vpop.eup %4567  ;;  %v3267_v8 = vmul.f32 0.6931472, %v4566_v32  ;;  %v3317_v1 = vsub.f32 %v6062_v12, %v3273_v4 }
 0x4a3   : > { %3134 = vrot.lane.b32.xlu0 %v3056_v28, %s4743_s14  ;;  %4573 = vlog2.f32 %v2982_v30  ;;  %v3269_v0 = vmul.f32 0.6931472, %v4568_v62 }
 0x4a4   : > { %4575 = vrcp.f32 %v2976_v19  ;;  %v3314_v20 = vsub.f32 %v6057_v57, %v3267_v8 }
 0x4a5   : > { %3136 = vrot.lane.b32.xlu1 %v3057_v9, %s4743_s14  ;;  %v2979_v21 = vpop.xlane.xlu0 %2978  ;;  %4577 = vlog2.f32 %v2985_v41  ;;  %v3315_v53 = vsub.f32 %v6073_v14, %v3269_v0  ;;  %v6675_v0 = vld [vmem:[#allocation20_spill] sm:$0xff] }
 0x4a6   : > { %4579 = vrcp.f32 %v2979_v21 }
 0x4a7   : > { %3130 = vrot.lane.b32.xlu0 %v3054_v37, %s4743_s14  ;;  %4581 = vlog2.f32 %v2976_v19  ;;  %v4570_v63 = vpop.eup %4569 }
 0x4a8   : > { %4583 = vlog2.f32 %v2979_v21  ;;  %v3064_v12 = vmul.f32 %v4570_v63, %v6108_v48 }
 0x4a9   : > { %3132 = vrot.lane.b32.xlu1 %v3055_v3, %s4743_s14 }
 0x4ab   : > { %3390 = vrot.lane.b32.xlu0 %v3312_v25, %s4743_s14 }
 0x4ac   : > { %v2994_v10 = vpop.xlane.xlu1 %2993  ;;  %v4572_v7 = vpop.eup %4571 }
 0x4ad   : > { %3392 = vrot.lane.b32.xlu1 %v3313_v11, %s4743_s14  ;;  %v4574_v40 = vpop.eup %4573  ;;  %v3065_v57 = vmul.f32 %v4572_v7, %v6118_v6  ;;  %4585 = vrcp.f32 %v2994_v10 }
 0x4ae   : > { %v4576_v43 = vpop.eup %4575  ;;  %v3279_v5 = vmul.f32 0.6931472, %v4574_v40 }
 0x4af   : > { %3386 = vrot.lane.b32.xlu0 %v3310_v29, %s4743_s14  ;;  %v4578_v46 = vpop.eup %4577  ;;  %v3062_v23 = vmul.f32 %v4576_v43, %v6115_v17 }
 0x4b0   : > { %v4580_v28 = vpop.eup %4579  ;;  %v2988_v14 = vpop.xlane.xlu1 %2987  ;;  %v3281_v59 = vmul.f32 0.6931472, %v4578_v46  ;;  %v3320_v6 = vsub.f32 %v6081_v33, %v3279_v5  ;;  %v6677_v46 = vld [vmem:[#allocation21_spill] sm:$0xff] }
 0x4b1   : > { %3388 = vrot.lane.b32.xlu1 %v3311_v39, %s4743_s14  ;;  %v2997_v51 = vpop.xlane.xlu0 %2996  ;;  %v4582_v9 = vpop.eup %4581  ;;  %v3063_v24 = vmul.f32 %v4580_v28, %v6131_v35 }
 0x4b2   : > { %4587 = vrcp.f32 %v2997_v51  ;;  %v4584_v2 = vpop.eup %4583  ;;  %v3275_v37 = vmul.f32 0.6931472, %v4582_v9  ;;  %v3321_v17 = vsub.f32 %v6096_v47, %v3281_v59 }
 0x4b3   : > { %3142 = vrot.lane.b32.xlu0 %v3060_v26, %s4743_s14  ;;  %4589 = vlog2.f32 %v2994_v10  ;;  %v3277_v58 = vmul.f32 0.6931472, %v4584_v2  ;;  %v6676_v10 = vld [vmem:[#allocation19_spill] sm:$0xff] }
 0x4b4   : > { %4591 = vrcp.f32 %v2988_v14  ;;  %v3318_v55 = vsub.f32 %v6093_v45, %v3275_v37  ;;  %v3006_v56 = vpop.xlane.xlu1 %3005 }
 0x4b5   : > { %3144 = vrot.lane.b32.xlu1 %v3061_v52, %s4743_s14  ;;  %v2991_v48 = vpop.xlane.xlu0 %2990  ;;  %4593 = vlog2.f32 %v2997_v51  ;;  %v3319_v33 = vsub.f32 %v6105_v15, %v3277_v58 }
 0x4b6   : > { %4595 = vrcp.f32 %v2991_v48 }
 0x4b7   : > { %3138 = vrot.lane.b32.xlu0 %v3058_v50, %s4743_s14  ;;  %4597 = vlog2.f32 %v2988_v14  ;;  %v4586_v35 = vpop.eup %4585  ;;  %v6673_v50 = vld [vmem:[#allocation12_spill] sm:$0xff]  ;;  %v6678_v14 = vld [vmem:[#allocation13_spill] sm:$0xff] }
 0x4b8   : > { %4599 = vlog2.f32 %v2991_v48  ;;  %v3068_v47 = vmul.f32 %v4586_v35, %v6150_v60  ;;  %v3000_v29 = vpop.xlane.xlu1 %2999 }
 0x4b9   : > { %3140 = vrot.lane.b32.xlu1 %v3059_v36, %s4743_s14  ;;  %v3009_v61 = vpop.xlane.xlu0 %3008  ;;  %4601 = vrcp.f32 %v3006_v56  ;;  %v6674_v36 = vld [vmem:[#allocation18_spill] sm:$0xff] }
 0x4ba   : > { %4603 = vrcp.f32 %v3009_v61 }
 0x4bb   : > { %3398 = vrot.lane.b32.xlu0 %v3316_v54, %s4743_s14  ;;  %4605 = vrcp.f32 %v3000_v29 }
 0x4bc   : > { %v4588_v3 = vpop.eup %4587  ;;  %4607 = vlog2.f32 %v3000_v29 }
 0x4bd   : > { %3400 = vrot.lane.b32.xlu1 %v3317_v1, %s4743_s14  ;;  %v4590_v25 = vpop.eup %4589  ;;  %v3069_v45 = vmul.f32 %v4588_v3, %v6161_v49  ;;  %v3003_v30 = vpop.xlane.xlu0 %3002  ;;  %v6670_v49 = vld [vmem:[#allocation9_spill] sm:$0xff] }
 0x4be   : > { %v4592_v44 = vpop.eup %4591  ;;  %v3287_v13 = vmul.f32 0.6931472, %v4590_v25  ;;  %4609 = vrcp.f32 %v3003_v30 }
 0x4bf   : > { %3394 = vrot.lane.b32.xlu0 %v3314_v20, %s4743_s14  ;;  %v4594_v11 = vpop.eup %4593  ;;  %v3066_v15 = vmul.f32 %v4592_v44, %v6159_v34  ;;  %4611 = vlog2.f32 %v3003_v30  ;;  %v6671_v34 = vld [vmem:[#allocation10_spill] sm:$0xff] }
 0x4c0   : > { %v4596_v38 = vpop.eup %4595  ;;  %v3289_v60 = vmul.f32 0.6931472, %v4594_v11  ;;  %v3324_v26 = vsub.f32 %v6670_v49, %v3287_v13  ;;  %4613 = vlog2.f32 %v3006_v56 }
 0x4c1   : > { %3396 = vrot.lane.b32.xlu1 %v3315_v53, %s4743_s14  ;;  %v4598_v39 = vpop.eup %4597  ;;  %v3067_v16 = vmul.f32 %v4596_v38, %v6669_v22  ;;  %4615 = vlog2.f32 %v3009_v61 }
 0x4c2   : > { %v4600_v41 = vpop.eup %4599  ;;  %v3283_v31 = vmul.f32 0.6931472, %v4598_v39  ;;  %v3325_v18 = vsub.f32 %v6671_v34, %v3289_v60 }
 0x4c3   : > { %3150 = vrot.lane.b32.xlu0 %v3064_v12, %s4743_s14  ;;  %v3285_v52 = vmul.f32 0.6931472, %v4600_v41  ;;  %v4602_v19 = vpop.eup %4601 }
 0x4c4   : > { %v3322_v27 = vsub.f32 %v6672_v42, %v3283_v31  ;;  %v4604_v4 = vpop.eup %4603  ;;  %v3072_v62 = vmul.f32 %v4602_v19, %v6674_v36 }
 0x4c5   : > { %3152 = vrot.lane.b32.xlu1 %v3065_v57, %s4743_s14  ;;  %v3323_v32 = vsub.f32 %v6673_v50, %v3285_v52  ;;  %v4606_v21 = vpop.eup %4605  ;;  %v3073_v20 = vmul.f32 %v4604_v4, %v6675_v0 }
 0x4c6   : > { %v4608_v54 = vpop.eup %4607  ;;  %v3070_v7 = vmul.f32 %v4606_v21, %v6676_v10 }
 0x4c7   : > { %3146 = vrot.lane.b32.xlu0 %v3062_v23, %s4743_s14  ;;  %v3291_v53 = vmul.f32 0.6931472, %v4608_v54 }
 0x4c8   : > { %v4610_v8 = vpop.eup %4609 }
 0x4c9   : > { %3148 = vrot.lane.b32.xlu1 %v3063_v24, %s4743_s14  ;;  %v4612_v63 = vpop.eup %4611  ;;  %v3071_v57 = vmul.f32 %v4610_v8, %v6677_v46  ;;  %v3326_v23 = vsub.f32 %v6678_v14, %v3291_v53 }
 0x4ca   : > { %v4614_v40 = vpop.eup %4613  ;;  %v3293_v12 = vmul.f32 0.6931472, %v4612_v63 }
 0x4cb   : > { %3406 = vrot.lane.b32.xlu0 %v3320_v6, %s4743_s14  ;;  %v4616_v28 = vpop.eup %4615  ;;  %v3295_v5 = vmul.f32 0.6931472, %v4614_v40 }
 0x4cd   : > { %3408 = vrot.lane.b32.xlu1 %v3321_v17, %s4743_s14 }
 0x4cf   : > { %3402 = vrot.lane.b32.xlu0 %v3318_v55, %s4743_s14 }
 0x4d1   : > { %3404 = vrot.lane.b32.xlu1 %v3319_v33, %s4743_s14 }
 0x4d3   : > { %3158 = vrot.lane.b32.xlu0 %v3068_v47, %s4743_s14 }
 0x4d5   : > { %3160 = vrot.lane.b32.xlu1 %v3069_v45, %s4743_s14 }
 0x4d7   : > { %3154 = vrot.lane.b32.xlu0 %v3066_v15, %s4743_s14 }
 0x4d9   : > { %3156 = vrot.lane.b32.xlu1 %v3067_v16, %s4743_s14 }
 0x4db   : > { %3414 = vrot.lane.b32.xlu0 %v3324_v26, %s4743_s14 }
 0x4dd   : > { %3416 = vrot.lane.b32.xlu1 %v3325_v18, %s4743_s14 }
 0x4df   : > { %3410 = vrot.lane.b32.xlu0 %v3322_v27, %s4743_s14 }
 0x4e1   : > { %3412 = vrot.lane.b32.xlu1 %v3323_v32, %s4743_s14 }
 0x4e3   : > { %3166 = vrot.lane.b32.xlu0 %v3072_v62, %s4743_s14  ;;  %v3111_v1 = vpop.permute.xlu1 %3110 }
 0x4e4   : > { %3204 = vst.msk [vmem:[%s6336_s16 + $0x10] sm:$0xff] %vm2560_vm3, %v3111_v1 }
 0x4e5   : > { %3168 = vrot.lane.b32.xlu1 %v3073_v20, %s4743_s14 }
 0x4e6   : > { %v3367_v51 = vpop.permute.xlu0 %3366 }
 0x4e7   : > { %3162 = vrot.lane.b32.xlu0 %v3070_v7, %s4743_s14  ;;  %3460 = vst.msk [vmem:[%s6348_s20 + $0x10] sm:$0xff] %vm2560_vm3, %v3367_v51  ;;  %v3107_v43 = vpop.permute.xlu1 %3106 }
 0x4e8   : > { %3202 = vst.msk [vmem:[%s6336_s16] sm:$0xff] %vm2560_vm3, %v3107_v43 }
 0x4e9   : > { %3164 = vrot.lane.b32.xlu1 %v3071_v57, %s4743_s14 }
 0x4ea   : > { %4630 = shalt.err (!%p4627_p3)
}
 0x4eb   : > { %s4631_s18 = scalar_lea.hbm %s6357_s29, 4096  ;;  %s4635_s10 = scalar_lea.hbm %s6618_s5, 8192 }
 0x4ec   : > { %p4632_p4 = scmp.ne.s32.totalorder %s6357_s29, %s4631_s18  ;;  %p4636_p9 = scmp.lt.u32.totalorder %s6357_s29, %s6618_s5 }
 0x4ed   : > { %p4637_p10 = scmp.lt.u32.totalorder %s4635_s10, %s4631_s18  ;;  %p4639_p12 = scmp.lt.u32.totalorder %s4631_s18, %s6357_s29 }
 0x4ee   : > { %p4633_p7 = pnand %p4632_p4, %p4824_p5 }
 0x4ef   : > { %p4638_p11 = por %p4637_p10, %p4636_p9 }
 0x4f0   : > { %p4634_p8 = pneg %p4633_p7 }
 0x4f1   : > { %p4640_p13 = por %p4639_p12, %p4638_p11 }
 0x4f3   : > { %p4641_p0 = pnand %p4640_p13, %p4634_p8 }
 0x4f5   : > { %4644 = shalt.err (!%p4641_p0)
}
 0x4f6   : > { %s4745_s9 = smov 128   ;;  %s4746_s13 = smov 8   ;;  %v3297_v9 = vmul.f32 0.6931472, %v4616_v28  ;;  %v6679_v59 = vld [vmem:[#allocation15_spill] sm:$0xff]  ;;  %3418 = vrot.lane.b32.xlu0 %v3326_v23, %s4743_s14  ;;  %v3113_v24 = vpop.permute.xlu1 %3112  ;;  %v6680_v2 = vld [vmem:[#allocation14_spill] sm:$0xff]  ;;  %v3109_v37 = vpop.permute.xlu0 %3108 }
 0x4f7   : > { %4175 = dma.vmem_to_hbm [thread:$0]  (%p4824_p5), %s6362_s17, 4096, %s6357_s29, %s6366_s15, %s4745_s9, %s4745_s9, %s4746_s13   ;;  %v3327_v48 = vsub.f32 %v6679_v59, %v3293_v12  ;;  %v3328_v6 = vsub.f32 %v6680_v2, %v3295_v5  ;;  %v6681_v17 = vld [vmem:[#allocation17_spill] sm:$0xff] }
 0x4f8   : > { %3205 = vst.msk [vmem:[%s6336_s16 + $0x18] sm:$0xff] %vm2560_vm3, %v3113_v24  ;;  %3203 = vst.msk [vmem:[%s6336_s16 + $0x8] sm:$0xff] %vm2560_vm3, %v3109_v37  ;;  %v3329_v58 = vsub.f32 %v6681_v17, %v3297_v9  ;;  %s3514_s26 = sshll.u32 %s6336_s16, 4  ;;  %s6517_s17 = scalar_lea.hbm %s6617_s4, %s6342_s19  ;;  %s6519_s26 = int_to_ptr.vmem [resolvable:$true] %s3514_s26 }
 0x4f9   : > { %3420 = vrot.lane.b32.xlu1 %v3327_v48, %s4743_s14  ;;  %s6525_s18 = scalar_lea.sflag [#allocation3], %s261_s11  ;;  %s4645_s25 = scalar_lea.vmem %s6519_s26, 4096 }
 0x4fa   : > { %3422 = vrot.lane.b32.xlu0 %v3328_v6, %s4743_s14  ;;  %v3369_v55 = vpop.permute.xlu1 %3368  ;;  %v3363_v35 = vpop.permute.xlu0 %3362  ;;  %p4646_p1 = scmp.ne.s32.totalorder %s6519_s26, %s4645_s25  ;;  %s4747_s28 = smov [#allocation2]  }
 0x4fb   : > { %3461 = vst.msk [vmem:[%s6348_s20 + $0x18] sm:$0xff] %vm2560_vm3, %v3369_v55  ;;  %3458 = vst.msk [vmem:[%s6348_s20] sm:$0xff] %vm2560_vm3, %v3363_v35  ;;  %s4649_s10 = sshll.u32 %s4747_s28, 4  ;;  %s4650_s10 = int_to_ptr.vmem [resolvable:$false] %s4649_s10 }
 0x4fc   : > { %p4647_p2 = pnand %p4646_p1, %p4824_p5  ;;  %s4651_s12 = scalar_lea.vmem %s4650_s10, 8192 }
 0x4fd   : > { %3424 = vrot.lane.b32.xlu1 %v3329_v58, %s4743_s14  ;;  %p4652_p4 = scmp.lt.s32.totalorder %s6519_s26, %s4650_s10  ;;  %p4653_p7 = scmp.lt.s32.totalorder %s4651_s12, %s4645_s25 }
 0x4fe   : > { %v3365_v56 = vpop.permute.xlu1 %3364  ;;  %v3119_v33 = vpop.permute.xlu0 %3118  ;;  %p4648_p3 = pneg %p4647_p2 }
 0x4ff   : > { %3459 = vst.msk [vmem:[%s6348_s20 + $0x8] sm:$0xff] %vm2560_vm3, %v3365_v56  ;;  %3208 = vst.msk [vmem:[%s6336_s16 + $0x30] sm:$0xff] %vm2560_vm3, %v3119_v33  ;;  %p4654_p8 = por %p4653_p7, %p4652_p4 }
 0x501   : > { %p4655_p9 = pnand %p4654_p8, %p4648_p3 }
 0x502   : > { %v3121_v3 = vpop.permute.xlu1 %3120  ;;  %v3115_v61 = vpop.permute.xlu0 %3114 }
 0x503   : > { %3209 = vst.msk [vmem:[%s6336_s16 + $0x38] sm:$0xff] %vm2560_vm3, %v3121_v3  ;;  %3206 = vst.msk [vmem:[%s6336_s16 + $0x20] sm:$0xff] %vm2560_vm3, %v3115_v61 }
 0x506   : > { %v3117_v25 = vpop.permute.xlu1 %3116  ;;  %v3375_v47 = vpop.permute.xlu0 %3374 }
 0x507   : > { %3207 = vst.msk [vmem:[%s6336_s16 + $0x28] sm:$0xff] %vm2560_vm3, %v3117_v25  ;;  %3464 = vst.msk [vmem:[%s6348_s20 + $0x30] sm:$0xff] %vm2560_vm3, %v3375_v47 }
 0x50a   : > { %v3377_v44 = vpop.permute.xlu1 %3376  ;;  %v3371_v11 = vpop.permute.xlu0 %3370 }
 0x50b   : > { %3465 = vst.msk [vmem:[%s6348_s20 + $0x38] sm:$0xff] %vm2560_vm3, %v3377_v44  ;;  %3462 = vst.msk [vmem:[%s6348_s20 + $0x20] sm:$0xff] %vm2560_vm3, %v3371_v11 }
 0x50e   : > { %v3373_v45 = vpop.permute.xlu1 %3372  ;;  %v3127_v38 = vpop.permute.xlu0 %3126 }
 0x50f   : > { %3463 = vst.msk [vmem:[%s6348_s20 + $0x28] sm:$0xff] %vm2560_vm3, %v3373_v45  ;;  %3212 = vst.msk [vmem:[%s6336_s16 + $0x50] sm:$0xff] %vm2560_vm3, %v3127_v38 }
 0x512   : > { %v3129_v29 = vpop.permute.xlu1 %3128  ;;  %v3123_v13 = vpop.permute.xlu0 %3122 }
 0x513   : > { %3213 = vst.msk [vmem:[%s6336_s16 + $0x58] sm:$0xff] %vm2560_vm3, %v3129_v29  ;;  %3210 = vst.msk [vmem:[%s6336_s16 + $0x40] sm:$0xff] %vm2560_vm3, %v3123_v13 }
 0x516   : > { %v3125_v15 = vpop.permute.xlu1 %3124  ;;  %v3383_v39 = vpop.permute.xlu0 %3382 }
 0x517   : > { %3211 = vst.msk [vmem:[%s6336_s16 + $0x48] sm:$0xff] %vm2560_vm3, %v3125_v15  ;;  %3468 = vst.msk [vmem:[%s6348_s20 + $0x50] sm:$0xff] %vm2560_vm3, %v3383_v39 }
 0x51a   : > { %v3385_v30 = vpop.permute.xlu1 %3384  ;;  %v3379_v60 = vpop.permute.xlu0 %3378 }
 0x51b   : > { %3469 = vst.msk [vmem:[%s6348_s20 + $0x58] sm:$0xff] %vm2560_vm3, %v3385_v30  ;;  %3466 = vst.msk [vmem:[%s6348_s20 + $0x40] sm:$0xff] %vm2560_vm3, %v3379_v60 }
 0x51e   : > { %v3381_v22 = vpop.permute.xlu1 %3380  ;;  %v3135_v16 = vpop.permute.xlu0 %3134 }
 0x51f   : > { %3467 = vst.msk [vmem:[%s6348_s20 + $0x48] sm:$0xff] %vm2560_vm3, %v3381_v22  ;;  %3216 = vst.msk [vmem:[%s6336_s16 + $0x70] sm:$0xff] %vm2560_vm3, %v3135_v16 }
 0x522   : > { %v3137_v41 = vpop.permute.xlu1 %3136  ;;  %v3131_v49 = vpop.permute.xlu0 %3130 }
 0x523   : > { %3217 = vst.msk [vmem:[%s6336_s16 + $0x78] sm:$0xff] %vm2560_vm3, %v3137_v41  ;;  %3214 = vst.msk [vmem:[%s6336_s16 + $0x60] sm:$0xff] %vm2560_vm3, %v3131_v49 }
 0x526   : > { %v3133_v26 = vpop.permute.xlu1 %3132  ;;  %v3391_v31 = vpop.permute.xlu0 %3390 }
 0x527   : > { %3215 = vst.msk [vmem:[%s6336_s16 + $0x68] sm:$0xff] %vm2560_vm3, %v3133_v26  ;;  %3472 = vst.msk [vmem:[%s6348_s20 + $0x70] sm:$0xff] %vm2560_vm3, %v3391_v31 }
 0x52a   : > { %v3393_v34 = vpop.permute.xlu1 %3392  ;;  %v3387_v18 = vpop.permute.xlu0 %3386 }
 0x52b   : > { %3473 = vst.msk [vmem:[%s6348_s20 + $0x78] sm:$0xff] %vm2560_vm3, %v3393_v34  ;;  %3470 = vst.msk [vmem:[%s6348_s20 + $0x60] sm:$0xff] %vm2560_vm3, %v3387_v18 }
 0x52e   : > { %v3389_v52 = vpop.permute.xlu1 %3388  ;;  %v3143_v42 = vpop.permute.xlu0 %3142 }
 0x52f   : > { %3471 = vst.msk [vmem:[%s6348_s20 + $0x68] sm:$0xff] %vm2560_vm3, %v3389_v52  ;;  %3220 = vst.msk [vmem:[%s6336_s16 + $0x90] sm:$0xff] %vm2560_vm3, %v3143_v42 }
 0x532   : > { %v3145_v27 = vpop.permute.xlu1 %3144  ;;  %v3139_v19 = vpop.permute.xlu0 %3138 }
 0x533   : > { %3221 = vst.msk [vmem:[%s6336_s16 + $0x98] sm:$0xff] %vm2560_vm3, %v3145_v27  ;;  %3218 = vst.msk [vmem:[%s6336_s16 + $0x80] sm:$0xff] %vm2560_vm3, %v3139_v19 }
 0x536   : > { %v3141_v50 = vpop.permute.xlu1 %3140  ;;  %v3399_v32 = vpop.permute.xlu0 %3398 }
 0x537   : > { %3219 = vst.msk [vmem:[%s6336_s16 + $0x88] sm:$0xff] %vm2560_vm3, %v3141_v50  ;;  %3476 = vst.msk [vmem:[%s6348_s20 + $0x90] sm:$0xff] %vm2560_vm3, %v3399_v32 }
 0x53a   : > { %v3401_v4 = vpop.permute.xlu1 %3400  ;;  %v3395_v21 = vpop.permute.xlu0 %3394 }
 0x53b   : > { %3477 = vst.msk [vmem:[%s6348_s20 + $0x98] sm:$0xff] %vm2560_vm3, %v3401_v4  ;;  %3474 = vst.msk [vmem:[%s6348_s20 + $0x80] sm:$0xff] %vm2560_vm3, %v3395_v21 }
 0x53e   : > { %v3397_v36 = vpop.permute.xlu1 %3396  ;;  %v3151_v62 = vpop.permute.xlu0 %3150 }
 0x53f   : > { %3475 = vst.msk [vmem:[%s6348_s20 + $0x88] sm:$0xff] %vm2560_vm3, %v3397_v36  ;;  %3224 = vst.msk [vmem:[%s6336_s16 + $0xb0] sm:$0xff] %vm2560_vm3, %v3151_v62 }
 0x542   : > { %v3153_v54 = vpop.permute.xlu1 %3152  ;;  %v3147_v8 = vpop.permute.xlu0 %3146 }
 0x543   : > { %3225 = vst.msk [vmem:[%s6336_s16 + $0xb8] sm:$0xff] %vm2560_vm3, %v3153_v54  ;;  %3222 = vst.msk [vmem:[%s6336_s16 + $0xa0] sm:$0xff] %vm2560_vm3, %v3147_v8 }
 0x546   : > { %v3149_v1 = vpop.permute.xlu1 %3148  ;;  %v3407_v0 = vpop.permute.xlu0 %3406 }
 0x547   : > { %3223 = vst.msk [vmem:[%s6336_s16 + $0xa8] sm:$0xff] %vm2560_vm3, %v3149_v1  ;;  %3480 = vst.msk [vmem:[%s6348_s20 + $0xb0] sm:$0xff] %vm2560_vm3, %v3407_v0 }
 0x54a   : > { %v3409_v20 = vpop.permute.xlu1 %3408  ;;  %v3403_v63 = vpop.permute.xlu0 %3402 }
 0x54b   : > { %3481 = vst.msk [vmem:[%s6348_s20 + $0xb8] sm:$0xff] %vm2560_vm3, %v3409_v20  ;;  %3478 = vst.msk [vmem:[%s6348_s20 + $0xa0] sm:$0xff] %vm2560_vm3, %v3403_v63 }
 0x54e   : > { %v3405_v53 = vpop.permute.xlu1 %3404  ;;  %v3159_v10 = vpop.permute.xlu0 %3158 }
 0x54f   : > { %3479 = vst.msk [vmem:[%s6348_s20 + $0xa8] sm:$0xff] %vm2560_vm3, %v3405_v53  ;;  %3228 = vst.msk [vmem:[%s6336_s16 + $0xd0] sm:$0xff] %vm2560_vm3, %v3159_v10 }
 0x552   : > { %v3161_v7 = vpop.permute.xlu1 %3160  ;;  %v3155_v40 = vpop.permute.xlu0 %3154 }
 0x553   : > { %3229 = vst.msk [vmem:[%s6336_s16 + $0xd8] sm:$0xff] %vm2560_vm3, %v3161_v7  ;;  %3226 = vst.msk [vmem:[%s6336_s16 + $0xc0] sm:$0xff] %vm2560_vm3, %v3155_v40 }
 0x556   : > { %v3157_v51 = vpop.permute.xlu1 %3156  ;;  %v3415_v12 = vpop.permute.xlu0 %3414 }
 0x557   : > { %3227 = vst.msk [vmem:[%s6336_s16 + $0xc8] sm:$0xff] %vm2560_vm3, %v3157_v51  ;;  %3484 = vst.msk [vmem:[%s6348_s20 + $0xd0] sm:$0xff] %vm2560_vm3, %v3415_v12 }
 0x55a   : > { %v3417_v43 = vpop.permute.xlu1 %3416  ;;  %v3411_v46 = vpop.permute.xlu0 %3410 }
 0x55b   : > { %3485 = vst.msk [vmem:[%s6348_s20 + $0xd8] sm:$0xff] %vm2560_vm3, %v3417_v43  ;;  %3482 = vst.msk [vmem:[%s6348_s20 + $0xc0] sm:$0xff] %vm2560_vm3, %v3411_v46 }
 0x55e   : > { %v3413_v57 = vpop.permute.xlu1 %3412  ;;  %v3167_v28 = vpop.permute.xlu0 %3166 }
 0x55f   : > { %3483 = vst.msk [vmem:[%s6348_s20 + $0xc8] sm:$0xff] %vm2560_vm3, %v3413_v57  ;;  %3232 = vst.msk [vmem:[%s6336_s16 + $0xf0] sm:$0xff] %vm2560_vm3, %v3167_v28 }
 0x562   : > { %v3169_v5 = vpop.permute.xlu1 %3168  ;;  %v3163_v14 = vpop.permute.xlu0 %3162 }
 0x563   : > { %3233 = vst.msk [vmem:[%s6336_s16 + $0xf8] sm:$0xff] %vm2560_vm3, %v3169_v5  ;;  %3230 = vst.msk [vmem:[%s6336_s16 + $0xe0] sm:$0xff] %vm2560_vm3, %v3163_v14 }
 0x566   : > { %v3165_v23 = vpop.permute.xlu1 %3164 }
 0x567   : > { %3231 = vst.msk [vmem:[%s6336_s16 + $0xe8] sm:$0xff] %vm2560_vm3, %v3165_v23 }
 0x568   : > { %v3419_v9 = vpop.permute.xlu0 %3418 }
 0x569   : > { %4658 = shalt.err (!%p4655_p9)
}
 0x56a   : > { %s4659_s11 = scalar_lea.hbm %s6517_s17, 4096  ;;  %s4663_s29 = scalar_lea.hbm %s6617_s4, 8192 }
 0x56b   : > { %p4660_p10 = scmp.ne.s32.totalorder %s6517_s17, %s4659_s11  ;;  %p4664_p13 = scmp.lt.u32.totalorder %s6517_s17, %s6617_s4 }
 0x56c   : > { %p4665_p0 = scmp.lt.u32.totalorder %s4663_s29, %s4659_s11  ;;  %p4667_p2 = scmp.lt.u32.totalorder %s4659_s11, %s6517_s17 }
 0x56d   : > { %p4661_p11 = pnand %p4660_p10, %p4824_p5 }
 0x56e   : > { %p4666_p1 = por %p4665_p0, %p4664_p13 }
 0x56f   : > { %p4662_p12 = pneg %p4661_p11 }
 0x570   : > { %p4668_p3 = por %p4667_p2, %p4666_p1 }
 0x572   : > { %p4669_p4 = pnand %p4668_p3, %p4662_p12 }
 0x574   : > { %4672 = shalt.err (!%p4669_p4)
}
 0x575   : > { %4174 = dma.vmem_to_hbm [thread:$0]  (%p4824_p5), %s6519_s26, 4096, %s6517_s17, %s6525_s18, %s4745_s9, %s4745_s9, %s4746_s13   ;;  %v3421_v59 = vpop.permute.xlu1 %3420  ;;  %v3423_v48 = vpop.permute.xlu0 %3422 }
 0x576   : > { %3486 = vst.msk [vmem:[%s6348_s20 + $0xe0] sm:$0xff] %vm2560_vm3, %v3419_v9  ;;  %s3546_s25 = sshll.u32 %s6348_s20, 4  ;;  %3487 = vst.msk [vmem:[%s6348_s20 + $0xe8] sm:$0xff] %vm2560_vm3, %v3421_v59  ;;  %s6563_s16 = scalar_lea.hbm %s6619_s6, %s6342_s19  ;;  %s6565_s25 = int_to_ptr.vmem [resolvable:$true] %s3546_s25 }
 0x577   : > { %3488 = vst.msk [vmem:[%s6348_s20 + $0xf0] sm:$0xff] %vm2560_vm3, %v3423_v48  ;;  %s4673_s26 = scalar_lea.vmem %s6565_s25, 4096  ;;  %s4748_s17 = smov [#allocation6]  }
 0x578   : > { %p4674_p7 = scmp.ne.s32.totalorder %s6565_s25, %s4673_s26  ;;  %s4677_s18 = sshll.u32 %s4748_s17, 4  ;;  %s4678_s18 = int_to_ptr.vmem [resolvable:$false] %s4677_s18 }
 0x579   : > { %v3425_v24 = vpop.permute.xlu1 %3424  ;;  %s4679_s14 = scalar_lea.vmem %s4678_s18, 8192  ;;  %p4680_p10 = scmp.lt.s32.totalorder %s6565_s25, %s4678_s18 }
 0x57a   : > { %3489 = vst.msk [vmem:[%s6348_s20 + $0xf8] sm:$0xff] %vm2560_vm3, %v3425_v24  ;;  %p4675_p8 = pnand %p4674_p7, %p4824_p5  ;;  %p4681_p11 = scmp.lt.s32.totalorder %s4679_s14, %s4673_s26 }
 0x57c   : > { %p4676_p9 = pneg %p4675_p8  ;;  %p4682_p12 = por %p4681_p11, %p4680_p10 }
 0x57e   : > { %p4683_p13 = pnand %p4682_p12, %p4676_p9 }
 0x580   : > { %4686 = shalt.err (!%p4683_p13)
}
 0x581   : > { %s4687_s19 = scalar_lea.hbm %s6563_s16, 4096  ;;  %s4691_s28 = scalar_lea.hbm %s6619_s6, 8192 }
 0x582   : > { %p4688_p0 = scmp.ne.s32.totalorder %s6563_s16, %s4687_s19  ;;  %p4692_p3 = scmp.lt.u32.totalorder %s6563_s16, %s6619_s6 }
 0x583   : > { %p4693_p4 = scmp.lt.u32.totalorder %s4691_s28, %s4687_s19  ;;  %p4695_p8 = scmp.lt.u32.totalorder %s4687_s19, %s6563_s16 }
 0x584   : > { %p4689_p1 = pnand %p4688_p0, %p4824_p5 }
 0x585   : > { %p4694_p7 = por %p4693_p4, %p4692_p3 }
 0x586   : > { %p4690_p2 = pneg %p4689_p1 }
 0x587   : > { %p4696_p9 = por %p4695_p8, %p4694_p7 }
 0x589   : > { %p4697_p10 = pnand %p4696_p9, %p4690_p2 }
 0x58b   : > { %4700 = shalt.err (!%p4697_p10)
}
 0x58c   : > { %4176 = dma.vmem_to_hbm [thread:$0]  (%p4824_p5), %s6565_s25, 4096, %s6563_s16, %s6366_s15, %s4745_s9, %s4745_s9, %s4746_s13  }
 0x58d PF: > { %p4190_p11 = scmp.ge.s32.totalorder %s4739_s24, 2  ;;  %s3561_s11 = sand.u32 1, %s4727_s21  }
 0x58e   : > { %s3562_s26 = scalar_lea.sflag [#allocation3], %s3561_s11 }
 0x58f   : > { %p4181_p12 = pnand %p4190_p11, %p4828_p6 }
 0x591   : > { %4718 = dma.done.wait (!%p4181_p12), %s3562_s26, 4096  }
 0x592   : > { %4720 = vsyncadd (!%p4181_p12), %s3562_s26, 4294963200  ;;  %s6682_s7 = sadd.s32 4294967294, %s4739_s24  }
 0x593   : > { %s3570_s17 = sand.u32 1, %s6682_s7  }
 0x594   : > { %s3571_s18 = scalar_lea.sflag [#allocation5], %s3570_s17 }
 0x595   : > { %4722 = dma.done.wait (!%p4181_p12), %s3571_s18, 8192  }
 0x596   : > { %4724 = vsyncadd (!%p4181_p12), %s3571_s18, 4294959104  ;;  %p20_p5 = scmp.ge.s32.totalorder %s4809_s27, 4   ;;  %s6683_s21 = smov %s4731_s22 }
 0x597   : > { %s6684_s22 = smov %s4735_s23  ;;  %s6685_s23 = smov %s4822_s30 }
 0x598   : > { %s6686_s24 = smov %s4809_s27  ;;  %22 = sbr.rel (!%p20_p5) target bundleno = 5 (0x5), region = 108 }
 0x59f   :  { %3585 = vsyncpa [#allocation3], 1 }
 0x5a0   :  { %3587 = vsyncpa [#allocation3 + $0x1], 1 }
 0x5a1   :  { %3588 = vsyncpa [#allocation5], 1 }
 0x5a2   :  { %3590 = vsyncpa [#allocation5 + $0x1], 1 }

</bundles_post_ra>
